<compile_context>
chip_gen: v7x
topology: tpu7x:2x2x1
jax: 0.10.0
libtpu: 0.0.40
codegen_flags: <defaults>
</compile_context>

<pallas_src>
import math

import jax
import jax.numpy as jnp
from jax import lax
from jax.experimental import pallas as pl
from jax.experimental.pallas import tpu as pltpu


# ----------------------------------------------------------------------------
# pure-jnp helpers (used both inside the Pallas kernel and by the pure-JAX
# reference, so kernel vs reference differ only in backend numerics)
# ----------------------------------------------------------------------------
def _layernorm(x, gamma, beta, eps=1e-5):
    mu = jnp.mean(x, axis=-1, keepdims=True)
    var = jnp.mean((x - mu) ** 2, axis=-1, keepdims=True)
    return (x - mu) * lax.rsqrt(var + eps) * gamma + beta


def _masked_mha(x, mask, wqkv, bqkv, wo, bo, num_heads):
    """MHA over the rows of x restricted by an additive mask (0 = attend,
    -1e9 = blocked); equivalent to independent MHA per mutually-visible group.

    x: [N, E] f32; mask: [N, N] f32; wqkv: [E, 3E] bf16; wo: [E, E] bf16.
    """
    N, E = x.shape
    dh = E // num_heads
    scale = 1.0 / math.sqrt(dh)
    # one fused QKV projection (single MXU push for all tokens / heads)
    qkv = jnp.dot(x.astype(jnp.bfloat16), wqkv,
                  preferred_element_type=jnp.float32) + bqkv           # [N, 3E]
    ctx_heads = []
    for h in range(num_heads):
        q = qkv[:, h * dh:(h + 1) * dh]
        k = qkv[:, E + h * dh:E + (h + 1) * dh]
        v = qkv[:, 2 * E + h * dh:2 * E + (h + 1) * dh]
        s = jnp.dot(q, k.T, preferred_element_type=jnp.float32) * scale + mask
        s = s - jnp.max(s, axis=-1, keepdims=True)
        p = jnp.exp(s)
        p = p / jnp.sum(p, axis=-1, keepdims=True)
        ctx_heads.append(jnp.dot(p, v, preferred_element_type=jnp.float32))
    # lane-concatenated context -> ONE output projection matmul
    ctx = jnp.concatenate(ctx_heads, axis=-1)                          # [N, E]
    return jnp.dot(ctx.astype(jnp.bfloat16), wo,
                   preferred_element_type=jnp.float32) + bo


def _encoder_layer(x, mask, wqkv, bqkv, wo, bo,
                   g1, be1, w1, b1, w2, b2, g2, be2, num_heads):
    """Post-norm transformer encoder layer (masked MHA + ReLU FFN)."""
    attn = _masked_mha(x, mask, wqkv, bqkv, wo, bo, num_heads)
    x = _layernorm(x + attn, g1, be1)
    h = jnp.dot(x.astype(jnp.bfloat16), w1, preferred_element_type=jnp.float32) + b1
    h = jnp.maximum(h, 0.0)
    ff = jnp.dot(h.astype(jnp.bfloat16), w2, preferred_element_type=jnp.float32) + b2
    return _layernorm(x + ff, g2, be2)


# ----------------------------------------------------------------------------
# fused whole-model kernel.  grid = (batch, frame-chunk); stage 1 runs every
# step, stages 2-4 only on the last chunk of each batch element.
# ----------------------------------------------------------------------------
def make_fused_kernel(chunk, n_chunks, H, W, C, Cmid, num_heads, num_layers):
    WC = W * C          # lanes of one shifted slab (w, c interleaved)
    WO = W * Cmid       # lanes of the conv output   (w, cout interleaved)
    rows = chunk * H
    VT = n_chunks * chunk

    def kernel(frames_ref, wbig_ref, bct_ref, poolw_ref, wp_ref, bp_ref,
               vmask_ref, tmask_ref,
               v_wqkv_ref, v_bqkv_ref, v_wo_ref, v_bo_ref,
               t_wqkv_ref, t_bqkv_ref, t_wo_ref, t_bo_ref,
               t_g1_ref, t_be1_ref, t_w1_ref, t_b1_ref,
               t_w2_ref, t_b2_ref, t_g2_ref, t_be2_ref,
               c_g_ref, c_b_ref, c_w_ref, c_bc_ref,
               o_ref, pooled_scr):
        c = pl.program_id(1)

        # ---- stage 1 (every chunk): in-kernel im2col conv -> ReLU -> pool ----
        fr = frames_ref[0].astype(jnp.float32)          # [chunk, H+2, (W+2)*C]
        acc = jnp.zeros((rows, WO), jnp.float32)
        for k in range(9):                              # 3x3 offsets
            dy, dx = k // 3, k % 3
            slab = fr[:, dy:dy + H, dx * C:dx * C + WC]  # [chunk, H, W*C]
            slab = slab.reshape(rows, WC).astype(jnp.bfloat16)
            acc = acc + jnp.dot(slab, wbig_ref[k],
                                preferred_element_type=jnp.float32)
        hsp = jnp.maximum(acc + bct_ref[...], 0.0).astype(jnp.bfloat16)  # [rows, W*Cmid]
        # average over w via a tiny exact-in-bf16 matmul, over h via a mean
        pooled_hw = jnp.dot(hsp, poolw_ref[...],
                            preferred_element_type=jnp.float32)          # [rows, Cmid]
        pooled = jnp.mean(pooled_hw.reshape(chunk, H, Cmid), axis=1)     # [chunk, Cmid]
        pooled_scr[c] = pooled

        # ---- stages 2..4 (last chunk only) ----
        @pl.when(c == n_chunks - 1)
        def _():
            pooled_all = pooled_scr[...].reshape(VT, Cmid)
            feats = jnp.dot(pooled_all.astype(jnp.bfloat16), wp_ref[...],
                            preferred_element_type=jnp.float32) + bp_ref[...]
            feats = jnp.maximum(feats, 0.0)                              # [VT, E]

            # multi-head attention across views (same-timestep tokens attend)
            x = _masked_mha(feats, vmask_ref[...],
                            v_wqkv_ref[...], v_bqkv_ref[...],
                            v_wo_ref[...], v_bo_ref[...], num_heads)

            # temporal transformer layers (same-view tokens attend)
            tmask = tmask_ref[...]
            for l in range(num_layers):
                x = _encoder_layer(x, tmask,
                                   t_wqkv_ref[l], t_bqkv_ref[l],
                                   t_wo_ref[l], t_bo_ref[l],
                                   t_g1_ref[l], t_be1_ref[l],
                                   t_w1_ref[l], t_b1_ref[l],
                                   t_w2_ref[l], t_b2_ref[l],
                                   t_g2_ref[l], t_be2_ref[l], num_heads)

            # mean over (time, views) -> LayerNorm -> Linear
            pooled_tok = jnp.mean(x, axis=0, keepdims=True)              # [1, E]
            y = _layernorm(pooled_tok, c_g_ref[...], c_b_ref[...])
            logits = jnp.dot(y, c_w_ref[...],
                             preferred_element_type=jnp.float32) + c_bc_ref[...]
            o_ref[0] = logits

    return kernel


# ----------------------------------------------------------------------------
# parameter init (natural layouts; kernel-specific layouts derived per call)
# ----------------------------------------------------------------------------
def init_params(key, C, E, Cmid, num_layers, num_classes, ff_dim):
    keys = iter(jax.random.split(key, 32))

    def nrm(shape, scale=0.05):
        return scale * jax.random.normal(next(keys), shape, jnp.float32)

    spatial = dict(wconv=nrm((9, C, Cmid)),                 # 3x3 conv weight
                   bconv=nrm((Cmid,), 0.01),
                   wproj=nrm((Cmid, E)).astype(jnp.bfloat16),
                   bproj=nrm((1, E), 0.01))

    view_attn = dict(wqkv=nrm((E, 3 * E)).astype(jnp.bfloat16),
                     bqkv=nrm((1, 3 * E), 0.01),
                     wo=nrm((E, E)).astype(jnp.bfloat16),
                     bo=nrm((1, E), 0.01))

    L = num_layers
    temporal = dict(
        wqkv=nrm((L, E, 3 * E)).astype(jnp.bfloat16),
        bqkv=nrm((L, 1, 3 * E), 0.01),
        wo=nrm((L, E, E)).astype(jnp.bfloat16),
        bo=nrm((L, 1, E), 0.01),
        g1=jnp.ones((L, 1, E), jnp.float32),
        be1=jnp.zeros((L, 1, E), jnp.float32),
        w1=nrm((L, E, ff_dim)).astype(jnp.bfloat16),
        b1=nrm((L, 1, ff_dim), 0.01),
        w2=nrm((L, ff_dim, E)).astype(jnp.bfloat16),
        b2=nrm((L, 1, E), 0.01),
        g2=jnp.ones((L, 1, E), jnp.float32),
        be2=jnp.zeros((L, 1, E), jnp.float32))

    classifier = dict(g=jnp.ones((1, E), jnp.float32),
                      b=jnp.zeros((1, E), jnp.float32),
                      w=nrm((E, num_classes)),
                      bias=nrm((1, num_classes), 0.01))
    return dict(spatial=spatial, view_attn=view_attn,
                temporal=temporal, classifier=classifier)


# ----------------------------------------------------------------------------
# forward
# ----------------------------------------------------------------------------
def multiview_action_recognition_forward(x, params, num_heads=4):
    """x: [B, V, T, C, H, W] float32 -> logits [B, num_classes]."""
    B, V, T, C, H, W = x.shape
    VT = V * T
    sp, va, tl, cl = (params['spatial'], params['view_attn'],
                      params['temporal'], params['classifier'])
    Cmid = sp['wconv'].shape[2]
    NC = cl['w'].shape[1]
    L = tl['wqkv'].shape[0]

    # raw frames, spatially zero-padded, channels-last, flattened to
    # [B, VT, H+2, (W+2)*C] bf16 — the only per-chunk HBM traffic.
    fr = x.reshape(B, VT, C, H, W)
    fr = jnp.pad(fr, ((0, 0), (0, 0), (0, 0), (1, 1), (1, 1)))
    frames = fr.transpose(0, 1, 3, 4, 2).reshape(
        B, VT, H + 2, (W + 2) * C).astype(jnp.bfloat16)

    # block-diagonal conv weight: wbig[k, w*C+c, w2*Cmid+o] = (w==w2)*wconv[k,c,o]
    eye_w = jnp.eye(W, dtype=jnp.float32)
    wbig = jnp.einsum('uv,kco->kucvo', eye_w, sp['wconv']).reshape(
        9, W * C, W * Cmid).astype(jnp.bfloat16)
    bct = jnp.tile(sp['bconv'], W)[None, :].astype(jnp.float32)       # [1, W*Cmid]
    poolw = (jnp.tile(jnp.eye(Cmid, dtype=jnp.float32), (W, 1)) / W
             ).astype(jnp.bfloat16)                                    # [W*Cmid, Cmid]

    # additive group masks over tokens; token id = v*T + t
    idx = jnp.arange(VT)
    t_id, v_id = idx % T, idx // T
    view_mask = jnp.where(t_id[:, None] == t_id[None, :], 0.0, -1e9).astype(jnp.float32)
    temp_mask = jnp.where(v_id[:, None] == v_id[None, :], 0.0, -1e9).astype(jnp.float32)

    chunk = math.gcd(VT, 8)
    n_chunks = VT // chunk
    kernel = make_fused_kernel(chunk, n_chunks, H, W, C, Cmid, num_heads, L)

    inputs = (frames, wbig, bct, poolw, sp['wproj'], sp['bproj'],
              view_mask, temp_mask,
              va['wqkv'], va['bqkv'], va['wo'], va['bo'],
              tl['wqkv'], tl['bqkv'], tl['wo'], tl['bo'],
              tl['g1'], tl['be1'], tl['w1'], tl['b1'],
              tl['w2'], tl['b2'], tl['g2'], tl['be2'],
              cl['g'], cl['b'], cl['w'], cl['bias'])

    def const_spec(a):
        # weights / masks: whole array, constant block index (DMAed once).
        # TODO(synk): pipeline_mode=pl.Buffered(1) would reclaim the second
        # VMEM buffer for these never-revisited inputs at larger configs.
        n = a.ndim
        return pl.BlockSpec(a.shape, lambda b, c, n=n: (0,) * n)

    in_specs = [pl.BlockSpec((1, chunk, H + 2, (W + 2) * C),
                             lambda b, c: (b, c, 0, 0))]
    in_specs += [const_spec(a) for a in inputs[1:]]

    out = pl.pallas_call(
        kernel,
        out_shape=jax.ShapeDtypeStruct((B, 1, NC), jnp.float32),
        grid=(B, n_chunks),
        in_specs=in_specs,
        out_specs=pl.BlockSpec((1, 1, NC), lambda b, c: (b, 0, 0)),
        scratch_shapes=[pltpu.VMEM((n_chunks, chunk, Cmid), jnp.float32)],
        compiler_params=pltpu.CompilerParams(
            dimension_semantics=("parallel", "arbitrary")),
    )(*inputs)
    return out[:, 0, :]


# ----------------------------------------------------------------------------
# pure-JAX reference (same bf16 rounding points as the kernel)
# ----------------------------------------------------------------------------
def reference_forward(x, params, num_heads=4):
    B, V, T, C, H, W = x.shape
    VT = V * T
    sp, va, tl, cl = (params['spatial'], params['view_attn'],
                      params['temporal'], params['classifier'])
    L = tl['wqkv'].shape[0]

    fr = x.reshape(B * VT, C, H, W)
    frp = jnp.pad(fr, ((0, 0), (0, 0), (1, 1), (1, 1)))
    frp = frp.astype(jnp.bfloat16).astype(jnp.float32)
    wc = sp['wconv'].astype(jnp.bfloat16).astype(jnp.float32)          # [9, C, Cmid]
    cols = [frp[:, :, dy:dy + H, dx:dx + W]
            for dy in range(3) for dx in range(3)]
    pat = jnp.stack(cols, axis=1)                                      # [N, 9, C, H, W]
    conv = jnp.einsum('nkchw,kco->nhwo', pat, wc) + sp['bconv']
    conv = jnp.maximum(conv, 0.0)
    conv = conv.astype(jnp.bfloat16).astype(jnp.float32)               # mirrors kernel cast
    pooled = conv.mean(axis=(1, 2))                                    # [N, Cmid]
    feats = jnp.dot(pooled.astype(jnp.bfloat16), sp['wproj'],
                    preferred_element_type=jnp.float32) + sp['bproj']
    feats = jnp.maximum(feats, 0.0).reshape(B, VT, -1)

    idx = jnp.arange(VT)
    t_id, v_id = idx % T, idx // T
    vmask = jnp.where(t_id[:, None] == t_id[None, :], 0.0, -1e9).astype(jnp.float32)
    tmask = jnp.where(v_id[:, None] == v_id[None, :], 0.0, -1e9).astype(jnp.float32)

    def one(fb):
        xa = _masked_mha(fb, vmask, va['wqkv'], va['bqkv'],
                         va['wo'], va['bo'], num_heads)
        for l in range(L):
            xa = _encoder_layer(xa, tmask,
                                tl['wqkv'][l], tl['bqkv'][l], tl['wo'][l], tl['bo'][l],
                                tl['g1'][l], tl['be1'][l], tl['w1'][l], tl['b1'][l],
                                tl['w2'][l], tl['b2'][l], tl['g2'][l], tl['be2'][l],
                                num_heads)
        pooled_tok = jnp.mean(xa, axis=0, keepdims=True)
        y = _layernorm(pooled_tok, cl['g'], cl['b'])
        return (jnp.dot(y, cl['w'], preferred_element_type=jnp.float32) + cl['bias'])[0]

    return jax.vmap(one)(feats)


if __name__ == "__main__":
    B, V, T, C, H, W = 2, 4, 8, 4, 16, 16
    E, Cmid, num_heads = 32, 16, 4
    num_layers, num_classes, ff_dim = 2, 10, 64

    key = jax.random.PRNGKey(0)
    xkey, pkey = jax.random.split(key)
    x = jax.random.normal(xkey, (B, V, T, C, H, W), jnp.float32)
    params = init_params(pkey, C, E, Cmid, num_layers, num_classes, ff_dim)

    logits = multiview_action_recognition_forward(x, params, num_heads=num_heads)
    logits = jax.block_until_ready(logits)
    assert logits.shape == (B, num_classes), logits.shape
    assert bool(jnp.all(jnp.isfinite(logits)))

    ref = jax.block_until_ready(reference_forward(x, params, num_heads=num_heads))
    err = float(jnp.max(jnp.abs(logits - ref)))
    assert err < 2e-2, f"kernel vs pure-JAX reference mismatch: {err}"
    print("KERNEL_OK")
</pallas_src>

<mosaic_0001>
module attributes {stable_mosaic.version = 11 : i64} {
  func.func @kernel(%arg0: i32, %arg1: i32, %arg2: memref<1x8x18x72xbf16, #tpu.memory_space<vmem>>, %arg3: memref<9x64x256xbf16, #tpu.memory_space<vmem>>, %arg4: memref<1x256xf32, #tpu.memory_space<vmem>>, %arg5: memref<256x16xbf16, #tpu.memory_space<vmem>>, %arg6: memref<16x32xbf16, #tpu.memory_space<vmem>>, %arg7: memref<1x32xf32, #tpu.memory_space<vmem>>, %arg8: memref<32x32xf32, #tpu.memory_space<vmem>>, %arg9: memref<32x32xf32, #tpu.memory_space<vmem>>, %arg10: memref<32x96xbf16, #tpu.memory_space<vmem>>, %arg11: memref<1x96xf32, #tpu.memory_space<vmem>>, %arg12: memref<32x32xbf16, #tpu.memory_space<vmem>>, %arg13: memref<1x32xf32, #tpu.memory_space<vmem>>, %arg14: memref<2x32x96xbf16, #tpu.memory_space<vmem>>, %arg15: memref<2x1x96xf32, #tpu.memory_space<vmem>>, %arg16: memref<2x32x32xbf16, #tpu.memory_space<vmem>>, %arg17: memref<2x1x32xf32, #tpu.memory_space<vmem>>, %arg18: memref<2x1x32xf32, #tpu.memory_space<vmem>>, %arg19: memref<2x1x32xf32, #tpu.memory_space<vmem>>, %arg20: memref<2x32x64xbf16, #tpu.memory_space<vmem>>, %arg21: memref<2x1x64xf32, #tpu.memory_space<vmem>>, %arg22: memref<2x64x32xbf16, #tpu.memory_space<vmem>>, %arg23: memref<2x1x32xf32, #tpu.memory_space<vmem>>, %arg24: memref<2x1x32xf32, #tpu.memory_space<vmem>>, %arg25: memref<2x1x32xf32, #tpu.memory_space<vmem>>, %arg26: memref<1x32xf32, #tpu.memory_space<vmem>>, %arg27: memref<1x32xf32, #tpu.memory_space<vmem>>, %arg28: memref<32x10xf32, #tpu.memory_space<vmem>>, %arg29: memref<1x10xf32, #tpu.memory_space<vmem>>, %arg30: memref<1x1x10xf32, #tpu.memory_space<vmem>>, %arg31: memref<4x8x16xf32, #tpu.memory_space<vmem>>) attributes {dimension_semantics = [#tpu.dimension_semantics<parallel>, #tpu.dimension_semantics<arbitrary>], iteration_bounds = array<i64: 2, 4>, scalar_prefetch = 0 : i64, scratch_operands = 1 : i64, tpu.core_type = #tpu.core_type<tc>, window_params = [{transform_indices = @transform_0, window_bounds = array<i64: 1, 8, 18, 72>}, {pipeline_mode = #tpu.pipeline_mode<synchronous>, transform_indices = @transform_1, window_bounds = array<i64: 9, 64, 256>}, {pipeline_mode = #tpu.pipeline_mode<synchronous>, transform_indices = @transform_2, window_bounds = array<i64: 1, 256>}, {pipeline_mode = #tpu.pipeline_mode<synchronous>, transform_indices = @transform_3, window_bounds = array<i64: 256, 16>}, {pipeline_mode = #tpu.pipeline_mode<synchronous>, transform_indices = @transform_4, window_bounds = array<i64: 16, 32>}, {pipeline_mode = #tpu.pipeline_mode<synchronous>, transform_indices = @transform_5, window_bounds = array<i64: 1, 32>}, {pipeline_mode = #tpu.pipeline_mode<synchronous>, transform_indices = @transform_6, window_bounds = array<i64: 32, 32>}, {pipeline_mode = #tpu.pipeline_mode<synchronous>, transform_indices = @transform_7, window_bounds = array<i64: 32, 32>}, {pipeline_mode = #tpu.pipeline_mode<synchronous>, transform_indices = @transform_8, window_bounds = array<i64: 32, 96>}, {pipeline_mode = #tpu.pipeline_mode<synchronous>, transform_indices = @transform_9, window_bounds = array<i64: 1, 96>}, {pipeline_mode = #tpu.pipeline_mode<synchronous>, transform_indices = @transform_10, window_bounds = array<i64: 32, 32>}, {pipeline_mode = #tpu.pipeline_mode<synchronous>, transform_indices = @transform_11, window_bounds = array<i64: 1, 32>}, {pipeline_mode = #tpu.pipeline_mode<synchronous>, transform_indices = @transform_12, window_bounds = array<i64: 2, 32, 96>}, {pipeline_mode = #tpu.pipeline_mode<synchronous>, transform_indices = @transform_13, window_bounds = array<i64: 2, 1, 96>}, {pipeline_mode = #tpu.pipeline_mode<synchronous>, transform_indices = @transform_14, window_bounds = array<i64: 2, 32, 32>}, {pipeline_mode = #tpu.pipeline_mode<synchronous>, transform_indices = @transform_15, window_bounds = array<i64: 2, 1, 32>}, {pipeline_mode = #tpu.pipeline_mode<synchronous>, transform_indices = @transform_16, window_bounds = array<i64: 2, 1, 32>}, {pipeline_mode = #tpu.pipeline_mode<synchronous>, transform_indices = @transform_17, window_bounds = array<i64: 2, 1, 32>}, {pipeline_mode = #tpu.pipeline_mode<synchronous>, transform_indices = @transform_18, window_bounds = array<i64: 2, 32, 64>}, {pipeline_mode = #tpu.pipeline_mode<synchronous>, transform_indices = @transform_19, window_bounds = array<i64: 2, 1, 64>}, {pipeline_mode = #tpu.pipeline_mode<synchronous>, transform_indices = @transform_20, window_bounds = array<i64: 2, 64, 32>}, {pipeline_mode = #tpu.pipeline_mode<synchronous>, transform_indices = @transform_21, window_bounds = array<i64: 2, 1, 32>}, {pipeline_mode = #tpu.pipeline_mode<synchronous>, transform_indices = @transform_22, window_bounds = array<i64: 2, 1, 32>}, {pipeline_mode = #tpu.pipeline_mode<synchronous>, transform_indices = @transform_23, window_bounds = array<i64: 2, 1, 32>}, {pipeline_mode = #tpu.pipeline_mode<synchronous>, transform_indices = @transform_24, window_bounds = array<i64: 1, 32>}, {pipeline_mode = #tpu.pipeline_mode<synchronous>, transform_indices = @transform_25, window_bounds = array<i64: 1, 32>}, {pipeline_mode = #tpu.pipeline_mode<synchronous>, transform_indices = @transform_26, window_bounds = array<i64: 32, 10>}, {pipeline_mode = #tpu.pipeline_mode<synchronous>, transform_indices = @transform_27, window_bounds = array<i64: 1, 10>}, {transform_indices = @transform_28, window_bounds = array<i64: 1, 1, 10>}]} {
    %c0 = arith.constant 0 : index
    %c0_0 = arith.constant 0 : index
    %c0_1 = arith.constant 0 : index
    %c0_2 = arith.constant 0 : index
    %0 = vector.load %arg2[%c0, %c0_0, %c0_1, %c0_2] : memref<1x8x18x72xbf16, #tpu.memory_space<vmem>>, vector<1x8x18x72xbf16>
    %1 = vector.shape_cast %0 : vector<1x8x18x72xbf16> to vector<8x18x72xbf16>
    %2 = arith.extf %1 : vector<8x18x72xbf16> to vector<8x18x72xf32>
    %cst = arith.constant 0.000000e+00 : f32
    %3 = vector.broadcast %cst : f32 to vector<128x256xf32>
    %4 = vector.extract_strided_slice %2 {offsets = [0, 0, 0], sizes = [8, 16, 64], strides = [1, 1, 1]} : vector<8x18x72xf32> to vector<8x16x64xf32>
    %5 = vector.shape_cast %4 : vector<8x16x64xf32> to vector<128x64xf32>
    %6 = arith.truncf %5 : vector<128x64xf32> to vector<128x64xbf16>
    %c0_3 = arith.constant 0 : index
    %c0_4 = arith.constant 0 : index
    %c0_5 = arith.constant 0 : index
    %7 = vector.load %arg3[%c0_3, %c0_4, %c0_5] : memref<9x64x256xbf16, #tpu.memory_space<vmem>>, vector<1x64x256xbf16>
    %8 = vector.shape_cast %7 : vector<1x64x256xbf16> to vector<64x256xbf16>
    %cst_6 = arith.constant dense<0.000000e+00> : vector<128x256xf32>
    %9 = tpu.matmul %6, %8, %cst_6 {dimension_numbers = #tpu.dot_dimension_numbers<[1], [0], [0], [1], [0, 0, 1, 1], [], []>} : vector<128x64xbf16>, vector<64x256xbf16>, vector<128x256xf32> -> vector<128x256xf32>
    %10 = arith.addf %3, %9 : vector<128x256xf32>
    %11 = vector.extract_strided_slice %2 {offsets = [0, 0, 4], sizes = [8, 16, 64], strides = [1, 1, 1]} : vector<8x18x72xf32> to vector<8x16x64xf32>
    %12 = vector.shape_cast %11 : vector<8x16x64xf32> to vector<128x64xf32>
    %13 = arith.truncf %12 : vector<128x64xf32> to vector<128x64xbf16>
    %c1 = arith.constant 1 : index
    %c0_7 = arith.constant 0 : index
    %c0_8 = arith.constant 0 : index
    %14 = vector.load %arg3[%c1, %c0_7, %c0_8] : memref<9x64x256xbf16, #tpu.memory_space<vmem>>, vector<1x64x256xbf16>
    %15 = vector.shape_cast %14 : vector<1x64x256xbf16> to vector<64x256xbf16>
    %cst_9 = arith.constant dense<0.000000e+00> : vector<128x256xf32>
    %16 = tpu.matmul %13, %15, %cst_9 {dimension_numbers = #tpu.dot_dimension_numbers<[1], [0], [0], [1], [0, 0, 1, 1], [], []>} : vector<128x64xbf16>, vector<64x256xbf16>, vector<128x256xf32> -> vector<128x256xf32>
    %17 = arith.addf %10, %16 : vector<128x256xf32>
    %18 = vector.extract_strided_slice %2 {offsets = [0, 0, 8], sizes = [8, 16, 64], strides = [1, 1, 1]} : vector<8x18x72xf32> to vector<8x16x64xf32>
    %19 = vector.shape_cast %18 : vector<8x16x64xf32> to vector<128x64xf32>
    %20 = arith.truncf %19 : vector<128x64xf32> to vector<128x64xbf16>
    %c2 = arith.constant 2 : index
    %c0_10 = arith.constant 0 : index
    %c0_11 = arith.constant 0 : index
    %21 = vector.load %arg3[%c2, %c0_10, %c0_11] : memref<9x64x256xbf16, #tpu.memory_space<vmem>>, vector<1x64x256xbf16>
    %22 = vector.shape_cast %21 : vector<1x64x256xbf16> to vector<64x256xbf16>
    %cst_12 = arith.constant dense<0.000000e+00> : vector<128x256xf32>
    %23 = tpu.matmul %20, %22, %cst_12 {dimension_numbers = #tpu.dot_dimension_numbers<[1], [0], [0], [1], [0, 0, 1, 1], [], []>} : vector<128x64xbf16>, vector<64x256xbf16>, vector<128x256xf32> -> vector<128x256xf32>
    %24 = arith.addf %17, %23 : vector<128x256xf32>
    %25 = vector.extract_strided_slice %2 {offsets = [0, 1, 0], sizes = [8, 16, 64], strides = [1, 1, 1]} : vector<8x18x72xf32> to vector<8x16x64xf32>
    %26 = vector.shape_cast %25 : vector<8x16x64xf32> to vector<128x64xf32>
    %27 = arith.truncf %26 : vector<128x64xf32> to vector<128x64xbf16>
    %c3 = arith.constant 3 : index
    %c0_13 = arith.constant 0 : index
    %c0_14 = arith.constant 0 : index
    %28 = vector.load %arg3[%c3, %c0_13, %c0_14] : memref<9x64x256xbf16, #tpu.memory_space<vmem>>, vector<1x64x256xbf16>
    %29 = vector.shape_cast %28 : vector<1x64x256xbf16> to vector<64x256xbf16>
    %cst_15 = arith.constant dense<0.000000e+00> : vector<128x256xf32>
    %30 = tpu.matmul %27, %29, %cst_15 {dimension_numbers = #tpu.dot_dimension_numbers<[1], [0], [0], [1], [0, 0, 1, 1], [], []>} : vector<128x64xbf16>, vector<64x256xbf16>, vector<128x256xf32> -> vector<128x256xf32>
    %31 = arith.addf %24, %30 : vector<128x256xf32>
    %32 = vector.extract_strided_slice %2 {offsets = [0, 1, 4], sizes = [8, 16, 64], strides = [1, 1, 1]} : vector<8x18x72xf32> to vector<8x16x64xf32>
    %33 = vector.shape_cast %32 : vector<8x16x64xf32> to vector<128x64xf32>
    %34 = arith.truncf %33 : vector<128x64xf32> to vector<128x64xbf16>
    %c4 = arith.constant 4 : index
    %c0_16 = arith.constant 0 : index
    %c0_17 = arith.constant 0 : index
    %35 = vector.load %arg3[%c4, %c0_16, %c0_17] : memref<9x64x256xbf16, #tpu.memory_space<vmem>>, vector<1x64x256xbf16>
    %36 = vector.shape_cast %35 : vector<1x64x256xbf16> to vector<64x256xbf16>
    %cst_18 = arith.constant dense<0.000000e+00> : vector<128x256xf32>
    %37 = tpu.matmul %34, %36, %cst_18 {dimension_numbers = #tpu.dot_dimension_numbers<[1], [0], [0], [1], [0, 0, 1, 1], [], []>} : vector<128x64xbf16>, vector<64x256xbf16>, vector<128x256xf32> -> vector<128x256xf32>
    %38 = arith.addf %31, %37 : vector<128x256xf32>
    %39 = vector.extract_strided_slice %2 {offsets = [0, 1, 8], sizes = [8, 16, 64], strides = [1, 1, 1]} : vector<8x18x72xf32> to vector<8x16x64xf32>
    %40 = vector.shape_cast %39 : vector<8x16x64xf32> to vector<128x64xf32>
    %41 = arith.truncf %40 : vector<128x64xf32> to vector<128x64xbf16>
    %c5 = arith.constant 5 : index
    %c0_19 = arith.constant 0 : index
    %c0_20 = arith.constant 0 : index
    %42 = vector.load %arg3[%c5, %c0_19, %c0_20] : memref<9x64x256xbf16, #tpu.memory_space<vmem>>, vector<1x64x256xbf16>
    %43 = vector.shape_cast %42 : vector<1x64x256xbf16> to vector<64x256xbf16>
    %cst_21 = arith.constant dense<0.000000e+00> : vector<128x256xf32>
    %44 = tpu.matmul %41, %43, %cst_21 {dimension_numbers = #tpu.dot_dimension_numbers<[1], [0], [0], [1], [0, 0, 1, 1], [], []>} : vector<128x64xbf16>, vector<64x256xbf16>, vector<128x256xf32> -> vector<128x256xf32>
    %45 = arith.addf %38, %44 : vector<128x256xf32>
    %46 = vector.extract_strided_slice %2 {offsets = [0, 2, 0], sizes = [8, 16, 64], strides = [1, 1, 1]} : vector<8x18x72xf32> to vector<8x16x64xf32>
    %47 = vector.shape_cast %46 : vector<8x16x64xf32> to vector<128x64xf32>
    %48 = arith.truncf %47 : vector<128x64xf32> to vector<128x64xbf16>
    %c6 = arith.constant 6 : index
    %c0_22 = arith.constant 0 : index
    %c0_23 = arith.constant 0 : index
    %49 = vector.load %arg3[%c6, %c0_22, %c0_23] : memref<9x64x256xbf16, #tpu.memory_space<vmem>>, vector<1x64x256xbf16>
    %50 = vector.shape_cast %49 : vector<1x64x256xbf16> to vector<64x256xbf16>
    %cst_24 = arith.constant dense<0.000000e+00> : vector<128x256xf32>
    %51 = tpu.matmul %48, %50, %cst_24 {dimension_numbers = #tpu.dot_dimension_numbers<[1], [0], [0], [1], [0, 0, 1, 1], [], []>} : vector<128x64xbf16>, vector<64x256xbf16>, vector<128x256xf32> -> vector<128x256xf32>
    %52 = arith.addf %45, %51 : vector<128x256xf32>
    %53 = vector.extract_strided_slice %2 {offsets = [0, 2, 4], sizes = [8, 16, 64], strides = [1, 1, 1]} : vector<8x18x72xf32> to vector<8x16x64xf32>
    %54 = vector.shape_cast %53 : vector<8x16x64xf32> to vector<128x64xf32>
    %55 = arith.truncf %54 : vector<128x64xf32> to vector<128x64xbf16>
    %c7 = arith.constant 7 : index
    %c0_25 = arith.constant 0 : index
    %c0_26 = arith.constant 0 : index
    %56 = vector.load %arg3[%c7, %c0_25, %c0_26] : memref<9x64x256xbf16, #tpu.memory_space<vmem>>, vector<1x64x256xbf16>
    %57 = vector.shape_cast %56 : vector<1x64x256xbf16> to vector<64x256xbf16>
    %cst_27 = arith.constant dense<0.000000e+00> : vector<128x256xf32>
    %58 = tpu.matmul %55, %57, %cst_27 {dimension_numbers = #tpu.dot_dimension_numbers<[1], [0], [0], [1], [0, 0, 1, 1], [], []>} : vector<128x64xbf16>, vector<64x256xbf16>, vector<128x256xf32> -> vector<128x256xf32>
    %59 = arith.addf %52, %58 : vector<128x256xf32>
    %60 = vector.extract_strided_slice %2 {offsets = [0, 2, 8], sizes = [8, 16, 64], strides = [1, 1, 1]} : vector<8x18x72xf32> to vector<8x16x64xf32>
    %61 = vector.shape_cast %60 : vector<8x16x64xf32> to vector<128x64xf32>
    %62 = arith.truncf %61 : vector<128x64xf32> to vector<128x64xbf16>
    %c8 = arith.constant 8 : index
    %c0_28 = arith.constant 0 : index
    %c0_29 = arith.constant 0 : index
    %63 = vector.load %arg3[%c8, %c0_28, %c0_29] : memref<9x64x256xbf16, #tpu.memory_space<vmem>>, vector<1x64x256xbf16>
    %64 = vector.shape_cast %63 : vector<1x64x256xbf16> to vector<64x256xbf16>
    %cst_30 = arith.constant dense<0.000000e+00> : vector<128x256xf32>
    %65 = tpu.matmul %62, %64, %cst_30 {dimension_numbers = #tpu.dot_dimension_numbers<[1], [0], [0], [1], [0, 0, 1, 1], [], []>} : vector<128x64xbf16>, vector<64x256xbf16>, vector<128x256xf32> -> vector<128x256xf32>
    %66 = arith.addf %59, %65 : vector<128x256xf32>
    %c0_31 = arith.constant 0 : index
    %c0_32 = arith.constant 0 : index
    %67 = vector.load %arg4[%c0_31, %c0_32] : memref<1x256xf32, #tpu.memory_space<vmem>>, vector<1x256xf32>
    %68 = vector.broadcast %67 : vector<1x256xf32> to vector<128x256xf32>
    %69 = arith.addf %66, %68 : vector<128x256xf32>
    %cst_33 = arith.constant 0.000000e+00 : f32
    %70 = vector.broadcast %cst_33 : f32 to vector<128x256xf32>
    %71 = arith.maximumf %69, %70 : vector<128x256xf32>
    %72 = arith.truncf %71 : vector<128x256xf32> to vector<128x256xbf16>
    %c0_34 = arith.constant 0 : index
    %c0_35 = arith.constant 0 : index
    %73 = vector.load %arg5[%c0_34, %c0_35] : memref<256x16xbf16, #tpu.memory_space<vmem>>, vector<256x16xbf16>
    %cst_36 = arith.constant dense<0.000000e+00> : vector<128x16xf32>
    %74 = tpu.matmul %72, %73, %cst_36 {dimension_numbers = #tpu.dot_dimension_numbers<[1], [0], [0], [1], [0, 0, 1, 1], [], []>} : vector<128x256xbf16>, vector<256x16xbf16>, vector<128x16xf32> -> vector<128x16xf32>
    %75 = vector.shape_cast %74 : vector<128x16xf32> to vector<8x16x16xf32>
    %cst_37 = arith.constant dense<0.000000e+00> : vector<8x16xf32>
    %76 = vector.multi_reduction <add>, %75, %cst_37 [1] : vector<8x16x16xf32> to vector<8x16xf32>
    %cst_38 = arith.constant 1.600000e+01 : f32
    %77 = vector.broadcast %cst_38 : f32 to vector<8x16xf32>
    %78 = arith.divf %76, %77 : vector<8x16xf32>
    %79 = arith.index_cast %arg1 : i32 to index
    %c0_39 = arith.constant 0 : index
    %c0_40 = arith.constant 0 : index
    %80 = vector.load %arg31[%79, %c0_39, %c0_40] : memref<4x8x16xf32, #tpu.memory_space<vmem>>, vector<1x8x16xf32>
    %81 = vector.shape_cast %80 : vector<1x8x16xf32> to vector<8x16xf32>
    %82 = vector.shape_cast %78 : vector<8x16xf32> to vector<1x8x16xf32>
    tpu.vector_store %arg31[%79, %c0_39, %c0_40], %82 {strides = array<i32>} : memref<4x8x16xf32, #tpu.memory_space<vmem>>, vector<1x8x16xf32>,
    %c3_i32 = arith.constant 3 : i32
    %83 = arith.cmpi eq, %arg1, %c3_i32 : i32
    %84 = arith.extui %83 : i1 to i32
    %c0_i32 = arith.constant 0 : i32
    %85 = arith.cmpi ne, %84, %c0_i32 : i32
    scf.if %85 {
      %c0_41 = arith.constant 0 : index
      %c0_42 = arith.constant 0 : index
      %c0_43 = arith.constant 0 : index
      %86 = vector.load %arg31[%c0_41, %c0_42, %c0_43] : memref<4x8x16xf32, #tpu.memory_space<vmem>>, vector<4x8x16xf32>
      %87 = vector.shape_cast %86 : vector<4x8x16xf32> to vector<32x16xf32>
      %88 = arith.truncf %87 : vector<32x16xf32> to vector<32x16xbf16>
      %c0_44 = arith.constant 0 : index
      %c0_45 = arith.constant 0 : index
      %89 = vector.load %arg6[%c0_44, %c0_45] : memref<16x32xbf16, #tpu.memory_space<vmem>>, vector<16x32xbf16>
      %cst_46 = arith.constant dense<0.000000e+00> : vector<32x32xf32>
      %90 = tpu.matmul %88, %89, %cst_46 {dimension_numbers = #tpu.dot_dimension_numbers<[1], [0], [0], [1], [0, 0, 1, 1], [], []>} : vector<32x16xbf16>, vector<16x32xbf16>, vector<32x32xf32> -> vector<32x32xf32>
      %c0_47 = arith.constant 0 : index
      %c0_48 = arith.constant 0 : index
      %91 = vector.load %arg7[%c0_47, %c0_48] : memref<1x32xf32, #tpu.memory_space<vmem>>, vector<1x32xf32>
      %92 = vector.broadcast %91 : vector<1x32xf32> to vector<32x32xf32>
      %93 = arith.addf %90, %92 : vector<32x32xf32>
      %cst_49 = arith.constant 0.000000e+00 : f32
      %94 = vector.broadcast %cst_49 : f32 to vector<32x32xf32>
      %95 = arith.maximumf %93, %94 : vector<32x32xf32>
      %c0_50 = arith.constant 0 : index
      %c0_51 = arith.constant 0 : index
      %96 = vector.load %arg8[%c0_50, %c0_51] : memref<32x32xf32, #tpu.memory_space<vmem>>, vector<32x32xf32>
      %c0_52 = arith.constant 0 : index
      %c0_53 = arith.constant 0 : index
      %97 = vector.load %arg10[%c0_52, %c0_53] : memref<32x96xbf16, #tpu.memory_space<vmem>>, vector<32x96xbf16>
      %c0_54 = arith.constant 0 : index
      %c0_55 = arith.constant 0 : index
      %98 = vector.load %arg11[%c0_54, %c0_55] : memref<1x96xf32, #tpu.memory_space<vmem>>, vector<1x96xf32>
      %c0_56 = arith.constant 0 : index
      %c0_57 = arith.constant 0 : index
      %99 = vector.load %arg12[%c0_56, %c0_57] : memref<32x32xbf16, #tpu.memory_space<vmem>>, vector<32x32xbf16>
      %c0_58 = arith.constant 0 : index
      %c0_59 = arith.constant 0 : index
      %100 = vector.load %arg13[%c0_58, %c0_59] : memref<1x32xf32, #tpu.memory_space<vmem>>, vector<1x32xf32>
      %101 = arith.truncf %95 : vector<32x32xf32> to vector<32x32xbf16>
      %cst_60 = arith.constant dense<0.000000e+00> : vector<32x96xf32>
      %102 = tpu.matmul %101, %97, %cst_60 {dimension_numbers = #tpu.dot_dimension_numbers<[1], [0], [0], [1], [0, 0, 1, 1], [], []>} : vector<32x32xbf16>, vector<32x96xbf16>, vector<32x96xf32> -> vector<32x96xf32>
      %103 = vector.broadcast %98 : vector<1x96xf32> to vector<32x96xf32>
      %104 = arith.addf %102, %103 : vector<32x96xf32>
      %105 = vector.extract_strided_slice %104 {offsets = [0, 0], sizes = [32, 8], strides = [1, 1]} : vector<32x96xf32> to vector<32x8xf32>
      %106 = vector.extract_strided_slice %104 {offsets = [0, 32], sizes = [32, 8], strides = [1, 1]} : vector<32x96xf32> to vector<32x8xf32>
      %107 = vector.extract_strided_slice %104 {offsets = [0, 64], sizes = [32, 8], strides = [1, 1]} : vector<32x96xf32> to vector<32x8xf32>
      %108 = tpu.transpose %106, [1, 0] : vector<32x8xf32> -> vector<8x32xf32>
      %cst_61 = arith.constant dense<0.000000e+00> : vector<32x32xf32>
      %109 = tpu.matmul %105, %108, %cst_61 {dimension_numbers = #tpu.dot_dimension_numbers<[1], [0], [0], [1], [0, 0, 1, 1], [], []>} : vector<32x8xf32>, vector<8x32xf32>, vector<32x32xf32> -> vector<32x32xf32>
      %cst_62 = arith.constant 0.353553385 : f32
      %110 = vector.broadcast %cst_62 : f32 to vector<32x32xf32>
      %111 = arith.mulf %109, %110 : vector<32x32xf32>
      %112 = arith.addf %111, %96 : vector<32x32xf32>
      %cst_63 = arith.constant dense<0xFF800000> : vector<32xf32>
      %113 = vector.multi_reduction <maximumf>, %112, %cst_63 [1] : vector<32x32xf32> to vector<32xf32>
      %114 = vector.shape_cast %113 : vector<32xf32> to vector<32x1xf32>
      %115 = vector.broadcast %114 : vector<32x1xf32> to vector<32x32xf32>
      %116 = arith.subf %112, %115 : vector<32x32xf32>
      %117 = math.exp %116 : vector<32x32xf32>
      %cst_64 = arith.constant dense<0.000000e+00> : vector<32xf32>
      %118 = vector.multi_reduction <add>, %117, %cst_64 [1] : vector<32x32xf32> to vector<32xf32>
      %119 = vector.shape_cast %118 : vector<32xf32> to vector<32x1xf32>
      %120 = vector.broadcast %119 : vector<32x1xf32> to vector<32x32xf32>
      %121 = arith.divf %117, %120 : vector<32x32xf32>
      %cst_65 = arith.constant dense<0.000000e+00> : vector<32x8xf32>
      %122 = tpu.matmul %121, %107, %cst_65 {dimension_numbers = #tpu.dot_dimension_numbers<[1], [0], [0], [1], [0, 0, 1, 1], [], []>} : vector<32x32xf32>, vector<32x8xf32>, vector<32x8xf32> -> vector<32x8xf32>
      %123 = vector.extract_strided_slice %104 {offsets = [0, 8], sizes = [32, 8], strides = [1, 1]} : vector<32x96xf32> to vector<32x8xf32>
      %124 = vector.extract_strided_slice %104 {offsets = [0, 40], sizes = [32, 8], strides = [1, 1]} : vector<32x96xf32> to vector<32x8xf32>
      %125 = vector.extract_strided_slice %104 {offsets = [0, 72], sizes = [32, 8], strides = [1, 1]} : vector<32x96xf32> to vector<32x8xf32>
      %126 = tpu.transpose %124, [1, 0] : vector<32x8xf32> -> vector<8x32xf32>
      %cst_66 = arith.constant dense<0.000000e+00> : vector<32x32xf32>
      %127 = tpu.matmul %123, %126, %cst_66 {dimension_numbers = #tpu.dot_dimension_numbers<[1], [0], [0], [1], [0, 0, 1, 1], [], []>} : vector<32x8xf32>, vector<8x32xf32>, vector<32x32xf32> -> vector<32x32xf32>
      %cst_67 = arith.constant 0.353553385 : f32
      %128 = vector.broadcast %cst_67 : f32 to vector<32x32xf32>
      %129 = arith.mulf %127, %128 : vector<32x32xf32>
      %130 = arith.addf %129, %96 : vector<32x32xf32>
      %cst_68 = arith.constant dense<0xFF800000> : vector<32xf32>
      %131 = vector.multi_reduction <maximumf>, %130, %cst_68 [1] : vector<32x32xf32> to vector<32xf32>
      %132 = vector.shape_cast %131 : vector<32xf32> to vector<32x1xf32>
      %133 = vector.broadcast %132 : vector<32x1xf32> to vector<32x32xf32>
      %134 = arith.subf %130, %133 : vector<32x32xf32>
      %135 = math.exp %134 : vector<32x32xf32>
      %cst_69 = arith.constant dense<0.000000e+00> : vector<32xf32>
      %136 = vector.multi_reduction <add>, %135, %cst_69 [1] : vector<32x32xf32> to vector<32xf32>
      %137 = vector.shape_cast %136 : vector<32xf32> to vector<32x1xf32>
      %138 = vector.broadcast %137 : vector<32x1xf32> to vector<32x32xf32>
      %139 = arith.divf %135, %138 : vector<32x32xf32>
      %cst_70 = arith.constant dense<0.000000e+00> : vector<32x8xf32>
      %140 = tpu.matmul %139, %125, %cst_70 {dimension_numbers = #tpu.dot_dimension_numbers<[1], [0], [0], [1], [0, 0, 1, 1], [], []>} : vector<32x32xf32>, vector<32x8xf32>, vector<32x8xf32> -> vector<32x8xf32>
      %141 = vector.extract_strided_slice %104 {offsets = [0, 16], sizes = [32, 8], strides = [1, 1]} : vector<32x96xf32> to vector<32x8xf32>
      %142 = vector.extract_strided_slice %104 {offsets = [0, 48], sizes = [32, 8], strides = [1, 1]} : vector<32x96xf32> to vector<32x8xf32>
      %143 = vector.extract_strided_slice %104 {offsets = [0, 80], sizes = [32, 8], strides = [1, 1]} : vector<32x96xf32> to vector<32x8xf32>
      %144 = tpu.transpose %142, [1, 0] : vector<32x8xf32> -> vector<8x32xf32>
      %cst_71 = arith.constant dense<0.000000e+00> : vector<32x32xf32>
      %145 = tpu.matmul %141, %144, %cst_71 {dimension_numbers = #tpu.dot_dimension_numbers<[1], [0], [0], [1], [0, 0, 1, 1], [], []>} : vector<32x8xf32>, vector<8x32xf32>, vector<32x32xf32> -> vector<32x32xf32>
      %cst_72 = arith.constant 0.353553385 : f32
      %146 = vector.broadcast %cst_72 : f32 to vector<32x32xf32>
      %147 = arith.mulf %145, %146 : vector<32x32xf32>
      %148 = arith.addf %147, %96 : vector<32x32xf32>
      %cst_73 = arith.constant dense<0xFF800000> : vector<32xf32>
      %149 = vector.multi_reduction <maximumf>, %148, %cst_73 [1] : vector<32x32xf32> to vector<32xf32>
      %150 = vector.shape_cast %149 : vector<32xf32> to vector<32x1xf32>
      %151 = vector.broadcast %150 : vector<32x1xf32> to vector<32x32xf32>
      %152 = arith.subf %148, %151 : vector<32x32xf32>
      %153 = math.exp %152 : vector<32x32xf32>
      %cst_74 = arith.constant dense<0.000000e+00> : vector<32xf32>
      %154 = vector.multi_reduction <add>, %153, %cst_74 [1] : vector<32x32xf32> to vector<32xf32>
      %155 = vector.shape_cast %154 : vector<32xf32> to vector<32x1xf32>
      %156 = vector.broadcast %155 : vector<32x1xf32> to vector<32x32xf32>
      %157 = arith.divf %153, %156 : vector<32x32xf32>
      %cst_75 = arith.constant dense<0.000000e+00> : vector<32x8xf32>
      %158 = tpu.matmul %157, %143, %cst_75 {dimension_numbers = #tpu.dot_dimension_numbers<[1], [0], [0], [1], [0, 0, 1, 1], [], []>} : vector<32x32xf32>, vector<32x8xf32>, vector<32x8xf32> -> vector<32x8xf32>
      %159 = vector.extract_strided_slice %104 {offsets = [0, 24], sizes = [32, 8], strides = [1, 1]} : vector<32x96xf32> to vector<32x8xf32>
      %160 = vector.extract_strided_slice %104 {offsets = [0, 56], sizes = [32, 8], strides = [1, 1]} : vector<32x96xf32> to vector<32x8xf32>
      %161 = vector.extract_strided_slice %104 {offsets = [0, 88], sizes = [32, 8], strides = [1, 1]} : vector<32x96xf32> to vector<32x8xf32>
      %162 = tpu.transpose %160, [1, 0] : vector<32x8xf32> -> vector<8x32xf32>
      %cst_76 = arith.constant dense<0.000000e+00> : vector<32x32xf32>
      %163 = tpu.matmul %159, %162, %cst_76 {dimension_numbers = #tpu.dot_dimension_numbers<[1], [0], [0], [1], [0, 0, 1, 1], [], []>} : vector<32x8xf32>, vector<8x32xf32>, vector<32x32xf32> -> vector<32x32xf32>
      %cst_77 = arith.constant 0.353553385 : f32
      %164 = vector.broadcast %cst_77 : f32 to vector<32x32xf32>
      %165 = arith.mulf %163, %164 : vector<32x32xf32>
      %166 = arith.addf %165, %96 : vector<32x32xf32>
      %cst_78 = arith.constant dense<0xFF800000> : vector<32xf32>
      %167 = vector.multi_reduction <maximumf>, %166, %cst_78 [1] : vector<32x32xf32> to vector<32xf32>
      %168 = vector.shape_cast %167 : vector<32xf32> to vector<32x1xf32>
      %169 = vector.broadcast %168 : vector<32x1xf32> to vector<32x32xf32>
      %170 = arith.subf %166, %169 : vector<32x32xf32>
      %171 = math.exp %170 : vector<32x32xf32>
      %cst_79 = arith.constant dense<0.000000e+00> : vector<32xf32>
      %172 = vector.multi_reduction <add>, %171, %cst_79 [1] : vector<32x32xf32> to vector<32xf32>
      %173 = vector.shape_cast %172 : vector<32xf32> to vector<32x1xf32>
      %174 = vector.broadcast %173 : vector<32x1xf32> to vector<32x32xf32>
      %175 = arith.divf %171, %174 : vector<32x32xf32>
      %cst_80 = arith.constant dense<0.000000e+00> : vector<32x8xf32>
      %176 = tpu.matmul %175, %161, %cst_80 {dimension_numbers = #tpu.dot_dimension_numbers<[1], [0], [0], [1], [0, 0, 1, 1], [], []>} : vector<32x32xf32>, vector<32x8xf32>, vector<32x8xf32> -> vector<32x8xf32>
      %177 = tpu.concatenate %122, %140, %158, %176 in 1 : vector<32x8xf32>, vector<32x8xf32>, vector<32x8xf32>, vector<32x8xf32> -> vector<32x32xf32>
      %178 = arith.truncf %177 : vector<32x32xf32> to vector<32x32xbf16>
      %cst_81 = arith.constant dense<0.000000e+00> : vector<32x32xf32>
      %179 = tpu.matmul %178, %99, %cst_81 {dimension_numbers = #tpu.dot_dimension_numbers<[1], [0], [0], [1], [0, 0, 1, 1], [], []>} : vector<32x32xbf16>, vector<32x32xbf16>, vector<32x32xf32> -> vector<32x32xf32>
      %180 = vector.broadcast %100 : vector<1x32xf32> to vector<32x32xf32>
      %181 = arith.addf %179, %180 : vector<32x32xf32>
      %c0_82 = arith.constant 0 : index
      %c0_83 = arith.constant 0 : index
      %182 = vector.load %arg9[%c0_82, %c0_83] : memref<32x32xf32, #tpu.memory_space<vmem>>, vector<32x32xf32>
      %c0_84 = arith.constant 0 : index
      %c0_85 = arith.constant 0 : index
      %c0_86 = arith.constant 0 : index
      %183 = vector.load %arg14[%c0_84, %c0_85, %c0_86] : memref<2x32x96xbf16, #tpu.memory_space<vmem>>, vector<1x32x96xbf16>
      %184 = vector.shape_cast %183 : vector<1x32x96xbf16> to vector<32x96xbf16>
      %c0_87 = arith.constant 0 : index
      %c0_88 = arith.constant 0 : index
      %c0_89 = arith.constant 0 : index
      %185 = vector.load %arg15[%c0_87, %c0_88, %c0_89] : memref<2x1x96xf32, #tpu.memory_space<vmem>>, vector<1x1x96xf32>
      %186 = vector.shape_cast %185 : vector<1x1x96xf32> to vector<1x96xf32>
      %c0_90 = arith.constant 0 : index
      %c0_91 = arith.constant 0 : index
      %c0_92 = arith.constant 0 : index
      %187 = vector.load %arg16[%c0_90, %c0_91, %c0_92] : memref<2x32x32xbf16, #tpu.memory_space<vmem>>, vector<1x32x32xbf16>
      %188 = vector.shape_cast %187 : vector<1x32x32xbf16> to vector<32x32xbf16>
      %c0_93 = arith.constant 0 : index
      %c0_94 = arith.constant 0 : index
      %c0_95 = arith.constant 0 : index
      %189 = vector.load %arg17[%c0_93, %c0_94, %c0_95] : memref<2x1x32xf32, #tpu.memory_space<vmem>>, vector<1x1x32xf32>
      %190 = vector.shape_cast %189 : vector<1x1x32xf32> to vector<1x32xf32>
      %c0_96 = arith.constant 0 : index
      %c0_97 = arith.constant 0 : index
      %c0_98 = arith.constant 0 : index
      %191 = vector.load %arg18[%c0_96, %c0_97, %c0_98] : memref<2x1x32xf32, #tpu.memory_space<vmem>>, vector<1x1x32xf32>
      %192 = vector.shape_cast %191 : vector<1x1x32xf32> to vector<1x32xf32>
      %c0_99 = arith.constant 0 : index
      %c0_100 = arith.constant 0 : index
      %c0_101 = arith.constant 0 : index
      %193 = vector.load %arg19[%c0_99, %c0_100, %c0_101] : memref<2x1x32xf32, #tpu.memory_space<vmem>>, vector<1x1x32xf32>
      %194 = vector.shape_cast %193 : vector<1x1x32xf32> to vector<1x32xf32>
      %c0_102 = arith.constant 0 : index
      %c0_103 = arith.constant 0 : index
      %c0_104 = arith.constant 0 : index
      %195 = vector.load %arg20[%c0_102, %c0_103, %c0_104] : memref<2x32x64xbf16, #tpu.memory_space<vmem>>, vector<1x32x64xbf16>
      %196 = vector.shape_cast %195 : vector<1x32x64xbf16> to vector<32x64xbf16>
      %c0_105 = arith.constant 0 : index
      %c0_106 = arith.constant 0 : index
      %c0_107 = arith.constant 0 : index
      %197 = vector.load %arg21[%c0_105, %c0_106, %c0_107] : memref<2x1x64xf32, #tpu.memory_space<vmem>>, vector<1x1x64xf32>
      %198 = vector.shape_cast %197 : vector<1x1x64xf32> to vector<1x64xf32>
      %c0_108 = arith.constant 0 : index
      %c0_109 = arith.constant 0 : index
      %c0_110 = arith.constant 0 : index
      %199 = vector.load %arg22[%c0_108, %c0_109, %c0_110] : memref<2x64x32xbf16, #tpu.memory_space<vmem>>, vector<1x64x32xbf16>
      %200 = vector.shape_cast %199 : vector<1x64x32xbf16> to vector<64x32xbf16>
      %c0_111 = arith.constant 0 : index
      %c0_112 = arith.constant 0 : index
      %c0_113 = arith.constant 0 : index
      %201 = vector.load %arg23[%c0_111, %c0_112, %c0_113] : memref<2x1x32xf32, #tpu.memory_space<vmem>>, vector<1x1x32xf32>
      %202 = vector.shape_cast %201 : vector<1x1x32xf32> to vector<1x32xf32>
      %c0_114 = arith.constant 0 : index
      %c0_115 = arith.constant 0 : index
      %c0_116 = arith.constant 0 : index
      %203 = vector.load %arg24[%c0_114, %c0_115, %c0_116] : memref<2x1x32xf32, #tpu.memory_space<vmem>>, vector<1x1x32xf32>
      %204 = vector.shape_cast %203 : vector<1x1x32xf32> to vector<1x32xf32>
      %c0_117 = arith.constant 0 : index
      %c0_118 = arith.constant 0 : index
      %c0_119 = arith.constant 0 : index
      %205 = vector.load %arg25[%c0_117, %c0_118, %c0_119] : memref<2x1x32xf32, #tpu.memory_space<vmem>>, vector<1x1x32xf32>
      %206 = vector.shape_cast %205 : vector<1x1x32xf32> to vector<1x32xf32>
      %207 = arith.truncf %181 : vector<32x32xf32> to vector<32x32xbf16>
      %cst_120 = arith.constant dense<0.000000e+00> : vector<32x96xf32>
      %208 = tpu.matmul %207, %184, %cst_120 {dimension_numbers = #tpu.dot_dimension_numbers<[1], [0], [0], [1], [0, 0, 1, 1], [], []>} : vector<32x32xbf16>, vector<32x96xbf16>, vector<32x96xf32> -> vector<32x96xf32>
      %209 = vector.broadcast %186 : vector<1x96xf32> to vector<32x96xf32>
      %210 = arith.addf %208, %209 : vector<32x96xf32>
      %211 = vector.extract_strided_slice %210 {offsets = [0, 0], sizes = [32, 8], strides = [1, 1]} : vector<32x96xf32> to vector<32x8xf32>
      %212 = vector.extract_strided_slice %210 {offsets = [0, 32], sizes = [32, 8], strides = [1, 1]} : vector<32x96xf32> to vector<32x8xf32>
      %213 = vector.extract_strided_slice %210 {offsets = [0, 64], sizes = [32, 8], strides = [1, 1]} : vector<32x96xf32> to vector<32x8xf32>
      %214 = tpu.transpose %212, [1, 0] : vector<32x8xf32> -> vector<8x32xf32>
      %cst_121 = arith.constant dense<0.000000e+00> : vector<32x32xf32>
      %215 = tpu.matmul %211, %214, %cst_121 {dimension_numbers = #tpu.dot_dimension_numbers<[1], [0], [0], [1], [0, 0, 1, 1], [], []>} : vector<32x8xf32>, vector<8x32xf32>, vector<32x32xf32> -> vector<32x32xf32>
      %cst_122 = arith.constant 0.353553385 : f32
      %216 = vector.broadcast %cst_122 : f32 to vector<32x32xf32>
      %217 = arith.mulf %215, %216 : vector<32x32xf32>
      %218 = arith.addf %217, %182 : vector<32x32xf32>
      %cst_123 = arith.constant dense<0xFF800000> : vector<32xf32>
      %219 = vector.multi_reduction <maximumf>, %218, %cst_123 [1] : vector<32x32xf32> to vector<32xf32>
      %220 = vector.shape_cast %219 : vector<32xf32> to vector<32x1xf32>
      %221 = vector.broadcast %220 : vector<32x1xf32> to vector<32x32xf32>
      %222 = arith.subf %218, %221 : vector<32x32xf32>
      %223 = math.exp %222 : vector<32x32xf32>
      %cst_124 = arith.constant dense<0.000000e+00> : vector<32xf32>
      %224 = vector.multi_reduction <add>, %223, %cst_124 [1] : vector<32x32xf32> to vector<32xf32>
      %225 = vector.shape_cast %224 : vector<32xf32> to vector<32x1xf32>
      %226 = vector.broadcast %225 : vector<32x1xf32> to vector<32x32xf32>
      %227 = arith.divf %223, %226 : vector<32x32xf32>
      %cst_125 = arith.constant dense<0.000000e+00> : vector<32x8xf32>
      %228 = tpu.matmul %227, %213, %cst_125 {dimension_numbers = #tpu.dot_dimension_numbers<[1], [0], [0], [1], [0, 0, 1, 1], [], []>} : vector<32x32xf32>, vector<32x8xf32>, vector<32x8xf32> -> vector<32x8xf32>
      %229 = vector.extract_strided_slice %210 {offsets = [0, 8], sizes = [32, 8], strides = [1, 1]} : vector<32x96xf32> to vector<32x8xf32>
      %230 = vector.extract_strided_slice %210 {offsets = [0, 40], sizes = [32, 8], strides = [1, 1]} : vector<32x96xf32> to vector<32x8xf32>
      %231 = vector.extract_strided_slice %210 {offsets = [0, 72], sizes = [32, 8], strides = [1, 1]} : vector<32x96xf32> to vector<32x8xf32>
      %232 = tpu.transpose %230, [1, 0] : vector<32x8xf32> -> vector<8x32xf32>
      %cst_126 = arith.constant dense<0.000000e+00> : vector<32x32xf32>
      %233 = tpu.matmul %229, %232, %cst_126 {dimension_numbers = #tpu.dot_dimension_numbers<[1], [0], [0], [1], [0, 0, 1, 1], [], []>} : vector<32x8xf32>, vector<8x32xf32>, vector<32x32xf32> -> vector<32x32xf32>
      %cst_127 = arith.constant 0.353553385 : f32
      %234 = vector.broadcast %cst_127 : f32 to vector<32x32xf32>
      %235 = arith.mulf %233, %234 : vector<32x32xf32>
      %236 = arith.addf %235, %182 : vector<32x32xf32>
      %cst_128 = arith.constant dense<0xFF800000> : vector<32xf32>
      %237 = vector.multi_reduction <maximumf>, %236, %cst_128 [1] : vector<32x32xf32> to vector<32xf32>
      %238 = vector.shape_cast %237 : vector<32xf32> to vector<32x1xf32>
      %239 = vector.broadcast %238 : vector<32x1xf32> to vector<32x32xf32>
      %240 = arith.subf %236, %239 : vector<32x32xf32>
      %241 = math.exp %240 : vector<32x32xf32>
      %cst_129 = arith.constant dense<0.000000e+00> : vector<32xf32>
      %242 = vector.multi_reduction <add>, %241, %cst_129 [1] : vector<32x32xf32> to vector<32xf32>
      %243 = vector.shape_cast %242 : vector<32xf32> to vector<32x1xf32>
      %244 = vector.broadcast %243 : vector<32x1xf32> to vector<32x32xf32>
      %245 = arith.divf %241, %244 : vector<32x32xf32>
      %cst_130 = arith.constant dense<0.000000e+00> : vector<32x8xf32>
      %246 = tpu.matmul %245, %231, %cst_130 {dimension_numbers = #tpu.dot_dimension_numbers<[1], [0], [0], [1], [0, 0, 1, 1], [], []>} : vector<32x32xf32>, vector<32x8xf32>, vector<32x8xf32> -> vector<32x8xf32>
      %247 = vector.extract_strided_slice %210 {offsets = [0, 16], sizes = [32, 8], strides = [1, 1]} : vector<32x96xf32> to vector<32x8xf32>
      %248 = vector.extract_strided_slice %210 {offsets = [0, 48], sizes = [32, 8], strides = [1, 1]} : vector<32x96xf32> to vector<32x8xf32>
      %249 = vector.extract_strided_slice %210 {offsets = [0, 80], sizes = [32, 8], strides = [1, 1]} : vector<32x96xf32> to vector<32x8xf32>
      %250 = tpu.transpose %248, [1, 0] : vector<32x8xf32> -> vector<8x32xf32>
      %cst_131 = arith.constant dense<0.000000e+00> : vector<32x32xf32>
      %251 = tpu.matmul %247, %250, %cst_131 {dimension_numbers = #tpu.dot_dimension_numbers<[1], [0], [0], [1], [0, 0, 1, 1], [], []>} : vector<32x8xf32>, vector<8x32xf32>, vector<32x32xf32> -> vector<32x32xf32>
      %cst_132 = arith.constant 0.353553385 : f32
      %252 = vector.broadcast %cst_132 : f32 to vector<32x32xf32>
      %253 = arith.mulf %251, %252 : vector<32x32xf32>
      %254 = arith.addf %253, %182 : vector<32x32xf32>
      %cst_133 = arith.constant dense<0xFF800000> : vector<32xf32>
      %255 = vector.multi_reduction <maximumf>, %254, %cst_133 [1] : vector<32x32xf32> to vector<32xf32>
      %256 = vector.shape_cast %255 : vector<32xf32> to vector<32x1xf32>
      %257 = vector.broadcast %256 : vector<32x1xf32> to vector<32x32xf32>
      %258 = arith.subf %254, %257 : vector<32x32xf32>
      %259 = math.exp %258 : vector<32x32xf32>
      %cst_134 = arith.constant dense<0.000000e+00> : vector<32xf32>
      %260 = vector.multi_reduction <add>, %259, %cst_134 [1] : vector<32x32xf32> to vector<32xf32>
      %261 = vector.shape_cast %260 : vector<32xf32> to vector<32x1xf32>
      %262 = vector.broadcast %261 : vector<32x1xf32> to vector<32x32xf32>
      %263 = arith.divf %259, %262 : vector<32x32xf32>
      %cst_135 = arith.constant dense<0.000000e+00> : vector<32x8xf32>
      %264 = tpu.matmul %263, %249, %cst_135 {dimension_numbers = #tpu.dot_dimension_numbers<[1], [0], [0], [1], [0, 0, 1, 1], [], []>} : vector<32x32xf32>, vector<32x8xf32>, vector<32x8xf32> -> vector<32x8xf32>
      %265 = vector.extract_strided_slice %210 {offsets = [0, 24], sizes = [32, 8], strides = [1, 1]} : vector<32x96xf32> to vector<32x8xf32>
      %266 = vector.extract_strided_slice %210 {offsets = [0, 56], sizes = [32, 8], strides = [1, 1]} : vector<32x96xf32> to vector<32x8xf32>
      %267 = vector.extract_strided_slice %210 {offsets = [0, 88], sizes = [32, 8], strides = [1, 1]} : vector<32x96xf32> to vector<32x8xf32>
      %268 = tpu.transpose %266, [1, 0] : vector<32x8xf32> -> vector<8x32xf32>
      %cst_136 = arith.constant dense<0.000000e+00> : vector<32x32xf32>
      %269 = tpu.matmul %265, %268, %cst_136 {dimension_numbers = #tpu.dot_dimension_numbers<[1], [0], [0], [1], [0, 0, 1, 1], [], []>} : vector<32x8xf32>, vector<8x32xf32>, vector<32x32xf32> -> vector<32x32xf32>
      %cst_137 = arith.constant 0.353553385 : f32
      %270 = vector.broadcast %cst_137 : f32 to vector<32x32xf32>
      %271 = arith.mulf %269, %270 : vector<32x32xf32>
      %272 = arith.addf %271, %182 : vector<32x32xf32>
      %cst_138 = arith.constant dense<0xFF800000> : vector<32xf32>
      %273 = vector.multi_reduction <maximumf>, %272, %cst_138 [1] : vector<32x32xf32> to vector<32xf32>
      %274 = vector.shape_cast %273 : vector<32xf32> to vector<32x1xf32>
      %275 = vector.broadcast %274 : vector<32x1xf32> to vector<32x32xf32>
      %276 = arith.subf %272, %275 : vector<32x32xf32>
      %277 = math.exp %276 : vector<32x32xf32>
      %cst_139 = arith.constant dense<0.000000e+00> : vector<32xf32>
      %278 = vector.multi_reduction <add>, %277, %cst_139 [1] : vector<32x32xf32> to vector<32xf32>
      %279 = vector.shape_cast %278 : vector<32xf32> to vector<32x1xf32>
      %280 = vector.broadcast %279 : vector<32x1xf32> to vector<32x32xf32>
      %281 = arith.divf %277, %280 : vector<32x32xf32>
      %cst_140 = arith.constant dense<0.000000e+00> : vector<32x8xf32>
      %282 = tpu.matmul %281, %267, %cst_140 {dimension_numbers = #tpu.dot_dimension_numbers<[1], [0], [0], [1], [0, 0, 1, 1], [], []>} : vector<32x32xf32>, vector<32x8xf32>, vector<32x8xf32> -> vector<32x8xf32>
      %283 = tpu.concatenate %228, %246, %264, %282 in 1 : vector<32x8xf32>, vector<32x8xf32>, vector<32x8xf32>, vector<32x8xf32> -> vector<32x32xf32>
      %284 = arith.truncf %283 : vector<32x32xf32> to vector<32x32xbf16>
      %cst_141 = arith.constant dense<0.000000e+00> : vector<32x32xf32>
      %285 = tpu.matmul %284, %188, %cst_141 {dimension_numbers = #tpu.dot_dimension_numbers<[1], [0], [0], [1], [0, 0, 1, 1], [], []>} : vector<32x32xbf16>, vector<32x32xbf16>, vector<32x32xf32> -> vector<32x32xf32>
      %286 = vector.broadcast %190 : vector<1x32xf32> to vector<32x32xf32>
      %287 = arith.addf %285, %286 : vector<32x32xf32>
      %288 = arith.addf %181, %287 : vector<32x32xf32>
      %cst_142 = arith.constant dense<0.000000e+00> : vector<32xf32>
      %289 = vector.multi_reduction <add>, %288, %cst_142 [1] : vector<32x32xf32> to vector<32xf32>
      %290 = vector.shape_cast %289 : vector<32xf32> to vector<32x1xf32>
      %cst_143 = arith.constant 3.200000e+01 : f32
      %291 = vector.broadcast %cst_143 : f32 to vector<32x1xf32>
      %292 = arith.divf %290, %291 : vector<32x1xf32>
      %293 = vector.broadcast %292 : vector<32x1xf32> to vector<32x32xf32>
      %294 = arith.subf %288, %293 : vector<32x32xf32>
      %295 = arith.mulf %294, %294 : vector<32x32xf32>
      %cst_144 = arith.constant dense<0.000000e+00> : vector<32xf32>
      %296 = vector.multi_reduction <add>, %295, %cst_144 [1] : vector<32x32xf32> to vector<32xf32>
      %297 = vector.shape_cast %296 : vector<32xf32> to vector<32x1xf32>
      %cst_145 = arith.constant 3.200000e+01 : f32
      %298 = vector.broadcast %cst_145 : f32 to vector<32x1xf32>
      %299 = arith.divf %297, %298 : vector<32x1xf32>
      %300 = vector.broadcast %292 : vector<32x1xf32> to vector<32x32xf32>
      %301 = arith.subf %288, %300 : vector<32x32xf32>
      %cst_146 = arith.constant 9.99999974E-6 : f32
      %302 = vector.broadcast %cst_146 : f32 to vector<32x1xf32>
      %303 = arith.addf %299, %302 : vector<32x1xf32>
      %304 = math.rsqrt %303 : vector<32x1xf32>
      %305 = vector.broadcast %304 : vector<32x1xf32> to vector<32x32xf32>
      %306 = arith.mulf %301, %305 : vector<32x32xf32>
      %307 = vector.broadcast %192 : vector<1x32xf32> to vector<32x32xf32>
      %308 = arith.mulf %306, %307 : vector<32x32xf32>
      %309 = vector.broadcast %194 : vector<1x32xf32> to vector<32x32xf32>
      %310 = arith.addf %308, %309 : vector<32x32xf32>
      %311 = arith.truncf %310 : vector<32x32xf32> to vector<32x32xbf16>
      %cst_147 = arith.constant dense<0.000000e+00> : vector<32x64xf32>
      %312 = tpu.matmul %311, %196, %cst_147 {dimension_numbers = #tpu.dot_dimension_numbers<[1], [0], [0], [1], [0, 0, 1, 1], [], []>} : vector<32x32xbf16>, vector<32x64xbf16>, vector<32x64xf32> -> vector<32x64xf32>
      %313 = vector.broadcast %198 : vector<1x64xf32> to vector<32x64xf32>
      %314 = arith.addf %312, %313 : vector<32x64xf32>
      %cst_148 = arith.constant 0.000000e+00 : f32
      %315 = vector.broadcast %cst_148 : f32 to vector<32x64xf32>
      %316 = arith.maximumf %314, %315 : vector<32x64xf32>
      %317 = arith.truncf %316 : vector<32x64xf32> to vector<32x64xbf16>
      %cst_149 = arith.constant dense<0.000000e+00> : vector<32x32xf32>
      %318 = tpu.matmul %317, %200, %cst_149 {dimension_numbers = #tpu.dot_dimension_numbers<[1], [0], [0], [1], [0, 0, 1, 1], [], []>} : vector<32x64xbf16>, vector<64x32xbf16>, vector<32x32xf32> -> vector<32x32xf32>
      %319 = vector.broadcast %202 : vector<1x32xf32> to vector<32x32xf32>
      %320 = arith.addf %318, %319 : vector<32x32xf32>
      %321 = arith.addf %310, %320 : vector<32x32xf32>
      %cst_150 = arith.constant dense<0.000000e+00> : vector<32xf32>
      %322 = vector.multi_reduction <add>, %321, %cst_150 [1] : vector<32x32xf32> to vector<32xf32>
      %323 = vector.shape_cast %322 : vector<32xf32> to vector<32x1xf32>
      %cst_151 = arith.constant 3.200000e+01 : f32
      %324 = vector.broadcast %cst_151 : f32 to vector<32x1xf32>
      %325 = arith.divf %323, %324 : vector<32x1xf32>
      %326 = vector.broadcast %325 : vector<32x1xf32> to vector<32x32xf32>
      %327 = arith.subf %321, %326 : vector<32x32xf32>
      %328 = arith.mulf %327, %327 : vector<32x32xf32>
      %cst_152 = arith.constant dense<0.000000e+00> : vector<32xf32>
      %329 = vector.multi_reduction <add>, %328, %cst_152 [1] : vector<32x32xf32> to vector<32xf32>
      %330 = vector.shape_cast %329 : vector<32xf32> to vector<32x1xf32>
      %cst_153 = arith.constant 3.200000e+01 : f32
      %331 = vector.broadcast %cst_153 : f32 to vector<32x1xf32>
      %332 = arith.divf %330, %331 : vector<32x1xf32>
      %333 = vector.broadcast %325 : vector<32x1xf32> to vector<32x32xf32>
      %334 = arith.subf %321, %333 : vector<32x32xf32>
      %cst_154 = arith.constant 9.99999974E-6 : f32
      %335 = vector.broadcast %cst_154 : f32 to vector<32x1xf32>
      %336 = arith.addf %332, %335 : vector<32x1xf32>
      %337 = math.rsqrt %336 : vector<32x1xf32>
      %338 = vector.broadcast %337 : vector<32x1xf32> to vector<32x32xf32>
      %339 = arith.mulf %334, %338 : vector<32x32xf32>
      %340 = vector.broadcast %204 : vector<1x32xf32> to vector<32x32xf32>
      %341 = arith.mulf %339, %340 : vector<32x32xf32>
      %342 = vector.broadcast %206 : vector<1x32xf32> to vector<32x32xf32>
      %343 = arith.addf %341, %342 : vector<32x32xf32>
      %c1_155 = arith.constant 1 : index
      %c0_156 = arith.constant 0 : index
      %c0_157 = arith.constant 0 : index
      %344 = vector.load %arg14[%c1_155, %c0_156, %c0_157] : memref<2x32x96xbf16, #tpu.memory_space<vmem>>, vector<1x32x96xbf16>
      %345 = vector.shape_cast %344 : vector<1x32x96xbf16> to vector<32x96xbf16>
      %c1_158 = arith.constant 1 : index
      %c0_159 = arith.constant 0 : index
      %c0_160 = arith.constant 0 : index
      %346 = vector.load %arg15[%c1_158, %c0_159, %c0_160] : memref<2x1x96xf32, #tpu.memory_space<vmem>>, vector<1x1x96xf32>
      %347 = vector.shape_cast %346 : vector<1x1x96xf32> to vector<1x96xf32>
      %c1_161 = arith.constant 1 : index
      %c0_162 = arith.constant 0 : index
      %c0_163 = arith.constant 0 : index
      %348 = vector.load %arg16[%c1_161, %c0_162, %c0_163] : memref<2x32x32xbf16, #tpu.memory_space<vmem>>, vector<1x32x32xbf16>
      %349 = vector.shape_cast %348 : vector<1x32x32xbf16> to vector<32x32xbf16>
      %c1_164 = arith.constant 1 : index
      %c0_165 = arith.constant 0 : index
      %c0_166 = arith.constant 0 : index
      %350 = vector.load %arg17[%c1_164, %c0_165, %c0_166] : memref<2x1x32xf32, #tpu.memory_space<vmem>>, vector<1x1x32xf32>
      %351 = vector.shape_cast %350 : vector<1x1x32xf32> to vector<1x32xf32>
      %c1_167 = arith.constant 1 : index
      %c0_168 = arith.constant 0 : index
      %c0_169 = arith.constant 0 : index
      %352 = vector.load %arg18[%c1_167, %c0_168, %c0_169] : memref<2x1x32xf32, #tpu.memory_space<vmem>>, vector<1x1x32xf32>
      %353 = vector.shape_cast %352 : vector<1x1x32xf32> to vector<1x32xf32>
      %c1_170 = arith.constant 1 : index
      %c0_171 = arith.constant 0 : index
      %c0_172 = arith.constant 0 : index
      %354 = vector.load %arg19[%c1_170, %c0_171, %c0_172] : memref<2x1x32xf32, #tpu.memory_space<vmem>>, vector<1x1x32xf32>
      %355 = vector.shape_cast %354 : vector<1x1x32xf32> to vector<1x32xf32>
      %c1_173 = arith.constant 1 : index
      %c0_174 = arith.constant 0 : index
      %c0_175 = arith.constant 0 : index
      %356 = vector.load %arg20[%c1_173, %c0_174, %c0_175] : memref<2x32x64xbf16, #tpu.memory_space<vmem>>, vector<1x32x64xbf16>
      %357 = vector.shape_cast %356 : vector<1x32x64xbf16> to vector<32x64xbf16>
      %c1_176 = arith.constant 1 : index
      %c0_177 = arith.constant 0 : index
      %c0_178 = arith.constant 0 : index
      %358 = vector.load %arg21[%c1_176, %c0_177, %c0_178] : memref<2x1x64xf32, #tpu.memory_space<vmem>>, vector<1x1x64xf32>
      %359 = vector.shape_cast %358 : vector<1x1x64xf32> to vector<1x64xf32>
      %c1_179 = arith.constant 1 : index
      %c0_180 = arith.constant 0 : index
      %c0_181 = arith.constant 0 : index
      %360 = vector.load %arg22[%c1_179, %c0_180, %c0_181] : memref<2x64x32xbf16, #tpu.memory_space<vmem>>, vector<1x64x32xbf16>
      %361 = vector.shape_cast %360 : vector<1x64x32xbf16> to vector<64x32xbf16>
      %c1_182 = arith.constant 1 : index
      %c0_183 = arith.constant 0 : index
      %c0_184 = arith.constant 0 : index
      %362 = vector.load %arg23[%c1_182, %c0_183, %c0_184] : memref<2x1x32xf32, #tpu.memory_space<vmem>>, vector<1x1x32xf32>
      %363 = vector.shape_cast %362 : vector<1x1x32xf32> to vector<1x32xf32>
      %c1_185 = arith.constant 1 : index
      %c0_186 = arith.constant 0 : index
      %c0_187 = arith.constant 0 : index
      %364 = vector.load %arg24[%c1_185, %c0_186, %c0_187] : memref<2x1x32xf32, #tpu.memory_space<vmem>>, vector<1x1x32xf32>
      %365 = vector.shape_cast %364 : vector<1x1x32xf32> to vector<1x32xf32>
      %c1_188 = arith.constant 1 : index
      %c0_189 = arith.constant 0 : index
      %c0_190 = arith.constant 0 : index
      %366 = vector.load %arg25[%c1_188, %c0_189, %c0_190] : memref<2x1x32xf32, #tpu.memory_space<vmem>>, vector<1x1x32xf32>
      %367 = vector.shape_cast %366 : vector<1x1x32xf32> to vector<1x32xf32>
      %368 = arith.truncf %343 : vector<32x32xf32> to vector<32x32xbf16>
      %cst_191 = arith.constant dense<0.000000e+00> : vector<32x96xf32>
      %369 = tpu.matmul %368, %345, %cst_191 {dimension_numbers = #tpu.dot_dimension_numbers<[1], [0], [0], [1], [0, 0, 1, 1], [], []>} : vector<32x32xbf16>, vector<32x96xbf16>, vector<32x96xf32> -> vector<32x96xf32>
      %370 = vector.broadcast %347 : vector<1x96xf32> to vector<32x96xf32>
      %371 = arith.addf %369, %370 : vector<32x96xf32>
      %372 = vector.extract_strided_slice %371 {offsets = [0, 0], sizes = [32, 8], strides = [1, 1]} : vector<32x96xf32> to vector<32x8xf32>
      %373 = vector.extract_strided_slice %371 {offsets = [0, 32], sizes = [32, 8], strides = [1, 1]} : vector<32x96xf32> to vector<32x8xf32>
      %374 = vector.extract_strided_slice %371 {offsets = [0, 64], sizes = [32, 8], strides = [1, 1]} : vector<32x96xf32> to vector<32x8xf32>
      %375 = tpu.transpose %373, [1, 0] : vector<32x8xf32> -> vector<8x32xf32>
      %cst_192 = arith.constant dense<0.000000e+00> : vector<32x32xf32>
      %376 = tpu.matmul %372, %375, %cst_192 {dimension_numbers = #tpu.dot_dimension_numbers<[1], [0], [0], [1], [0, 0, 1, 1], [], []>} : vector<32x8xf32>, vector<8x32xf32>, vector<32x32xf32> -> vector<32x32xf32>
      %cst_193 = arith.constant 0.353553385 : f32
      %377 = vector.broadcast %cst_193 : f32 to vector<32x32xf32>
      %378 = arith.mulf %376, %377 : vector<32x32xf32>
      %379 = arith.addf %378, %182 : vector<32x32xf32>
      %cst_194 = arith.constant dense<0xFF800000> : vector<32xf32>
      %380 = vector.multi_reduction <maximumf>, %379, %cst_194 [1] : vector<32x32xf32> to vector<32xf32>
      %381 = vector.shape_cast %380 : vector<32xf32> to vector<32x1xf32>
      %382 = vector.broadcast %381 : vector<32x1xf32> to vector<32x32xf32>
      %383 = arith.subf %379, %382 : vector<32x32xf32>
      %384 = math.exp %383 : vector<32x32xf32>
      %cst_195 = arith.constant dense<0.000000e+00> : vector<32xf32>
      %385 = vector.multi_reduction <add>, %384, %cst_195 [1] : vector<32x32xf32> to vector<32xf32>
      %386 = vector.shape_cast %385 : vector<32xf32> to vector<32x1xf32>
      %387 = vector.broadcast %386 : vector<32x1xf32> to vector<32x32xf32>
      %388 = arith.divf %384, %387 : vector<32x32xf32>
      %cst_196 = arith.constant dense<0.000000e+00> : vector<32x8xf32>
      %389 = tpu.matmul %388, %374, %cst_196 {dimension_numbers = #tpu.dot_dimension_numbers<[1], [0], [0], [1], [0, 0, 1, 1], [], []>} : vector<32x32xf32>, vector<32x8xf32>, vector<32x8xf32> -> vector<32x8xf32>
      %390 = vector.extract_strided_slice %371 {offsets = [0, 8], sizes = [32, 8], strides = [1, 1]} : vector<32x96xf32> to vector<32x8xf32>
      %391 = vector.extract_strided_slice %371 {offsets = [0, 40], sizes = [32, 8], strides = [1, 1]} : vector<32x96xf32> to vector<32x8xf32>
      %392 = vector.extract_strided_slice %371 {offsets = [0, 72], sizes = [32, 8], strides = [1, 1]} : vector<32x96xf32> to vector<32x8xf32>
      %393 = tpu.transpose %391, [1, 0] : vector<32x8xf32> -> vector<8x32xf32>
      %cst_197 = arith.constant dense<0.000000e+00> : vector<32x32xf32>
      %394 = tpu.matmul %390, %393, %cst_197 {dimension_numbers = #tpu.dot_dimension_numbers<[1], [0], [0], [1], [0, 0, 1, 1], [], []>} : vector<32x8xf32>, vector<8x32xf32>, vector<32x32xf32> -> vector<32x32xf32>
      %cst_198 = arith.constant 0.353553385 : f32
      %395 = vector.broadcast %cst_198 : f32 to vector<32x32xf32>
      %396 = arith.mulf %394, %395 : vector<32x32xf32>
      %397 = arith.addf %396, %182 : vector<32x32xf32>
      %cst_199 = arith.constant dense<0xFF800000> : vector<32xf32>
      %398 = vector.multi_reduction <maximumf>, %397, %cst_199 [1] : vector<32x32xf32> to vector<32xf32>
      %399 = vector.shape_cast %398 : vector<32xf32> to vector<32x1xf32>
      %400 = vector.broadcast %399 : vector<32x1xf32> to vector<32x32xf32>
      %401 = arith.subf %397, %400 : vector<32x32xf32>
      %402 = math.exp %401 : vector<32x32xf32>
      %cst_200 = arith.constant dense<0.000000e+00> : vector<32xf32>
      %403 = vector.multi_reduction <add>, %402, %cst_200 [1] : vector<32x32xf32> to vector<32xf32>
      %404 = vector.shape_cast %403 : vector<32xf32> to vector<32x1xf32>
      %405 = vector.broadcast %404 : vector<32x1xf32> to vector<32x32xf32>
      %406 = arith.divf %402, %405 : vector<32x32xf32>
      %cst_201 = arith.constant dense<0.000000e+00> : vector<32x8xf32>
      %407 = tpu.matmul %406, %392, %cst_201 {dimension_numbers = #tpu.dot_dimension_numbers<[1], [0], [0], [1], [0, 0, 1, 1], [], []>} : vector<32x32xf32>, vector<32x8xf32>, vector<32x8xf32> -> vector<32x8xf32>
      %408 = vector.extract_strided_slice %371 {offsets = [0, 16], sizes = [32, 8], strides = [1, 1]} : vector<32x96xf32> to vector<32x8xf32>
      %409 = vector.extract_strided_slice %371 {offsets = [0, 48], sizes = [32, 8], strides = [1, 1]} : vector<32x96xf32> to vector<32x8xf32>
      %410 = vector.extract_strided_slice %371 {offsets = [0, 80], sizes = [32, 8], strides = [1, 1]} : vector<32x96xf32> to vector<32x8xf32>
      %411 = tpu.transpose %409, [1, 0] : vector<32x8xf32> -> vector<8x32xf32>
      %cst_202 = arith.constant dense<0.000000e+00> : vector<32x32xf32>
      %412 = tpu.matmul %408, %411, %cst_202 {dimension_numbers = #tpu.dot_dimension_numbers<[1], [0], [0], [1], [0, 0, 1, 1], [], []>} : vector<32x8xf32>, vector<8x32xf32>, vector<32x32xf32> -> vector<32x32xf32>
      %cst_203 = arith.constant 0.353553385 : f32
      %413 = vector.broadcast %cst_203 : f32 to vector<32x32xf32>
      %414 = arith.mulf %412, %413 : vector<32x32xf32>
      %415 = arith.addf %414, %182 : vector<32x32xf32>
      %cst_204 = arith.constant dense<0xFF800000> : vector<32xf32>
      %416 = vector.multi_reduction <maximumf>, %415, %cst_204 [1] : vector<32x32xf32> to vector<32xf32>
      %417 = vector.shape_cast %416 : vector<32xf32> to vector<32x1xf32>
      %418 = vector.broadcast %417 : vector<32x1xf32> to vector<32x32xf32>
      %419 = arith.subf %415, %418 : vector<32x32xf32>
      %420 = math.exp %419 : vector<32x32xf32>
      %cst_205 = arith.constant dense<0.000000e+00> : vector<32xf32>
      %421 = vector.multi_reduction <add>, %420, %cst_205 [1] : vector<32x32xf32> to vector<32xf32>
      %422 = vector.shape_cast %421 : vector<32xf32> to vector<32x1xf32>
      %423 = vector.broadcast %422 : vector<32x1xf32> to vector<32x32xf32>
      %424 = arith.divf %420, %423 : vector<32x32xf32>
      %cst_206 = arith.constant dense<0.000000e+00> : vector<32x8xf32>
      %425 = tpu.matmul %424, %410, %cst_206 {dimension_numbers = #tpu.dot_dimension_numbers<[1], [0], [0], [1], [0, 0, 1, 1], [], []>} : vector<32x32xf32>, vector<32x8xf32>, vector<32x8xf32> -> vector<32x8xf32>
      %426 = vector.extract_strided_slice %371 {offsets = [0, 24], sizes = [32, 8], strides = [1, 1]} : vector<32x96xf32> to vector<32x8xf32>
      %427 = vector.extract_strided_slice %371 {offsets = [0, 56], sizes = [32, 8], strides = [1, 1]} : vector<32x96xf32> to vector<32x8xf32>
      %428 = vector.extract_strided_slice %371 {offsets = [0, 88], sizes = [32, 8], strides = [1, 1]} : vector<32x96xf32> to vector<32x8xf32>
      %429 = tpu.transpose %427, [1, 0] : vector<32x8xf32> -> vector<8x32xf32>
      %cst_207 = arith.constant dense<0.000000e+00> : vector<32x32xf32>
      %430 = tpu.matmul %426, %429, %cst_207 {dimension_numbers = #tpu.dot_dimension_numbers<[1], [0], [0], [1], [0, 0, 1, 1], [], []>} : vector<32x8xf32>, vector<8x32xf32>, vector<32x32xf32> -> vector<32x32xf32>
      %cst_208 = arith.constant 0.353553385 : f32
      %431 = vector.broadcast %cst_208 : f32 to vector<32x32xf32>
      %432 = arith.mulf %430, %431 : vector<32x32xf32>
      %433 = arith.addf %432, %182 : vector<32x32xf32>
      %cst_209 = arith.constant dense<0xFF800000> : vector<32xf32>
      %434 = vector.multi_reduction <maximumf>, %433, %cst_209 [1] : vector<32x32xf32> to vector<32xf32>
      %435 = vector.shape_cast %434 : vector<32xf32> to vector<32x1xf32>
      %436 = vector.broadcast %435 : vector<32x1xf32> to vector<32x32xf32>
      %437 = arith.subf %433, %436 : vector<32x32xf32>
      %438 = math.exp %437 : vector<32x32xf32>
      %cst_210 = arith.constant dense<0.000000e+00> : vector<32xf32>
      %439 = vector.multi_reduction <add>, %438, %cst_210 [1] : vector<32x32xf32> to vector<32xf32>
      %440 = vector.shape_cast %439 : vector<32xf32> to vector<32x1xf32>
      %441 = vector.broadcast %440 : vector<32x1xf32> to vector<32x32xf32>
      %442 = arith.divf %438, %441 : vector<32x32xf32>
      %cst_211 = arith.constant dense<0.000000e+00> : vector<32x8xf32>
      %443 = tpu.matmul %442, %428, %cst_211 {dimension_numbers = #tpu.dot_dimension_numbers<[1], [0], [0], [1], [0, 0, 1, 1], [], []>} : vector<32x32xf32>, vector<32x8xf32>, vector<32x8xf32> -> vector<32x8xf32>
      %444 = tpu.concatenate %389, %407, %425, %443 in 1 : vector<32x8xf32>, vector<32x8xf32>, vector<32x8xf32>, vector<32x8xf32> -> vector<32x32xf32>
      %445 = arith.truncf %444 : vector<32x32xf32> to vector<32x32xbf16>
      %cst_212 = arith.constant dense<0.000000e+00> : vector<32x32xf32>
      %446 = tpu.matmul %445, %349, %cst_212 {dimension_numbers = #tpu.dot_dimension_numbers<[1], [0], [0], [1], [0, 0, 1, 1], [], []>} : vector<32x32xbf16>, vector<32x32xbf16>, vector<32x32xf32> -> vector<32x32xf32>
      %447 = vector.broadcast %351 : vector<1x32xf32> to vector<32x32xf32>
      %448 = arith.addf %446, %447 : vector<32x32xf32>
      %449 = arith.addf %343, %448 : vector<32x32xf32>
      %cst_213 = arith.constant dense<0.000000e+00> : vector<32xf32>
      %450 = vector.multi_reduction <add>, %449, %cst_213 [1] : vector<32x32xf32> to vector<32xf32>
      %451 = vector.shape_cast %450 : vector<32xf32> to vector<32x1xf32>
      %cst_214 = arith.constant 3.200000e+01 : f32
      %452 = vector.broadcast %cst_214 : f32 to vector<32x1xf32>
      %453 = arith.divf %451, %452 : vector<32x1xf32>
      %454 = vector.broadcast %453 : vector<32x1xf32> to vector<32x32xf32>
      %455 = arith.subf %449, %454 : vector<32x32xf32>
      %456 = arith.mulf %455, %455 : vector<32x32xf32>
      %cst_215 = arith.constant dense<0.000000e+00> : vector<32xf32>
      %457 = vector.multi_reduction <add>, %456, %cst_215 [1] : vector<32x32xf32> to vector<32xf32>
      %458 = vector.shape_cast %457 : vector<32xf32> to vector<32x1xf32>
      %cst_216 = arith.constant 3.200000e+01 : f32
      %459 = vector.broadcast %cst_216 : f32 to vector<32x1xf32>
      %460 = arith.divf %458, %459 : vector<32x1xf32>
      %461 = vector.broadcast %453 : vector<32x1xf32> to vector<32x32xf32>
      %462 = arith.subf %449, %461 : vector<32x32xf32>
      %cst_217 = arith.constant 9.99999974E-6 : f32
      %463 = vector.broadcast %cst_217 : f32 to vector<32x1xf32>
      %464 = arith.addf %460, %463 : vector<32x1xf32>
      %465 = math.rsqrt %464 : vector<32x1xf32>
      %466 = vector.broadcast %465 : vector<32x1xf32> to vector<32x32xf32>
      %467 = arith.mulf %462, %466 : vector<32x32xf32>
      %468 = vector.broadcast %353 : vector<1x32xf32> to vector<32x32xf32>
      %469 = arith.mulf %467, %468 : vector<32x32xf32>
      %470 = vector.broadcast %355 : vector<1x32xf32> to vector<32x32xf32>
      %471 = arith.addf %469, %470 : vector<32x32xf32>
      %472 = arith.truncf %471 : vector<32x32xf32> to vector<32x32xbf16>
      %cst_218 = arith.constant dense<0.000000e+00> : vector<32x64xf32>
      %473 = tpu.matmul %472, %357, %cst_218 {dimension_numbers = #tpu.dot_dimension_numbers<[1], [0], [0], [1], [0, 0, 1, 1], [], []>} : vector<32x32xbf16>, vector<32x64xbf16>, vector<32x64xf32> -> vector<32x64xf32>
      %474 = vector.broadcast %359 : vector<1x64xf32> to vector<32x64xf32>
      %475 = arith.addf %473, %474 : vector<32x64xf32>
      %cst_219 = arith.constant 0.000000e+00 : f32
      %476 = vector.broadcast %cst_219 : f32 to vector<32x64xf32>
      %477 = arith.maximumf %475, %476 : vector<32x64xf32>
      %478 = arith.truncf %477 : vector<32x64xf32> to vector<32x64xbf16>
      %cst_220 = arith.constant dense<0.000000e+00> : vector<32x32xf32>
      %479 = tpu.matmul %478, %361, %cst_220 {dimension_numbers = #tpu.dot_dimension_numbers<[1], [0], [0], [1], [0, 0, 1, 1], [], []>} : vector<32x64xbf16>, vector<64x32xbf16>, vector<32x32xf32> -> vector<32x32xf32>
      %480 = vector.broadcast %363 : vector<1x32xf32> to vector<32x32xf32>
      %481 = arith.addf %479, %480 : vector<32x32xf32>
      %482 = arith.addf %471, %481 : vector<32x32xf32>
      %cst_221 = arith.constant dense<0.000000e+00> : vector<32xf32>
      %483 = vector.multi_reduction <add>, %482, %cst_221 [1] : vector<32x32xf32> to vector<32xf32>
      %484 = vector.shape_cast %483 : vector<32xf32> to vector<32x1xf32>
      %cst_222 = arith.constant 3.200000e+01 : f32
      %485 = vector.broadcast %cst_222 : f32 to vector<32x1xf32>
      %486 = arith.divf %484, %485 : vector<32x1xf32>
      %487 = vector.broadcast %486 : vector<32x1xf32> to vector<32x32xf32>
      %488 = arith.subf %482, %487 : vector<32x32xf32>
      %489 = arith.mulf %488, %488 : vector<32x32xf32>
      %cst_223 = arith.constant dense<0.000000e+00> : vector<32xf32>
      %490 = vector.multi_reduction <add>, %489, %cst_223 [1] : vector<32x32xf32> to vector<32xf32>
      %491 = vector.shape_cast %490 : vector<32xf32> to vector<32x1xf32>
      %cst_224 = arith.constant 3.200000e+01 : f32
      %492 = vector.broadcast %cst_224 : f32 to vector<32x1xf32>
      %493 = arith.divf %491, %492 : vector<32x1xf32>
      %494 = vector.broadcast %486 : vector<32x1xf32> to vector<32x32xf32>
      %495 = arith.subf %482, %494 : vector<32x32xf32>
      %cst_225 = arith.constant 9.99999974E-6 : f32
      %496 = vector.broadcast %cst_225 : f32 to vector<32x1xf32>
      %497 = arith.addf %493, %496 : vector<32x1xf32>
      %498 = math.rsqrt %497 : vector<32x1xf32>
      %499 = vector.broadcast %498 : vector<32x1xf32> to vector<32x32xf32>
      %500 = arith.mulf %495, %499 : vector<32x32xf32>
      %501 = vector.broadcast %365 : vector<1x32xf32> to vector<32x32xf32>
      %502 = arith.mulf %500, %501 : vector<32x32xf32>
      %503 = vector.broadcast %367 : vector<1x32xf32> to vector<32x32xf32>
      %504 = arith.addf %502, %503 : vector<32x32xf32>
      %cst_226 = arith.constant dense<0.000000e+00> : vector<32xf32>
      %505 = vector.multi_reduction <add>, %504, %cst_226 [0] : vector<32x32xf32> to vector<32xf32>
      %506 = vector.shape_cast %505 : vector<32xf32> to vector<1x32xf32>
      %cst_227 = arith.constant 3.200000e+01 : f32
      %507 = vector.broadcast %cst_227 : f32 to vector<1x32xf32>
      %508 = arith.divf %506, %507 : vector<1x32xf32>
      %c0_228 = arith.constant 0 : index
      %c0_229 = arith.constant 0 : index
      %509 = vector.load %arg26[%c0_228, %c0_229] : memref<1x32xf32, #tpu.memory_space<vmem>>, vector<1x32xf32>
      %c0_230 = arith.constant 0 : index
      %c0_231 = arith.constant 0 : index
      %510 = vector.load %arg27[%c0_230, %c0_231] : memref<1x32xf32, #tpu.memory_space<vmem>>, vector<1x32xf32>
      %cst_232 = arith.constant dense<0.000000e+00> : vector<1xf32>
      %511 = vector.multi_reduction <add>, %508, %cst_232 [1] : vector<1x32xf32> to vector<1xf32>
      %512 = vector.shape_cast %511 : vector<1xf32> to vector<1x1xf32>
      %cst_233 = arith.constant 3.200000e+01 : f32
      %513 = vector.broadcast %cst_233 : f32 to vector<1x1xf32>
      %514 = arith.divf %512, %513 : vector<1x1xf32>
      %515 = vector.broadcast %514 : vector<1x1xf32> to vector<1x32xf32>
      %516 = arith.subf %508, %515 : vector<1x32xf32>
      %517 = arith.mulf %516, %516 : vector<1x32xf32>
      %cst_234 = arith.constant dense<0.000000e+00> : vector<1xf32>
      %518 = vector.multi_reduction <add>, %517, %cst_234 [1] : vector<1x32xf32> to vector<1xf32>
      %519 = vector.shape_cast %518 : vector<1xf32> to vector<1x1xf32>
      %cst_235 = arith.constant 3.200000e+01 : f32
      %520 = vector.broadcast %cst_235 : f32 to vector<1x1xf32>
      %521 = arith.divf %519, %520 : vector<1x1xf32>
      %522 = vector.broadcast %514 : vector<1x1xf32> to vector<1x32xf32>
      %523 = arith.subf %508, %522 : vector<1x32xf32>
      %cst_236 = arith.constant 9.99999974E-6 : f32
      %524 = vector.broadcast %cst_236 : f32 to vector<1x1xf32>
      %525 = arith.addf %521, %524 : vector<1x1xf32>
      %526 = math.rsqrt %525 : vector<1x1xf32>
      %527 = vector.broadcast %526 : vector<1x1xf32> to vector<1x32xf32>
      %528 = arith.mulf %523, %527 : vector<1x32xf32>
      %529 = arith.mulf %528, %509 : vector<1x32xf32>
      %530 = arith.addf %529, %510 : vector<1x32xf32>
      %c0_237 = arith.constant 0 : index
      %c0_238 = arith.constant 0 : index
      %531 = vector.load %arg28[%c0_237, %c0_238] : memref<32x10xf32, #tpu.memory_space<vmem>>, vector<32x10xf32>
      %cst_239 = arith.constant dense<0.000000e+00> : vector<1x10xf32>
      %532 = tpu.matmul %530, %531, %cst_239 {dimension_numbers = #tpu.dot_dimension_numbers<[1], [0], [0], [1], [0, 0, 1, 1], [], []>} : vector<1x32xf32>, vector<32x10xf32>, vector<1x10xf32> -> vector<1x10xf32>
      %c0_240 = arith.constant 0 : index
      %c0_241 = arith.constant 0 : index
      %533 = vector.load %arg29[%c0_240, %c0_241] : memref<1x10xf32, #tpu.memory_space<vmem>>, vector<1x10xf32>
      %534 = arith.addf %532, %533 : vector<1x10xf32>
      %c0_242 = arith.constant 0 : index
      %c0_243 = arith.constant 0 : index
      %c0_244 = arith.constant 0 : index
      %535 = vector.load %arg30[%c0_242, %c0_243, %c0_244] : memref<1x1x10xf32, #tpu.memory_space<vmem>>, vector<1x1x10xf32>
      %536 = vector.shape_cast %535 : vector<1x1x10xf32> to vector<1x10xf32>
      %537 = vector.shape_cast %534 : vector<1x10xf32> to vector<1x1x10xf32>
      tpu.vector_store %arg30[%c0_242, %c0_243, %c0_244], %537 {strides = array<i32>} : memref<1x1x10xf32, #tpu.memory_space<vmem>>, vector<1x1x10xf32>,
    } else {
    }
    return
  }
  func.func @transform_0(%arg0: i32, %arg1: i32) -> (i32, i32, i32, i32) {
    %c0_i32 = arith.constant 0 : i32
    %c0_i32_0 = arith.constant 0 : i32
    %c0_i32_1 = arith.constant 0 : i32
    return %arg0, %arg1, %c0_i32, %c0_i32_0 : i32, i32, i32, i32
  }
  func.func @transform_1(%arg0: i32, %arg1: i32) -> (i32, i32, i32) {
    %c0_i32 = arith.constant 0 : i32
    %c0_i32_0 = arith.constant 0 : i32
    %c0_i32_1 = arith.constant 0 : i32
    %c0_i32_2 = arith.constant 0 : i32
    return %c0_i32, %c0_i32_0, %c0_i32_1 : i32, i32, i32
  }
  func.func @transform_2(%arg0: i32, %arg1: i32) -> (i32, i32) {
    %c0_i32 = arith.constant 0 : i32
    %c0_i32_0 = arith.constant 0 : i32
    %c0_i32_1 = arith.constant 0 : i32
    return %c0_i32, %c0_i32_0 : i32, i32
  }
  func.func @transform_3(%arg0: i32, %arg1: i32) -> (i32, i32) {
    %c0_i32 = arith.constant 0 : i32
    %c0_i32_0 = arith.constant 0 : i32
    %c0_i32_1 = arith.constant 0 : i32
    return %c0_i32, %c0_i32_0 : i32, i32
  }
  func.func @transform_4(%arg0: i32, %arg1: i32) -> (i32, i32) {
    %c0_i32 = arith.constant 0 : i32
    %c0_i32_0 = arith.constant 0 : i32
    %c0_i32_1 = arith.constant 0 : i32
    return %c0_i32, %c0_i32_0 : i32, i32
  }
  func.func @transform_5(%arg0: i32, %arg1: i32) -> (i32, i32) {
    %c0_i32 = arith.constant 0 : i32
    %c0_i32_0 = arith.constant 0 : i32
    %c0_i32_1 = arith.constant 0 : i32
    return %c0_i32, %c0_i32_0 : i32, i32
  }
  func.func @transform_6(%arg0: i32, %arg1: i32) -> (i32, i32) {
    %c0_i32 = arith.constant 0 : i32
    %c0_i32_0 = arith.constant 0 : i32
    %c0_i32_1 = arith.constant 0 : i32
    return %c0_i32, %c0_i32_0 : i32, i32
  }
  func.func @transform_7(%arg0: i32, %arg1: i32) -> (i32, i32) {
    %c0_i32 = arith.constant 0 : i32
    %c0_i32_0 = arith.constant 0 : i32
    %c0_i32_1 = arith.constant 0 : i32
    return %c0_i32, %c0_i32_0 : i32, i32
  }
  func.func @transform_8(%arg0: i32, %arg1: i32) -> (i32, i32) {
    %c0_i32 = arith.constant 0 : i32
    %c0_i32_0 = arith.constant 0 : i32
    %c0_i32_1 = arith.constant 0 : i32
    return %c0_i32, %c0_i32_0 : i32, i32
  }
  func.func @transform_9(%arg0: i32, %arg1: i32) -> (i32, i32) {
    %c0_i32 = arith.constant 0 : i32
    %c0_i32_0 = arith.constant 0 : i32
    %c0_i32_1 = arith.constant 0 : i32
    return %c0_i32, %c0_i32_0 : i32, i32
  }
  func.func @transform_10(%arg0: i32, %arg1: i32) -> (i32, i32) {
    %c0_i32 = arith.constant 0 : i32
    %c0_i32_0 = arith.constant 0 : i32
    %c0_i32_1 = arith.constant 0 : i32
    return %c0_i32, %c0_i32_0 : i32, i32
  }
  func.func @transform_11(%arg0: i32, %arg1: i32) -> (i32, i32) {
    %c0_i32 = arith.constant 0 : i32
    %c0_i32_0 = arith.constant 0 : i32
    %c0_i32_1 = arith.constant 0 : i32
    return %c0_i32, %c0_i32_0 : i32, i32
  }
  func.func @transform_12(%arg0: i32, %arg1: i32) -> (i32, i32, i32) {
    %c0_i32 = arith.constant 0 : i32
    %c0_i32_0 = arith.constant 0 : i32
    %c0_i32_1 = arith.constant 0 : i32
    %c0_i32_2 = arith.constant 0 : i32
    return %c0_i32, %c0_i32_0, %c0_i32_1 : i32, i32, i32
  }
  func.func @transform_13(%arg0: i32, %arg1: i32) -> (i32, i32, i32) {
    %c0_i32 = arith.constant 0 : i32
    %c0_i32_0 = arith.constant 0 : i32
    %c0_i32_1 = arith.constant 0 : i32
    %c0_i32_2 = arith.constant 0 : i32
    return %c0_i32, %c0_i32_0, %c0_i32_1 : i32, i32, i32
  }
  func.func @transform_14(%arg0: i32, %arg1: i32) -> (i32, i32, i32) {
    %c0_i32 = arith.constant 0 : i32
    %c0_i32_0 = arith.constant 0 : i32
    %c0_i32_1 = arith.constant 0 : i32
    %c0_i32_2 = arith.constant 0 : i32
    return %c0_i32, %c0_i32_0, %c0_i32_1 : i32, i32, i32
  }
  func.func @transform_15(%arg0: i32, %arg1: i32) -> (i32, i32, i32) {
    %c0_i32 = arith.constant 0 : i32
    %c0_i32_0 = arith.constant 0 : i32
    %c0_i32_1 = arith.constant 0 : i32
    %c0_i32_2 = arith.constant 0 : i32
    return %c0_i32, %c0_i32_0, %c0_i32_1 : i32, i32, i32
  }
  func.func @transform_16(%arg0: i32, %arg1: i32) -> (i32, i32, i32) {
    %c0_i32 = arith.constant 0 : i32
    %c0_i32_0 = arith.constant 0 : i32
    %c0_i32_1 = arith.constant 0 : i32
    %c0_i32_2 = arith.constant 0 : i32
    return %c0_i32, %c0_i32_0, %c0_i32_1 : i32, i32, i32
  }
  func.func @transform_17(%arg0: i32, %arg1: i32) -> (i32, i32, i32) {
    %c0_i32 = arith.constant 0 : i32
    %c0_i32_0 = arith.constant 0 : i32
    %c0_i32_1 = arith.constant 0 : i32
    %c0_i32_2 = arith.constant 0 : i32
    return %c0_i32, %c0_i32_0, %c0_i32_1 : i32, i32, i32
  }
  func.func @transform_18(%arg0: i32, %arg1: i32) -> (i32, i32, i32) {
    %c0_i32 = arith.constant 0 : i32
    %c0_i32_0 = arith.constant 0 : i32
    %c0_i32_1 = arith.constant 0 : i32
    %c0_i32_2 = arith.constant 0 : i32
    return %c0_i32, %c0_i32_0, %c0_i32_1 : i32, i32, i32
  }
  func.func @transform_19(%arg0: i32, %arg1: i32) -> (i32, i32, i32) {
    %c0_i32 = arith.constant 0 : i32
    %c0_i32_0 = arith.constant 0 : i32
    %c0_i32_1 = arith.constant 0 : i32
    %c0_i32_2 = arith.constant 0 : i32
    return %c0_i32, %c0_i32_0, %c0_i32_1 : i32, i32, i32
  }
  func.func @transform_20(%arg0: i32, %arg1: i32) -> (i32, i32, i32) {
    %c0_i32 = arith.constant 0 : i32
    %c0_i32_0 = arith.constant 0 : i32
    %c0_i32_1 = arith.constant 0 : i32
    %c0_i32_2 = arith.constant 0 : i32
    return %c0_i32, %c0_i32_0, %c0_i32_1 : i32, i32, i32
  }
  func.func @transform_21(%arg0: i32, %arg1: i32) -> (i32, i32, i32) {
    %c0_i32 = arith.constant 0 : i32
    %c0_i32_0 = arith.constant 0 : i32
    %c0_i32_1 = arith.constant 0 : i32
    %c0_i32_2 = arith.constant 0 : i32
    return %c0_i32, %c0_i32_0, %c0_i32_1 : i32, i32, i32
  }
  func.func @transform_22(%arg0: i32, %arg1: i32) -> (i32, i32, i32) {
    %c0_i32 = arith.constant 0 : i32
    %c0_i32_0 = arith.constant 0 : i32
    %c0_i32_1 = arith.constant 0 : i32
    %c0_i32_2 = arith.constant 0 : i32
    return %c0_i32, %c0_i32_0, %c0_i32_1 : i32, i32, i32
  }
  func.func @transform_23(%arg0: i32, %arg1: i32) -> (i32, i32, i32) {
    %c0_i32 = arith.constant 0 : i32
    %c0_i32_0 = arith.constant 0 : i32
    %c0_i32_1 = arith.constant 0 : i32
    %c0_i32_2 = arith.constant 0 : i32
    return %c0_i32, %c0_i32_0, %c0_i32_1 : i32, i32, i32
  }
  func.func @transform_24(%arg0: i32, %arg1: i32) -> (i32, i32) {
    %c0_i32 = arith.constant 0 : i32
    %c0_i32_0 = arith.constant 0 : i32
    %c0_i32_1 = arith.constant 0 : i32
    return %c0_i32, %c0_i32_0 : i32, i32
  }
  func.func @transform_25(%arg0: i32, %arg1: i32) -> (i32, i32) {
    %c0_i32 = arith.constant 0 : i32
    %c0_i32_0 = arith.constant 0 : i32
    %c0_i32_1 = arith.constant 0 : i32
    return %c0_i32, %c0_i32_0 : i32, i32
  }
  func.func @transform_26(%arg0: i32, %arg1: i32) -> (i32, i32) {
    %c0_i32 = arith.constant 0 : i32
    %c0_i32_0 = arith.constant 0 : i32
    %c0_i32_1 = arith.constant 0 : i32
    return %c0_i32, %c0_i32_0 : i32, i32
  }
  func.func @transform_27(%arg0: i32, %arg1: i32) -> (i32, i32) {
    %c0_i32 = arith.constant 0 : i32
    %c0_i32_0 = arith.constant 0 : i32
    %c0_i32_1 = arith.constant 0 : i32
    return %c0_i32, %c0_i32_0 : i32, i32
  }
  func.func @transform_28(%arg0: i32, %arg1: i32) -> (i32, i32, i32) {
    %c0_i32 = arith.constant 0 : i32
    %c0_i32_0 = arith.constant 0 : i32
    %c0_i32_1 = arith.constant 0 : i32
    return %arg0, %c0_i32, %c0_i32_0 : i32, i32, i32
  }
}

</mosaic_0001>

<bundles_post_ra>
// kernel: tpu_custom_call.1
= control target key start
LH: loop header
LB: loop body
LE: loop exit
PB: predicated region body
PF: predicated region fallthrough
CT: control target
= control target key end

     0   :  { %s13358_s0 = inlined_call_operand.vmem [shape: bf16[2,32,18,72], index: 0, kind: input, shape index: {}]   ;;  %s13359_s1 = inlined_call_operand.vmem [shape: bf16[9,64,256], index: 1, kind: input, shape index: {}]   ;;  %s13360_s2 = inlined_call_operand.vmem [shape: f32[1,256], index: 2, kind: input, shape index: {}]   ;;  %s13361_s3 = inlined_call_operand.vmem [shape: bf16[256,16], index: 3, kind: input, shape index: {}]   ;;  %s13362_s4 = inlined_call_operand.vmem [shape: bf16[16,32], index: 4, kind: input, shape index: {}]   ;;  %s13363_s5 = inlined_call_operand.vmem [shape: f32[1,32], index: 5, kind: input, shape index: {}]   ;;  %s13364_s6 = inlined_call_operand.vmem [shape: f32[32,32], index: 6, kind: input, shape index: {}]   ;;  %s13365_s7 = inlined_call_operand.vmem [shape: f32[32,32], index: 7, kind: input, shape index: {}]   ;;  %s13366_s8 = inlined_call_operand.vmem [shape: bf16[32,96], index: 8, kind: input, shape index: {}]   ;;  %s13367_s9 = inlined_call_operand.vmem [shape: f32[1,96], index: 9, kind: input, shape index: {}]   ;;  %s13368_s10 = inlined_call_operand.vmem [shape: bf16[32,32], index: 10, kind: input, shape index: {}]   ;;  %s13369_s11 = inlined_call_operand.vmem [shape: f32[1,32], index: 11, kind: input, shape index: {}]   ;;  %s13370_s12 = inlined_call_operand.vmem [shape: bf16[2,32,96], index: 12, kind: input, shape index: {}]   ;;  %s13371_s13 = inlined_call_operand.vmem [shape: f32[2,1,96], index: 13, kind: input, shape index: {}]   ;;  %s13372_s14 = inlined_call_operand.vmem [shape: bf16[2,32,32], index: 14, kind: input, shape index: {}]   ;;  %s13373_s15 = inlined_call_operand.vmem [shape: f32[2,1,32], index: 15, kind: input, shape index: {}]   ;;  %s13374_s16 = inlined_call_operand.vmem [shape: f32[2,1,32], index: 16, kind: input, shape index: {}]   ;;  %s13375_s17 = inlined_call_operand.vmem [shape: f32[2,1,32], index: 17, kind: input, shape index: {}]   ;;  %s13376_s18 = inlined_call_operand.vmem [shape: bf16[2,32,64], index: 18, kind: input, shape index: {}]   ;;  %s13377_s19 = inlined_call_operand.vmem [shape: f32[2,1,64], index: 19, kind: input, shape index: {}]   ;;  %s13378_s20 = inlined_call_operand.vmem [shape: bf16[2,64,32], index: 20, kind: input, shape index: {}]   ;;  %s13379_s21 = inlined_call_operand.vmem [shape: f32[2,1,32], index: 21, kind: input, shape index: {}]   ;;  %s13380_s22 = inlined_call_operand.vmem [shape: f32[2,1,32], index: 22, kind: input, shape index: {}]   ;;  %s13381_s23 = inlined_call_operand.vmem [shape: f32[2,1,32], index: 23, kind: input, shape index: {}]   ;;  %s13382_s24 = inlined_call_operand.vmem [shape: f32[1,32], index: 24, kind: input, shape index: {}]   ;;  %s13383_s25 = inlined_call_operand.vmem [shape: f32[1,32], index: 25, kind: input, shape index: {}]   ;;  %s13384_s26 = inlined_call_operand.vmem [shape: f32[32,10], index: 26, kind: input, shape index: {}]   ;;  %s13385_s27 = inlined_call_operand.vmem [shape: f32[1,10], index: 27, kind: input, shape index: {}]   ;;  %s13386_s28 = inlined_call_operand.hbm [shape: f32[2,1,10], index: 28, kind: output, shape index: {}]  }
   0x1   :  { %13442 = sst [smem:[#allocation19_spill]] %s13358_s0 }
   0x2   :  { %13443 = sst [smem:[#allocation20_spill]] %s13359_s1 }
   0x3   :  { %13444 = sst [smem:[#allocation21_spill]] %s13360_s2 }
   0x4   :  { %13445 = sst [smem:[#allocation22_spill]] %s13361_s3 }
   0x5   :  { %13446 = sst [smem:[#allocation23_spill]] %s13362_s4 }
   0x6   :  { %13447 = sst [smem:[#allocation24_spill]] %s13363_s5 }
   0x7   :  { %13448 = sst [smem:[#allocation25_spill]] %s13364_s6 }
   0x8   :  { %13449 = sst [smem:[#allocation26_spill]] %s13365_s7 }
   0x9   :  { %13450 = sst [smem:[#allocation27_spill]] %s13366_s8 }
   0xa   :  { %13451 = sst [smem:[#allocation28_spill]] %s13367_s9 }
   0xb   :  { %13452 = sst [smem:[#allocation29_spill]] %s13368_s10 }
   0xc   :  { %13453 = sst [smem:[#allocation30_spill]] %s13369_s11 }
   0xd   :  { %13454 = sst [smem:[#allocation31_spill]] %s13370_s12 }
   0xe   :  { %13455 = sst [smem:[#allocation32_spill]] %s13373_s15 }
   0xf   :  { %13456 = sst [smem:[#allocation33_spill]] %s13382_s24 }
  0x10   :  { %13457 = sst [smem:[#allocation34_spill]] %s13383_s25 }
  0x11   :  { %13458 = sst [smem:[#allocation35_spill]] %s13384_s26 }
  0x12   :  { %13459 = sst [smem:[#allocation36_spill]] %s13385_s27 }
  0x13   :  { %13460 = sst [smem:[#allocation37_spill]] %s13386_s28 }
  0x14   :  { %33 = vsyncpa [#allocation4], 0 }
  0x15   :  { %35 = vsyncpa [#allocation4 + $0x1], 0  ;;  %s11307_s8 = smov 0   ;;  %s11309_s5 = smov 0  }
  0x16   :  { %s11311_s9 = smov 0   ;;  %s11313_s30 = smov 0  }
  0x17   :  { %s11315_s3 = smov 0   ;;  %s11317_s6 = smov 0  }
  0x18   :  { %s11319_s10 = smov 0   ;;  %s11321_s0 = smov 0  }
  0x19 LB: > { %13461 = sst [smem:[#allocation6_spill]] %s11111_s8  ;;  %s8493_s11 = sadd.s32 4294967295, %s11139_s0   ;;  %s11139_s0 = sphi %s11321_s0, %s41_s0   ;;  %s11135_s10 = sphi %s11319_s10, %s13533_s10   ;;  %s11131_s6 = sphi %s11317_s6, %s13532_s6   ;;  %s11127_s3 = sphi %s11315_s3, %s13531_s3   ;;  %s11123_s30 = sphi %s11313_s30, %s13530_s30   ;;  %s11119_s9 = sphi %s11311_s9, %s13529_s9   ;;  %s11115_s5 = sphi %s11309_s5, %s13528_s5   ;;  %s11111_s8 = sphi %s11307_s8, %s13527_s8  }
  0x1a   : > { %13462 = sst [smem:[#allocation7_spill]] %s11115_s5  ;;  %s8494_s29 = sadd.s32 4294967294, %s11139_s0  }
  0x1b   : > { %13463 = sst [smem:[#allocation8_spill]] %s11119_s9  ;;  %s50_s2 = sadd.s32 1, %s11131_s6 }
  0x1c   : > { %13464 = sst [smem:[#allocation9_spill]] %s11127_s3  ;;  %p51_p0 = scmp.ge.s32.totalorder %s50_s2, 4 }
  0x1d   : > { %13465 = sst [smem:[#allocation10_spill]] %s11131_s6  ;;  %s53_s7 = sadd.s32 1, %s11135_s10 }
  0x1e   : > { %13466 = sst [smem:[#allocation11_spill]] %s11135_s10  ;;  %p665_p1 = scmp.ne.s32.totalorder %s11119_s9, %s11115_s5 }
  0x1f   : > { %13467 = sst [smem:[#allocation12_spill]] %s11139_s0  ;;  %p666_p2 = scmp.eq.s32.totalorder %s8493_s11, 7 }
  0x20   : > { %s13535_s2 = smov (%p51_p0, %s50_s2), 0  ;;  %s13537_s7 = smov (!%p51_p0, %s53_s7), %s11135_s10 }
  0x21   : > { %13468 = sst [smem:[#allocation13_spill]] %s13535_s2  ;;  %p11356_p3 = por %p666_p2, %p665_p1 }
  0x22   : > { %p671_p4 = scmp.ne.s32.totalorder %s11115_s5, %s11111_s8  ;;  %p55_p5 = scmp.ge.s32.totalorder %s13537_s7, 2 }
  0x23   : > { %s13469_s12 = scalar_select %p11356_p3, 1, 0 }
  0x24   : > { %p672_p6 = scmp.eq.s32.totalorder %s8494_s29, 7  ;;  %p8497_p7 = scmp.ge.s32.totalorder %s11139_s0, 1 }
  0x25   : > { %13470 = sst [smem:[#allocation14_spill]] %s13469_s12  ;;  %p785_p8 = scmp.lt.s32.totalorder %s11139_s0, 9 }
  0x26   : > { %s13539_s7 = smov (%p55_p5, %s13537_s7), 0  ;;  %p11366_p9 = por %p672_p6, %p671_p4 }
  0x27   : > { %13471 = sst [smem:[#allocation15_spill]] %s13539_s7  ;;  %p786_p10 = pnand %p8497_p7, %p785_p8 }
  0x28   : > { %s13472_s1 = scalar_select %p11366_p9, 1, 0 }
  0x29   : > { %s652_s4 = ssub.s32 %s11135_s10, %s13539_s7  ;;  %s655_s11 = sadd.s32 1, %s11119_s9 }
  0x2a   : > { %13473 = sst [smem:[#allocation16_spill]] %s13472_s1  ;;  %p653_p11 = scmp.eq.s32.totalorder %s652_s4, 0 }
  0x2b   : > { %789 = sbr.rel (%p786_p10) target bundleno = 13544 (0x34e8), region = 132 }
  0x2c   : > { %s11374_s2 = scalar_select %p653_p11, %s11119_s9, %s655_s11  }
  0x2e   : > { %13474 = sst [smem:[#allocation17_spill]] %s11374_s2 }
  0x32   : > { %s11377_s29 = sshll.u32 %s11123_s30, 3  ;;  %p864_p12 = scmp.lt.s32.totalorder %s11127_s3, 1  ;;  %v11141_v4 = vmov 0   ;;  %vm1585_vm0 = vcmask 1046528   ;;  %vm2344_vm1 = vcmask 1045504   ;;  %vm1012_vm2 = vcmask 523264  }
  0x33   : > { %p866_p13 = scmp.lt.s32.totalorder %s11377_s29, 31  ;;  %s13475_s0 = sld [smem:[#allocation20_spill]]  ;;  %1997 = vmatprep.mubr.bf16.mxu0 %v11141_v4  ;;  %1069 = vmatprep.mubr.bf16.mxu1 %v11141_v4  ;;  %vm3420_vm3 = vcmask 130048   ;;  %vm3510_vm4 = vcmask 1041409   ;;  %vm3512_vm5 = vcmask 1042434   ;;  %vm3514_vm6 = vcmask 1043459  }
  0x34   : > { %s865_s4 = scalar_select %p864_p12, %s11127_s3, 1  ;;  %vm3516_vm7 = vcmask 1044484   ;;  %vm3518_vm8 = vcmask 1045509   ;;  %vm3520_vm9 = vcmask 1046534   ;;  %vm3522_vm10 = vcmask 1047559  }
  0x35   : > { %s867_s2 = scalar_select %p866_p13, %s11377_s29, 31 }
  0x36   : > { %s10228_s9 = smul.u32 96, %s865_s4  ;;  %s13406_s1 = sand.u32 1, %s11115_s5  }
  0x37   : > { %s10227_s8 = smul.u32 3, %s867_s2  ;;  %s13477_s10 = sld [smem:[#allocation19_spill]] }
  0x38   : > { %s13478_s27 = sld [smem:[#allocation22_spill]]  ;;  %s13479_s3 = sld [smem:[#allocation21_spill]] }
  0x39   : > { %s13476_s28 = smov %s13475_s0  ;;  %v10328_v0 = vld [vmem:[%s13475_s0 + $0x104] ss:$8 sps:$4 sm:$0xff]   ;;  %s870_s4 = sadd.s32 %s10228_s9, %s10227_s8 }
  0x3a   : > { %v10330_v1 = vld [vmem:[%s13476_s28 + $0x100] ss:$8 sps:$4 sm:$0xff]   ;;  %v10331_v2 = vld [vmem:[%s13476_s28 + $0x114] ss:$8 sps:$4 sm:$0xff]   ;;  %1965 = vmatprep.subr.bf16.mxu0 %v10328_v0  ;;  %v10333_v3 = vld [vmem:[%s13476_s28 + $0x110] ss:$8 sps:$4 sm:$0xff]  }
  0x3b   : > { %1966 = vmatpush1.bf16.msra.mxu0 %v10330_v1  ;;  %v10334_v5 = vld [vmem:[%s13476_s28 + $0x124] ss:$8 sps:$4 sm:$0xff]   ;;  %v10336_v6 = vld [vmem:[%s13476_s28 + $0x120] ss:$8 sps:$4 sm:$0xff]   ;;  %v10337_v7 = vld [vmem:[%s13476_s28 + $0x134] ss:$8 sps:$4 sm:$0xff]  }
  0x3c   : > { %1967 = vmatprep.subr.bf16.mxu0 %v10331_v2  ;;  %v10343_v8 = vld [vmem:[%s13476_s28 + $0x44] ss:$8 sps:$4 sm:$0xff]   ;;  %s8499_s2 = sshll.u32 %s870_s4, 2  ;;  %v10345_v9 = vld [vmem:[%s13476_s28 + $0x40] ss:$8 sps:$4 sm:$0xff]   ;;  %s3526_s8 = scalar_lea.vmem [#allocation2], %s11377_s29 }
  0x3d   : > { %s11416_s7 = scalar_lea.vmem %s13477_s10, %s8499_s2  ;;  %1037 = vmatprep.subr.bf16.mxu1 %v10343_v8  ;;  %v10346_v10 = vld [vmem:[%s13476_s28 + $0x54] ss:$8 sps:$4 sm:$0xff]   ;;  %v10348_v11 = vld [vmem:[%s13476_s28 + $0x50] ss:$8 sps:$4 sm:$0xff]   ;;  %v10342_v32 = vld [vmem:[%s13476_s28 + $0x144] ss:$8 sps:$4 sm:$0xff]  }
  0x3e   : > { %v11425_v12 = vld [vmem:[%s11416_s7] sm:$0xff]   ;;  %v11428_v13 = vld [vmem:[%s11416_s7 + $0x8] sm:$0x1]  ;;  %v11431_v14 = vld [vmem:[%s11416_s7 + $0xc] sm:$0xff]   ;;  %1038 = vmatpush1.bf16.msra.mxu1 %v10345_v9  ;;  %s11142_s10 = smov 124   ;;  %s12280_s4 = scalar_lea.vmem [#allocation3], %s13406_s1 }
  0x3f   : > { %1968 = vmatpush1.bf16.msra.mxu0 %v10333_v3  ;;  %v899_v15 = vunpack.c.l.bf16 %v11425_v12  ;;  %v900_v16 = vunpack.c.h.bf16 %v11425_v12  ;;  %v901_v17 = vunpack.c.l.bf16 %v11428_v13  ;;  %v11437_v18 = vld [vmem:[%s11416_s7 + $0x14] sm:$0x1]  ;;  %v902_v19 = vunpack.c.l.bf16 %v11431_v14  ;;  %v11444_v21 = vld [vmem:[%s11416_s7 + $0x38] sm:$0x1]  ;;  %1039 = vmatprep.subr.bf16.mxu1 %v10346_v10  ;;  %v11451_v26 = vld [vmem:[%s11416_s7 + $0x48] sm:$0xff]   ;;  %13480 = sst [smem:[#allocation18_spill]] %s12280_s4 }
  0x40   : > { %1969 = vmatprep.subr.bf16.mxu0 %v10334_v5  ;;  %v11441_v20 = vld [vmem:[%s11416_s7 + $0x30] sm:$0xff]   ;;  %v903_v22 = vunpack.c.h.bf16 %v11431_v14  ;;  %v904_v23 = vunpack.c.l.bf16 %v11437_v18  ;;  %v913_v35 = vunpack.c.l.bf16 %v11444_v21  ;;  %v917_v41 = vunpack.c.l.bf16 %v11451_v26  ;;  %v11483_v42 = vld [vmem:[%s11416_s7 + $0x18] sm:$0xff]   ;;  %v11486_v43 = vld [vmem:[%s11416_s7 + $0x20] sm:$0x1]  ;;  %p8733_p0 = scmp.ne.s32.totalorder %s11123_s30, 3 }
  0x41   : > { %v911_v24 = vunpack.c.l.bf16 %v11441_v20  ;;  %v912_v25 = vunpack.c.h.bf16 %v11441_v20  ;;  %v10339_v27 = vld [vmem:[%s13476_s28 + $0x130] ss:$8 sps:$4 sm:$0xff]   ;;  %v1586_v28 = vrot.slane %v899_v15, 1  ;;  %v1587_v29 = vrot.slane %v900_v16, 1  ;;  %v11495_v48 = vld [vmem:[%s11416_s7 + $0x24] sm:$0xff]   ;;  %v11527_v0 = vld [vmem:[%s11416_s7 + $0x3c] sm:$0xff]  }
  0x42   : > { %v1589_v30 = vrot.slane %v901_v17, 1  ;;  %v1591_v31 = vrot.slane %v902_v19, 1  ;;  %v1592_v33 = vrot.slane %v903_v22, 1  ;;  %v1594_v34 = vrot.slane %v904_v23, 1  ;;  %v11475_v37 = vld [vmem:[%s11416_s7 + $0x50] sm:$0x1]  ;;  %1040 = vmatpush1.bf16.msra.mxu1 %v10348_v11 }
  0x43   : > { %1970 = vmatpush1.bf16.msra.mxu0 %v10336_v6  ;;  %v1606_v36 = vrot.slane %v911_v24, 1  ;;  %v1588_v38 = vsel %vm1585_vm0, %v1586_v28, %v1587_v29  ;;  %v1607_v40 = vrot.slane %v912_v25, 1  ;;  %v1609_v47 = vrot.slane %v913_v35, 1  ;;  %v10349_v49 = vld [vmem:[%s13476_s28 + $0x64] ss:$8 sps:$4 sm:$0xff]   ;;  %v11547_v11 = vld [vmem:[%s11416_s7 + $0x54] sm:$0xff]  }
  0x44   : > { %1971 = vmatprep.subr.bf16.mxu0 %v10337_v7  ;;  %v1590_v39 = vsel %vm1585_vm0, %v1587_v29, %v1589_v30  ;;  %v1593_v45 = vsel %vm1585_vm0, %v1591_v31, %v1592_v33  ;;  %v1595_v46 = vsel %vm1585_vm0, %v1592_v33, %v1594_v34  ;;  %v918_v52 = vunpack.c.h.bf16 %v11451_v26  ;;  %v10351_v54 = vld [vmem:[%s13476_s28 + $0x60] ss:$8 sps:$4 sm:$0xff]   ;;  %v11516_v59 = vld [vmem:[%s11416_s7 + $0x2c] sm:$0x1]  ;;  %1041 = vmatprep.subr.bf16.mxu1 %v10349_v49  ;;  %v10352_v60 = vld [vmem:[%s13476_s28 + $0x74] ss:$8 sps:$4 sm:$0xff]  }
  0x45   : > { %v11488_v44 = vpack.c.bf16 %v1590_v39, %v1588_v38  ;;  %v11500_v50 = vpack.c.bf16 %v1595_v46, %v1593_v45  ;;  %v1608_v51 = vsel %vm1585_vm0, %v1606_v36, %v1607_v40  ;;  %v919_v53 = vunpack.c.l.bf16 %v11475_v37  ;;  %v10354_v1 = vld [vmem:[%s13476_s28 + $0x70] ss:$8 sps:$4 sm:$0xff]   ;;  %v11538_v6 = vld [vmem:[%s11416_s7 + $0x44] sm:$0x1]  ;;  %v11557_v31 = vld [vmem:[%s11416_s7 + $0x5c] sm:$0x1] }
  0x46   : > { %v1610_v55 = vsel %vm1585_vm0, %v1607_v40, %v1609_v47  ;;  %v1616_v56 = vrot.slane %v917_v41, 1  ;;  %v905_v57 = vunpack.c.l.bf16 %v11483_v42  ;;  %v906_v58 = vunpack.c.h.bf16 %v11483_v42  ;;  %1042 = vmatpush1.bf16.msra.mxu1 %v10351_v54  ;;  %s11143_s7 = smov 120   ;;  %v10357_v37 = vld [vmem:[%s13476_s28 + $0x154] ss:$8 sps:$4 sm:$0xff]   ;;  %s13481_s11 = sld [smem:[#allocation23_spill]] (!%p8733_p0) }
  0x47   : > { %1972 = vmatpush1.bf16.msra.mxu0 %v10339_v27  ;;  %1885 = vrot.lane.b32.xlu0 %v11488_v44, %s11142_s10  ;;  %v1617_v61 = vrot.slane %v918_v52, 1  ;;  %v1619_v62 = vrot.slane %v919_v53, 1  ;;  %v907_v63 = vunpack.c.l.bf16 %v11486_v43  ;;  %v908_v5 = vunpack.c.l.bf16 %v11495_v48  ;;  %s13482_s30 = sld [smem:[#allocation27_spill]] (!%p8733_p0)  ;;  %s13484_s9 = sld [smem:[#allocation24_spill]] (!%p8733_p0) }
  0x48   : > { %2199 = vmatprep.subr.bf16.mxu0 %v10342_v32  ;;  %v1596_v2 = vrot.slane %v905_v57, 1  ;;  %v1597_v3 = vrot.slane %v906_v58, 1  ;;  %1043 = vmatprep.subr.bf16.mxu1 %v10352_v60  ;;  %v11540_v7 = vpack.c.bf16 %v1610_v55, %v1608_v51  ;;  %v909_v10 = vunpack.c.h.bf16 %v11495_v48  ;;  %s13485_s24 = sld [smem:[#allocation28_spill]] (!%p8733_p0)  ;;  %s13433_s25 = smov (!%p8733_p0), 96  }
  0x49   : > { %v1618_v8 = vsel %vm1585_vm0, %v1616_v56, %v1617_v61  ;;  %v1599_v9 = vrot.slane %v907_v63, 1  ;;  %v1620_v27 = vsel %vm1585_vm0, %v1617_v61, %v1619_v62  ;;  %v910_v29 = vunpack.c.l.bf16 %v11516_v59  ;;  %s13488_s12 = sld [smem:[#allocation25_spill]] (!%p8733_p0)  ;;  %s13421_s29 = smov (!%p8733_p0), 80  }
  0x4a   : > { %v1598_v28 = vsel %vm1585_vm0, %v1596_v2, %v1597_v3  ;;  %v1601_v30 = vrot.slane %v908_v5, 1  ;;  %v1602_v33 = vrot.slane %v909_v10, 1  ;;  %1044 = vmatpush1.bf16.msra.mxu1 %v10354_v1  ;;  %v914_v38 = vunpack.c.l.bf16 %v11527_v0  ;;  %s13415_s6 = smov (!%p8733_p0), 104   ;;  %s13411_s0 = smov (!%p8733_p0), 40  }
  0x4b   : > { %1887 = vrot.lane.b32.xlu0 %v11500_v50, %s11142_s10  ;;  %v1600_v32 = vsel %vm1585_vm0, %v1597_v3, %v1599_v9  ;;  %v1604_v36 = vrot.slane %v910_v29, 1  ;;  %v915_v39 = vunpack.c.h.bf16 %v11527_v0  ;;  %v11568_v40 = vpack.c.bf16 %v1620_v27, %v1618_v8  ;;  %s13407_s1 = smov (!%p8733_p0), 16   ;;  %s13507_s15 = sld [smem:[#allocation32_spill]] (!%p8733_p0) }
  0x4c   : > { %v11562_v34 = vpack.c.bf16 %v1600_v32, %v1598_v28  ;;  %v1603_v45 = vsel %vm1585_vm0, %v1601_v30, %v1602_v33  ;;  %v916_v46 = vunpack.c.l.bf16 %v11538_v6  ;;  %v1611_v49 = vrot.slane %v914_v38, 1  ;;  %v10366_v32 = vld [vmem:[%s13476_s28 + $0x4] ss:$8 sps:$4 sm:$0xff]   ;;  %s13516_s26 = sld [smem:[#allocation36_spill]] (!%p8733_p0) }
  0x4d   : > { %v1605_v47 = vsel %vm1585_vm0, %v1602_v33, %v1604_v36  ;;  %v1612_v51 = vrot.slane %v915_v39, 1  ;;  %v920_v54 = vunpack.c.l.bf16 %v11547_v11  ;;  %v921_v60 = vunpack.c.h.bf16 %v11547_v11  ;;  %1214 = vmatprep.subr.bf16.mxu1 %v10366_v32  ;;  %s13483_s2 = smov (!%p8733_p0), %s13482_s30 }
  0x4e   : > { %1889 = vrot.lane.b32.xlu1 %v11562_v34, %s11142_s10  ;;  %v11582_v55 = vpack.c.bf16 %v1605_v47, %v1603_v45  ;;  %v1614_v56 = vrot.slane %v916_v46, 1  ;;  %v922_v61 = vunpack.c.l.bf16 %v11557_v31  ;;  %v2345_v33 = vrot.slane %v899_v15, 2  ;;  %v10358_v31 = vld [vmem:[%s13476_s28 + $0x160] ss:$8 sps:$4 sm:$0xff]  }
  0x4f   : > { %1893 = vrot.lane.b32.xlu0 %v11540_v7, %s11142_s10  ;;  %v1613_v62 = vsel %vm1585_vm0, %v1611_v49, %v1612_v51  ;;  %v1621_v1 = vrot.slane %v920_v54, 1  ;;  %v1622_v3 = vrot.slane %v921_v60, 1  ;;  %v2346_v36 = vrot.slane %v900_v16, 2 }
  0x50   : > { %v1615_v2 = vsel %vm1585_vm0, %v1612_v51, %v1614_v56  ;;  %v1624_v8 = vrot.slane %v922_v61, 1  ;;  %v2348_v45 = vrot.slane %v901_v17, 2  ;;  %v2350_v15 = vrot.slane %v902_v19, 2 }
  0x51   : > { %v11600_v9 = vpack.c.bf16 %v1615_v2, %v1613_v62  ;;  %v1623_v27 = vsel %vm1585_vm0, %v1621_v1, %v1622_v3  ;;  %v2347_v47 = vsel %vm2344_vm1, %v2345_v33, %v2346_v36  ;;  %v2351_v16 = vrot.slane %v903_v22, 2 }
  0x52   : > { %1891 = vrot.lane.b32.xlu1 %v11582_v55, %s11142_s10  ;;  %v1625_v28 = vsel %vm1585_vm0, %v1622_v3, %v1624_v8  ;;  %v2349_v49 = vsel %vm2344_vm1, %v2346_v36, %v2348_v45  ;;  %v2353_v13 = vrot.slane %v904_v23, 2  ;;  %v2355_v19 = vrot.slane %v905_v57, 2 }
  0x53   : > { %1897 = vrot.lane.b32.xlu0 %v11568_v40, %s11142_s10  ;;  %v11608_v30 = vpack.c.bf16 %v1625_v28, %v1623_v27  ;;  %v11661_v51 = vpack.c.bf16 %v2349_v49, %v2347_v47  ;;  %v2352_v17 = vsel %vm2344_vm1, %v2350_v15, %v2351_v16  ;;  %v2356_v18 = vrot.slane %v906_v58, 2  ;;  %v10340_v47 = vld [vmem:[%s13476_s28 + $0x140] ss:$8 sps:$4 sm:$0xff]   ;;  %v10355_v15 = vld [vmem:[%s13476_s28 + $0x150] ss:$8 sps:$4 sm:$0xff]  }
  0x54   : > { %v2354_v56 = vsel %vm2344_vm1, %v2351_v16, %v2353_v13  ;;  %v2358_v22 = vrot.slane %v907_v63, 2  ;;  %v2360_v57 = vrot.slane %v908_v5, 2  ;;  %v2361_v43 = vrot.slane %v909_v10, 2  ;;  %v10360_v16 = vld [vmem:[%s13476_s28 + $0x164] ss:$8 sps:$4 sm:$0xff]  }
  0x55   : > { %v11677_v62 = vpack.c.bf16 %v2354_v56, %v2352_v17  ;;  %v2357_v23 = vsel %vm2344_vm1, %v2355_v19, %v2356_v18  ;;  %v2363_v58 = vrot.slane %v910_v29, 2  ;;  %v2365_v5 = vrot.slane %v911_v24, 2  ;;  %v10361_v19 = vld [vmem:[%s13476_s28 + $0x170] ss:$8 sps:$4 sm:$0xff]  }
  0x56   : > { %1895 = vrot.lane.b32.xlu1 %v11600_v9, %s11142_s10  ;;  %v2359_v1 = vsel %vm2344_vm1, %v2356_v18, %v2358_v22  ;;  %v2362_v63 = vsel %vm2344_vm1, %v2360_v57, %v2361_v43  ;;  %v2366_v10 = vrot.slane %v912_v25, 2  ;;  %v2368_v59 = vrot.slane %v913_v35, 2  ;;  %v10369_v18 = vld [vmem:[%s13476_s28 + $0x184] ss:$8 sps:$4 sm:$0xff]  }
  0x57   : > { %956 = vrot.lane.b32.xlu0 %v11425_v12, %s11142_s10  ;;  %v11693_v2 = vpack.c.bf16 %v2359_v1, %v2357_v23  ;;  %v2364_v3 = vsel %vm2344_vm1, %v2361_v43, %v2363_v58  ;;  %v2370_v24 = vrot.slane %v914_v38, 2  ;;  %v2371_v25 = vrot.slane %v915_v39, 2  ;;  %v10364_v1 = vld [vmem:[%s13476_s28] ss:$8 sps:$4 sm:$0xff]   ;;  %v10372_v43 = vld [vmem:[%s13476_s28 + $0x14] ss:$8 sps:$4 sm:$0xff]  }
  0x58   : > { %v11709_v8 = vpack.c.bf16 %v2364_v3, %v2362_v63  ;;  %v2367_v29 = vsel %vm2344_vm1, %v2365_v5, %v2366_v10  ;;  %v2369_v27 = vsel %vm2344_vm1, %v2366_v10, %v2368_v59  ;;  %v2373_v21 = vrot.slane %v916_v46, 2  ;;  %v10370_v58 = vld [vmem:[%s13476_s28 + $0x10] ss:$8 sps:$4 sm:$0xff]   ;;  %v10375_v63 = vld [vmem:[%s13476_s28 + $0x24] ss:$8 sps:$4 sm:$0xff]  }
  0x59   : > { %v11721_v28 = vpack.c.bf16 %v2369_v27, %v2367_v29  ;;  %v2372_v35 = vsel %vm2344_vm1, %v2370_v24, %v2371_v25  ;;  %v2375_v36 = vrot.slane %v917_v41, 2  ;;  %v2376_v38 = vrot.slane %v918_v52, 2  ;;  %v10373_v10 = vld [vmem:[%s13476_s28 + $0x20] ss:$8 sps:$4 sm:$0xff]   ;;  %v10378_v59 = vld [vmem:[%s13476_s28 + $0x34] ss:$8 sps:$4 sm:$0xff]  }
  0x5a   : > { %1899 = vrot.lane.b32.xlu1 %v11608_v30, %s11142_s10  ;;  %v2374_v32 = vsel %vm2344_vm1, %v2371_v25, %v2373_v21  ;;  %v2378_v39 = vrot.slane %v919_v53, 2  ;;  %v2380_v52 = vrot.slane %v920_v54, 2  ;;  %v2381_v53 = vrot.slane %v921_v60, 2  ;;  %v10376_v29 = vld [vmem:[%s13476_s28 + $0x30] ss:$8 sps:$4 sm:$0xff]  }
  0x5b   : > { %958 = vrot.lane.b32.xlu0 %v11431_v14, %s11142_s10  ;;  %v11735_v33 = vpack.c.bf16 %v2374_v32, %v2372_v35  ;;  %v2377_v6 = vsel %vm2344_vm1, %v2375_v36, %v2376_v38  ;;  %v2383_v49 = vrot.slane %v922_v61, 2  ;;  %v10363_v61 = vld [vmem:[%s13476_s28 + $0x174] ss:$8 sps:$4 sm:$0xff]   ;;  %v10390_v27 = vld [vmem:[%s13476_s28 + $0x84] ss:$8 sps:$4 sm:$0xff]   ;;  %vm3646_vm11 = vcmask (!%p8733_p0), 261120  }
  0x5c   : > { %v2379_v46 = vsel %vm2344_vm1, %v2376_v38, %v2378_v39  ;;  %v2382_v54 = vsel %vm2344_vm1, %v2380_v52, %v2381_v53  ;;  %v10367_v39 = vld [vmem:[%s13476_s28 + $0x180] ss:$8 sps:$4 sm:$0xff]   ;;  %vm3714_vm12 = vcmask (!%p8733_p0), 64512   ;;  %vm4867_vm14 = vcmask (!%p8733_p0), 195584  }
  0x5d   : > { %v11747_v45 = vpack.c.bf16 %v2379_v46, %v2377_v6  ;;  %v2384_v13 = vsel %vm2344_vm1, %v2381_v53, %v2383_v49  ;;  %v10381_v46 = vld [vmem:[%s13476_s28 + $0x194] ss:$8 sps:$4 sm:$0xff]   ;;  %v10382_v53 = vld [vmem:[%s13476_s28 + $0x1a0] ss:$8 sps:$4 sm:$0xff]   ;;  %vm12326_vm13 = vmpackc.low (!%p8733_p0), %vm3714_vm12, %vm3714_vm12  ;;  %vm11159_vm15 = vmmov (!%p8733_p0), 0   ;;  %vm8401_vm0 = vcmask (!%p8733_p0), 73728  }
  0x5e   : > { %2119 = vrot.lane.b32.xlu1 %v11488_v44, %s11143_s7  ;;  %v11775_v17 = vpack.c.bf16 %v2384_v13, %v2382_v54  ;;  %v10387_v49 = vld [vmem:[%s13476_s28 + $0x1b4] ss:$8 sps:$4 sm:$0xff]   ;;  %v10388_v13 = vld [vmem:[%s13476_s28 + $0x80] ss:$8 sps:$4 sm:$0xff]  }
  0x5f   : > { %960 = vrot.lane.b32.xlu0 %v11483_v42, %s11142_s10 }
  0x62   : > { %2121 = vrot.lane.b32.xlu1 %v11500_v50, %s11143_s7 }
  0x63   : > { %962 = vrot.lane.b32.xlu0 %v11495_v48, %s11142_s10 }
  0x66   : > { %2123 = vrot.lane.b32.xlu1 %v11562_v34, %s11143_s7 }
  0x67   : > { %964 = vrot.lane.b32.xlu0 %v11441_v20, %s11142_s10 }
  0x6a   : > { %2125 = vrot.lane.b32.xlu1 %v11582_v55, %s11143_s7 }
  0x6b   : > { %966 = vrot.lane.b32.xlu0 %v11527_v0, %s11142_s10 }
  0x6e   : > { %2127 = vrot.lane.b32.xlu1 %v11540_v7, %s11143_s7 }
  0x6f   : > { %968 = vrot.lane.b32.xlu0 %v11451_v26, %s11142_s10 }
  0x72   : > { %2129 = vrot.lane.b32.xlu1 %v11600_v9, %s11143_s7 }
  0x73   : > { %970 = vrot.lane.b32.xlu0 %v11547_v11, %s11142_s10 }
  0x76   : > { %2131 = vrot.lane.b32.xlu1 %v11568_v40, %s11143_s7 }
  0x77   : > { %1336 = vrot.lane.b32.xlu0 %v11425_v12, %s11143_s7 }
  0x7a   : > { %2133 = vrot.lane.b32.xlu1 %v11608_v30, %s11143_s7 }
  0x7b   : > { %1338 = vrot.lane.b32.xlu0 %v11431_v14, %s11143_s7 }
  0x7e   : > { %2644 = vrot.lane.b32.xlu1 %v11661_v51, %s11142_s10 }
  0x7f   : > { %1340 = vrot.lane.b32.xlu0 %v11483_v42, %s11143_s7 }
  0x82   : > { %2646 = vrot.lane.b32.xlu1 %v11677_v62, %s11142_s10 }
  0x83   : > { %1342 = vrot.lane.b32.xlu0 %v11495_v48, %s11143_s7 }
  0x86   : > { %2648 = vrot.lane.b32.xlu1 %v11693_v2, %s11142_s10 }
  0x87   : > { %1344 = vrot.lane.b32.xlu0 %v11441_v20, %s11143_s7 }
  0x8a   : > { %2650 = vrot.lane.b32.xlu1 %v11709_v8, %s11142_s10 }
  0x8b   : > { %1346 = vrot.lane.b32.xlu0 %v11527_v0, %s11143_s7 }
  0x8e   : > { %2652 = vrot.lane.b32.xlu1 %v11721_v28, %s11142_s10 }
  0x8f   : > { %1348 = vrot.lane.b32.xlu0 %v11451_v26, %s11143_s7 }
  0x92   : > { %2654 = vrot.lane.b32.xlu1 %v11735_v33, %s11142_s10 }
  0x93   : > { %1350 = vrot.lane.b32.xlu0 %v11547_v11, %s11143_s7 }
  0x96   : > { %2656 = vrot.lane.b32.xlu1 %v11747_v45, %s11142_s10 }
  0x97   : > { %2878 = vrot.lane.b32.xlu0 %v11661_v51, %s11143_s7 }
  0x9a   : > { %2658 = vrot.lane.b32.xlu1 %v11775_v17, %s11142_s10  ;;  %s13417_s10 = smov (!%p8733_p0), 48  }
  0x9b   : > { %2882 = vrot.lane.b32.xlu0 %v11693_v2, %s11143_s7 }
  0x9e   : > { %2880 = vrot.lane.b32.xlu1 %v11677_v62, %s11143_s7 }
  0x9f   : > { %2886 = vrot.lane.b32.xlu0 %v11721_v28, %s11143_s7 }
  0xa2   : > { %2884 = vrot.lane.b32.xlu1 %v11709_v8, %s11143_s7 }
  0xa3   : > { %2890 = vrot.lane.b32.xlu0 %v11747_v45, %s11143_s7 }
  0xa6   : > { %2888 = vrot.lane.b32.xlu1 %v11735_v33, %s11143_s7 }
  0xaa   : > { %2892 = vrot.lane.b32.xlu1 %v11775_v17, %s11143_s7  ;;  %s13413_s7 = smov (!%p8733_p0), 72  }
  0xb9   : > { %v1886_v41 = vpop.permute.xlu0 %1885 }
  0xba   : > { %8612 = vmatmul.mubr.msk.bf16.vlgmr.msra.gmra.mrb[0].mxu0 %vm1012_vm2, %v1886_v41 }
  0xbb   : > { %2200 = vmatpush1.bf16.msra.mxu0 %v10340_v47  ;;  %2007 = vmatprep.mubr.bf16.mxu0 %v11141_v4  ;;  %v10379_v47 = vld [vmem:[%s13476_s28 + $0x190] ss:$8 sps:$4 sm:$0xff]  }
  0xbc   : > { %2201 = vmatprep.subr.bf16.mxu0 %v10357_v37  ;;  %v10384_v37 = vld [vmem:[%s13476_s28 + $0x1a4] ss:$8 sps:$4 sm:$0xff]  }
  0xbd   : > { %v1888_v60 = vpop.permute.xlu0 %1887 }
  0xbf   : > { %2202 = vmatpush1.bf16.msra.mxu0 %v10355_v15  ;;  %v10385_v15 = vld [vmem:[%s13476_s28 + $0x1b0] ss:$8 sps:$4 sm:$0xff]  }
  0xc0   : > { %2203 = vmatprep.subr.bf16.mxu0 %v10360_v16  ;;  %v1890_v23 = vpop.permute.xlu1 %1889  ;;  %v10393_v16 = vld [vmem:[%s13476_s28 + $0x1c4] ss:$8 sps:$4 sm:$0xff]  }
  0xc1   : > { %v1894_v56 = vpop.permute.xlu0 %1893 }
  0xc2   : > { %8613 = vmatmul.mubr.msk.bf16.gmra.mrb[4].mxu0 %vm1012_vm2, %v1888_v60  ;;  %v10396_v60 = vld [vmem:[%s13476_s28 + $0x94] ss:$8 sps:$4 sm:$0xff]  }
  0xc3   : > { %2017 = vmatprep.mubr.bf16.mxu0 %v11141_v4  ;;  %2204 = vmatpush1.bf16.msra.mxu0 %v10358_v31  ;;  %v10394_v31 = vld [vmem:[%s13476_s28 + $0x90] ss:$8 sps:$4 sm:$0xff]  }
  0xc4   : > { %2205 = vmatprep.subr.bf16.mxu0 %v10363_v61  ;;  %v1892_v3 = vpop.permute.xlu1 %1891  ;;  %v10399_v61 = vld [vmem:[%s13476_s28 + $0xa4] ss:$8 sps:$4 sm:$0xff]  }
  0xc5   : > { %v1898_v22 = vpop.permute.xlu0 %1897 }
  0xc7   : > { %2206 = vmatpush1.bf16.msra.mxu0 %v10361_v19  ;;  %v10402_v19 = vld [vmem:[%s13476_s28 + $0xb4] ss:$8 sps:$4 sm:$0xff]  }
  0xc8   : > { %2482 = vmatprep.subr.bf16.mxu0 %v10369_v18  ;;  %v1896_v25 = vpop.permute.xlu1 %1895  ;;  %v10400_v18 = vld [vmem:[%s13476_s28 + $0xb0] ss:$8 sps:$4 sm:$0xff]  }
  0xc9   : > { %v957_v57 = vpop.permute.xlu0 %956 }
  0xca   : > { %8524 = vmatmul.mubr.msk.bf16.vlgmr.msra.gmra.mrb[0].mxu1 %vm1012_vm2, %v957_v57  ;;  %8614 = vmatmul.mubr.msk.bf16.gmra.mrb[8].mxu0 %vm1012_vm2, %v1890_v23  ;;  %v10408_v57 = vld [vmem:[%s13476_s28 + $0x1e4] ss:$8 sps:$4 sm:$0xff]  }
  0xcb   : > { %1079 = vmatprep.mubr.bf16.mxu1 %v11141_v4  ;;  %2027 = vmatprep.mubr.bf16.mxu0 %v11141_v4 }
  0xcc   : > { %1215 = vmatpush1.bf16.msra.mxu1 %v10364_v1  ;;  %v1900_v32 = vpop.permute.xlu1 %1899 }
  0xcd   : > { %1216 = vmatprep.subr.bf16.mxu1 %v10372_v43  ;;  %v959_v5 = vpop.permute.xlu0 %958  ;;  %v10409_v43 = vld [vmem:[%s13476_s28 + $0x1f0] ss:$8 sps:$4 sm:$0xff]  }
  0xd0   : > { %1217 = vmatpush1.bf16.msra.mxu1 %v10370_v58  ;;  %v2120_v38 = vpop.permute.xlu1 %2119  ;;  %v10417_v58 = vld [vmem:[%s13476_s28 + $0x204] ss:$8 sps:$4 sm:$0xff]  }
  0xd1   : > { %1218 = vmatprep.subr.bf16.mxu1 %v10375_v63  ;;  %v961_v24 = vpop.permute.xlu0 %960 }
  0xd2   : > { %8525 = vmatmul.mubr.msk.bf16.gmra.mrb[4].mxu1 %vm1012_vm2, %v959_v5  ;;  %8615 = vmatmul.mubr.msk.bf16.gmra.mrb[12].mxu0 %vm1012_vm2, %v1892_v3  ;;  %v10418_v3 = vld [vmem:[%s13476_s28 + $0xd0] ss:$8 sps:$4 sm:$0xff]   ;;  %v10423_v5 = vld [vmem:[%s13476_s28 + $0xe4] ss:$8 sps:$4 sm:$0xff]  }
  0xd3   : > { %1089 = vmatprep.mubr.bf16.mxu1 %v11141_v4  ;;  %2037 = vmatprep.mubr.bf16.mxu0 %v11141_v4 }
  0xd4   : > { %1219 = vmatpush1.bf16.msra.mxu1 %v10373_v10  ;;  %v2122_v41 = vpop.permute.xlu1 %2121 }
  0xd5   : > { %1220 = vmatprep.subr.bf16.mxu1 %v10378_v59  ;;  %v963_v21 = vpop.permute.xlu0 %962  ;;  %v10426_v59 = vld [vmem:[%s13476_s28 + $0xf4] ss:$8 sps:$4 sm:$0xff]  }
  0xd8   : > { %1221 = vmatpush1.bf16.msra.mxu1 %v10376_v29  ;;  %v2124_v54 = vpop.permute.xlu1 %2123  ;;  %v10424_v29 = vld [vmem:[%s13476_s28 + $0xf0] ss:$8 sps:$4 sm:$0xff]  }
  0xd9   : > { %1416 = vmatprep.subr.bf16.mxu1 %v10390_v27  ;;  %v965_v35 = vpop.permute.xlu0 %964 }
  0xda   : > { %8526 = vmatmul.mubr.msk.bf16.gmra.mrb[8].mxu1 %vm1012_vm2, %v961_v24  ;;  %8616 = vmatmul.mubr.msk.bf16.gmra.mrb[16].mxu0 %vm1012_vm2, %v1894_v56 }
  0xdb   : > { %1099 = vmatprep.mubr.bf16.mxu1 %v11141_v4  ;;  %2047 = vmatprep.mubr.bf16.mxu0 %v11141_v4 }
  0xdc   : > { %v2126_v56 = vpop.permute.xlu1 %2125 }
  0xdd   : > { %v967_v36 = vpop.permute.xlu0 %966 }
  0xe0   : > { %v2128_v23 = vpop.permute.xlu1 %2127 }
  0xe1   : > { %v969_v6 = vpop.permute.xlu0 %968 }
  0xe2   : > { %8527 = vmatmul.mubr.msk.bf16.gmra.mrb[12].mxu1 %vm1012_vm2, %v963_v21  ;;  %8617 = vmatmul.mubr.msk.bf16.gmra.mrb[20].mxu0 %vm1012_vm2, %v1896_v25  ;;  %v10415_v25 = vld [vmem:[%s13476_s28 + $0x200] ss:$8 sps:$4 sm:$0xff]  }
  0xe3   : > { %1109 = vmatprep.mubr.bf16.mxu1 %v11141_v4  ;;  %2057 = vmatprep.mubr.bf16.mxu0 %v11141_v4 }
  0xe5   : > { %v971_v52 = vpop.permute.xlu0 %970 }
  0xe9   : > { %v1337_v63 = vpop.permute.xlu0 %1336 }
  0xea   : > { %8528 = vmatmul.mubr.msk.bf16.gmra.mrb[16].mxu1 %vm1012_vm2, %v965_v35  ;;  %8618 = vmatmul.mubr.msk.bf16.gmra.mrb[24].mxu0 %vm1012_vm2, %v1898_v22  ;;  %v10414_v22 = vld [vmem:[%s13476_s28 + $0xc4] ss:$8 sps:$4 sm:$0xff]   ;;  %v10429_v35 = vld [vmem:[%s13476_s28 + $0x214] ss:$8 sps:$4 sm:$0xff]  }
  0xeb   : > { %1119 = vmatprep.mubr.bf16.mxu1 %v11141_v4  ;;  %2067 = vmatprep.mubr.bf16.mxu0 %v11141_v4 }
  0xed   : > { %v1339_v10 = vpop.permute.xlu0 %1338 }
  0xf1   : > { %v1341_v27 = vpop.permute.xlu0 %1340 }
  0xf2   : > { %8529 = vmatmul.mubr.msk.bf16.gmra.mrb[20].mxu1 %vm1012_vm2, %v967_v36  ;;  %8619 = vmatmul.mubr.msk.bf16.gmra.mrb[28].mxu0 %vm1012_vm2, %v1900_v32  ;;  %v10432_v32 = vld [vmem:[%s13476_s28 + $0x224] ss:$8 sps:$4 sm:$0xff]  }
  0xf3   : > { %1129 = vmatprep.mubr.bf16.mxu1 %v11141_v4  ;;  %2231 = vmatprep.mubr.bf16.mxu0 %v11141_v4 }
  0xfa   : > { %8530 = vmatmul.mubr.msk.bf16.gmra.mrb[24].mxu1 %vm1012_vm2, %v969_v6  ;;  %8636 = vmatmul.mubr.msk.bf16.vlgmr.msra.gmra.mrb[0].mxu0 %vm1012_vm2, %v2120_v38  ;;  %v10435_v6 = vld [vmem:[%s13476_s28 + $0x234] ss:$8 sps:$4 sm:$0xff]  }
  0xfb   : > { %2483 = vmatpush1.bf16.msra.mxu0 %v10367_v39  ;;  %1139 = vmatprep.mubr.bf16.mxu1 %v11141_v4  ;;  %v10430_v39 = vld [vmem:[%s13476_s28 + $0x220] ss:$8 sps:$4 sm:$0xff]  }
  0xfc   : > { %2241 = vmatprep.mubr.bf16.mxu0 %v11141_v4  ;;  %2484 = vmatprep.subr.bf16.mxu0 %v10381_v46  ;;  %v10433_v46 = vld [vmem:[%s13476_s28 + $0x230] ss:$8 sps:$4 sm:$0xff]  }
  0xff   : > { %2485 = vmatpush1.bf16.msra.mxu0 %v10379_v47 }
 0x100   : > { %2486 = vmatprep.subr.bf16.mxu0 %v10384_v37  ;;  %v10437_v37 = vld [vmem:[%s13478_s27] sm:$0xff]  }
 0x102   : > { %8531 = vmatmul.mubr.msk.bf16.gmra.mrb[28].mxu1 %vm1012_vm2, %v971_v52  ;;  %8637 = vmatmul.mubr.msk.bf16.gmra.mrb[4].mxu0 %vm1012_vm2, %v2122_v41 }
 0x103   : > { %1246 = vmatprep.mubr.bf16.mxu1 %v11141_v4  ;;  %2251 = vmatprep.mubr.bf16.mxu0 %v11141_v4 }
 0x104   : > { %2487 = vmatpush1.bf16.msra.mxu0 %v10382_v53 }
 0x105   : > { %2488 = vmatprep.subr.bf16.mxu0 %v10387_v49  ;;  %v10438_v49 = vld [vmem:[%s13478_s27 + $0x48] sm:$0xff]  }
 0x108   : > { %2489 = vmatpush1.bf16.msra.mxu0 %v10385_v15  ;;  %v10439_v15 = vld [vmem:[%s13478_s27 + $0x8] sm:$0xff]  }
 0x109   : > { %2724 = vmatprep.subr.bf16.mxu0 %v10393_v16 }
 0x10a   : > { %8540 = vmatmul.mubr.msk.bf16.vlgmr.msra.gmra.mrb[0].mxu1 %vm1012_vm2, %v11425_v12  ;;  %8638 = vmatmul.mubr.msk.bf16.gmra.mrb[8].mxu0 %vm1012_vm2, %v2124_v54  ;;  %v10397_v12 = vld [vmem:[%s13476_s28 + $0xa0] ss:$8 sps:$4 sm:$0xff]   ;;  %v10440_v54 = vld [vmem:[%s13478_s27 + $0x50] sm:$0xff]  }
 0x10b   : > { %1256 = vmatprep.mubr.bf16.mxu1 %v11141_v4  ;;  %2261 = vmatprep.mubr.bf16.mxu0 %v11141_v4 }
 0x10c   : > { %1417 = vmatpush1.bf16.msra.mxu1 %v10388_v13  ;;  %v10441_v13 = vld [vmem:[%s13478_s27 + $0x10] sm:$0xff]  }
 0x10d   : > { %1418 = vmatprep.subr.bf16.mxu1 %v10396_v60 }
 0x110   : > { %1419 = vmatpush1.bf16.msra.mxu1 %v10394_v31  ;;  %v10442_v31 = vld [vmem:[%s13478_s27 + $0x58] sm:$0xff]  }
 0x111   : > { %1420 = vmatprep.subr.bf16.mxu1 %v10399_v61  ;;  %v10443_v61 = vld [vmem:[%s13478_s27 + $0x18] sm:$0xff]  }
 0x112   : > { %8541 = vmatmul.mubr.msk.bf16.gmra.mrb[4].mxu1 %vm1012_vm2, %v11431_v14  ;;  %8639 = vmatmul.mubr.msk.bf16.gmra.mrb[12].mxu0 %vm1012_vm2, %v2126_v56  ;;  %v2130_v14 = vpop.permute.xlu1 %2129  ;;  %v10444_v56 = vld [vmem:[%s13478_s27 + $0x60] sm:$0xff]  }
 0x113   : > { %1266 = vmatprep.mubr.bf16.mxu1 %v11141_v4  ;;  %2271 = vmatprep.mubr.bf16.mxu0 %v11141_v4 }
 0x114   : > { %1421 = vmatpush1.bf16.msra.mxu1 %v10397_v12  ;;  %v10446_v12 = vld [vmem:[%s13478_s27 + $0x68] sm:$0xff]  }
 0x115   : > { %1422 = vmatprep.subr.bf16.mxu1 %v10402_v19  ;;  %v10447_v19 = vld [vmem:[%s13478_s27 + $0x28] sm:$0xff]  }
 0x116   : > { %v2132_v1 = vpop.permute.xlu1 %2131 }
 0x118   : > { %1423 = vmatpush1.bf16.msra.mxu1 %v10400_v18  ;;  %v10448_v18 = vld [vmem:[%s13478_s27 + $0x70] sm:$0xff]  }
 0x119   : > { %1723 = vmatprep.subr.bf16.mxu1 %v10414_v22  ;;  %v10449_v22 = vld [vmem:[%s13478_s27 + $0x30] sm:$0xff]  }
 0x11a   : > { %8542 = vmatmul.mubr.msk.bf16.gmra.mrb[8].mxu1 %vm1012_vm2, %v11483_v42  ;;  %8640 = vmatmul.mubr.msk.bf16.gmra.mrb[16].mxu0 %vm1012_vm2, %v2128_v23  ;;  %v2134_v42 = vpop.permute.xlu1 %2133  ;;  %v10450_v23 = vld [vmem:[%s13478_s27 + $0x78] sm:$0xff]  }
 0x11b   : > { %1276 = vmatprep.mubr.bf16.mxu1 %v11141_v4  ;;  %2281 = vmatprep.mubr.bf16.mxu0 %v11141_v4 }
 0x122   : > { %8543 = vmatmul.mubr.msk.bf16.gmra.mrb[12].mxu1 %vm1012_vm2, %v11495_v48  ;;  %8641 = vmatmul.mubr.msk.bf16.gmra.mrb[20].mxu0 %vm1012_vm2, %v2130_v14  ;;  %v10405_v48 = vld [vmem:[%s13476_s28 + $0x1d4] ss:$8 sps:$4 sm:$0xff]  }
 0x123   : > { %1286 = vmatprep.mubr.bf16.mxu1 %v11141_v4  ;;  %2291 = vmatprep.mubr.bf16.mxu0 %v11141_v4  ;;  %v10451_v14 = vld [vmem:[%s13478_s27 + $0x38] sm:$0xff]  }
 0x12a   : > { %8544 = vmatmul.mubr.msk.bf16.gmra.mrb[16].mxu1 %vm1012_vm2, %v11441_v20  ;;  %8642 = vmatmul.mubr.msk.bf16.gmra.mrb[24].mxu0 %vm1012_vm2, %v2132_v1  ;;  %v10391_v20 = vld [vmem:[%s13476_s28 + $0x1c0] ss:$8 sps:$4 sm:$0xff]  }
 0x12b   : > { %1296 = vmatprep.mubr.bf16.mxu1 %v11141_v4  ;;  %2301 = vmatprep.mubr.bf16.mxu0 %v11141_v4 }
 0x132   : > { %8545 = vmatmul.mubr.msk.bf16.gmra.mrb[20].mxu1 %vm1012_vm2, %v11527_v0  ;;  %8643 = vmatmul.mubr.msk.bf16.gmra.mrb[28].mxu0 %vm1012_vm2, %v2134_v42  ;;  %v10403_v0 = vld [vmem:[%s13476_s28 + $0x1d0] ss:$8 sps:$4 sm:$0xff]  }
 0x133   : > { %1306 = vmatprep.mubr.bf16.mxu1 %v11141_v4  ;;  %2514 = vmatprep.mubr.bf16.mxu0 %v11141_v4 }
 0x13a   : > { %8546 = vmatmul.mubr.msk.bf16.gmra.mrb[24].mxu1 %vm1012_vm2, %v11451_v26  ;;  %8660 = vmatmul.mubr.msk.bf16.vlgmr.msra.gmra.mrb[0].mxu0 %vm1012_vm2, %v11661_v51  ;;  %v10406_v26 = vld [vmem:[%s13476_s28 + $0x1e0] ss:$8 sps:$4 sm:$0xff]   ;;  %v10411_v51 = vld [vmem:[%s13476_s28 + $0x1f4] ss:$8 sps:$4 sm:$0xff]  }
 0x13b   : > { %2725 = vmatpush1.bf16.msra.mxu0 %v10391_v20  ;;  %1316 = vmatprep.mubr.bf16.mxu1 %v11141_v4 }
 0x13c   : > { %2524 = vmatprep.mubr.bf16.mxu0 %v11141_v4  ;;  %2726 = vmatprep.subr.bf16.mxu0 %v10405_v48 }
 0x13f   : > { %2727 = vmatpush1.bf16.msra.mxu0 %v10403_v0 }
 0x140   : > { %2728 = vmatprep.subr.bf16.mxu0 %v10408_v57 }
 0x142   : > { %8547 = vmatmul.mubr.msk.bf16.gmra.mrb[28].mxu1 %vm1012_vm2, %v11547_v11  ;;  %8661 = vmatmul.mubr.msk.bf16.gmra.mrb[4].mxu0 %vm1012_vm2, %v11677_v62  ;;  %v10412_v11 = vld [vmem:[%s13476_s28 + $0xc0] ss:$8 sps:$4 sm:$0xff]   ;;  %v10420_v62 = vld [vmem:[%s13476_s28 + $0xd4] ss:$8 sps:$4 sm:$0xff]  }
 0x143   : > { %1448 = vmatprep.mubr.bf16.mxu1 %v11141_v4  ;;  %2534 = vmatprep.mubr.bf16.mxu0 %v11141_v4 }
 0x144   : > { %2729 = vmatpush1.bf16.msra.mxu0 %v10406_v26 }
 0x145   : > { %2730 = vmatprep.subr.bf16.mxu0 %v10411_v51 }
 0x148   : > { %2731 = vmatpush1.bf16.msra.mxu0 %v10409_v43 }
 0x149   : > { %2958 = vmatprep.subr.bf16.mxu0 %v10417_v58 }
 0x14a   : > { %8564 = vmatmul.mubr.msk.bf16.vlgmr.msra.gmra.mrb[0].mxu1 %vm1012_vm2, %v1337_v63  ;;  %8662 = vmatmul.mubr.msk.bf16.gmra.mrb[8].mxu0 %vm1012_vm2, %v11693_v2  ;;  %v10421_v2 = vld [vmem:[%s13476_s28 + $0xe0] ss:$8 sps:$4 sm:$0xff]  }
 0x14b   : > { %1458 = vmatprep.mubr.bf16.mxu1 %v11141_v4  ;;  %2544 = vmatprep.mubr.bf16.mxu0 %v11141_v4 }
 0x14c   : > { %1724 = vmatpush1.bf16.msra.mxu1 %v10412_v11 }
 0x14d   : > { %1725 = vmatprep.subr.bf16.mxu1 %v10420_v62 }
 0x150   : > { %1726 = vmatpush1.bf16.msra.mxu1 %v10418_v3 }
 0x151   : > { %1727 = vmatprep.subr.bf16.mxu1 %v10423_v5 }
 0x152   : > { %8565 = vmatmul.mubr.msk.bf16.gmra.mrb[4].mxu1 %vm1012_vm2, %v1339_v10  ;;  %8663 = vmatmul.mubr.msk.bf16.gmra.mrb[12].mxu0 %vm1012_vm2, %v11709_v8  ;;  %v1343_v8 = vpop.permute.xlu0 %1342 }
 0x153   : > { %1468 = vmatprep.mubr.bf16.mxu1 %v11141_v4  ;;  %2554 = vmatprep.mubr.bf16.mxu0 %v11141_v4 }
 0x154   : > { %1728 = vmatpush1.bf16.msra.mxu1 %v10421_v2 }
 0x155   : > { %1729 = vmatprep.subr.bf16.mxu1 %v10426_v59 }
 0x156   : > { %v1345_v24 = vpop.permute.xlu0 %1344 }
 0x158   : > { %1730 = vmatpush1.bf16.msra.mxu1 %v10424_v29 }
 0x15a   : > { %8566 = vmatmul.mubr.msk.bf16.gmra.mrb[8].mxu1 %vm1012_vm2, %v1341_v27  ;;  %8664 = vmatmul.mubr.msk.bf16.gmra.mrb[16].mxu0 %vm1012_vm2, %v11721_v28  ;;  %v1347_v28 = vpop.permute.xlu0 %1346 }
 0x15b   : > { %1478 = vmatprep.mubr.bf16.mxu1 %v11141_v4  ;;  %2564 = vmatprep.mubr.bf16.mxu0 %v11141_v4 }
 0x15e   : > { %v1349_v21 = vpop.permute.xlu0 %1348 }
 0x162   : > { %8567 = vmatmul.mubr.msk.bf16.gmra.mrb[12].mxu1 %vm1012_vm2, %v1343_v8  ;;  %8665 = vmatmul.mubr.msk.bf16.gmra.mrb[20].mxu0 %vm1012_vm2, %v11735_v33  ;;  %v10436_v33 = vld [vmem:[%s13478_s27 + $0x40] sm:$0xff]   ;;  %v1351_v38 = vpop.permute.xlu0 %1350  ;;  %v3105_v8 = vlaneseq }
 0x163   : > { %1488 = vmatprep.mubr.bf16.mxu1 %v11141_v4  ;;  %2574 = vmatprep.mubr.bf16.mxu0 %v11141_v4 }
 0x164   : > { %8976 = vmatprep.subr.bf16.mxu1 %v10436_v33 }
 0x16a   : > { %8568 = vmatmul.mubr.msk.bf16.gmra.mrb[16].mxu1 %vm1012_vm2, %v1345_v24  ;;  %8666 = vmatmul.mubr.msk.bf16.gmra.mrb[24].mxu0 %vm1012_vm2, %v11747_v45  ;;  %v2645_v45 = vpop.permute.xlu1 %2644  ;;  %v3106_v24 = vshrl.u32 %v3105_v8, 7 }
 0x16b   : > { %1498 = vmatprep.mubr.bf16.mxu1 %v11141_v4  ;;  %2584 = vmatprep.mubr.bf16.mxu0 %v11141_v4 }
 0x16e   : > { %v2647_v36 = vpop.permute.xlu1 %2646 }
 0x172   : > { %8569 = vmatmul.mubr.msk.bf16.gmra.mrb[20].mxu1 %vm1012_vm2, %v1347_v28  ;;  %8667 = vmatmul.mubr.msk.bf16.gmra.mrb[28].mxu0 %vm1012_vm2, %v11775_v17  ;;  %v10427_v17 = vld [vmem:[%s13476_s28 + $0x210] ss:$8 sps:$4 sm:$0xff]   ;;  %v2649_v47 = vpop.permute.xlu1 %2648  ;;  %s13506_s28 = smov (!%p8733_p0), 24  }
 0x173   : > { %1508 = vmatprep.mubr.bf16.mxu1 %v11141_v4  ;;  %2756 = vmatprep.mubr.bf16.mxu0 %v11141_v4 }
 0x176   : > { %v2651_v41 = vpop.permute.xlu1 %2650 }
 0x17a   : > { %8570 = vmatmul.mubr.msk.bf16.gmra.mrb[24].mxu1 %vm1012_vm2, %v1349_v21  ;;  %8684 = vmatmul.mubr.msk.bf16.vlgmr.msra.gmra.mrb[0].mxu0 %vm1012_vm2, %v2645_v45  ;;  %v2653_v52 = vpop.permute.xlu1 %2652  ;;  %v3107_v21 = vsub.s32 0, %v3106_v24 }
 0x17b   : > { %2959 = vmatpush1.bf16.msra.mxu0 %v10415_v25  ;;  %1518 = vmatprep.mubr.bf16.mxu1 %v11141_v4 }
 0x17c   : > { %2766 = vmatprep.mubr.bf16.mxu0 %v11141_v4  ;;  %2960 = vmatprep.subr.bf16.mxu0 %v10429_v35  ;;  %v3103_v35 = vld [vmem:[%s13479_s3] sm:$0x3]  ;;  %s13431_s3 = smov (!%p8733_p0), 64  }
 0x17f   : > { %2961 = vmatpush1.bf16.msra.mxu0 %v10427_v17  ;;  %v3111_v17 = vsub.s32 1, %v3106_v24 }
 0x180   : > { %2962 = vmatprep.subr.bf16.mxu0 %v10432_v32  ;;  %v12184_v32 = vrot.slane %v3103_v35, %v3107_v21 }
 0x182   : > { %8571 = vmatmul.mubr.msk.bf16.gmra.mrb[28].mxu1 %vm1012_vm2, %v1351_v38  ;;  %8685 = vmatmul.mubr.msk.bf16.gmra.mrb[4].mxu0 %vm1012_vm2, %v2647_v36 }
 0x183   : > { %1755 = vmatprep.mubr.bf16.mxu1 %v11141_v4  ;;  %2776 = vmatprep.mubr.bf16.mxu0 %v11141_v4 }
 0x184   : > { %2963 = vmatpush1.bf16.msra.mxu0 %v10430_v39  ;;  %v12188_v39 = vrot.slane %v3103_v35, %v3111_v17 }
 0x185   : > { %2964 = vmatprep.subr.bf16.mxu0 %v10435_v6 }
 0x188   : > { %2965 = vmatpush1.bf16.msra.mxu0 %v10433_v46 }
 0x18a   : > { %8588 = vmatmul.mubr.msk.bf16.vlgmr.msra.gmra.mrb[0].mxu1 %vm1012_vm2, %v11488_v44  ;;  %8686 = vmatmul.mubr.msk.bf16.gmra.mrb[8].mxu0 %vm1012_vm2, %v2649_v47  ;;  %v2655_v44 = vpop.permute.xlu1 %2654 }
 0x18b   : > { %1765 = vmatprep.mubr.bf16.mxu1 %v11141_v4  ;;  %2786 = vmatprep.mubr.bf16.mxu0 %v11141_v4 }
 0x18c   : > { %8977 = vmatpush3.bf16.msra.mxu1 %v10437_v37 }
 0x18d   : > { %8978 = vmatprep.subr.bf16.mxu1 %v10438_v49 }
 0x190   : > { %8979 = vmatpush3.bf16.msra.mxu1 %v10439_v15 }
 0x191   : > { %8980 = vmatprep.subr.bf16.mxu1 %v10440_v54 }
 0x192   : > { %8589 = vmatmul.mubr.msk.bf16.gmra.mrb[4].mxu1 %vm1012_vm2, %v11500_v50  ;;  %8687 = vmatmul.mubr.msk.bf16.gmra.mrb[12].mxu0 %vm1012_vm2, %v2651_v41  ;;  %v2657_v50 = vpop.permute.xlu1 %2656 }
 0x193   : > { %1775 = vmatprep.mubr.bf16.mxu1 %v11141_v4  ;;  %2796 = vmatprep.mubr.bf16.mxu0 %v11141_v4 }
 0x194   : > { %8981 = vmatpush3.bf16.msra.mxu1 %v10441_v13 }
 0x195   : > { %8982 = vmatprep.subr.bf16.mxu1 %v10442_v31 }
 0x198   : > { %8983 = vmatpush3.bf16.msra.mxu1 %v10443_v61 }
 0x199   : > { %8984 = vmatprep.subr.bf16.mxu1 %v10444_v56 }
 0x19a   : > { %8590 = vmatmul.mubr.msk.bf16.gmra.mrb[8].mxu1 %vm1012_vm2, %v11562_v34  ;;  %8688 = vmatmul.mubr.msk.bf16.gmra.mrb[16].mxu0 %vm1012_vm2, %v2653_v52  ;;  %v2659_v34 = vpop.permute.xlu1 %2658 }
 0x19b   : > { %1785 = vmatprep.mubr.bf16.mxu1 %v11141_v4  ;;  %2806 = vmatprep.mubr.bf16.mxu0 %v11141_v4 }
 0x1a2   : > { %8591 = vmatmul.mubr.msk.bf16.gmra.mrb[12].mxu1 %vm1012_vm2, %v11582_v55  ;;  %8689 = vmatmul.mubr.msk.bf16.gmra.mrb[20].mxu0 %vm1012_vm2, %v2655_v44  ;;  %v2879_v55 = vpop.permute.xlu0 %2878 }
 0x1a3   : > { %1795 = vmatprep.mubr.bf16.mxu1 %v11141_v4  ;;  %2816 = vmatprep.mubr.bf16.mxu0 %v11141_v4 }
 0x1aa   : > { %8592 = vmatmul.mubr.msk.bf16.gmra.mrb[16].mxu1 %vm1012_vm2, %v11540_v7  ;;  %8690 = vmatmul.mubr.msk.bf16.gmra.mrb[24].mxu0 %vm1012_vm2, %v2657_v50  ;;  %v2881_v7 = vpop.permute.xlu1 %2880 }
 0x1ab   : > { %1805 = vmatprep.mubr.bf16.mxu1 %v11141_v4  ;;  %2826 = vmatprep.mubr.bf16.mxu0 %v11141_v4 }
 0x1b2   : > { %8593 = vmatmul.mubr.msk.bf16.gmra.mrb[20].mxu1 %vm1012_vm2, %v11600_v9  ;;  %8691 = vmatmul.mubr.msk.bf16.gmra.mrb[28].mxu0 %vm1012_vm2, %v2659_v34  ;;  %v2883_v9 = vpop.permute.xlu0 %2882 }
 0x1b3   : > { %1815 = vmatprep.mubr.bf16.mxu1 %v11141_v4  ;;  %2990 = vmatprep.mubr.bf16.mxu0 %v11141_v4 }
 0x1b6   : > { %v2887_v53 = vpop.permute.xlu0 %2886 }
 0x1ba   : > { %8594 = vmatmul.mubr.msk.bf16.gmra.mrb[24].mxu1 %vm1012_vm2, %v11568_v40  ;;  %8708 = vmatmul.mubr.msk.bf16.vlgmr.msra.gmra.mrb[0].mxu0 %vm1012_vm2, %v2879_v55  ;;  %v2885_v40 = vpop.permute.xlu1 %2884  ;;  %v2891_v16 = vpop.permute.xlu0 %2890 }
 0x1bb   : > { %1825 = vmatprep.mubr.bf16.mxu1 %v11141_v4  ;;  %3000 = vmatprep.mubr.bf16.mxu0 %v11141_v4 }
 0x1c2   : > { %8595 = vmatmul.mubr.msk.bf16.gmra.mrb[28].mxu1 %vm1012_vm2, %v11608_v30  ;;  %8709 = vmatmul.mubr.msk.bf16.gmra.mrb[4].mxu0 %vm1012_vm2, %v2881_v7  ;;  %v2889_v30 = vpop.permute.xlu1 %2888 }
 0x1c3   : > { %3010 = vmatprep.mubr.bf16.mxu0 %v11141_v4 }
 0x1c6   : > { %v2893_v60 = vpop.permute.xlu1 %2892 }
 0x1ca   : > { %8710 = vmatmul.mubr.msk.bf16.gmra.mrb[8].mxu0 %vm1012_vm2, %v2883_v9 }
 0x1cb   : > { %3020 = vmatprep.mubr.bf16.mxu0 %v11141_v4 }
 0x1d2   : > { %8711 = vmatmul.mubr.msk.bf16.gmra.mrb[12].mxu0 %vm1012_vm2, %v2885_v40 }
 0x1d3   : > { %3030 = vmatprep.mubr.bf16.mxu0 %v11141_v4 }
 0x1da   : > { %8712 = vmatmul.mubr.msk.bf16.gmra.mrb[16].mxu0 %vm1012_vm2, %v2887_v53 }
 0x1db   : > { %3040 = vmatprep.mubr.bf16.mxu0 %v11141_v4 }
 0x1e2   : > { %8713 = vmatmul.mubr.msk.bf16.gmra.mrb[20].mxu0 %vm1012_vm2, %v2889_v30 }
 0x1e3   : > { %3050 = vmatprep.mubr.bf16.mxu0 %v11141_v4 }
 0x1ea   : > { %8714 = vmatmul.mubr.msk.bf16.gmra.mrb[24].mxu0 %vm1012_vm2, %v2891_v16 }
 0x1eb   : > { %3060 = vmatprep.mubr.bf16.mxu0 %v11141_v4  ;;  %v10445_v4 = vld [vmem:[%s13478_s27 + $0x20] sm:$0xff]   ;;  %s13508_s27 = smov (!%p8733_p0), 96  }
 0x1ec   : > { %8985 = vmatpush3.bf16.msra.mxu1 %v10445_v4 }
 0x1ed   : > { %8986 = vmatprep.subr.bf16.mxu1 %v10446_v12 }
 0x1f0   : > { %8987 = vmatpush3.bf16.msra.mxu1 %v10447_v19 }
 0x1f1   : > { %8988 = vmatprep.subr.bf16.mxu1 %v10448_v18 }
 0x1f2   : > { %8715 = vmatmul.mubr.msk.bf16.gmra.mrb[28].mxu0 %vm1012_vm2, %v2893_v60 }
 0x1f4   : > { %8989 = vmatpush3.bf16.msra.mxu1 %v10449_v22 }
 0x1f5   : > { %8990 = vmatprep.subr.bf16.mxu1 %v10450_v23 }
 0x1f8   : > { %8991 = vmatpush3.bf16.msra.mxu1 %v10451_v14 }
 0x25d   : > { %v1757_v1 = vpop.f32.mrb[0].mxu1 }
 0x25e   : > { %v1759_v42 = vpop.f32.mrb[1].mxu1 }
 0x25f   : > { %v1761_v20 = vpop.f32.mrb[2].mxu1 }
 0x260   : > { %v1763_v48 = vpop.f32.mrb[3].mxu1 }
 0x265   : > { %v1767_v0 = vpop.f32.mrb[4].mxu1 }
 0x266   : > { %v1769_v57 = vpop.f32.mrb[5].mxu1 }
 0x267   : > { %v1771_v26 = vpop.f32.mrb[6].mxu1 }
 0x268   : > { %v1773_v51 = vpop.f32.mrb[7].mxu1 }
 0x26d   : > { %v12149_v43 = vpop.f32.mrb[8].mxu1 }
 0x26e   : > { %v12151_v58 = vpop.f32.mrb[9].mxu1 }
 0x26f   : > { %v12153_v63 = vpop.f32.mrb[10].mxu1 }
 0x270   : > { %v12155_v11 = vpop.f32.mrb[11].mxu1 }
 0x275   : > { %v12157_v62 = vpop.f32.mrb[12].mxu1 }
 0x276   : > { %v12159_v3 = vpop.f32.mrb[13].mxu1 }
 0x277   : > { %v12161_v5 = vpop.f32.mrb[14].mxu1 }
 0x278   : > { %v12163_v10 = vpop.f32.mrb[15].mxu1 }
 0x27d   : > { %v12165_v2 = vpop.f32.mrb[16].mxu1 }
 0x27e   : > { %v12167_v59 = vpop.f32.mrb[17].mxu1 }
 0x27f   : > { %v12169_v29 = vpop.f32.mrb[18].mxu1 }
 0x280   : > { %v12171_v27 = vpop.f32.mrb[19].mxu1 }
 0x285   : > { %v12173_v28 = vpop.f32.mrb[20].mxu1 }
 0x286   : > { %v12175_v33 = vpop.f32.mrb[21].mxu1 }
 0x287   : > { %v12177_v45 = vpop.f32.mrb[22].mxu1 }
 0x288   : > { %v12179_v25 = vpop.f32.mrb[23].mxu1 }
 0x28d   : > { %v12186_v36 = vpop.f32.mrb[24].mxu1  ;;  %v2992_v38 = vpop.f32.mrb[0].mxu0 }
 0x28e   : > { %v9971_v6 = vadd.f32 %v2992_v38, %v1757_v1  ;;  %v12190_v46 = vpop.f32.mrb[25].mxu1  ;;  %v2994_v47 = vpop.f32.mrb[1].mxu0 }
 0x28f   : > { %v9972_v37 = vadd.f32 %v2994_v47, %v1759_v42  ;;  %v12192_v41 = vpop.f32.mrb[26].mxu1  ;;  %v2996_v52 = vpop.f32.mrb[2].mxu0 }
 0x290   : > { %v3115_v44 = vadd.f32 %v9971_v6, %v12184_v32  ;;  %v9973_v50 = vadd.f32 %v2996_v52, %v1761_v20  ;;  %v12195_v34 = vpop.f32.mrb[27].mxu1  ;;  %v2998_v55 = vpop.f32.mrb[3].mxu0 }
 0x291   : > { %v3116_v7 = vadd.f32 %v9972_v37, %v12188_v39  ;;  %v9974_v9 = vadd.f32 %v2998_v55, %v1763_v48 }
 0x292   : > { %v3117_v40 = vadd.f32 %v9973_v50, %v12184_v32  ;;  %v3147_v30 = vmax.f32 %v3115_v44, 0.0 }
 0x293   : > { %v3118_v53 = vadd.f32 %v9974_v9, %v12188_v39  ;;  %v3148_v15 = vmax.f32 %v3116_v7, 0.0 }
 0x294   : > { %v3149_v49 = vmax.f32 %v3117_v40, 0.0 }
 0x295   : > { %v3150_v16 = vmax.f32 %v3118_v53, 0.0  ;;  %v12200_v54 = vpop.f32.mrb[28].mxu1  ;;  %v3002_v13 = vpop.f32.mrb[4].mxu0 }
 0x296   : > { %v3179_v60 = vpack.c.bf16 %v3149_v49, %v3147_v30  ;;  %v9975_v31 = vadd.f32 %v3002_v13, %v1767_v0  ;;  %v12202_v61 = vpop.f32.mrb[29].mxu1  ;;  %v3004_v56 = vpop.f32.mrb[5].mxu0 }
 0x297   : > { %v9976_v4 = vadd.f32 %v3004_v56, %v1769_v57  ;;  %v12204_v12 = vpop.f32.mrb[30].mxu1  ;;  %v3006_v19 = vpop.f32.mrb[6].mxu0  ;;  %v3180_v18 = vpack.c.bf16 %v3150_v16, %v3148_v15 }
 0x298   : > { %v3119_v22 = vadd.f32 %v9975_v31, %v12184_v32  ;;  %v9977_v23 = vadd.f32 %v3006_v19, %v1771_v26  ;;  %v12207_v14 = vpop.f32.mrb[31].mxu1  ;;  %v3008_v1 = vpop.f32.mrb[7].mxu0 }
 0x299   : > { %v3120_v42 = vadd.f32 %v9976_v4, %v12188_v39  ;;  %v9978_v20 = vadd.f32 %v3008_v1, %v1773_v51  ;;  %3355 = vmatprep.mubr.bf16.mxu1 %v3180_v18 }
 0x29a   : > { %v3121_v48 = vadd.f32 %v9977_v23, %v12184_v32  ;;  %3356 = vmatmul.mubr.bf16.vlgmr.msra.gmra.mrb[32].mxu1 %v3179_v60  ;;  %v3151_v57 = vmax.f32 %v3119_v22, 0.0 }
 0x29b   : > { %v3122_v0 = vadd.f32 %v9978_v20, %v12188_v39  ;;  %v3152_v24 = vmax.f32 %v3120_v42, 0.0 }
 0x29c   : > { %v3153_v8 = vmax.f32 %v3121_v48, 0.0 }
 0x29d   : > { %v3154_v21 = vmax.f32 %v3122_v0, 0.0  ;;  %v3012_v35 = vpop.f32.mrb[8].mxu0 }
 0x29e   : > { %v9979_v17 = vadd.f32 %v3012_v35, %v12149_v43  ;;  %v3014_v26 = vpop.f32.mrb[9].mxu0  ;;  %v3181_v38 = vpack.c.bf16 %v3153_v8, %v3151_v57 }
 0x29f   : > { %v9980_v6 = vadd.f32 %v3014_v26, %v12151_v58  ;;  %v3016_v47 = vpop.f32.mrb[10].mxu0  ;;  %v3182_v37 = vpack.c.bf16 %v3154_v21, %v3152_v24 }
 0x2a0   : > { %v3123_v51 = vadd.f32 %v9979_v17, %v12184_v32  ;;  %v9981_v52 = vadd.f32 %v3016_v47, %v12153_v63  ;;  %v3018_v44 = vpop.f32.mrb[11].mxu0 }
 0x2a1   : > { %v3124_v50 = vadd.f32 %v9980_v6, %v12188_v39  ;;  %v9982_v55 = vadd.f32 %v3018_v44, %v12155_v11  ;;  %3363 = vmatprep.mubr.bf16.mxu1 %v3182_v37 }
 0x2a2   : > { %v3125_v7 = vadd.f32 %v9981_v52, %v12184_v32  ;;  %3364 = vmatmul.mubr.bf16.gmra.mrb[36].mxu1 %v3181_v38  ;;  %v3155_v9 = vmax.f32 %v3123_v51, 0.0 }
 0x2a3   : > { %v3126_v43 = vadd.f32 %v9982_v55, %v12188_v39  ;;  %v3156_v58 = vmax.f32 %v3124_v50, 0.0 }
 0x2a4   : > { %v3157_v40 = vmax.f32 %v3125_v7, 0.0 }
 0x2a5   : > { %v3158_v53 = vmax.f32 %v3126_v43, 0.0  ;;  %v3022_v30 = vpop.f32.mrb[12].mxu0 }
 0x2a6   : > { %v9983_v49 = vadd.f32 %v3022_v30, %v12157_v62  ;;  %v3024_v15 = vpop.f32.mrb[13].mxu0  ;;  %v3183_v63 = vpack.c.bf16 %v3157_v40, %v3155_v9 }
 0x2a7   : > { %v9984_v16 = vadd.f32 %v3024_v15, %v12159_v3  ;;  %v3026_v13 = vpop.f32.mrb[14].mxu0  ;;  %v3184_v60 = vpack.c.bf16 %v3158_v53, %v3156_v58 }
 0x2a8   : > { %v3127_v11 = vadd.f32 %v9983_v49, %v12184_v32  ;;  %v9985_v31 = vadd.f32 %v3026_v13, %v12161_v5  ;;  %v3028_v56 = vpop.f32.mrb[15].mxu0 }
 0x2a9   : > { %v3128_v4 = vadd.f32 %v9984_v16, %v12188_v39  ;;  %v9986_v19 = vadd.f32 %v3028_v56, %v12163_v10  ;;  %3371 = vmatprep.mubr.bf16.mxu1 %v3184_v60 }
 0x2aa   : > { %v3129_v18 = vadd.f32 %v9985_v31, %v12184_v32  ;;  %3372 = vmatmul.mubr.bf16.gmra.mrb[40].mxu1 %v3183_v63  ;;  %v3159_v22 = vmax.f32 %v3127_v11, 0.0 }
 0x2ab   : > { %v3130_v62 = vadd.f32 %v9986_v19, %v12188_v39  ;;  %v3160_v3 = vmax.f32 %v3128_v4, 0.0 }
 0x2ac   : > { %v3161_v23 = vmax.f32 %v3129_v18, 0.0 }
 0x2ad   : > { %v3162_v1 = vmax.f32 %v3130_v62, 0.0  ;;  %v3032_v42 = vpop.f32.mrb[16].mxu0 }
 0x2ae   : > { %v9987_v20 = vadd.f32 %v3032_v42, %v12165_v2  ;;  %v3034_v48 = vpop.f32.mrb[17].mxu0  ;;  %v3185_v5 = vpack.c.bf16 %v3161_v23, %v3159_v22 }
 0x2af   : > { %v9988_v0 = vadd.f32 %v3034_v48, %v12167_v59  ;;  %v3036_v57 = vpop.f32.mrb[18].mxu0  ;;  %v3186_v8 = vpack.c.bf16 %v3162_v1, %v3160_v3 }
 0x2b0   : > { %v3131_v10 = vadd.f32 %v9987_v20, %v12184_v32  ;;  %v9989_v24 = vadd.f32 %v3036_v57, %v12169_v29  ;;  %v3038_v21 = vpop.f32.mrb[19].mxu0 }
 0x2b1   : > { %v3132_v35 = vadd.f32 %v9988_v0, %v12188_v39  ;;  %v9990_v17 = vadd.f32 %v3038_v21, %v12171_v27  ;;  %3379 = vmatprep.mubr.bf16.mxu1 %v3186_v8 }
 0x2b2   : > { %v3133_v26 = vadd.f32 %v9989_v24, %v12184_v32  ;;  %3380 = vmatmul.mubr.bf16.gmra.mrb[44].mxu1 %v3185_v5  ;;  %v3163_v38 = vmax.f32 %v3131_v10, 0.0 }
 0x2b3   : > { %v3134_v2 = vadd.f32 %v9990_v17, %v12188_v39  ;;  %v3164_v59 = vmax.f32 %v3132_v35, 0.0 }
 0x2b4   : > { %v3165_v6 = vmax.f32 %v3133_v26, 0.0 }
 0x2b5   : > { %v3166_v47 = vmax.f32 %v3134_v2, 0.0  ;;  %v3042_v37 = vpop.f32.mrb[20].mxu0 }
 0x2b6   : > { %v9991_v51 = vadd.f32 %v3042_v37, %v12173_v28  ;;  %v3044_v52 = vpop.f32.mrb[21].mxu0  ;;  %v3187_v29 = vpack.c.bf16 %v3165_v6, %v3163_v38 }
 0x2b7   : > { %v9992_v44 = vadd.f32 %v3044_v52, %v12175_v33  ;;  %v3046_v50 = vpop.f32.mrb[22].mxu0  ;;  %v3188_v55 = vpack.c.bf16 %v3166_v47, %v3164_v59 }
 0x2b8   : > { %v3135_v27 = vadd.f32 %v9991_v51, %v12184_v32  ;;  %v9993_v7 = vadd.f32 %v3046_v50, %v12177_v45  ;;  %v3048_v43 = vpop.f32.mrb[23].mxu0 }
 0x2b9   : > { %v3136_v9 = vadd.f32 %v9992_v44, %v12188_v39  ;;  %v9994_v40 = vadd.f32 %v3048_v43, %v12179_v25  ;;  %3387 = vmatprep.mubr.bf16.mxu1 %v3188_v55 }
 0x2ba   : > { %v3137_v58 = vadd.f32 %v9993_v7, %v12184_v32  ;;  %3388 = vmatmul.mubr.bf16.gmra.mrb[48].mxu1 %v3187_v29  ;;  %v3167_v53 = vmax.f32 %v3135_v27, 0.0 }
 0x2bb   : > { %v3138_v28 = vadd.f32 %v9994_v40, %v12188_v39  ;;  %v3168_v33 = vmax.f32 %v3136_v9, 0.0 }
 0x2bc   : > { %v3169_v30 = vmax.f32 %v3137_v58, 0.0 }
 0x2bd   : > { %v3170_v49 = vmax.f32 %v3138_v28, 0.0  ;;  %v3052_v15 = vpop.f32.mrb[24].mxu0 }
 0x2be   : > { %v9995_v63 = vadd.f32 %v3052_v15, %v12186_v36  ;;  %v3054_v16 = vpop.f32.mrb[25].mxu0  ;;  %v3189_v45 = vpack.c.bf16 %v3169_v30, %v3167_v53 }
 0x2bf   : > { %v9996_v13 = vadd.f32 %v3054_v16, %v12190_v46  ;;  %v3056_v60 = vpop.f32.mrb[26].mxu0  ;;  %v3190_v11 = vpack.c.bf16 %v3170_v49, %v3168_v33 }
 0x2c0   : > { %v3139_v25 = vadd.f32 %v9995_v63, %v12184_v32  ;;  %v9997_v31 = vadd.f32 %v3056_v60, %v12192_v41  ;;  %v3058_v56 = vpop.f32.mrb[27].mxu0 }
 0x2c1   : > { %v3140_v4 = vadd.f32 %v9996_v13, %v12188_v39  ;;  %v9998_v19 = vadd.f32 %v3058_v56, %v12195_v34  ;;  %3395 = vmatprep.mubr.bf16.mxu1 %v3190_v11 }
 0x2c2   : > { %v3141_v18 = vadd.f32 %v9997_v31, %v12184_v32  ;;  %3396 = vmatmul.mubr.bf16.gmra.mrb[52].mxu1 %v3189_v45  ;;  %v3171_v62 = vmax.f32 %v3139_v25, 0.0 }
 0x2c3   : > { %v3142_v36 = vadd.f32 %v9998_v19, %v12188_v39  ;;  %v3172_v46 = vmax.f32 %v3140_v4, 0.0 }
 0x2c4   : > { %v3173_v22 = vmax.f32 %v3141_v18, 0.0 }
 0x2c5   : > { %v3174_v23 = vmax.f32 %v3142_v36, 0.0  ;;  %v3062_v3 = vpop.f32.mrb[28].mxu0 }
 0x2c6   : > { %v9999_v1 = vadd.f32 %v3062_v3, %v12200_v54  ;;  %v3064_v42 = vpop.f32.mrb[29].mxu0  ;;  %v3191_v41 = vpack.c.bf16 %v3173_v22, %v3171_v62 }
 0x2c7   : > { %v10000_v20 = vadd.f32 %v3064_v42, %v12202_v61  ;;  %v3066_v48 = vpop.f32.mrb[30].mxu0  ;;  %v3192_v5 = vpack.c.bf16 %v3174_v23, %v3172_v46 }
 0x2c8   : > { %v3143_v34 = vadd.f32 %v9999_v1, %v12184_v32  ;;  %v10001_v0 = vadd.f32 %v3066_v48, %v12204_v12  ;;  %v3068_v57 = vpop.f32.mrb[31].mxu0 }
 0x2c9   : > { %v3144_v8 = vadd.f32 %v10000_v20, %v12188_v39  ;;  %v10002_v10 = vadd.f32 %v3068_v57, %v12207_v14  ;;  %3403 = vmatprep.mubr.bf16.mxu1 %v3192_v5 }
 0x2ca   : > { %v3145_v24 = vadd.f32 %v10001_v0, %v12184_v32  ;;  %3404 = vmatmul.mubr.bf16.gmra.mrb[56].mxu1 %v3191_v41  ;;  %v3175_v21 = vmax.f32 %v3143_v34, 0.0 }
 0x2cb   : > { %v3146_v54 = vadd.f32 %v10002_v10, %v12188_v39  ;;  %v3176_v61 = vmax.f32 %v3144_v8, 0.0 }
 0x2cc   : > { %v3177_v35 = vmax.f32 %v3145_v24, 0.0 }
 0x2cd   : > { %v3178_v17 = vmax.f32 %v3146_v54, 0.0 }
 0x2ce   : > { %v3193_v26 = vpack.c.bf16 %v3177_v35, %v3175_v21 }
 0x2cf   : > { %v3194_v2 = vpack.c.bf16 %v3178_v17, %v3176_v61 }
 0x2d1   : > { %3411 = vmatprep.mubr.bf16.mxu1 %v3194_v2 }
 0x2d2   : > { %3412 = vmatmul.mubr.bf16.gmra.mrb[60].mxu1 %v3193_v26 }
 0x36d   : > { %v8992_v12 = vpop.f32.mrb[32].mxu1 }
 0x36e   : > { %v8993_v38 = vpop.f32.mrb[33].mxu1 }
 0x36f   : > { %v8994_v6 = vadd.f32 %v8993_v38, %v8992_v12  ;;  %v8995_v59 = vpop.f32.mrb[34].mxu1 }
 0x370   : > { %v8996_v14 = vpop.f32.mrb[35].mxu1 }
 0x371   : > { %v8997_v47 = vadd.f32 %v8996_v14, %v8995_v59  ;;  %v3421_v32 = vsel %vm3420_vm3, %v8994_v6, 0.0 }
 0x373   : > { %v3422_v37 = vsel %vm3420_vm3, %v8997_v47, 0.0 }
 0x374   : > { %v3423_v39 = vadd.f32 %v3422_v37, %v3421_v32 }
 0x375   : > { %v8998_v51 = vpop.f32.mrb[36].mxu1 }
 0x376   : > { %v3424_v52 = vrot.slane %v3423_v39, 4  ;;  %v8999_v29 = vpop.f32.mrb[37].mxu1 }
 0x377   : > { %v9000_v44 = vadd.f32 %v8999_v29, %v8998_v51  ;;  %v9001_v50 = vpop.f32.mrb[38].mxu1 }
 0x378   : > { %v3425_v55 = vadd.f32 %v3424_v52, %v3423_v39  ;;  %v9002_v27 = vpop.f32.mrb[39].mxu1 }
 0x379   : > { %v9003_v7 = vadd.f32 %v9002_v27, %v9001_v50  ;;  %v3430_v9 = vsel %vm3420_vm3, %v9000_v44, 0.0 }
 0x37a   : > { %v3426_v43 = vrot.slane %v3425_v55, 2 }
 0x37b   : > { %v3431_v40 = vsel %vm3420_vm3, %v9003_v7, 0.0 }
 0x37c   : > { %v3432_v58 = vadd.f32 %v3431_v40, %v3430_v9  ;;  %v3427_v53 = vadd.f32 %v3426_v43, %v3425_v55 }
 0x37d   : > { %v9004_v28 = vpop.f32.mrb[40].mxu1 }
 0x37e   : > { %v3433_v30 = vrot.slane %v3432_v58, 4  ;;  %v9005_v33 = vpop.f32.mrb[41].mxu1  ;;  %v3428_v13 = vrot.slane %v3427_v53, 1 }
 0x37f   : > { %v9006_v49 = vadd.f32 %v9005_v33, %v9004_v28  ;;  %v9007_v15 = vpop.f32.mrb[42].mxu1 }
 0x380   : > { %v3434_v63 = vadd.f32 %v3433_v30, %v3432_v58  ;;  %v9008_v16 = vpop.f32.mrb[43].mxu1  ;;  %v3429_v19 = vadd.f32 %v3428_v13, %v3427_v53 }
 0x381   : > { %v9009_v45 = vadd.f32 %v9008_v16, %v9007_v15  ;;  %v3439_v11 = vsel %vm3420_vm3, %v9006_v49, 0.0 }
 0x382   : > { %v3435_v60 = vrot.slane %v3434_v63, 2  ;;  %v3494_v41 = vmul.f32 0.0625, %v3429_v19 }
 0x383   : > { %v3440_v25 = vsel %vm3420_vm3, %v9009_v45, 0.0 }
 0x384   : > { %v3436_v31 = vadd.f32 %v3435_v60, %v3434_v63  ;;  %v3441_v56 = vadd.f32 %v3440_v25, %v3439_v11 }
 0x385   : > { %v9010_v4 = vpop.f32.mrb[44].mxu1 }
 0x386   : > { %v3437_v18 = vrot.slane %v3436_v31, 1  ;;  %v3442_v36 = vrot.slane %v3441_v56, 4  ;;  %v9011_v62 = vpop.f32.mrb[45].mxu1 }
 0x387   : > { %v9012_v22 = vadd.f32 %v9011_v62, %v9010_v4  ;;  %v9013_v46 = vpop.f32.mrb[46].mxu1 }
 0x388   : > { %v3438_v23 = vadd.f32 %v3437_v18, %v3436_v31  ;;  %v3443_v3 = vadd.f32 %v3442_v36, %v3441_v56  ;;  %v9014_v1 = vpop.f32.mrb[47].mxu1 }
 0x389   : > { %v9015_v42 = vadd.f32 %v9014_v1, %v9013_v46  ;;  %v3448_v5 = vsel %vm3420_vm3, %v9012_v22, 0.0 }
 0x38a   : > { %v3495_v20 = vmul.f32 0.0625, %v3438_v23  ;;  %v3444_v48 = vrot.slane %v3443_v3, 2 }
 0x38b   : > { %v3449_v34 = vsel %vm3420_vm3, %v9015_v42, 0.0 }
 0x38c   : > { %v3511_v0 = vsel %vm3510_vm4, %v3495_v20, %v3494_v41  ;;  %v3445_v57 = vadd.f32 %v3444_v48, %v3443_v3  ;;  %v3450_v8 = vadd.f32 %v3449_v34, %v3448_v5 }
 0x38d   : > { %v9016_v10 = vpop.f32.mrb[48].mxu1 }
 0x38e   : > { %v3446_v24 = vrot.slane %v3445_v57, 1  ;;  %v3451_v54 = vrot.slane %v3450_v8, 4  ;;  %v9017_v21 = vpop.f32.mrb[49].mxu1 }
 0x38f   : > { %v9018_v35 = vadd.f32 %v9017_v21, %v9016_v10  ;;  %v9019_v61 = vpop.f32.mrb[50].mxu1 }
 0x390   : > { %v3447_v17 = vadd.f32 %v3446_v24, %v3445_v57  ;;  %v3452_v26 = vadd.f32 %v3451_v54, %v3450_v8  ;;  %v9020_v2 = vpop.f32.mrb[51].mxu1 }
 0x391   : > { %v9021_v12 = vadd.f32 %v9020_v2, %v9019_v61  ;;  %v3457_v59 = vsel %vm3420_vm3, %v9018_v35, 0.0 }
 0x392   : > { %v3496_v38 = vmul.f32 0.0625, %v3447_v17  ;;  %v3453_v6 = vrot.slane %v3452_v26, 2 }
 0x393   : > { %v3458_v14 = vsel %vm3420_vm3, %v9021_v12, 0.0 }
 0x394   : > { %v3513_v47 = vsel %vm3512_vm5, %v3496_v38, %v3511_v0  ;;  %v3454_v32 = vadd.f32 %v3453_v6, %v3452_v26  ;;  %v3459_v37 = vadd.f32 %v3458_v14, %v3457_v59 }
 0x395   : > { %v9022_v39 = vpop.f32.mrb[52].mxu1 }
 0x396   : > { %v3455_v51 = vrot.slane %v3454_v32, 1  ;;  %v3460_v52 = vrot.slane %v3459_v37, 4  ;;  %v9023_v29 = vpop.f32.mrb[53].mxu1 }
 0x397   : > { %v9024_v44 = vadd.f32 %v9023_v29, %v9022_v39  ;;  %v9025_v50 = vpop.f32.mrb[54].mxu1 }
 0x398   : > { %v3456_v55 = vadd.f32 %v3455_v51, %v3454_v32  ;;  %v3461_v27 = vadd.f32 %v3460_v52, %v3459_v37  ;;  %v9026_v7 = vpop.f32.mrb[55].mxu1  ;;  %v10790_v37 = vld [vmem:[%s13481_s11] sm:$0xff] (!%p8733_p0)   ;;  %s13425_s11 = smov (!%p8733_p0), 56  }
 0x399   : > { %v9027_v43 = vadd.f32 %v9026_v7, %v9025_v50  ;;  %v3466_v58 = vsel %vm3420_vm3, %v9024_v44, 0.0  ;;  %9284 = vmatprep.subr.bf16.mxu0 (!%p8733_p0), %v10790_v37  ;;  %v8734_v7 = vld [vmem:[%s13484_s9] ss:$0 sm:$0xff] (!%p8733_p0)  ;;  %s13409_s9 = smov (!%p8733_p0), 8  }
 0x39a   : > { %v3497_v9 = vmul.f32 0.0625, %v3456_v55  ;;  %v3462_v40 = vrot.slane %v3461_v27, 2  ;;  %9285 = vmatpush3.bf16.msra.mxu0 (!%p8733_p0), %v10790_v37  ;;  %v10791_v55 = vld [vmem:[%s13482_s30] sm:$0xff] (!%p8733_p0)   ;;  %s13419_s30 = smov (!%p8733_p0), 112  }
 0x39b   : > { %v3467_v28 = vsel %vm3420_vm3, %v9027_v43, 0.0  ;;  %9290 = vmatprep.subr.bf16.mxu1 (!%p8733_p0), %v10791_v55 }
 0x39c   : > { %v3515_v53 = vsel %vm3514_vm6, %v3497_v9, %v3513_v47  ;;  %v3463_v30 = vadd.f32 %v3462_v40, %v3461_v27  ;;  %v3468_v33 = vadd.f32 %v3467_v28, %v3466_v58  ;;  %9291 = vmatpush3.bf16.msra.mxu1 (!%p8733_p0), %v10791_v55  ;;  %v10792_v27 = vld [vmem:[%s13483_s2 + $0x8] sm:$0xff] (!%p8733_p0)  }
 0x39d   : > { %v9028_v49 = vpop.f32.mrb[56].mxu1  ;;  %9292 = vmatprep.subr.bf16.mxu1 (!%p8733_p0), %v10792_v27 }
 0x39e   : > { %v3464_v15 = vrot.slane %v3463_v30, 1  ;;  %v3469_v63 = vrot.slane %v3468_v33, 4  ;;  %v9029_v16 = vpop.f32.mrb[57].mxu1 }
 0x39f   : > { %v9030_v45 = vadd.f32 %v9029_v16, %v9028_v49  ;;  %v9031_v13 = vpop.f32.mrb[58].mxu1 }
 0x3a0   : > { %v3465_v60 = vadd.f32 %v3464_v15, %v3463_v30  ;;  %v3470_v11 = vadd.f32 %v3469_v63, %v3468_v33  ;;  %v9032_v25 = vpop.f32.mrb[59].mxu1  ;;  %9293 = vmatpush3.bf16.msra.mxu1 (!%p8733_p0), %v10792_v27 }
 0x3a1   : > { %v9033_v31 = vadd.f32 %v9032_v25, %v9031_v13  ;;  %v3475_v19 = vsel %vm3420_vm3, %v9030_v45, 0.0 }
 0x3a2   : > { %v3498_v56 = vmul.f32 0.0625, %v3465_v60  ;;  %v3471_v4 = vrot.slane %v3470_v11, 2  ;;  %v8738_v60 = vld [vmem:[%s13485_s24] ss:$0 sm:$0xff] (!%p8733_p0)  ;;  %s13427_s24 = smov (!%p8733_p0), 120  }
 0x3a3   : > { %v3476_v18 = vsel %vm3420_vm3, %v9033_v31, 0.0 }
 0x3a4   : > { %v3517_v36 = vsel %vm3516_vm7, %v3498_v56, %v3515_v53  ;;  %v3472_v62 = vadd.f32 %v3471_v4, %v3470_v11  ;;  %v3477_v22 = vadd.f32 %v3476_v18, %v3475_v19 }
 0x3a5   : > { %v9034_v46 = vpop.f32.mrb[60].mxu1 }
 0x3a6   : > { %v3473_v23 = vrot.slane %v3472_v62, 1  ;;  %v3478_v3 = vrot.slane %v3477_v22, 4  ;;  %v9035_v1 = vpop.f32.mrb[61].mxu1 }
 0x3a7   : > { %v9036_v42 = vadd.f32 %v9035_v1, %v9034_v46  ;;  %v9037_v41 = vpop.f32.mrb[62].mxu1 }
 0x3a8   : > { %v3474_v20 = vadd.f32 %v3473_v23, %v3472_v62  ;;  %v3479_v48 = vadd.f32 %v3478_v3, %v3477_v22  ;;  %v9038_v5 = vpop.f32.mrb[63].mxu1 }
 0x3a9   : > { %v9039_v34 = vadd.f32 %v9038_v5, %v9037_v41  ;;  %v3484_v8 = vsel %vm3420_vm3, %v9036_v42, 0.0 }
 0x3aa   : > { %v3499_v0 = vmul.f32 0.0625, %v3474_v20  ;;  %v3480_v57 = vrot.slane %v3479_v48, 2 }
 0x3ab   : > { %v3485_v10 = vsel %vm3420_vm3, %v9039_v34, 0.0 }
 0x3ac   : > { %v3519_v24 = vsel %vm3518_vm8, %v3499_v0, %v3517_v36  ;;  %v3481_v54 = vadd.f32 %v3480_v57, %v3479_v48  ;;  %v3486_v21 = vadd.f32 %v3485_v10, %v3484_v8  ;;  %v12347_v57 = vld [vmem:[%s13488_s12] sm:$0xff] (!%p8733_p0) }
 0x3ae   : > { %v3482_v35 = vrot.slane %v3481_v54, 1  ;;  %v3487_v61 = vrot.slane %v3486_v21, 4 }
 0x3b0   : > { %v3483_v17 = vadd.f32 %v3482_v35, %v3481_v54  ;;  %v3488_v26 = vadd.f32 %v3487_v61, %v3486_v21  ;;  %v12358_v61 = vld [vmem:[%s13488_s12 + $0x10] sm:$0xff] (!%p8733_p0) }
 0x3b2   : > { %v3500_v2 = vmul.f32 0.0625, %v3483_v17  ;;  %v3489_v12 = vrot.slane %v3488_v26, 2 }
 0x3b4   : > { %v3521_v38 = vsel %vm3520_vm9, %v3500_v2, %v3519_v24  ;;  %v3490_v6 = vadd.f32 %v3489_v12, %v3488_v26  ;;  %v12352_v24 = vld [vmem:[%s13488_s12 + $0x8] sm:$0xff] (!%p8733_p0) }
 0x3b6   : > { %v3491_v59 = vrot.slane %v3490_v6, 1 }
 0x3b7   : > { %3531 = sbr.rel (%p8733_p0) target bundleno = 13514 (0x34ca), region = 136 }
 0x3b8   : > { %v3492_v14 = vadd.f32 %v3491_v59, %v3490_v6 }
 0x3ba   : > { %v3501_v47 = vmul.f32 0.0625, %v3492_v14 }
 0x3bc   : > { %v3523_v32 = vsel %vm3522_vm10, %v3501_v47, %v3521_v38  ;;  %v12365_v38 = vld [vmem:[%s13488_s12 + $0x18] sm:$0xff] (!%p8733_p0)  ;;  %s13512_s12 = sld [smem:[#allocation35_spill]] (!%p8733_p0) }
 0x3bd   : > { %3527 = vst.msk [vmem:[%s3526_s8] sm:$0xff] %vm3420_vm3, %v3523_v32  ;;  %s13429_s8 = smov (!%p8733_p0), 88  }
 0x3c4   : > { %v3532_v39 = vld [vmem:[#allocation2] sm:$0xff]  ;;  %v3533_v51 = vld [vmem:[#allocation2 + $0x8] sm:$0xff]  ;;  %v3534_v52 = vld [vmem:[#allocation2 + $0x10] sm:$0xff] }
 0x3c5   : > { %v3536_v29 = vpack.c.bf16 %v3533_v51, %v3532_v39  ;;  %v3535_v44 = vld [vmem:[#allocation2 + $0x18] sm:$0xff] }
 0x3c6   : > { %v3537_v50 = vpack.c.bf16 %v3535_v44, %v3534_v52 }
 0x3c7   : > { %9286 = vmatprep.mubr.msk.bf16.mxu0 %vm3420_vm3, %v3536_v29 }
 0x3c8   : > { %9287 = vmatmul.mubr.msk.bf16.vlgmr.msra.gmra.mrb[0].mxu0 %vm3420_vm3, %v3537_v50 }
 0x49b   : > { %v9288_v43 = vpop.f32.mrb[0].mxu0 }
 0x49c   : > { %v3602_v9 = vadd.f32 %v9288_v43, %v8734_v7  ;;  %v3593_v40 = vpop.f32.mrb[1].mxu0 }
 0x49d   : > { %v3594_v58 = vadd.f32 %v8734_v7, %v3593_v40  ;;  %v9289_v28 = vpop.f32.mrb[2].mxu0 }
 0x49e   : > { %v3605_v53 = vadd.f32 %v9289_v28, %v8734_v7  ;;  %v3596_v30 = vpop.f32.mrb[3].mxu0  ;;  %v3610_v49 = vmax.f32 %v3602_v9, 0.0 }
 0x49f   : > { %v3597_v33 = vadd.f32 %v8734_v7, %v3596_v30  ;;  %v3608_v63 = vmax.f32 %v3594_v58, 0.0 }
 0x4a0   : > { %v3611_v15 = vmax.f32 %v3605_v53, 0.0 }
 0x4a1   : > { %v3609_v16 = vmax.f32 %v3597_v33, 0.0 }
 0x4a2   : > { %v3627_v45 = vpack.c.bf16 %v3611_v15, %v3610_v49 }
 0x4a3   : > { %v3626_v13 = vpack.c.bf16 %v3609_v16, %v3608_v63 }
 0x4a5   : > { %9294 = vmatprep.mubr.msk.bf16.mxu1 %vm3646_vm11, %v3626_v13 }
 0x4a6   : > { %9295 = vmatmul.mubr.msk.bf16.vlgmr.msra.gmra.mrb[0].mxu1 %vm3646_vm11, %v3627_v45 }
 0x579   : > { %v9296_v11 = vpop.f32.mrb[0].mxu1 }
 0x57a   : > { %v3687_v25 = vpop.f32.mrb[1].mxu1  ;;  %v12314_v62 = vadd.f32 %v9296_v11, %v8738_v60 }
 0x57b   : > { %v12302_v31 = vadd.f32 %v8738_v60, %v3687_v25  ;;  %v9297_v56 = vpop.f32.mrb[2].mxu1 }
 0x57c   : > { %v3690_v4 = vpop.f32.mrb[3].mxu1  ;;  %v12308_v18 = vadd.f32 %v9297_v56, %v8738_v60 }
 0x57d   : > { %v12304_v19 = vadd.f32 %v8738_v60, %v3690_v4  ;;  %9306 = vmatprep.mubr.msk.f32.mxu0 %vm3714_vm12, %v12302_v31 }
 0x57e   : > { %v12320_v22 = vpack.i.bf16 %v12308_v18, %v12314_v62 }
 0x57f   : > { %v12312_v36 = vpack.i.bf16 %v12304_v19, %v12302_v31 }
 0x581   : > { %10461 = vrot.lane.b32.xlu0 %v12312_v36, %s13433_s25 }
 0x585   : > { %10466 = vrot.lane.b32.xlu0 %v12320_v22, %s13433_s25 }
 0x5f3   : > { %v10462_v46 = vpop.permute.xlu0 %10461 }
 0x5f4   : > { %v10464_v23 = vunpack.i.h.bf16 %v10462_v46  ;;  %v10463_v3 = vunpack.i.l.bf16 %v10462_v46 }
 0x5f6   : > { %v9725_v42 = vpack.c.bf16 %v10464_v23, %v10463_v3 }
 0x5f7   : > { %v10467_v41 = vpop.permute.xlu0 %10466 }
 0x5f8   : > { %v10469_v20 = vunpack.i.h.bf16 %v10467_v41  ;;  %v10468_v48 = vunpack.i.l.bf16 %v10467_v41  ;;  %9727 = vmatprep.subr.msk.bf16.mxu0 %vm12326_vm13, %v9725_v42 }
 0x5f9   : > { %9730 = vmatpush3.bf16.xpose.msk.msra.mxu0 %vm12326_vm13, %v9725_v42 }
 0x5fa   : > { %v9731_v5 = vpack.c.bf16 %v10469_v20, %v10468_v48 }
 0x5fc   : > { %9733 = vmatprep.subr.msk.bf16.mxu0 %vm12326_vm13, %v9731_v5 }
 0x601   : > { %9736 = vmatpush3.bf16.xpose.msk.msra.mxu0 %vm12326_vm13, %v9731_v5 }
 0x608   : > { %9307 = vmatmul.mubr.msk.f32.vlgmr.msra.gmra.mrb[4].mxu0 %vm3714_vm12, %v12304_v19 }
 0x609   : > { %9309 = vmatprep.mubr.msk.f32.mxu0 %vm3714_vm12, %v12314_v62 }
 0x60c   : > { %9310 = vmatmul.mubr.msk.f32.gmra.mrb[6].mxu0 %vm3714_vm12, %v12308_v18 }
 0x6db   : > { %v9308_v34 = vpop.f32.mrb[4].mxu0 }
 0x6dc   : > { %v3797_v0 = vpop.f32.mrb[5].mxu0  ;;  %v3817_v8 = vmul.f32 0.35355338, %v9308_v34 }
 0x6dd   : > { %v3816_v10 = vmul.f32 0.35355338, %v3797_v0 }
 0x6de   : > { %v3821_v12 = vadd.f32 %v3817_v8, %v12352_v24 }
 0x6df   : > { %v9311_v54 = vpop.f32.mrb[6].mxu0  ;;  %v3820_v21 = vadd.f32 %v3816_v10, %v12347_v57 }
 0x6e0   : > { %v3807_v35 = vpop.f32.mrb[7].mxu0  ;;  %v3819_v17 = vmul.f32 0.35355338, %v9311_v54  ;;  %v3827_v59 = vsel %vm3646_vm11, %v3821_v12, -inf }
 0x6e1   : > { %v3818_v26 = vmul.f32 0.35355338, %v3807_v35  ;;  %v3824_v2 = vsel %vm3646_vm11, %v3820_v21, -inf }
 0x6e2   : > { %3825 = vmax.xlane.f32.xlu1 %v3824_v2  ;;  %v3823_v47 = vadd.f32 %v3819_v17, %v12365_v38 }
 0x6e3   : > { %v3822_v6 = vadd.f32 %v3818_v26, %v12358_v61 }
 0x6e4   : > { %v3833_v32 = vsel %vm3646_vm11, %v3823_v47, -inf }
 0x6e5   : > { %v3830_v14 = vsel %vm3646_vm11, %v3822_v6, -inf }
 0x6e6   : > { %3828 = vmax.xlane.f32.xlu1 %v3827_v59  ;;  %3831 = vmax.xlane.f32.xlu0 %v3830_v14 }
 0x6ea   : > { %3834 = vmax.xlane.f32.xlu1 %v3833_v32 }
 0x6fb   : > { %10471 = vrot.lane.b32.xlu1 %v12312_v36, %s13431_s3 }
 0x6fc   : > { %10476 = vrot.lane.b32.xlu0 %v12320_v22, %s13431_s3 }
 0x6ff   : > { %10481 = vrot.lane.b32.xlu1 %v12312_v36, %s13429_s8 }
 0x700   : > { %3981 = vrot.lane.b32.xlu0 %v12314_v62, %s13427_s24 }
 0x703   : > { %10486 = vrot.lane.b32.xlu1 %v12320_v22, %s13429_s8 }
 0x707   : > { %3977 = vrot.lane.b32.xlu1 %v12302_v31, %s13427_s24 }
 0x76f   : > { %v3826_v37 = vpop.xlane.xlu1 %3825 }
 0x770   : > { %v3836_v39 = vsub.f32 %v3820_v21, %v3826_v37 }
 0x772   : > { %v3840_v44 = vmul.f32 1.442695, %v3836_v39 }
 0x773   : > { %v3829_v51 = vpop.xlane.xlu1 %3828  ;;  %v3832_v52 = vpop.xlane.xlu0 %3831 }
 0x774   : > { %v3837_v29 = vsub.f32 %v3821_v12, %v3829_v51  ;;  %v3838_v43 = vsub.f32 %v3822_v6, %v3832_v52 }
 0x776   : > { %v3842_v50 = vmul.f32 1.442695, %v3837_v29  ;;  %v3844_v33 = vmul.f32 1.442695, %v3838_v43 }
 0x777   : > { %v3835_v55 = vpop.xlane.xlu1 %3834  ;;  %v10477_v7 = vpop.permute.xlu0 %10476 }
 0x778   : > { %10815 = vpow2.f32 %v3842_v50  ;;  %v3839_v27 = vsub.f32 %v3823_v47, %v3835_v55  ;;  %v10479_v58 = vunpack.i.h.bf16 %v10477_v7  ;;  %v10478_v28 = vunpack.i.l.bf16 %v10477_v7 }
 0x779   : > { %10817 = vpow2.f32 %v3840_v44 }
 0x77a   : > { %v3846_v9 = vmul.f32 1.442695, %v3839_v27  ;;  %v9741_v45 = vpack.c.bf16 %v10479_v58, %v10478_v28 }
 0x77b   : > { %v10472_v40 = vpop.permute.xlu1 %10471  ;;  %v3982_v14 = vpop.permute.xlu0 %3981 }
 0x77c   : > { %v10474_v53 = vunpack.i.h.bf16 %v10472_v40  ;;  %v10473_v30 = vunpack.i.l.bf16 %v10472_v40  ;;  %10819 = vpow2.f32 %v3846_v9 }
 0x77d   : > { %10821 = vpow2.f32 %v3844_v33 }
 0x77e   : > { %v9737_v49 = vpack.c.bf16 %v10474_v53, %v10473_v30 }
 0x77f   : > { %v10482_v15 = vpop.permute.xlu1 %10481 }
 0x780   : > { %v10484_v63 = vunpack.i.h.bf16 %v10482_v15  ;;  %v10483_v16 = vunpack.i.l.bf16 %v10482_v15  ;;  %9738 = vmatprep.subr.bf16.mxu1 %v9737_v49 }
 0x781   : > { %9740 = vmatpush3.bf16.msra.mxu1 %v9737_v49 }
 0x782   : > { %v10816_v13 = vpop.eup %10815  ;;  %9742 = vmatprep.subr.bf16.mxu1 %v9741_v45  ;;  %v9745_v25 = vpack.c.bf16 %v10484_v63, %v10483_v16 }
 0x783   : > { %v3851_v60 = vsel %vm3646_vm11, %v10816_v13, 0.0  ;;  %v10818_v11 = vpop.eup %10817  ;;  %v10487_v42 = vpop.permute.xlu1 %10486 }
 0x784   : > { %3852 = vadd.xlane.f32.xlu1 %v3851_v60  ;;  %v3848_v56 = vsel %vm3646_vm11, %v10818_v11, 0.0  ;;  %v10489_v10 = vunpack.i.h.bf16 %v10487_v42  ;;  %v10488_v54 = vunpack.i.l.bf16 %v10487_v42 }
 0x785   : > { %9744 = vmatpush3.bf16.msra.mxu1 %v9741_v45 }
 0x786   : > { %9747 = vmatprep.subr.msk.bf16.mxu1 %vm12326_vm13, %v9745_v25  ;;  %v10820_v4 = vpop.eup %10819  ;;  %v9751_v17 = vpack.c.bf16 %v10489_v10, %v10488_v54 }
 0x787   : > { %v3857_v46 = vsel %vm3646_vm11, %v10820_v4, 0.0  ;;  %v10822_v23 = vpop.eup %10821  ;;  %v3978_v41 = vpop.permute.xlu1 %3977 }
 0x788   : > { %3849 = vadd.xlane.f32.xlu1 %v3848_v56  ;;  %v3854_v3 = vsel %vm3646_vm11, %v10822_v23, 0.0 }
 0x78c   : > { %3858 = vadd.xlane.f32.xlu1 %v3857_v46 }
 0x790   : > { %3855 = vadd.xlane.f32.xlu1 %v3854_v3 }
 0x7a1   : > { %3979 = vrot.lane.b32.xlu1 %v12304_v19, %s13427_s24 }
 0x7a5   : > { %3983 = vrot.lane.b32.xlu1 %v12308_v18, %s13427_s24  ;;  %s13493_s24 = sld [smem:[#allocation30_spill]] }
 0x811   : > { %v3853_v20 = vpop.xlane.xlu1 %3852 }
 0x812   : > { %10823 = vrcp.f32 %v3853_v20 }
 0x815   : > { %v3850_v48 = vpop.xlane.xlu1 %3849 }
 0x816   : > { %10825 = vrcp.f32 %v3850_v48 }
 0x819   : > { %v3859_v5 = vpop.xlane.xlu1 %3858 }
 0x81a   : > { %10827 = vrcp.f32 %v3859_v5 }
 0x81c   : > { %v10824_v0 = vpop.eup %10823 }
 0x81d   : > { %v3856_v34 = vpop.xlane.xlu1 %3855  ;;  %v3863_v35 = vmul.f32 %v10824_v0, %v10816_v13 }
 0x81e   : > { %10829 = vrcp.f32 %v3856_v34 }
 0x820   : > { %v10826_v8 = vpop.eup %10825 }
 0x821   : > { %v3861_v21 = vmul.f32 %v10826_v8, %v10818_v11  ;;  %v3980_v59 = vpop.permute.xlu1 %3979 }
 0x823   : > { %9320 = vmatprep.mubr.msk.f32.mxu1 %vm3646_vm11, %v3861_v21 }
 0x824   : > { %9321 = vmatmul.mubr.msk.f32.vlgmr.msra.gmra.mrb[4].mxu1 %vm3646_vm11, %v3863_v35  ;;  %v10828_v26 = vpop.eup %10827 }
 0x825   : > { %9750 = vmatpush3.bf16.xpose.msk.msra.mxu1 %vm12326_vm13, %v9745_v25  ;;  %v3867_v6 = vmul.f32 %v10828_v26, %v10820_v4  ;;  %v3984_v47 = vpop.permute.xlu1 %3983 }
 0x826   : > { %9753 = vmatprep.subr.msk.bf16.mxu1 %vm12326_vm13, %v9751_v17 }
 0x828   : > { %v10830_v2 = vpop.eup %10829 }
 0x829   : > { %v3865_v12 = vmul.f32 %v10830_v2, %v10822_v23 }
 0x82b   : > { %9323 = vmatprep.mubr.msk.f32.mxu1 %vm3646_vm11, %v3865_v12 }
 0x82c   : > { %9324 = vmatmul.mubr.msk.f32.gmra.mrb[6].mxu1 %vm3646_vm11, %v3867_v6 }
 0x82d   : > { %9756 = vmatpush3.bf16.xpose.msk.msra.mxu1 %vm12326_vm13, %v9751_v17  ;;  %9334 = vmatprep.mubr.msk.f32.mxu1 %vm3714_vm12, %v3978_v41 }
 0x834   : > { %9335 = vmatmul.mubr.msk.f32.vlgmr.msra.gmra.mrb[8].mxu1 %vm3714_vm12, %v3980_v59 }
 0x835   : > { %9337 = vmatprep.mubr.msk.f32.mxu1 %vm3714_vm12, %v3982_v14 }
 0x838   : > { %9338 = vmatmul.mubr.msk.f32.gmra.mrb[10].mxu1 %vm3714_vm12, %v3984_v47 }
 0x8f7   : > { %v12408_v32 = vpop.f32.mrb[4].mxu1 }
 0x8f8   : > { %v12410_v37 = vpop.f32.mrb[5].mxu1 }
 0x8ff   : > { %v12412_v39 = vpop.f32.mrb[6].mxu1 }
 0x900   : > { %v12414_v51 = vpop.f32.mrb[7].mxu1 }
 0x907   : > { %v9336_v52 = vpop.f32.mrb[8].mxu1 }
 0x908   : > { %v4095_v29 = vmul.f32 0.35355338, %v9336_v52  ;;  %v4075_v44 = vpop.f32.mrb[9].mxu1 }
 0x909   : > { %v4094_v50 = vmul.f32 0.35355338, %v4075_v44 }
 0x90a   : > { %v4099_v55 = vadd.f32 %v4095_v29, %v12352_v24 }
 0x90b   : > { %v9339_v27 = vpop.f32.mrb[10].mxu1  ;;  %v4098_v7 = vadd.f32 %v4094_v50, %v12347_v57 }
 0x90c   : > { %v4085_v43 = vpop.f32.mrb[11].mxu1  ;;  %v4105_v9 = vsel %vm3646_vm11, %v4099_v55, -inf  ;;  %v4097_v40 = vmul.f32 0.35355338, %v9339_v27 }
 0x90d   : > { %v4096_v58 = vmul.f32 0.35355338, %v4085_v43  ;;  %4106 = vmax.xlane.f32.xlu1 %v4105_v9  ;;  %v4102_v28 = vsel %vm3646_vm11, %v4098_v7, -inf }
 0x90e   : > { %4103 = vmax.xlane.f32.xlu0 %v4102_v28  ;;  %v4101_v33 = vadd.f32 %v4097_v40, %v12365_v38 }
 0x90f   : > { %v4100_v53 = vadd.f32 %v4096_v58, %v12358_v61 }
 0x910   : > { %v4111_v49 = vsel %vm3646_vm11, %v4101_v33, -inf }
 0x911   : > { %v4108_v30 = vsel %vm3646_vm11, %v4100_v53, -inf }
 0x912   : > { %4109 = vmax.xlane.f32.xlu0 %v4108_v30 }
 0x916   : > { %4112 = vmax.xlane.f32.xlu0 %v4111_v49 }
 0x91e   : > { %10491 = vrot.lane.b32.xlu1 %v12312_v36, %s13425_s11 }
 0x922   : > { %10501 = vrot.lane.b32.xlu1 %v12312_v36, %s13421_s29 }
 0x99a   : > { %v4107_v15 = vpop.xlane.xlu1 %4106 }
 0x99b   : > { %v4115_v63 = vsub.f32 %v4099_v55, %v4107_v15  ;;  %v4104_v16 = vpop.xlane.xlu0 %4103 }
 0x99c   : > { %v4114_v45 = vsub.f32 %v4098_v7, %v4104_v16 }
 0x99d   : > { %v4120_v13 = vmul.f32 1.442695, %v4115_v63 }
 0x99e   : > { %v4118_v60 = vmul.f32 1.442695, %v4114_v45  ;;  %v10492_v11 = vpop.permute.xlu1 %10491 }
 0x99f   : > { %10831 = vpow2.f32 %v4120_v13  ;;  %v10494_v25 = vunpack.i.h.bf16 %v10492_v11  ;;  %v10493_v56 = vunpack.i.l.bf16 %v10492_v11  ;;  %v4110_v41 = vpop.xlane.xlu0 %4109 }
 0x9a0   : > { %10833 = vpow2.f32 %v4118_v60  ;;  %v4116_v5 = vsub.f32 %v4100_v53, %v4110_v41 }
 0x9a1   : > { %v9757_v4 = vpack.c.bf16 %v10494_v25, %v10493_v56 }
 0x9a2   : > { %v4122_v0 = vmul.f32 1.442695, %v4116_v5  ;;  %v10502_v35 = vpop.permute.xlu1 %10501 }
 0x9a3   : > { %9758 = vmatprep.subr.bf16.mxu0 %v9757_v4  ;;  %v4113_v20 = vpop.xlane.xlu0 %4112  ;;  %v10504_v12 = vunpack.i.h.bf16 %v10502_v35  ;;  %v10503_v6 = vunpack.i.l.bf16 %v10502_v35 }
 0x9a4   : > { %9760 = vmatpush3.bf16.msra.mxu0 %v9757_v4  ;;  %v4117_v48 = vsub.f32 %v4101_v33, %v4113_v20 }
 0x9a5   : > { %v9765_v52 = vpack.c.bf16 %v10504_v12, %v10503_v6 }
 0x9a6   : > { %v4124_v34 = vmul.f32 1.442695, %v4117_v48 }
 0x9a8   : > { %10835 = vpow2.f32 %v4124_v34 }
 0x9a9   : > { %v10832_v46 = vpop.eup %10831  ;;  %10837 = vpow2.f32 %v4122_v0 }
 0x9aa   : > { %v10834_v23 = vpop.eup %10833  ;;  %v4129_v3 = vsel %vm3646_vm11, %v10832_v46, 0.0 }
 0x9ab   : > { %4130 = vadd.xlane.f32.xlu0 %v4129_v3  ;;  %v4126_v42 = vsel %vm3646_vm11, %v10834_v23, 0.0 }
 0x9ac   : > { %4127 = vadd.xlane.f32.xlu1 %v4126_v42 }
 0x9b2   : > { %v10836_v8 = vpop.eup %10835 }
 0x9b3   : > { %v10838_v10 = vpop.eup %10837  ;;  %v4135_v54 = vsel %vm3646_vm11, %v10836_v8, 0.0 }
 0x9b4   : > { %v4132_v21 = vsel %vm3646_vm11, %v10838_v10, 0.0 }
 0x9bd   : > { %10506 = vrot.lane.b32.xlu1 %v12320_v22, %s13421_s29 }
 0x9c1   : > { %10496 = vrot.lane.b32.xlu0 %v12320_v22, %s13425_s11  ;;  %s13500_s11 = smov 48  }
 0x9e0   : > { %4136 = vadd.xlane.f32.xlu0 %v4135_v54 }
 0x9e1   : > { %4133 = vadd.xlane.f32.xlu1 %v4132_v21 }
 0x9f2   : > { %4257 = vrot.lane.b32.xlu1 %v12304_v19, %s13419_s30 }
 0x9f6   : > { %4261 = vrot.lane.b32.xlu1 %v12308_v18, %s13419_s30  ;;  %4255 = vrot.lane.b32.xlu0 %v12302_v31, %s13419_s30 }
 0x9fa   : > { %4259 = vrot.lane.b32.xlu0 %v12314_v62, %s13419_s30  ;;  %s13423_s30 = smov 24  }
 0xa38   : > { %v4131_v17 = vpop.xlane.xlu0 %4130 }
 0xa39   : > { %10839 = vrcp.f32 %v4131_v17  ;;  %v4128_v26 = vpop.xlane.xlu1 %4127 }
 0xa3a   : > { %10841 = vrcp.f32 %v4128_v26 }
 0xa3c   : > { %v10497_v2 = vpop.permute.xlu0 %10496 }
 0xa3d   : > { %v10499_v59 = vunpack.i.h.bf16 %v10497_v2  ;;  %v10498_v14 = vunpack.i.l.bf16 %v10497_v2  ;;  %v10507_v44 = vpop.permute.xlu1 %10506 }
 0xa3e   : > { %v10509_v7 = vunpack.i.h.bf16 %v10507_v44  ;;  %v10508_v43 = vunpack.i.l.bf16 %v10507_v44 }
 0xa3f   : > { %v9761_v47 = vpack.c.bf16 %v10499_v59, %v10498_v14 }
 0xa40   : > { %v9771_v9 = vpack.c.bf16 %v10509_v7, %v10508_v43 }
 0xa41   : > { %9762 = vmatprep.subr.bf16.mxu0 %v9761_v47 }
 0xa42   : > { %9764 = vmatpush3.bf16.msra.mxu0 %v9761_v47 }
 0xa43   : > { %v10840_v29 = vpop.eup %10839  ;;  %9767 = vmatprep.subr.msk.bf16.mxu0 %vm12326_vm13, %v9765_v52 }
 0xa44   : > { %v10842_v50 = vpop.eup %10841  ;;  %v4141_v27 = vmul.f32 %v10840_v29, %v10832_v46 }
 0xa45   : > { %v4139_v55 = vmul.f32 %v10842_v50, %v10834_v23 }
 0xa47   : > { %9348 = vmatprep.mubr.msk.f32.mxu0 %vm3646_vm11, %v4139_v55 }
 0xa48   : > { %9349 = vmatmul.mubr.msk.f32.vlgmr.msra.gmra.mrb[8].mxu0 %vm3646_vm11, %v4141_v27 }
 0xa4b   : > { %9770 = vmatpush3.bf16.xpose.msk.msra.mxu0 %vm12326_vm13, %v9765_v52 }
 0xa4c   : > { %9773 = vmatprep.subr.msk.bf16.mxu0 %vm12326_vm13, %v9771_v9 }
 0xa53   : > { %9776 = vmatpush3.bf16.xpose.msk.msra.mxu0 %vm12326_vm13, %v9771_v9 }
 0xa6d   : > { %v4137_v40 = vpop.xlane.xlu0 %4136 }
 0xa6e   : > { %10843 = vrcp.f32 %v4137_v40  ;;  %v4134_v58 = vpop.xlane.xlu1 %4133 }
 0xa6f   : > { %10845 = vrcp.f32 %v4134_v58 }
 0xa71   : > { %v4256_v33 = vpop.permute.xlu0 %4255 }
 0xa72   : > { %v4258_v15 = vpop.permute.xlu1 %4257 }
 0xa75   : > { %v4260_v63 = vpop.permute.xlu0 %4259 }
 0xa76   : > { %v4262_v16 = vpop.permute.xlu1 %4261 }
 0xa78   : > { %v10844_v28 = vpop.eup %10843 }
 0xa79   : > { %v10846_v53 = vpop.eup %10845  ;;  %v4145_v49 = vmul.f32 %v10844_v28, %v10836_v8 }
 0xa7a   : > { %v4143_v30 = vmul.f32 %v10846_v53, %v10838_v10 }
 0xa7c   : > { %9351 = vmatprep.mubr.msk.f32.mxu0 %vm3646_vm11, %v4143_v30 }
 0xa7d   : > { %9352 = vmatmul.mubr.msk.f32.gmra.mrb[10].mxu0 %vm3646_vm11, %v4145_v49 }
 0xa7e   : > { %9362 = vmatprep.mubr.msk.f32.mxu0 %vm3714_vm12, %v4256_v33 }
 0xa81   : > { %9363 = vmatmul.mubr.msk.f32.vlgmr.msra.gmra.mrb[12].mxu0 %vm3714_vm12, %v4258_v15 }
 0xa82   : > { %9365 = vmatprep.mubr.msk.f32.mxu0 %vm3714_vm12, %v4260_v63 }
 0xa85   : > { %9366 = vmatmul.mubr.msk.f32.gmra.mrb[14].mxu0 %vm3714_vm12, %v4262_v16 }
 0xb1b   : > { %v12460_v45 = vpop.f32.mrb[8].mxu0 }
 0xb1c   : > { %v12462_v13 = vpop.f32.mrb[9].mxu0 }
 0xb1d   : > { %v10540_v60 = vpack.i.bf16 %v12460_v45, %v12462_v13 }
 0xb50   : > { %v12466_v11 = vpop.f32.mrb[10].mxu0 }
 0xb51   : > { %v12468_v25 = vpop.f32.mrb[11].mxu0 }
 0xb52   : > { %v10545_v56 = vpack.i.bf16 %v12466_v11, %v12468_v25 }
 0xb54   : > { %v9364_v4 = vpop.f32.mrb[12].mxu0 }
 0xb55   : > { %v4373_v46 = vmul.f32 0.35355338, %v9364_v4  ;;  %v4353_v23 = vpop.f32.mrb[13].mxu0 }
 0xb56   : > { %v4372_v3 = vmul.f32 0.35355338, %v4353_v23 }
 0xb57   : > { %v4377_v42 = vadd.f32 %v4373_v46, %v12352_v24 }
 0xb58   : > { %v9367_v41 = vpop.f32.mrb[14].mxu0  ;;  %v4376_v20 = vadd.f32 %v4372_v3, %v12347_v57 }
 0xb59   : > { %v4363_v48 = vpop.f32.mrb[15].mxu0  ;;  %v4383_v5 = vsel %vm3646_vm11, %v4377_v42, -inf  ;;  %v4375_v34 = vmul.f32 0.35355338, %v9367_v41 }
 0xb5a   : > { %v4374_v0 = vmul.f32 0.35355338, %v4363_v48  ;;  %4384 = vmax.xlane.f32.xlu1 %v4383_v5  ;;  %v4380_v8 = vsel %vm3646_vm11, %v4376_v20, -inf }
 0xb5b   : > { %4381 = vmax.xlane.f32.xlu0 %v4380_v8  ;;  %v4379_v21 = vadd.f32 %v4375_v34, %v12365_v38 }
 0xb5c   : > { %v4378_v10 = vadd.f32 %v4374_v0, %v12358_v61 }
 0xb5d   : > { %v4389_v35 = vsel %vm3646_vm11, %v4379_v21, -inf }
 0xb5e   : > { %v4386_v54 = vsel %vm3646_vm11, %v4378_v10, -inf }
 0xb5f   : > { %4387 = vmax.xlane.f32.xlu0 %v4386_v54 }
 0xb63   : > { %4390 = vmax.xlane.f32.xlu0 %v4389_v35 }
 0xb6b   : > { %10511 = vrot.lane.b32.xlu1 %v12312_v36, %s13417_s10 }
 0xb6f   : > { %10521 = vrot.lane.b32.xlu1 %v12312_v36, %s13413_s7 }
 0xb73   : > { %10526 = vrot.lane.b32.xlu1 %v12320_v22, %s13413_s7 }
 0xbe7   : > { %v4385_v17 = vpop.xlane.xlu1 %4384 }
 0xbe8   : > { %v4393_v26 = vsub.f32 %v4377_v42, %v4385_v17  ;;  %v4382_v2 = vpop.xlane.xlu0 %4381 }
 0xbe9   : > { %v4392_v12 = vsub.f32 %v4376_v20, %v4382_v2 }
 0xbea   : > { %v4398_v6 = vmul.f32 1.442695, %v4393_v26 }
 0xbeb   : > { %v4396_v59 = vmul.f32 1.442695, %v4392_v12  ;;  %v10512_v14 = vpop.permute.xlu1 %10511 }
 0xbec   : > { %10847 = vpow2.f32 %v4398_v6  ;;  %v10514_v47 = vunpack.i.h.bf16 %v10512_v14  ;;  %v10513_v52 = vunpack.i.l.bf16 %v10512_v14  ;;  %v4388_v7 = vpop.xlane.xlu0 %4387 }
 0xbed   : > { %10849 = vpow2.f32 %v4396_v59  ;;  %v4394_v40 = vsub.f32 %v4378_v10, %v4388_v7 }
 0xbee   : > { %v9777_v29 = vpack.c.bf16 %v10514_v47, %v10513_v52 }
 0xbef   : > { %v4400_v28 = vmul.f32 1.442695, %v4394_v40 }
 0xbf0   : > { %9778 = vmatprep.subr.bf16.mxu1 %v9777_v29  ;;  %v4391_v43 = vpop.xlane.xlu0 %4390 }
 0xbf1   : > { %9780 = vmatpush3.bf16.msra.mxu1 %v9777_v29  ;;  %v4395_v9 = vsub.f32 %v4379_v21, %v4391_v43 }
 0xbf3   : > { %v4402_v58 = vmul.f32 1.442695, %v4395_v9 }
 0xbf5   : > { %10851 = vpow2.f32 %v4402_v58 }
 0xbf6   : > { %v10848_v44 = vpop.eup %10847  ;;  %10853 = vpow2.f32 %v4400_v28 }
 0xbf7   : > { %v10850_v50 = vpop.eup %10849  ;;  %v4407_v55 = vsel %vm3646_vm11, %v10848_v44, 0.0 }
 0xbf8   : > { %4408 = vadd.xlane.f32.xlu0 %v4407_v55  ;;  %v4404_v27 = vsel %vm3646_vm11, %v10850_v50, 0.0 }
 0xbf9   : > { %4405 = vadd.xlane.f32.xlu1 %v4404_v27 }
 0xbff   : > { %v10852_v53 = vpop.eup %10851 }
 0xc00   : > { %v10854_v30 = vpop.eup %10853  ;;  %v4413_v33 = vsel %vm3646_vm11, %v10852_v53, 0.0 }
 0xc01   : > { %v4410_v49 = vsel %vm3646_vm11, %v10854_v30, 0.0 }
 0xc0a   : > { %4535 = vrot.lane.b32.xlu1 %v12304_v19, %s13415_s6  ;;  %v10522_v19 = vpop.permute.xlu1 %10521 }
 0xc0b   : > { %v10524_v46 = vunpack.i.h.bf16 %v10522_v19  ;;  %v10523_v23 = vunpack.i.l.bf16 %v10522_v19 }
 0xc0d   : > { %v9785_v20 = vpack.c.bf16 %v10524_v46, %v10523_v23 }
 0xc0e   : > { %10516 = vrot.lane.b32.xlu0 %v12320_v22, %s13417_s10  ;;  %v10527_v15 = vpop.permute.xlu1 %10526  ;;  %s13494_s10 = sld [smem:[#allocation26_spill]] }
 0xc0f   : > { %v10529_v48 = vunpack.i.h.bf16 %v10527_v15  ;;  %v10528_v5 = vunpack.i.l.bf16 %v10527_v15 }
 0xc11   : > { %v9791_v0 = vpack.c.bf16 %v10529_v48, %v10528_v5 }
 0xc2d   : > { %4414 = vadd.xlane.f32.xlu0 %v4413_v33 }
 0xc2e   : > { %4411 = vadd.xlane.f32.xlu1 %v4410_v49 }
 0xc3f   : > { %4539 = vrot.lane.b32.xlu1 %v12308_v18, %s13415_s6 }
 0xc43   : > { %4533 = vrot.lane.b32.xlu0 %v12302_v31, %s13415_s6 }
 0xc47   : > { %4537 = vrot.lane.b32.xlu0 %v12314_v62, %s13415_s6  ;;  %s13491_s6 = sld [smem:[#allocation31_spill]] }
 0xc4d   : > { %s13492_s29 = smov %s13491_s6 }
 0xc85   : > { %v4409_v63 = vpop.xlane.xlu0 %4408 }
 0xc86   : > { %10855 = vrcp.f32 %v4409_v63  ;;  %v4406_v16 = vpop.xlane.xlu1 %4405 }
 0xc87   : > { %10857 = vrcp.f32 %v4406_v16 }
 0xc89   : > { %v10517_v4 = vpop.permute.xlu0 %10516 }
 0xc8a   : > { %v10519_v3 = vunpack.i.h.bf16 %v10517_v4  ;;  %v10518_v42 = vunpack.i.l.bf16 %v10517_v4  ;;  %v4536_v8 = vpop.permute.xlu1 %4535 }
 0xc8c   : > { %v9781_v41 = vpack.c.bf16 %v10519_v3, %v10518_v42 }
 0xc8e   : > { %9782 = vmatprep.subr.bf16.mxu1 %v9781_v41 }
 0xc8f   : > { %9784 = vmatpush3.bf16.msra.mxu1 %v9781_v41 }
 0xc90   : > { %v10856_v18 = vpop.eup %10855  ;;  %9787 = vmatprep.subr.msk.bf16.mxu1 %vm12326_vm13, %v9785_v20 }
 0xc91   : > { %v10858_v31 = vpop.eup %10857  ;;  %v4419_v34 = vmul.f32 %v10856_v18, %v10848_v44 }
 0xc92   : > { %v4417_v62 = vmul.f32 %v10858_v31, %v10850_v50 }
 0xc94   : > { %9376 = vmatprep.mubr.msk.f32.mxu1 %vm3646_vm11, %v4417_v62 }
 0xc95   : > { %9377 = vmatmul.mubr.msk.f32.vlgmr.msra.gmra.mrb[12].mxu1 %vm3646_vm11, %v4419_v34 }
 0xc98   : > { %9790 = vmatpush3.bf16.xpose.msk.msra.mxu1 %vm12326_vm13, %v9785_v20 }
 0xc99   : > { %9793 = vmatprep.subr.msk.bf16.mxu1 %vm12326_vm13, %v9791_v0 }
 0xca0   : > { %9796 = vmatpush3.bf16.xpose.msk.msra.mxu1 %vm12326_vm13, %v9791_v0 }
 0xcba   : > { %v4415_v10 = vpop.xlane.xlu0 %4414 }
 0xcbb   : > { %10859 = vrcp.f32 %v4415_v10  ;;  %v4412_v54 = vpop.xlane.xlu1 %4411 }
 0xcbc   : > { %10861 = vrcp.f32 %v4412_v54 }
 0xcbe   : > { %v4534_v26 = vpop.permute.xlu0 %4533 }
 0xcbf   : > { %v4540_v6 = vpop.permute.xlu1 %4539 }
 0xcc2   : > { %v4538_v12 = vpop.permute.xlu0 %4537 }
 0xcc5   : > { %v10860_v21 = vpop.eup %10859 }
 0xcc6   : > { %v10862_v35 = vpop.eup %10861  ;;  %v4423_v2 = vmul.f32 %v10860_v21, %v10852_v53 }
 0xcc7   : > { %v4421_v17 = vmul.f32 %v10862_v35, %v10854_v30 }
 0xcc9   : > { %9379 = vmatprep.mubr.msk.f32.mxu1 %vm3646_vm11, %v4421_v17 }
 0xcca   : > { %9380 = vmatmul.mubr.msk.f32.gmra.mrb[14].mxu1 %vm3646_vm11, %v4423_v2 }
 0xccb   : > { %9390 = vmatprep.mubr.msk.f32.mxu1 %vm3714_vm12, %v4534_v26 }
 0xcce   : > { %9391 = vmatmul.mubr.msk.f32.vlgmr.msra.gmra.mrb[16].mxu1 %vm3714_vm12, %v4536_v8 }
 0xccf   : > { %9393 = vmatprep.mubr.msk.f32.mxu1 %vm3714_vm12, %v4538_v12 }
 0xcd2   : > { %9394 = vmatmul.mubr.msk.f32.gmra.mrb[18].mxu1 %vm3714_vm12, %v4540_v6 }
 0xd68   : > { %v9378_v59 = vpop.f32.mrb[12].mxu1 }
 0xd69   : > { %v4514_v14 = vpop.f32.mrb[13].mxu1 }
 0xd6a   : > { %v10550_v47 = vpack.i.bf16 %v9378_v59, %v4514_v14 }
 0xd9d   : > { %v9381_v52 = vpop.f32.mrb[14].mxu1 }
 0xd9e   : > { %v4524_v29 = vpop.f32.mrb[15].mxu1 }
 0xd9f   : > { %v10555_v44 = vpack.i.bf16 %v9381_v52, %v4524_v29 }
 0xda1   : > { %v9392_v50 = vpop.f32.mrb[16].mxu1 }
 0xda2   : > { %v4651_v55 = vmul.f32 0.35355338, %v9392_v50  ;;  %v4631_v27 = vpop.f32.mrb[17].mxu1 }
 0xda3   : > { %v4650_v7 = vmul.f32 0.35355338, %v4631_v27 }
 0xda4   : > { %v4655_v43 = vadd.f32 %v4651_v55, %v12352_v24 }
 0xda5   : > { %v9395_v9 = vpop.f32.mrb[18].mxu1  ;;  %v4654_v40 = vadd.f32 %v4650_v7, %v12347_v57 }
 0xda6   : > { %v4641_v58 = vpop.f32.mrb[19].mxu1  ;;  %v4661_v28 = vsel %vm3646_vm11, %v4655_v43, -inf  ;;  %v4653_v53 = vmul.f32 0.35355338, %v9395_v9 }
 0xda7   : > { %v4652_v30 = vmul.f32 0.35355338, %v4641_v58  ;;  %4662 = vmax.xlane.f32.xlu1 %v4661_v28  ;;  %v4658_v33 = vsel %vm3646_vm11, %v4654_v40, -inf }
 0xda8   : > { %4659 = vmax.xlane.f32.xlu0 %v4658_v33  ;;  %v4657_v15 = vadd.f32 %v4653_v53, %v12365_v38 }
 0xda9   : > { %v4656_v49 = vadd.f32 %v4652_v30, %v12358_v61 }
 0xdaa   : > { %v4667_v24 = vsel %vm3646_vm11, %v4657_v15, -inf }
 0xdab   : > { %v4664_v19 = vsel %vm3646_vm11, %v4656_v49, -inf }
 0xdac   : > { %4665 = vmax.xlane.f32.xlu0 %v4664_v19 }
 0xdb0   : > { %4668 = vmax.xlane.f32.xlu0 %v4667_v24 }
 0xe34   : > { %v4663_v57 = vpop.xlane.xlu1 %4662 }
 0xe35   : > { %v4671_v63 = vsub.f32 %v4655_v43, %v4663_v57  ;;  %v4660_v16 = vpop.xlane.xlu0 %4659 }
 0xe36   : > { %v4670_v4 = vsub.f32 %v4654_v40, %v4660_v16 }
 0xe37   : > { %v4676_v46 = vmul.f32 1.442695, %v4671_v63 }
 0xe38   : > { %v4674_v23 = vmul.f32 1.442695, %v4670_v4 }
 0xe39   : > { %10863 = vpow2.f32 %v4676_v46  ;;  %v4666_v3 = vpop.xlane.xlu0 %4665 }
 0xe3a   : > { %10865 = vpow2.f32 %v4674_v23  ;;  %v4672_v42 = vsub.f32 %v4656_v49, %v4666_v3 }
 0xe3c   : > { %v4678_v41 = vmul.f32 1.442695, %v4672_v42 }
 0xe3d   : > { %v4669_v61 = vpop.xlane.xlu0 %4668 }
 0xe3e   : > { %10867 = vpow2.f32 %v4678_v41  ;;  %v4673_v20 = vsub.f32 %v4657_v15, %v4669_v61 }
 0xe40   : > { %v4680_v18 = vmul.f32 1.442695, %v4673_v20 }
 0xe42   : > { %10869 = vpow2.f32 %v4680_v18 }
 0xe43   : > { %v10864_v38 = vpop.eup %10863 }
 0xe44   : > { %v10866_v31 = vpop.eup %10865  ;;  %v4685_v62 = vsel %vm3646_vm11, %v10864_v38, 0.0 }
 0xe45   : > { %4686 = vadd.xlane.f32.xlu0 %v4685_v62  ;;  %v4682_v48 = vsel %vm3646_vm11, %v10866_v31, 0.0 }
 0xe46   : > { %4683 = vadd.xlane.f32.xlu1 %v4682_v48 }
 0xe48   : > { %v10868_v5 = vpop.eup %10867 }
 0xe49   : > { %v4688_v34 = vsel %vm3646_vm11, %v10868_v5, 0.0 }
 0xe4a   : > { %4689 = vadd.xlane.f32.xlu1 %v4688_v34 }
 0xe4c   : > { %v10870_v0 = vpop.eup %10869 }
 0xe4d   : > { %v4691_v8 = vsel %vm3646_vm11, %v10870_v0, 0.0 }
 0xe4e   : > { %4692 = vadd.xlane.f32.xlu0 %v4691_v8 }
 0xe5b   : > { %10531 = vrot.lane.b32.xlu1 %v12312_v36, %s13411_s0 }
 0xe5f   : > { %10541 = vrot.lane.b32.xlu1 %v10540_v60, %s13409_s9 }
 0xe63   : > { %10546 = vrot.lane.b32.xlu1 %v10545_v56, %s13409_s9  ;;  %s13499_s9 = smov 112  }
 0xe64   : > { %10536 = vrot.lane.b32.xlu0 %v12320_v22, %s13411_s0  ;;  %s13489_s0 = sld [smem:[#allocation29_spill]] }
 0xe67   : > { %10556 = vrot.lane.b32.xlu1 %v10555_v44, %s13407_s1 }
 0xe68   : > { %10551 = vrot.lane.b32.xlu0 %v10550_v47, %s13407_s1  ;;  %s13502_s1 = smov 104  }
 0xe6a   : > { %s13490_s7 = smov %s13489_s0  ;;  %v10793_v52 = vld [vmem:[%s13489_s0] sm:$0xff]   ;;  %s13498_s0 = smov 80  }
 0xe6b   : > { %v10794_v29 = vld [vmem:[%s13490_s7 + $0x8] sm:$0xff]   ;;  %s13509_s7 = smov 64  }
 0xed2   : > { %v4687_v10 = vpop.xlane.xlu0 %4686 }
 0xed3   : > { %v4684_v36 = vpop.xlane.xlu1 %4683 }
 0xed4   : > { %10871 = vrcp.f32 %v4684_v36  ;;  %v8791_v36 = vld [vmem:[%s13493_s24] ss:$0 sm:$0xff]  ;;  %s13495_s24 = smov %s13494_s10 }
 0xed5   : > { %10873 = vrcp.f32 %v4687_v10 }
 0xed7   : > { %v4690_v54 = vpop.xlane.xlu1 %4689 }
 0xed8   : > { %10875 = vrcp.f32 %v4690_v54 }
 0xedb   : > { %v10532_v45 = vpop.permute.xlu1 %10531  ;;  %v4693_v13 = vpop.xlane.xlu0 %4692 }
 0xedc   : > { %v10534_v60 = vunpack.i.h.bf16 %v10532_v45  ;;  %v10533_v21 = vunpack.i.l.bf16 %v10532_v45  ;;  %10877 = vrcp.f32 %v4693_v13 }
 0xede   : > { %v10872_v11 = vpop.eup %10871  ;;  %v9797_v25 = vpack.c.bf16 %v10534_v60, %v10533_v21 }
 0xedf   : > { %v10537_v56 = vpop.permute.xlu0 %10536  ;;  %v4695_v22 = vmul.f32 %v10872_v11, %v10866_v31  ;;  %v10874_v2 = vpop.eup %10873 }
 0xee0   : > { %v10539_v35 = vunpack.i.h.bf16 %v10537_v56  ;;  %v10538_v17 = vunpack.i.l.bf16 %v10537_v56  ;;  %9798 = vmatprep.subr.bf16.mxu0 %v9797_v25  ;;  %v4697_v6 = vmul.f32 %v10874_v2, %v10864_v38  ;;  %v10542_v9 = vpop.permute.xlu1 %10541 }
 0xee1   : > { %9800 = vmatpush3.bf16.msra.mxu0 %v9797_v25  ;;  %9404 = vmatprep.mubr.msk.f32.mxu0 %vm3646_vm11, %v4695_v22  ;;  %v10544_v28 = vunpack.i.h.bf16 %v10542_v9  ;;  %v10543_v53 = vunpack.i.l.bf16 %v10542_v9  ;;  %v8796_v22 = vld [vmem:[%s13371_s13] ss:$0 sm:$0xff] }
 0xee2   : > { %v9801_v26 = vpack.c.bf16 %v10539_v35, %v10538_v17  ;;  %v10876_v12 = vpop.eup %10875 }
 0xee3   : > { %v4699_v14 = vmul.f32 %v10876_v12, %v10868_v5  ;;  %v10552_v58 = vpop.permute.xlu0 %10551  ;;  %v4859_v19 = vsel %vm3714_vm12, %v12410_v37, %v10543_v53  ;;  %v4860_v15 = vsel %vm3714_vm12, %v12408_v32, %v10544_v28 }
 0xee4   : > { %9802 = vmatprep.subr.bf16.mxu0 %v9801_v26  ;;  %v10547_v40 = vpop.permute.xlu1 %10546  ;;  %v10554_v30 = vunpack.i.h.bf16 %v10552_v58  ;;  %v10553_v33 = vunpack.i.l.bf16 %v10552_v58  ;;  %v12637_v58 = vld [vmem:[%s13494_s10 + $0x8] sm:$0xff]  ;;  %s13496_s10 = smov 120  }
 0xee5   : > { %9804 = vmatpush3.bf16.msra.mxu0 %v9801_v26  ;;  %v10549_v57 = vunpack.i.h.bf16 %v10547_v40  ;;  %v10548_v63 = vunpack.i.l.bf16 %v10547_v40 }
 0xee6   : > { %v10878_v59 = vpop.eup %10877  ;;  %9410 = vmatprep.subr.bf16.mxu0 %v10793_v52  ;;  %v4864_v46 = vsel %vm3420_vm3, %v4860_v15, %v10554_v30  ;;  %v4863_v23 = vsel %vm3420_vm3, %v4859_v19, %v10553_v33  ;;  %v12642_v30 = vld [vmem:[%s13495_s24] sm:$0xff] }
 0xee7   : > { %v4701_v47 = vmul.f32 %v10878_v59, %v10870_v0  ;;  %v4861_v32 = vsel %vm3714_vm12, %v12414_v51, %v10548_v63  ;;  %v4862_v18 = vsel %vm3714_vm12, %v12412_v39, %v10549_v57  ;;  %v10795_v51 = vld [vmem:[%s13491_s6] sm:$0xff]   ;;  %v10796_v39 = vld [vmem:[%s13492_s29 + $0x8] sm:$0xff]   ;;  %v12650_v63 = vld [vmem:[%s13495_s24 + $0x10] sm:$0xff]  ;;  %s13497_s6 = smov 56  }
 0xee8   : > { %9405 = vmatmul.mubr.msk.f32.vlgmr.msra.gmra.mrb[16].mxu0 %vm3646_vm11, %v4697_v6  ;;  %v10557_v49 = vpop.permute.xlu1 %10556  ;;  %9418 = vmatprep.subr.bf16.mxu1 %v10795_v51 }
 0xee9   : > { %9407 = vmatprep.mubr.msk.f32.mxu0 %vm3646_vm11, %v4699_v14  ;;  %9411 = vmatpush3.bf16.msra.mxu0 %v10793_v52  ;;  %v10559_v3 = vunpack.i.h.bf16 %v10557_v49  ;;  %v10558_v42 = vunpack.i.l.bf16 %v10557_v49 }
 0xeea   : > { %9412 = vmatprep.subr.bf16.mxu0 %v10794_v29  ;;  %9419 = vmatpush3.bf16.msra.mxu1 %v10795_v51 }
 0xeeb   : > { %v4865_v62 = vsel %vm3420_vm3, %v4861_v32, %v10558_v42  ;;  %v4866_v48 = vsel %vm3420_vm3, %v4862_v18, %v10559_v3  ;;  %9420 = vmatprep.subr.bf16.mxu1 %v10796_v39 }
 0xeec   : > { %9408 = vmatmul.mubr.msk.f32.gmra.mrb[18].mxu0 %vm3646_vm11, %v4701_v47 }
 0xeed   : > { %9413 = vmatpush3.bf16.msra.mxu0 %v10794_v29 }
 0xeee   : > { %9421 = vmatpush3.bf16.msra.mxu1 %v10796_v39 }
 0xfbb   : > { %v9406_v44 = vpop.f32.mrb[16].mxu0 }
 0xfbc   : > { %v4792_v50 = vpop.f32.mrb[17].mxu0 }
 0xfbd   : > { %v10560_v55 = vpack.i.bf16 %v9406_v44, %v4792_v50 }
 0xfbf   : > { %10561 = vrot.lane.b32.xlu0 %v10560_v55, %s13423_s30  ;;  %v9409_v27 = vpop.f32.mrb[18].mxu0 }
 0xfc0   : > { %v4802_v7 = vpop.f32.mrb[19].mxu0 }
 0xfc1   : > { %v10565_v43 = vpack.i.bf16 %v9409_v27, %v4802_v7 }
 0xfc3   : > { %10566 = vrot.lane.b32.xlu1 %v10565_v43, %s13423_s30  ;;  %s13501_s30 = smov 72  }
0x1031   : > { %v10562_v24 = vpop.permute.xlu0 %10561 }
0x1032   : > { %v10564_v16 = vunpack.i.h.bf16 %v10562_v24  ;;  %v10563_v4 = vunpack.i.l.bf16 %v10562_v24 }
0x1034   : > { %v4869_v41 = vsel %vm4867_vm14, %v4864_v46, %v10564_v16  ;;  %v4868_v61 = vsel %vm4867_vm14, %v4863_v23, %v10563_v4  ;;  %v12656_v23 = vld [vmem:[%s13495_s24 + $0x18] sm:$0xff] }
0x1035   : > { %v10567_v37 = vpop.permute.xlu1 %10566  ;;  %v4872_v20 = vpack.c.bf16 %v4869_v41, %v4868_v61 }
0x1036   : > { %v10569_v38 = vunpack.i.h.bf16 %v10567_v37  ;;  %v10568_v31 = vunpack.i.l.bf16 %v10567_v37 }
0x1037   : > { %9414 = vmatprep.mubr.msk.bf16.mxu0 %vm3646_vm11, %v4872_v20 }
0x1038   : > { %v4871_v5 = vsel %vm4867_vm14, %v4866_v48, %v10569_v38  ;;  %v4870_v34 = vsel %vm4867_vm14, %v4865_v62, %v10568_v31 }
0x1039   : > { %v4873_v0 = vpack.c.bf16 %v4871_v5, %v4870_v34 }
0x103b   : > { %9415 = vmatmul.mubr.msk.bf16.vlgmr.msra.gmra.mrb[20].mxu0 %vm3646_vm11, %v4873_v0 }
0x110e   : > { %v9416_v8 = vpop.f32.mrb[20].mxu0 }
0x110f   : > { %v4932_v10 = vpop.f32.mrb[21].mxu0  ;;  %v12587_v11 = vadd.f32 %v9416_v8, %v8791_v36 }
0x1110   : > { %v9417_v54 = vpop.f32.mrb[22].mxu0  ;;  %v12583_v60 = vadd.f32 %v8791_v36, %v4932_v10 }
0x1111   : > { %v12581_v45 = vadd.f32 %v9417_v54, %v8791_v36  ;;  %v4935_v13 = vpop.f32.mrb[23].mxu0 }
0x1112   : > { %v12585_v21 = vadd.f32 %v8791_v36, %v4935_v13 }
0x1113   : > { %v4980_v56 = vpack.c.bf16 %v12581_v45, %v12587_v11 }
0x1114   : > { %v4979_v25 = vpack.c.bf16 %v12585_v21, %v12583_v60 }
0x1116   : > { %9422 = vmatprep.mubr.msk.bf16.mxu1 %vm3646_vm11, %v4979_v25 }
0x1117   : > { %9423 = vmatmul.mubr.msk.bf16.vlgmr.msra.gmra.mrb[20].mxu1 %vm3646_vm11, %v4980_v56 }
0x11ea   : > { %v9424_v35 = vpop.f32.mrb[20].mxu1 }
0x11eb   : > { %v5039_v17 = vpop.f32.mrb[21].mxu1  ;;  %v12600_v12 = vadd.f32 %v9424_v35, %v8796_v22 }
0x11ec   : > { %v12598_v26 = vadd.f32 %v8796_v22, %v5039_v17  ;;  %v9425_v2 = vpop.f32.mrb[22].mxu1 }
0x11ed   : > { %v12602_v6 = vadd.f32 %v9425_v2, %v8796_v22  ;;  %v5042_v59 = vpop.f32.mrb[23].mxu1 }
0x11ee   : > { %v12604_v14 = vadd.f32 %v8796_v22, %v5042_v59  ;;  %9434 = vmatprep.mubr.msk.f32.mxu0 %vm3714_vm12, %v12598_v26 }
0x11ef   : > { %v12610_v47 = vpack.i.bf16 %v12602_v6, %v12600_v12 }
0x11f0   : > { %v12614_v52 = vpack.i.bf16 %v12604_v14, %v12598_v26 }
0x11f1   : > { %10576 = vrot.lane.b32.xlu1 %v12610_v47, %s13433_s25 }
0x11f2   : > { %10571 = vrot.lane.b32.xlu0 %v12614_v52, %s13433_s25  ;;  %s13505_s25 = smov 16  }
0x1263   : > { %v10577_v29 = vpop.permute.xlu1 %10576 }
0x1264   : > { %v10572_v44 = vpop.permute.xlu0 %10571  ;;  %v10579_v50 = vunpack.i.h.bf16 %v10577_v29  ;;  %v10578_v55 = vunpack.i.l.bf16 %v10577_v29 }
0x1265   : > { %v10574_v27 = vunpack.i.h.bf16 %v10572_v44  ;;  %v10573_v7 = vunpack.i.l.bf16 %v10572_v44 }
0x1266   : > { %v9811_v9 = vpack.c.bf16 %v10579_v50, %v10578_v55 }
0x1267   : > { %v9805_v43 = vpack.c.bf16 %v10574_v27, %v10573_v7 }
0x1269   : > { %9807 = vmatprep.subr.msk.bf16.mxu0 %vm12326_vm13, %v9805_v43 }
0x126a   : > { %9810 = vmatpush3.bf16.xpose.msk.msra.mxu0 %vm12326_vm13, %v9805_v43 }
0x126b   : > { %9813 = vmatprep.subr.msk.bf16.mxu0 %vm12326_vm13, %v9811_v9 }
0x1272   : > { %9816 = vmatpush3.bf16.xpose.msk.msra.mxu0 %vm12326_vm13, %v9811_v9 }
0x1279   : > { %9435 = vmatmul.mubr.msk.f32.vlgmr.msra.gmra.mrb[24].mxu0 %vm3714_vm12, %v12604_v14 }
0x127a   : > { %9437 = vmatprep.mubr.msk.f32.mxu0 %vm3714_vm12, %v12600_v12 }
0x127d   : > { %9438 = vmatmul.mubr.msk.f32.gmra.mrb[26].mxu0 %vm3714_vm12, %v12602_v6 }
0x134c   : > { %v9436_v40 = vpop.f32.mrb[24].mxu0 }
0x134d   : > { %v5168_v28 = vmul.f32 0.35355338, %v9436_v40  ;;  %v5148_v53 = vpop.f32.mrb[25].mxu0 }
0x134e   : > { %v5167_v33 = vmul.f32 0.35355338, %v5148_v53 }
0x134f   : > { %v5172_v49 = vadd.f32 %v5168_v28, %v12637_v58 }
0x1350   : > { %v9439_v19 = vpop.f32.mrb[26].mxu0  ;;  %v5171_v15 = vadd.f32 %v5167_v33, %v12642_v30 }
0x1351   : > { %v5158_v24 = vpop.f32.mrb[27].mxu0  ;;  %v5178_v57 = vsel %vm3646_vm11, %v5172_v49, -inf  ;;  %v5170_v16 = vmul.f32 0.35355338, %v9439_v19 }
0x1352   : > { %v5169_v4 = vmul.f32 0.35355338, %v5158_v24  ;;  %5179 = vmax.xlane.f32.xlu1 %v5178_v57  ;;  %v5175_v46 = vsel %vm3646_vm11, %v5171_v15, -inf }
0x1353   : > { %5176 = vmax.xlane.f32.xlu0 %v5175_v46  ;;  %v5174_v41 = vadd.f32 %v5170_v16, %v12656_v23 }
0x1354   : > { %v5173_v3 = vadd.f32 %v5169_v4, %v12650_v63 }
0x1355   : > { %v5184_v61 = vsel %vm3646_vm11, %v5174_v41, -inf }
0x1356   : > { %v5181_v42 = vsel %vm3646_vm11, %v5173_v3, -inf }
0x1357   : > { %5182 = vmax.xlane.f32.xlu0 %v5181_v42 }
0x135b   : > { %5185 = vmax.xlane.f32.xlu0 %v5184_v61 }
0x1363   : > { %10581 = vrot.lane.b32.xlu1 %v12614_v52, %s13431_s3 }
0x1367   : > { %10591 = vrot.lane.b32.xlu1 %v12614_v52, %s13429_s8 }
0x13df   : > { %v5180_v37 = vpop.xlane.xlu1 %5179 }
0x13e0   : > { %v5188_v20 = vsub.f32 %v5172_v49, %v5180_v37  ;;  %v5177_v32 = vpop.xlane.xlu0 %5176 }
0x13e1   : > { %v5187_v18 = vsub.f32 %v5171_v15, %v5177_v32 }
0x13e2   : > { %v5193_v38 = vmul.f32 1.442695, %v5188_v20 }
0x13e3   : > { %v5191_v31 = vmul.f32 1.442695, %v5187_v18  ;;  %v10582_v62 = vpop.permute.xlu1 %10581 }
0x13e4   : > { %10879 = vpow2.f32 %v5193_v38  ;;  %v10584_v48 = vunpack.i.h.bf16 %v10582_v62  ;;  %v10583_v5 = vunpack.i.l.bf16 %v10582_v62  ;;  %v5183_v36 = vpop.xlane.xlu0 %5182 }
0x13e5   : > { %10881 = vpow2.f32 %v5191_v31  ;;  %v5189_v13 = vsub.f32 %v5173_v3, %v5183_v36 }
0x13e6   : > { %v9817_v34 = vpack.c.bf16 %v10584_v48, %v10583_v5 }
0x13e7   : > { %v5195_v56 = vmul.f32 1.442695, %v5189_v13  ;;  %v10592_v59 = vpop.permute.xlu1 %10591 }
0x13e8   : > { %9818 = vmatprep.subr.bf16.mxu1 %v9817_v34  ;;  %v5186_v10 = vpop.xlane.xlu0 %5185  ;;  %v10594_v55 = vunpack.i.h.bf16 %v10592_v59  ;;  %v10593_v27 = vunpack.i.l.bf16 %v10592_v59 }
0x13e9   : > { %9820 = vmatpush3.bf16.msra.mxu1 %v9817_v34  ;;  %v5190_v54 = vsub.f32 %v5174_v41, %v5186_v10 }
0x13ea   : > { %v9825_v40 = vpack.c.bf16 %v10594_v55, %v10593_v27 }
0x13eb   : > { %v5197_v25 = vmul.f32 1.442695, %v5190_v54 }
0x13ed   : > { %10883 = vpow2.f32 %v5197_v25 }
0x13ee   : > { %v10880_v0 = vpop.eup %10879  ;;  %10885 = vpow2.f32 %v5195_v56 }
0x13ef   : > { %v10882_v51 = vpop.eup %10881  ;;  %v5202_v39 = vsel %vm3646_vm11, %v10880_v0, 0.0 }
0x13f0   : > { %5203 = vadd.xlane.f32.xlu0 %v5202_v39  ;;  %v5199_v8 = vsel %vm3646_vm11, %v10882_v51, 0.0 }
0x13f1   : > { %5200 = vadd.xlane.f32.xlu1 %v5199_v8 }
0x13f7   : > { %v10884_v22 = vpop.eup %10883 }
0x13f8   : > { %v10886_v35 = vpop.eup %10885  ;;  %v5208_v17 = vsel %vm3646_vm11, %v10884_v22, 0.0 }
0x13f9   : > { %v5205_v2 = vsel %vm3646_vm11, %v10886_v35, 0.0 }
0x1402   : > { %10596 = vrot.lane.b32.xlu1 %v12610_v47, %s13429_s8  ;;  %s13503_s8 = smov 40  }
0x1406   : > { %10586 = vrot.lane.b32.xlu0 %v12610_v47, %s13431_s3  ;;  %s13504_s3 = smov 8  }
0x1425   : > { %5209 = vadd.xlane.f32.xlu0 %v5208_v17 }
0x1426   : > { %5206 = vadd.xlane.f32.xlu1 %v5205_v2 }
0x1437   : > { %5330 = vrot.lane.b32.xlu1 %v12604_v14, %s13496_s10 }
0x143b   : > { %5334 = vrot.lane.b32.xlu1 %v12602_v6, %s13496_s10  ;;  %5328 = vrot.lane.b32.xlu0 %v12598_v26, %s13496_s10 }
0x143f   : > { %5332 = vrot.lane.b32.xlu0 %v12600_v12, %s13496_s10 }
0x147d   : > { %v5204_v29 = vpop.xlane.xlu0 %5203 }
0x147e   : > { %10887 = vrcp.f32 %v5204_v29  ;;  %v5201_v44 = vpop.xlane.xlu1 %5200 }
0x147f   : > { %10889 = vrcp.f32 %v5201_v44 }
0x1481   : > { %v10587_v50 = vpop.permute.xlu0 %10586 }
0x1482   : > { %v10589_v7 = vunpack.i.h.bf16 %v10587_v50  ;;  %v10588_v43 = vunpack.i.l.bf16 %v10587_v50  ;;  %v10597_v53 = vpop.permute.xlu1 %10596 }
0x1483   : > { %v10599_v19 = vunpack.i.h.bf16 %v10597_v53  ;;  %v10598_v15 = vunpack.i.l.bf16 %v10597_v53 }
0x1484   : > { %v9821_v9 = vpack.c.bf16 %v10589_v7, %v10588_v43 }
0x1485   : > { %v9831_v57 = vpack.c.bf16 %v10599_v19, %v10598_v15 }
0x1486   : > { %9822 = vmatprep.subr.bf16.mxu1 %v9821_v9 }
0x1487   : > { %9824 = vmatpush3.bf16.msra.mxu1 %v9821_v9 }
0x1488   : > { %v10888_v28 = vpop.eup %10887  ;;  %9827 = vmatprep.subr.msk.bf16.mxu1 %vm12326_vm13, %v9825_v40 }
0x1489   : > { %v10890_v33 = vpop.eup %10889  ;;  %v5214_v24 = vmul.f32 %v10888_v28, %v10880_v0 }
0x148a   : > { %v5212_v49 = vmul.f32 %v10890_v33, %v10882_v51 }
0x148c   : > { %9448 = vmatprep.mubr.msk.f32.mxu1 %vm3646_vm11, %v5212_v49 }
0x148d   : > { %9449 = vmatmul.mubr.msk.f32.vlgmr.msra.gmra.mrb[24].mxu1 %vm3646_vm11, %v5214_v24 }
0x1490   : > { %9830 = vmatpush3.bf16.xpose.msk.msra.mxu1 %vm12326_vm13, %v9825_v40 }
0x1491   : > { %9833 = vmatprep.subr.msk.bf16.mxu1 %vm12326_vm13, %v9831_v57 }
0x1498   : > { %9836 = vmatpush3.bf16.xpose.msk.msra.mxu1 %vm12326_vm13, %v9831_v57 }
0x14b2   : > { %v5210_v16 = vpop.xlane.xlu0 %5209 }
0x14b3   : > { %10891 = vrcp.f32 %v5210_v16  ;;  %v5207_v4 = vpop.xlane.xlu1 %5206 }
0x14b4   : > { %10893 = vrcp.f32 %v5207_v4 }
0x14b6   : > { %v5329_v41 = vpop.permute.xlu0 %5328 }
0x14b7   : > { %v5331_v37 = vpop.permute.xlu1 %5330 }
0x14ba   : > { %v5333_v20 = vpop.permute.xlu0 %5332 }
0x14bb   : > { %v5335_v32 = vpop.permute.xlu1 %5334 }
0x14bd   : > { %v10892_v46 = vpop.eup %10891 }
0x14be   : > { %v10894_v3 = vpop.eup %10893  ;;  %v5218_v61 = vmul.f32 %v10892_v46, %v10884_v22 }
0x14bf   : > { %v5216_v42 = vmul.f32 %v10894_v3, %v10886_v35 }
0x14c1   : > { %9451 = vmatprep.mubr.msk.f32.mxu1 %vm3646_vm11, %v5216_v42 }
0x14c2   : > { %9452 = vmatmul.mubr.msk.f32.gmra.mrb[26].mxu1 %vm3646_vm11, %v5218_v61 }
0x14c3   : > { %9462 = vmatprep.mubr.msk.f32.mxu1 %vm3714_vm12, %v5329_v41 }
0x14c6   : > { %9463 = vmatmul.mubr.msk.f32.vlgmr.msra.gmra.mrb[28].mxu1 %vm3714_vm12, %v5331_v37 }
0x14c7   : > { %9465 = vmatprep.mubr.msk.f32.mxu1 %vm3714_vm12, %v5333_v20 }
0x14ca   : > { %9466 = vmatmul.mubr.msk.f32.gmra.mrb[30].mxu1 %vm3714_vm12, %v5335_v32 }
0x1560   : > { %v12698_v18 = vpop.f32.mrb[24].mxu1 }
0x1561   : > { %v12700_v38 = vpop.f32.mrb[25].mxu1 }
0x1595   : > { %v12702_v31 = vpop.f32.mrb[26].mxu1 }
0x1596   : > { %v12704_v62 = vpop.f32.mrb[27].mxu1 }
0x1599   : > { %v9464_v48 = vpop.f32.mrb[28].mxu1 }
0x159a   : > { %v5446_v5 = vmul.f32 0.35355338, %v9464_v48  ;;  %v5426_v34 = vpop.f32.mrb[29].mxu1 }
0x159b   : > { %v5445_v0 = vmul.f32 0.35355338, %v5426_v34 }
0x159c   : > { %v5450_v51 = vadd.f32 %v5446_v5, %v12637_v58 }
0x159d   : > { %v9467_v39 = vpop.f32.mrb[30].mxu1  ;;  %v5449_v8 = vadd.f32 %v5445_v0, %v12642_v30 }
0x159e   : > { %v5436_v36 = vpop.f32.mrb[31].mxu1  ;;  %v5456_v10 = vsel %vm3646_vm11, %v5450_v51, -inf  ;;  %v5448_v54 = vmul.f32 0.35355338, %v9467_v39 }
0x159f   : > { %v5447_v13 = vmul.f32 0.35355338, %v5436_v36  ;;  %5457 = vmax.xlane.f32.xlu1 %v5456_v10  ;;  %v5453_v25 = vsel %vm3646_vm11, %v5449_v8, -inf }
0x15a0   : > { %5454 = vmax.xlane.f32.xlu0 %v5453_v25  ;;  %v5452_v35 = vadd.f32 %v5448_v54, %v12656_v23 }
0x15a1   : > { %v5451_v56 = vadd.f32 %v5447_v13, %v12650_v63 }
0x15a2   : > { %v5462_v17 = vsel %vm3646_vm11, %v5452_v35, -inf }
0x15a3   : > { %v5459_v22 = vsel %vm3646_vm11, %v5451_v56, -inf }
0x15a4   : > { %5460 = vmax.xlane.f32.xlu0 %v5459_v22 }
0x15a8   : > { %5463 = vmax.xlane.f32.xlu0 %v5462_v17 }
0x15b0   : > { %10601 = vrot.lane.b32.xlu1 %v12614_v52, %s13497_s6 }
0x15b4   : > { %10611 = vrot.lane.b32.xlu1 %v12614_v52, %s13498_s0 }
0x162c   : > { %v5458_v2 = vpop.xlane.xlu1 %5457 }
0x162d   : > { %v5466_v59 = vsub.f32 %v5450_v51, %v5458_v2  ;;  %v5455_v29 = vpop.xlane.xlu0 %5454 }
0x162e   : > { %v5465_v44 = vsub.f32 %v5449_v8, %v5455_v29 }
0x162f   : > { %v5471_v50 = vmul.f32 1.442695, %v5466_v59 }
0x1630   : > { %v5469_v55 = vmul.f32 1.442695, %v5465_v44  ;;  %v10602_v27 = vpop.permute.xlu1 %10601 }
0x1631   : > { %10895 = vpow2.f32 %v5471_v50  ;;  %v10604_v7 = vunpack.i.h.bf16 %v10602_v27  ;;  %v10603_v43 = vunpack.i.l.bf16 %v10602_v27  ;;  %v5461_v49 = vpop.xlane.xlu0 %5460 }
0x1632   : > { %10897 = vpow2.f32 %v5469_v55  ;;  %v5467_v24 = vsub.f32 %v5451_v56, %v5461_v49 }
0x1633   : > { %v9837_v9 = vpack.c.bf16 %v10604_v7, %v10603_v43 }
0x1634   : > { %v5473_v16 = vmul.f32 1.442695, %v5467_v24  ;;  %v10612_v41 = vpop.permute.xlu1 %10611 }
0x1635   : > { %9838 = vmatprep.subr.bf16.mxu0 %v9837_v9  ;;  %v5464_v19 = vpop.xlane.xlu0 %5463  ;;  %v10614_v32 = vunpack.i.h.bf16 %v10612_v41  ;;  %v10613_v48 = vunpack.i.l.bf16 %v10612_v41 }
0x1636   : > { %9840 = vmatpush3.bf16.msra.mxu0 %v9837_v9  ;;  %v5468_v15 = vsub.f32 %v5452_v35, %v5464_v19 }
0x1637   : > { %v9845_v51 = vpack.c.bf16 %v10614_v32, %v10613_v48 }
0x1638   : > { %v5475_v57 = vmul.f32 1.442695, %v5468_v15 }
0x163a   : > { %10899 = vpow2.f32 %v5475_v57 }
0x163b   : > { %v10896_v40 = vpop.eup %10895  ;;  %10901 = vpow2.f32 %v5473_v16 }
0x163c   : > { %v10898_v28 = vpop.eup %10897  ;;  %v5480_v53 = vsel %vm3646_vm11, %v10896_v40, 0.0 }
0x163d   : > { %5481 = vadd.xlane.f32.xlu0 %v5480_v53  ;;  %v5477_v33 = vsel %vm3646_vm11, %v10898_v28, 0.0 }
0x163e   : > { %5478 = vadd.xlane.f32.xlu1 %v5477_v33 }
0x1644   : > { %v10900_v4 = vpop.eup %10899 }
0x1645   : > { %v10902_v46 = vpop.eup %10901  ;;  %v5486_v3 = vsel %vm3646_vm11, %v10900_v4, 0.0 }
0x1646   : > { %v5483_v42 = vsel %vm3646_vm11, %v10902_v46, 0.0 }
0x164f   : > { %10616 = vrot.lane.b32.xlu1 %v12610_v47, %s13498_s0 }
0x1653   : > { %10606 = vrot.lane.b32.xlu0 %v12610_v47, %s13497_s6 }
0x1672   : > { %5487 = vadd.xlane.f32.xlu0 %v5486_v3 }
0x1673   : > { %5484 = vadd.xlane.f32.xlu1 %v5483_v42 }
0x1684   : > { %5608 = vrot.lane.b32.xlu1 %v12604_v14, %s13499_s9 }
0x1688   : > { %5612 = vrot.lane.b32.xlu1 %v12602_v6, %s13499_s9  ;;  %5606 = vrot.lane.b32.xlu0 %v12598_v26, %s13499_s9 }
0x168c   : > { %5610 = vrot.lane.b32.xlu0 %v12600_v12, %s13499_s9 }
0x16ca   : > { %v5482_v61 = vpop.xlane.xlu0 %5481 }
0x16cb   : > { %10903 = vrcp.f32 %v5482_v61  ;;  %v5479_v37 = vpop.xlane.xlu1 %5478 }
0x16cc   : > { %10905 = vrcp.f32 %v5479_v37 }
0x16ce   : > { %v10607_v20 = vpop.permute.xlu0 %10606 }
0x16cf   : > { %v10609_v5 = vunpack.i.h.bf16 %v10607_v20  ;;  %v10608_v34 = vunpack.i.l.bf16 %v10607_v20  ;;  %v10617_v8 = vpop.permute.xlu1 %10616 }
0x16d0   : > { %v10619_v13 = vunpack.i.h.bf16 %v10617_v8  ;;  %v10618_v25 = vunpack.i.l.bf16 %v10617_v8 }
0x16d1   : > { %v9841_v0 = vpack.c.bf16 %v10609_v5, %v10608_v34 }
0x16d2   : > { %v9851_v56 = vpack.c.bf16 %v10619_v13, %v10618_v25 }
0x16d3   : > { %9842 = vmatprep.subr.bf16.mxu0 %v9841_v0 }
0x16d4   : > { %9844 = vmatpush3.bf16.msra.mxu0 %v9841_v0 }
0x16d5   : > { %v10904_v39 = vpop.eup %10903  ;;  %9847 = vmatprep.subr.msk.bf16.mxu0 %vm12326_vm13, %v9845_v51 }
0x16d6   : > { %v10906_v36 = vpop.eup %10905  ;;  %v5492_v54 = vmul.f32 %v10904_v39, %v10896_v40 }
0x16d7   : > { %v5490_v10 = vmul.f32 %v10906_v36, %v10898_v28 }
0x16d9   : > { %9476 = vmatprep.mubr.msk.f32.mxu0 %vm3646_vm11, %v5490_v10 }
0x16da   : > { %9477 = vmatmul.mubr.msk.f32.vlgmr.msra.gmra.mrb[28].mxu0 %vm3646_vm11, %v5492_v54 }
0x16dd   : > { %9850 = vmatpush3.bf16.xpose.msk.msra.mxu0 %vm12326_vm13, %v9845_v51 }
0x16de   : > { %9853 = vmatprep.subr.msk.bf16.mxu0 %vm12326_vm13, %v9851_v56 }
0x16e5   : > { %9856 = vmatpush3.bf16.xpose.msk.msra.mxu0 %vm12326_vm13, %v9851_v56 }
0x16ff   : > { %v5488_v22 = vpop.xlane.xlu0 %5487 }
0x1700   : > { %10907 = vrcp.f32 %v5488_v22  ;;  %v5485_v35 = vpop.xlane.xlu1 %5484 }
0x1701   : > { %10909 = vrcp.f32 %v5485_v35 }
0x1703   : > { %v5607_v29 = vpop.permute.xlu0 %5606 }
0x1704   : > { %v5609_v50 = vpop.permute.xlu1 %5608 }
0x1707   : > { %v5611_v55 = vpop.permute.xlu0 %5610 }
0x1708   : > { %v5613_v27 = vpop.permute.xlu1 %5612 }
0x170a   : > { %v10908_v17 = vpop.eup %10907 }
0x170b   : > { %v10910_v2 = vpop.eup %10909  ;;  %v5496_v44 = vmul.f32 %v10908_v17, %v10900_v4 }
0x170c   : > { %v5494_v59 = vmul.f32 %v10910_v2, %v10902_v46 }
0x170e   : > { %9479 = vmatprep.mubr.msk.f32.mxu0 %vm3646_vm11, %v5494_v59 }
0x170f   : > { %9480 = vmatmul.mubr.msk.f32.gmra.mrb[30].mxu0 %vm3646_vm11, %v5496_v44 }
0x1710   : > { %9490 = vmatprep.mubr.msk.f32.mxu0 %vm3714_vm12, %v5607_v29 }
0x1713   : > { %9491 = vmatmul.mubr.msk.f32.vlgmr.msra.gmra.mrb[32].mxu0 %vm3714_vm12, %v5609_v50 }
0x1714   : > { %9493 = vmatprep.mubr.msk.f32.mxu0 %vm3714_vm12, %v5611_v55 }
0x1717   : > { %9494 = vmatmul.mubr.msk.f32.gmra.mrb[34].mxu0 %vm3714_vm12, %v5613_v27 }
0x17ad   : > { %v12750_v7 = vpop.f32.mrb[28].mxu0 }
0x17ae   : > { %v12752_v43 = vpop.f32.mrb[29].mxu0 }
0x17af   : > { %v10650_v9 = vpack.i.bf16 %v12750_v7, %v12752_v43 }
0x17e2   : > { %v12756_v40 = vpop.f32.mrb[30].mxu0 }
0x17e3   : > { %v12758_v28 = vpop.f32.mrb[31].mxu0 }
0x17e4   : > { %v10655_v53 = vpack.i.bf16 %v12756_v40, %v12758_v28 }
0x17e6   : > { %v9492_v33 = vpop.f32.mrb[32].mxu0 }
0x17e7   : > { %v5724_v49 = vmul.f32 0.35355338, %v9492_v33  ;;  %v5704_v19 = vpop.f32.mrb[33].mxu0 }
0x17e8   : > { %v5723_v15 = vmul.f32 0.35355338, %v5704_v19 }
0x17e9   : > { %v5728_v24 = vadd.f32 %v5724_v49, %v12637_v58 }
0x17ea   : > { %v9495_v57 = vpop.f32.mrb[34].mxu0  ;;  %v5727_v16 = vadd.f32 %v5723_v15, %v12642_v30 }
0x17eb   : > { %v5714_v4 = vpop.f32.mrb[35].mxu0  ;;  %v5734_v46 = vsel %vm3646_vm11, %v5728_v24, -inf  ;;  %v5726_v3 = vmul.f32 0.35355338, %v9495_v57 }
0x17ec   : > { %v5725_v42 = vmul.f32 0.35355338, %v5714_v4  ;;  %5735 = vmax.xlane.f32.xlu1 %v5734_v46  ;;  %v5731_v41 = vsel %vm3646_vm11, %v5727_v16, -inf }
0x17ed   : > { %5732 = vmax.xlane.f32.xlu0 %v5731_v41  ;;  %v5730_v20 = vadd.f32 %v5726_v3, %v12656_v23 }
0x17ee   : > { %v5729_v61 = vadd.f32 %v5725_v42, %v12650_v63 }
0x17ef   : > { %v5740_v32 = vsel %vm3646_vm11, %v5730_v20, -inf }
0x17f0   : > { %v5737_v37 = vsel %vm3646_vm11, %v5729_v61, -inf }
0x17f1   : > { %5738 = vmax.xlane.f32.xlu0 %v5737_v37 }
0x17f5   : > { %5741 = vmax.xlane.f32.xlu0 %v5740_v32 }
0x17fd   : > { %10621 = vrot.lane.b32.xlu1 %v12614_v52, %s13500_s11 }
0x1801   : > { %10631 = vrot.lane.b32.xlu1 %v12614_v52, %s13501_s30 }
0x1805   : > { %10636 = vrot.lane.b32.xlu1 %v12610_v47, %s13501_s30 }
0x1879   : > { %v5736_v48 = vpop.xlane.xlu1 %5735 }
0x187a   : > { %v5744_v5 = vsub.f32 %v5728_v24, %v5736_v48  ;;  %v5733_v34 = vpop.xlane.xlu0 %5732 }
0x187b   : > { %v5743_v0 = vsub.f32 %v5727_v16, %v5733_v34 }
0x187c   : > { %v5749_v51 = vmul.f32 1.442695, %v5744_v5 }
0x187d   : > { %v5747_v39 = vmul.f32 1.442695, %v5743_v0  ;;  %v10622_v8 = vpop.permute.xlu1 %10621 }
0x187e   : > { %10911 = vpow2.f32 %v5749_v51  ;;  %v10624_v36 = vunpack.i.h.bf16 %v10622_v8  ;;  %v10623_v10 = vunpack.i.l.bf16 %v10622_v8  ;;  %v5739_v35 = vpop.xlane.xlu0 %5738 }
0x187f   : > { %10913 = vpow2.f32 %v5747_v39  ;;  %v5745_v59 = vsub.f32 %v5729_v61, %v5739_v35 }
0x1880   : > { %v9857_v54 = vpack.c.bf16 %v10624_v36, %v10623_v10 }
0x1881   : > { %v5751_v44 = vmul.f32 1.442695, %v5745_v59 }
0x1882   : > { %9858 = vmatprep.subr.bf16.mxu1 %v9857_v54  ;;  %v5742_v17 = vpop.xlane.xlu0 %5741 }
0x1883   : > { %9860 = vmatpush3.bf16.msra.mxu1 %v9857_v54  ;;  %v5746_v2 = vsub.f32 %v5730_v20, %v5742_v17 }
0x1885   : > { %v5753_v29 = vmul.f32 1.442695, %v5746_v2 }
0x1887   : > { %10915 = vpow2.f32 %v5753_v29 }
0x1888   : > { %v10912_v13 = vpop.eup %10911  ;;  %10917 = vpow2.f32 %v5751_v44 }
0x1889   : > { %v10914_v25 = vpop.eup %10913  ;;  %v5758_v56 = vsel %vm3646_vm11, %v10912_v13, 0.0 }
0x188a   : > { %5759 = vadd.xlane.f32.xlu0 %v5758_v56  ;;  %v5755_v22 = vsel %vm3646_vm11, %v10914_v25, 0.0 }
0x188b   : > { %5756 = vadd.xlane.f32.xlu1 %v5755_v22 }
0x1891   : > { %v10916_v50 = vpop.eup %10915 }
0x1892   : > { %v10918_v55 = vpop.eup %10917  ;;  %v5764_v27 = vsel %vm3646_vm11, %v10916_v50, 0.0 }
0x1893   : > { %v5761_v33 = vsel %vm3646_vm11, %v10918_v55, 0.0 }
0x189c   : > { %5886 = vrot.lane.b32.xlu1 %v12604_v14, %s13502_s1  ;;  %v10632_v14 = vpop.permute.xlu1 %10631 }
0x189d   : > { %v10634_v57 = vunpack.i.h.bf16 %v10632_v14  ;;  %v10633_v16 = vunpack.i.l.bf16 %v10632_v14 }
0x189f   : > { %v9865_v42 = vpack.c.bf16 %v10634_v57, %v10633_v16 }
0x18a0   : > { %10626 = vrot.lane.b32.xlu0 %v12610_v47, %s13500_s11  ;;  %v10637_v49 = vpop.permute.xlu1 %10636 }
0x18a1   : > { %v10639_v41 = vunpack.i.h.bf16 %v10637_v49  ;;  %v10638_v61 = vunpack.i.l.bf16 %v10637_v49 }
0x18a3   : > { %v9871_v20 = vpack.c.bf16 %v10639_v41, %v10638_v61 }
0x18bf   : > { %5765 = vadd.xlane.f32.xlu0 %v5764_v27 }
0x18c0   : > { %5762 = vadd.xlane.f32.xlu1 %v5761_v33 }
0x18d1   : > { %5890 = vrot.lane.b32.xlu1 %v12602_v6, %s13502_s1 }
0x18d5   : > { %5884 = vrot.lane.b32.xlu0 %v12598_v26, %s13502_s1 }
0x18d9   : > { %5888 = vrot.lane.b32.xlu0 %v12600_v12, %s13502_s1 }
0x1917   : > { %v5760_v19 = vpop.xlane.xlu0 %5759 }
0x1918   : > { %10919 = vrcp.f32 %v5760_v19  ;;  %v5757_v15 = vpop.xlane.xlu1 %5756 }
0x1919   : > { %10921 = vrcp.f32 %v5757_v15 }
0x191b   : > { %v10627_v24 = vpop.permute.xlu0 %10626 }
0x191c   : > { %v10629_v4 = vunpack.i.h.bf16 %v10627_v24  ;;  %v10628_v46 = vunpack.i.l.bf16 %v10627_v24  ;;  %v5887_v32 = vpop.permute.xlu1 %5886 }
0x191e   : > { %v9861_v3 = vpack.c.bf16 %v10629_v4, %v10628_v46 }
0x1920   : > { %9862 = vmatprep.subr.bf16.mxu1 %v9861_v3 }
0x1921   : > { %9864 = vmatpush3.bf16.msra.mxu1 %v9861_v3 }
0x1922   : > { %v10920_v6 = vpop.eup %10919  ;;  %9867 = vmatprep.subr.msk.bf16.mxu1 %vm12326_vm13, %v9865_v42 }
0x1923   : > { %v10922_v26 = vpop.eup %10921  ;;  %v5770_v37 = vmul.f32 %v10920_v6, %v10912_v13 }
0x1924   : > { %v5768_v12 = vmul.f32 %v10922_v26, %v10914_v25 }
0x1926   : > { %9504 = vmatprep.mubr.msk.f32.mxu1 %vm3646_vm11, %v5768_v12 }
0x1927   : > { %9505 = vmatmul.mubr.msk.f32.vlgmr.msra.gmra.mrb[32].mxu1 %vm3646_vm11, %v5770_v37 }
0x192a   : > { %9870 = vmatpush3.bf16.xpose.msk.msra.mxu1 %vm12326_vm13, %v9865_v42 }
0x192b   : > { %9873 = vmatprep.subr.msk.bf16.mxu1 %vm12326_vm13, %v9871_v20 }
0x1932   : > { %9876 = vmatpush3.bf16.xpose.msk.msra.mxu1 %vm12326_vm13, %v9871_v20 }
0x194c   : > { %v5766_v48 = vpop.xlane.xlu0 %5765 }
0x194d   : > { %10923 = vrcp.f32 %v5766_v48  ;;  %v5763_v5 = vpop.xlane.xlu1 %5762 }
0x194e   : > { %10925 = vrcp.f32 %v5763_v5 }
0x1950   : > { %v5885_v39 = vpop.permute.xlu0 %5884 }
0x1951   : > { %v5891_v10 = vpop.permute.xlu1 %5890 }
0x1954   : > { %v5889_v36 = vpop.permute.xlu0 %5888 }
0x1957   : > { %v10924_v34 = vpop.eup %10923 }
0x1958   : > { %v10926_v0 = vpop.eup %10925  ;;  %v5774_v8 = vmul.f32 %v10924_v34, %v10916_v50 }
0x1959   : > { %v5772_v51 = vmul.f32 %v10926_v0, %v10918_v55 }
0x195b   : > { %9507 = vmatprep.mubr.msk.f32.mxu1 %vm3646_vm11, %v5772_v51 }
0x195c   : > { %9508 = vmatmul.mubr.msk.f32.gmra.mrb[34].mxu1 %vm3646_vm11, %v5774_v8 }
0x195d   : > { %9518 = vmatprep.mubr.msk.f32.mxu1 %vm3714_vm12, %v5885_v39 }
0x1960   : > { %9519 = vmatmul.mubr.msk.f32.vlgmr.msra.gmra.mrb[36].mxu1 %vm3714_vm12, %v5887_v32 }
0x1961   : > { %9521 = vmatprep.mubr.msk.f32.mxu1 %vm3714_vm12, %v5889_v36 }
0x1964   : > { %9522 = vmatmul.mubr.msk.f32.gmra.mrb[38].mxu1 %vm3714_vm12, %v5891_v10 }
0x19fa   : > { %v9506_v54 = vpop.f32.mrb[32].mxu1 }
0x19fb   : > { %v5865_v13 = vpop.f32.mrb[33].mxu1 }
0x19fc   : > { %v10660_v25 = vpack.i.bf16 %v9506_v54, %v5865_v13 }
0x1a2f   : > { %v9509_v56 = vpop.f32.mrb[34].mxu1 }
0x1a30   : > { %v5875_v22 = vpop.f32.mrb[35].mxu1 }
0x1a31   : > { %v10665_v35 = vpack.i.bf16 %v9509_v56, %v5875_v22 }
0x1a33   : > { %v9520_v17 = vpop.f32.mrb[36].mxu1 }
0x1a34   : > { %v6002_v2 = vmul.f32 0.35355338, %v9520_v17  ;;  %v5982_v59 = vpop.f32.mrb[37].mxu1 }
0x1a35   : > { %v6001_v29 = vmul.f32 0.35355338, %v5982_v59  ;;  %v10798_v59 = vld [vmem:[%s13372_s14 + $0x8] sm:$0xff]  }
0x1a36   : > { %v6006_v44 = vadd.f32 %v6002_v2, %v12637_v58  ;;  %v10797_v2 = vld [vmem:[%s13372_s14] sm:$0xff]  }
0x1a37   : > { %v6005_v50 = vadd.f32 %v6001_v29, %v12642_v30  ;;  %v9523_v55 = vpop.f32.mrb[38].mxu1 }
0x1a38   : > { %v5992_v27 = vpop.f32.mrb[39].mxu1  ;;  %v6012_v33 = vsel %vm3646_vm11, %v6006_v44, -inf  ;;  %v6004_v14 = vmul.f32 0.35355338, %v9523_v55 }
0x1a39   : > { %v6003_v49 = vmul.f32 0.35355338, %v5992_v27  ;;  %6013 = vmax.xlane.f32.xlu1 %v6012_v33  ;;  %v6009_v19 = vsel %vm3646_vm11, %v6005_v50, -inf }
0x1a3a   : > { %6010 = vmax.xlane.f32.xlu0 %v6009_v19  ;;  %v6008_v24 = vadd.f32 %v6004_v14, %v12656_v23 }
0x1a3b   : > { %v6007_v15 = vadd.f32 %v6003_v49, %v12650_v63 }
0x1a3c   : > { %v6018_v58 = vsel %vm3646_vm11, %v6008_v24, -inf }
0x1a3d   : > { %v6015_v57 = vsel %vm3646_vm11, %v6007_v15, -inf }
0x1a3e   : > { %6016 = vmax.xlane.f32.xlu0 %v6015_v57 }
0x1a42   : > { %6019 = vmax.xlane.f32.xlu0 %v6018_v58 }
0x1ac6   : > { %v6014_v30 = vpop.xlane.xlu1 %6013 }
0x1ac7   : > { %v6022_v16 = vsub.f32 %v6006_v44, %v6014_v30  ;;  %v6011_v4 = vpop.xlane.xlu0 %6010 }
0x1ac8   : > { %v6021_v46 = vsub.f32 %v6005_v50, %v6011_v4 }
0x1ac9   : > { %v6027_v3 = vmul.f32 1.442695, %v6022_v16 }
0x1aca   : > { %v6025_v42 = vmul.f32 1.442695, %v6021_v46 }
0x1acb   : > { %10927 = vpow2.f32 %v6027_v3  ;;  %v6017_v6 = vpop.xlane.xlu0 %6016 }
0x1acc   : > { %10929 = vpow2.f32 %v6025_v42  ;;  %v6023_v26 = vsub.f32 %v6007_v15, %v6017_v6 }
0x1ace   : > { %v6029_v12 = vmul.f32 1.442695, %v6023_v26 }
0x1acf   : > { %v6020_v63 = vpop.xlane.xlu0 %6019 }
0x1ad0   : > { %10931 = vpow2.f32 %v6029_v12  ;;  %v6024_v23 = vsub.f32 %v6008_v24, %v6020_v63 }
0x1ad2   : > { %v6031_v41 = vmul.f32 1.442695, %v6024_v23 }
0x1ad4   : > { %10933 = vpow2.f32 %v6031_v41 }
0x1ad5   : > { %v10928_v61 = vpop.eup %10927 }
0x1ad6   : > { %v10930_v37 = vpop.eup %10929  ;;  %v6036_v20 = vsel %vm3646_vm11, %v10928_v61, 0.0 }
0x1ad7   : > { %6037 = vadd.xlane.f32.xlu0 %v6036_v20  ;;  %v6033_v32 = vsel %vm3646_vm11, %v10930_v37, 0.0 }
0x1ad8   : > { %6034 = vadd.xlane.f32.xlu1 %v6033_v32 }
0x1ada   : > { %v10932_v48 = vpop.eup %10931 }
0x1adb   : > { %v6039_v5 = vsel %vm3646_vm11, %v10932_v48, 0.0 }
0x1adc   : > { %6040 = vadd.xlane.f32.xlu1 %v6039_v5 }
0x1ade   : > { %v10934_v34 = vpop.eup %10933 }
0x1adf   : > { %v6042_v0 = vsel %vm3646_vm11, %v10934_v34, 0.0 }
0x1ae0   : > { %6043 = vadd.xlane.f32.xlu0 %v6042_v0 }
0x1aed   : > { %10641 = vrot.lane.b32.xlu1 %v12614_v52, %s13503_s8 }
0x1af1   : > { %10651 = vrot.lane.b32.xlu1 %v10650_v9, %s13504_s3 }
0x1af5   : > { %10656 = vrot.lane.b32.xlu1 %v10655_v53, %s13504_s3 }
0x1af6   : > { %10646 = vrot.lane.b32.xlu0 %v12610_v47, %s13503_s8 }
0x1af9   : > { %10666 = vrot.lane.b32.xlu1 %v10665_v35, %s13505_s25 }
0x1afa   : > { %10661 = vrot.lane.b32.xlu0 %v10660_v25, %s13505_s25 }
0x1b64   : > { %v6038_v52 = vpop.xlane.xlu0 %6037 }
0x1b65   : > { %v6035_v51 = vpop.xlane.xlu1 %6034 }
0x1b66   : > { %10935 = vrcp.f32 %v6035_v51 }
0x1b67   : > { %10937 = vrcp.f32 %v6038_v52 }
0x1b69   : > { %v6041_v39 = vpop.xlane.xlu1 %6040 }
0x1b6a   : > { %10939 = vrcp.f32 %v6041_v39 }
0x1b6d   : > { %v10642_v7 = vpop.permute.xlu1 %10641  ;;  %v6044_v43 = vpop.xlane.xlu0 %6043 }
0x1b6e   : > { %v10644_v9 = vunpack.i.h.bf16 %v10642_v7  ;;  %v10643_v8 = vunpack.i.l.bf16 %v10642_v7  ;;  %10941 = vrcp.f32 %v6044_v43 }
0x1b70   : > { %v10936_v40 = vpop.eup %10935  ;;  %v9877_v28 = vpack.c.bf16 %v10644_v9, %v10643_v8 }
0x1b71   : > { %v10647_v53 = vpop.permute.xlu0 %10646  ;;  %v6046_v36 = vmul.f32 %v10936_v40, %v10930_v37  ;;  %v10938_v13 = vpop.eup %10937 }
0x1b72   : > { %v10649_v47 = vunpack.i.h.bf16 %v10647_v53  ;;  %v10648_v10 = vunpack.i.l.bf16 %v10647_v53  ;;  %9878 = vmatprep.subr.bf16.mxu0 %v9877_v28  ;;  %v6048_v56 = vmul.f32 %v10938_v13, %v10928_v61  ;;  %v10652_v14 = vpop.permute.xlu1 %10651 }
0x1b73   : > { %9880 = vmatpush3.bf16.msra.mxu0 %v9877_v28  ;;  %9532 = vmatprep.mubr.msk.f32.mxu0 %vm3646_vm11, %v6046_v36  ;;  %v10654_v15 = vunpack.i.h.bf16 %v10652_v14  ;;  %v10653_v24 = vunpack.i.l.bf16 %v10652_v14 }
0x1b74   : > { %v9881_v54 = vpack.c.bf16 %v10649_v47, %v10648_v10  ;;  %v10940_v25 = vpop.eup %10939 }
0x1b75   : > { %v6050_v35 = vmul.f32 %v10940_v25, %v10932_v48  ;;  %v10662_v19 = vpop.permute.xlu0 %10661  ;;  %v6210_v16 = vsel %vm3714_vm12, %v12700_v38, %v10653_v24  ;;  %v6211_v4 = vsel %vm3714_vm12, %v12698_v18, %v10654_v15 }
0x1b76   : > { %9882 = vmatprep.subr.bf16.mxu0 %v9881_v54  ;;  %v10657_v49 = vpop.permute.xlu1 %10656  ;;  %v10664_v57 = vunpack.i.h.bf16 %v10662_v19  ;;  %v10663_v58 = vunpack.i.l.bf16 %v10662_v19 }
0x1b77   : > { %9884 = vmatpush3.bf16.msra.mxu0 %v9881_v54  ;;  %v10659_v3 = vunpack.i.h.bf16 %v10657_v49  ;;  %v10658_v42 = vunpack.i.l.bf16 %v10657_v49 }
0x1b78   : > { %v10942_v22 = vpop.eup %10941  ;;  %9538 = vmatprep.subr.bf16.mxu0 %v10797_v2  ;;  %v6215_v12 = vsel %vm3420_vm3, %v6211_v4, %v10664_v57  ;;  %v6214_v63 = vsel %vm3420_vm3, %v6210_v16, %v10663_v58  ;;  %v10799_v58 = vld [vmem:[%s13376_s18] sm:$0xff]   ;;  %v10802_v4 = vld [vmem:[%s13378_s20 + $0x8] sm:$0xff]  }
0x1b79   : > { %v6052_v17 = vmul.f32 %v10942_v22, %v10934_v34  ;;  %v6212_v18 = vsel %vm3714_vm12, %v12704_v62, %v10658_v42  ;;  %v6213_v32 = vsel %vm3714_vm12, %v12702_v31, %v10659_v3  ;;  %v8849_v62 = vld [vmem:[%s13507_s15] ss:$0 sm:$0xff]  ;;  %9546 = vmatprep.subr.bf16.mxu1 %v10799_v58  ;;  %s13510_s15 = smov 88  }
0x1b7a   : > { %9533 = vmatmul.mubr.msk.f32.vlgmr.msra.gmra.mrb[36].mxu0 %vm3646_vm11, %v6048_v56  ;;  %v10667_v30 = vpop.permute.xlu1 %10666  ;;  %9547 = vmatpush3.bf16.msra.mxu1 %v10799_v58  ;;  %v10801_v16 = vld [vmem:[%s13378_s20] sm:$0xff]  }
0x1b7b   : > { %9535 = vmatprep.mubr.msk.f32.mxu0 %vm3646_vm11, %v6050_v35  ;;  %9539 = vmatpush3.bf16.msra.mxu0 %v10797_v2  ;;  %v10669_v23 = vunpack.i.h.bf16 %v10667_v30  ;;  %v10668_v41 = vunpack.i.l.bf16 %v10667_v30  ;;  %v10800_v30 = vld [vmem:[%s13376_s18 + $0x8] sm:$0xff]  }
0x1b7c   : > { %9540 = vmatprep.subr.bf16.mxu0 %v10798_v59  ;;  %9548 = vmatprep.subr.bf16.mxu1 %v10800_v30 }
0x1b7d   : > { %v6216_v34 = vsel %vm3420_vm3, %v6212_v18, %v10668_v41  ;;  %v6217_v0 = vsel %vm3420_vm3, %v6213_v32, %v10669_v23  ;;  %v8854_v18 = vld [vmem:[%s13374_s16] ss:$0 sm:$0xff] }
0x1b7e   : > { %9536 = vmatmul.mubr.msk.f32.gmra.mrb[38].mxu0 %vm3646_vm11, %v6052_v17  ;;  %9549 = vmatpush3.bf16.msra.mxu1 %v10800_v30 }
0x1b7f   : > { %9541 = vmatpush3.bf16.msra.mxu0 %v10798_v59 }
0x1b80   : > { %9554 = vmatprep.subr.bf16.mxu0 %v10801_v16 }
0x1c4d   : > { %v9534_v29 = vpop.f32.mrb[36].mxu0 }
0x1c4e   : > { %v6143_v44 = vpop.f32.mrb[37].mxu0 }
0x1c4f   : > { %v10670_v50 = vpack.i.bf16 %v9534_v29, %v6143_v44 }
0x1c51   : > { %10671 = vrot.lane.b32.xlu0 %v10670_v50, %s13506_s28  ;;  %v9537_v55 = vpop.f32.mrb[38].mxu0 }
0x1c52   : > { %v6153_v27 = vpop.f32.mrb[39].mxu0 }
0x1c53   : > { %v10675_v33 = vpack.i.bf16 %v9537_v55, %v6153_v27 }
0x1c55   : > { %10676 = vrot.lane.b32.xlu1 %v10675_v33, %s13506_s28 }
0x1cc3   : > { %v10672_v46 = vpop.permute.xlu0 %10671 }
0x1cc4   : > { %v10674_v6 = vunpack.i.h.bf16 %v10672_v46  ;;  %v10673_v26 = vunpack.i.l.bf16 %v10672_v46 }
0x1cc6   : > { %v6219_v61 = vsel %vm4867_vm14, %v6215_v12, %v10674_v6  ;;  %v6218_v37 = vsel %vm4867_vm14, %v6214_v63, %v10673_v26 }
0x1cc7   : > { %v10677_v20 = vpop.permute.xlu1 %10676  ;;  %v6222_v38 = vpack.c.bf16 %v6219_v61, %v6218_v37 }
0x1cc8   : > { %v10679_v48 = vunpack.i.h.bf16 %v10677_v20  ;;  %v10678_v5 = vunpack.i.l.bf16 %v10677_v20 }
0x1cc9   : > { %9542 = vmatprep.mubr.msk.bf16.mxu0 %vm3646_vm11, %v6222_v38 }
0x1cca   : > { %v6221_v51 = vsel %vm4867_vm14, %v6217_v0, %v10679_v48  ;;  %v6220_v52 = vsel %vm4867_vm14, %v6216_v34, %v10678_v5 }
0x1ccb   : > { %v6223_v39 = vpack.c.bf16 %v6221_v51, %v6220_v52  ;;  %v8855_v51 = vld [vmem:[%s13375_s17] ss:$0 sm:$0xff] }
0x1ccd   : > { %9543 = vmatmul.mubr.msk.bf16.vlgmr.msra.gmra.mrb[40].mxu0 %vm3646_vm11, %v6223_v39 }
0x1cce   : > { %9555 = vmatpush3.bf16.msra.mxu0 %v10801_v16 }
0x1ccf   : > { %9556 = vmatprep.subr.bf16.mxu0 %v10802_v4 }
0x1cd2   : > { %9557 = vmatpush3.bf16.msra.mxu0 %v10802_v4 }
0x1da0   : > { %v9544_v31 = vpop.f32.mrb[40].mxu0 }
0x1da1   : > { %v6282_v7 = vpop.f32.mrb[41].mxu0  ;;  %v6291_v43 = vadd.f32 %v9544_v31, %v8849_v62 }
0x1da2   : > { %v6283_v9 = vadd.f32 %v8849_v62, %v6282_v7  ;;  %v9545_v8 = vpop.f32.mrb[42].mxu0 }
0x1da3   : > { %v6285_v40 = vpop.f32.mrb[43].mxu0  ;;  %v6299_v36 = vadd.f32 %v6291_v43, %v12587_v11  ;;  %v6294_v47 = vadd.f32 %v9545_v8, %v8849_v62 }
0x1da4   : > { %v6297_v28 = vadd.f32 %v6283_v9, %v12583_v60  ;;  %v6286_v53 = vadd.f32 %v8849_v62, %v6285_v40 }
0x1da5   : > { %v6300_v25 = vadd.f32 %v6294_v47, %v12581_v45  ;;  %v6307_v56 = vsel %vm3646_vm11, %v6299_v36, 0.0  ;;  %v10803_v47 = vld [vmem:[%s13378_s20 + $0x10] sm:$0xff]  }
0x1da6   : > { %v6298_v10 = vadd.f32 %v6286_v53, %v12585_v21  ;;  %v6301_v54 = vsel %vm3646_vm11, %v6297_v28, 0.0  ;;  %9558 = vmatprep.subr.bf16.mxu0 %v10803_v47 }
0x1da7   : > { %6302 = vadd.xlane.f32.xlu0 %v6301_v54  ;;  %v6310_v22 = vsel %vm3646_vm11, %v6300_v25, 0.0  ;;  %9559 = vmatpush3.bf16.msra.mxu0 %v10803_v47  ;;  %v8856_v54 = vld [vmem:[%s13377_s19] ss:$0 sm:$0xff] }
0x1da8   : > { %v6304_v13 = vsel %vm3646_vm11, %v6298_v10, 0.0 }
0x1da9   : > { %6305 = vadd.xlane.f32.xlu1 %v6304_v13 }
0x1dab   : > { %6308 = vadd.xlane.f32.xlu0 %v6307_v56 }
0x1daf   : > { %6311 = vadd.xlane.f32.xlu0 %v6310_v22 }
0x1e34   : > { %v6303_v60 = vpop.xlane.xlu0 %6302 }
0x1e35   : > { %v6314_v35 = vmul.f32 0.03125, %v6303_v60 }
0x1e36   : > { %v6306_v11 = vpop.xlane.xlu1 %6305 }
0x1e37   : > { %v6318_v17 = vsub.f32 %v6297_v28, %v6314_v35  ;;  %v6315_v2 = vmul.f32 0.03125, %v6306_v11 }
0x1e38   : > { %v6309_v21 = vpop.xlane.xlu0 %6308 }
0x1e39   : > { %v6319_v59 = vsub.f32 %v6298_v10, %v6315_v2  ;;  %v6316_v29 = vmul.f32 0.03125, %v6309_v21  ;;  %v6322_v44 = vmul.f32 %v6318_v17, %v6318_v17  ;;  %v10804_v10 = vld [vmem:[%s13378_s20 + $0x18] sm:$0xff]  }
0x1e3a   : > { %9560 = vmatprep.subr.bf16.mxu0 %v10804_v10 }
0x1e3b   : > { %v6320_v50 = vsub.f32 %v6299_v36, %v6316_v29  ;;  %v6326_v55 = vsel %vm3646_vm11, %v6322_v44, 0.0  ;;  %v6323_v27 = vmul.f32 %v6319_v59, %v6319_v59  ;;  %9561 = vmatpush3.bf16.msra.mxu0 %v10804_v10 }
0x1e3c   : > { %6327 = vadd.xlane.f32.xlu1 %v6326_v55  ;;  %v6312_v45 = vpop.xlane.xlu0 %6311  ;;  %v8861_v55 = vld [vmem:[%s13379_s21] ss:$0 sm:$0xff] }
0x1e3d   : > { %v6317_v33 = vmul.f32 0.03125, %v6312_v45  ;;  %v6329_v14 = vsel %vm3646_vm11, %v6323_v27, 0.0  ;;  %v6324_v49 = vmul.f32 %v6320_v50, %v6320_v50 }
0x1e3e   : > { %6330 = vadd.xlane.f32.xlu0 %v6329_v14 }
0x1e3f   : > { %v6321_v19 = vsub.f32 %v6300_v25, %v6317_v33  ;;  %v6332_v15 = vsel %vm3646_vm11, %v6324_v49, 0.0 }
0x1e40   : > { %6333 = vadd.xlane.f32.xlu1 %v6332_v15 }
0x1e41   : > { %v6325_v24 = vmul.f32 %v6321_v19, %v6321_v19 }
0x1e43   : > { %v6335_v57 = vsel %vm3646_vm11, %v6325_v24, 0.0 }
0x1e44   : > { %6336 = vadd.xlane.f32.xlu0 %v6335_v57 }
0x1ec9   : > { %v6328_v46 = vpop.xlane.xlu1 %6327 }
0x1eca   : > { %v6338_v3 = vmul.f32 0.03125, %v6328_v46 }
0x1ecb   : > { %v6331_v42 = vpop.xlane.xlu0 %6330 }
0x1ecc   : > { %v6342_v6 = vadd.f32 1e-05, %v6338_v3  ;;  %v6339_v26 = vmul.f32 0.03125, %v6331_v42 }
0x1ecd   : > { %v6334_v12 = vpop.xlane.xlu1 %6333 }
0x1ece   : > { %10943 = vrsqrt.f32 %v6342_v6  ;;  %v6343_v63 = vadd.f32 1e-05, %v6339_v26  ;;  %v6340_v23 = vmul.f32 0.03125, %v6334_v12 }
0x1ed0   : > { %10945 = vrsqrt.f32 %v6343_v63  ;;  %v6344_v41 = vadd.f32 1e-05, %v6340_v23 }
0x1ed1   : > { %v6337_v61 = vpop.xlane.xlu0 %6336 }
0x1ed2   : > { %10947 = vrsqrt.f32 %v6344_v41  ;;  %v6341_v37 = vmul.f32 0.03125, %v6337_v61 }
0x1ed4   : > { %v6345_v20 = vadd.f32 1e-05, %v6341_v37 }
0x1ed6   : > { %10949 = vrsqrt.f32 %v6345_v20 }
0x1ed8   : > { %v10944_v38 = vpop.eup %10943 }
0x1ed9   : > { %v6350_v32 = vmul.f32 %v10944_v38, %v6318_v17 }
0x1eda   : > { %v10946_v48 = vpop.eup %10945 }
0x1edb   : > { %v6351_v5 = vmul.f32 %v10946_v48, %v6319_v59  ;;  %v6360_v34 = vmul.f32 %v8854_v18, %v6350_v32 }
0x1edc   : > { %v10948_v0 = vpop.eup %10947 }
0x1edd   : > { %v6352_v52 = vmul.f32 %v10948_v0, %v6320_v50  ;;  %v6361_v39 = vmul.f32 %v8854_v18, %v6351_v5  ;;  %v6370_v62 = vadd.f32 %v8855_v51, %v6360_v34 }
0x1edf   : > { %v6371_v31 = vadd.f32 %v8855_v51, %v6361_v39  ;;  %v6362_v43 = vmul.f32 %v8854_v18, %v6352_v52 }
0x1ee0   : > { %v10950_v7 = vpop.eup %10949 }
0x1ee1   : > { %v6353_v9 = vmul.f32 %v10950_v7, %v6321_v19  ;;  %v6374_v8 = vpack.c.bf16 %v6371_v31, %v6370_v62  ;;  %v6372_v28 = vadd.f32 %v8855_v51, %v6362_v43  ;;  %v10806_v7 = vld [vmem:[%s13492_s29 + $0x18] sm:$0xff]  }
0x1ee3   : > { %v6363_v40 = vmul.f32 %v8854_v18, %v6353_v9  ;;  %9550 = vmatprep.mubr.msk.bf16.mxu1 %vm3646_vm11, %v6374_v8 }
0x1ee5   : > { %v6373_v53 = vadd.f32 %v8855_v51, %v6363_v40 }
0x1ee7   : > { %v6375_v36 = vpack.c.bf16 %v6373_v53, %v6372_v28 }
0x1ee9   : > { %9551 = vmatmul.mubr.msk.bf16.vlgmr.msra.gmra.mrb[40].mxu1 %vm3646_vm11, %v6375_v36 }
0x1fbc   : > { %v9552_v13 = vpop.f32.mrb[40].mxu1 }
0x1fbd   : > { %v6443_v25 = vadd.f32 %v9552_v13, %v8856_v54  ;;  %v6434_v56 = vpop.f32.mrb[41].mxu1 }
0x1fbe   : > { %v6435_v22 = vadd.f32 %v8856_v54, %v6434_v56  ;;  %v9553_v60 = vpop.f32.mrb[42].mxu1 }
0x1fbf   : > { %v6446_v35 = vadd.f32 %v9553_v60, %v8856_v54  ;;  %v6437_v11 = vpop.f32.mrb[43].mxu1  ;;  %v6451_v2 = vmax.f32 %v6443_v25, 0.0 }
0x1fc0   : > { %v6438_v17 = vadd.f32 %v8856_v54, %v6437_v11  ;;  %v6449_v59 = vmax.f32 %v6435_v22, 0.0  ;;  %v8868_v22 = vld [vmem:[%s13380_s22] ss:$0 sm:$0xff] }
0x1fc1   : > { %v6452_v21 = vmax.f32 %v6446_v35, 0.0 }
0x1fc2   : > { %v6450_v29 = vmax.f32 %v6438_v17, 0.0 }
0x1fc3   : > { %v6454_v44 = vpack.c.bf16 %v6452_v21, %v6451_v2  ;;  %v8869_v21 = vld [vmem:[%s13381_s23] ss:$0 sm:$0xff] }
0x1fc4   : > { %v6453_v50 = vpack.c.bf16 %v6450_v29, %v6449_v59 }
0x1fc6   : > { %9562 = vmatprep.mubr.msk.bf16.mxu0 %vm1012_vm2, %v6453_v50 }
0x1fc7   : > { %9563 = vmatmul.mubr.msk.bf16.vlgmr.msra.gmra.mrb[44].mxu0 %vm1012_vm2, %v6454_v44 }
0x209a   : > { %v9564_v27 = vpop.f32.mrb[44].mxu0 }
0x209b   : > { %v6525_v45 = vpop.f32.mrb[45].mxu0  ;;  %v6534_v33 = vadd.f32 %v9564_v27, %v8861_v55 }
0x209c   : > { %v6526_v14 = vadd.f32 %v8861_v55, %v6525_v45  ;;  %v9565_v49 = vpop.f32.mrb[46].mxu0 }
0x209d   : > { %v6528_v19 = vpop.f32.mrb[47].mxu0  ;;  %v6537_v24 = vadd.f32 %v9565_v49, %v8861_v55  ;;  %v6542_v58 = vadd.f32 %v6534_v33, %v6372_v28 }
0x209e   : > { %v6540_v15 = vadd.f32 %v6526_v14, %v6370_v62  ;;  %v6529_v57 = vadd.f32 %v8861_v55, %v6528_v19 }
0x209f   : > { %v6543_v4 = vadd.f32 %v6537_v24, %v6373_v53  ;;  %v6550_v3 = vsel %vm3646_vm11, %v6542_v58, 0.0  ;;  %v8898_v24 = vld [vmem:[%s13371_s13 + $0x1] ss:$0 sm:$0xff] }
0x20a0   : > { %v6541_v30 = vadd.f32 %v6529_v57, %v6371_v31  ;;  %v6544_v16 = vsel %vm3646_vm11, %v6540_v15, 0.0  ;;  %v10805_v31 = vld [vmem:[%s13492_s29 + $0x10] sm:$0xff]  }
0x20a1   : > { %6545 = vadd.xlane.f32.xlu1 %v6544_v16  ;;  %v6553_v42 = vsel %vm3646_vm11, %v6543_v4, 0.0  ;;  %9566 = vmatprep.subr.bf16.mxu1 %v10805_v31 }
0x20a2   : > { %v6547_v46 = vsel %vm3646_vm11, %v6541_v30, 0.0  ;;  %9567 = vmatpush3.bf16.msra.mxu1 %v10805_v31 }
0x20a3   : > { %6548 = vadd.xlane.f32.xlu0 %v6547_v46  ;;  %9568 = vmatprep.subr.bf16.mxu1 %v10806_v7 }
0x20a5   : > { %6551 = vadd.xlane.f32.xlu1 %v6550_v3 }
0x20a6   : > { %9569 = vmatpush3.bf16.msra.mxu1 %v10806_v7 }
0x20a7   : > { %6554 = vadd.xlane.f32.xlu0 %v6553_v42 }
0x212e   : > { %v6546_v6 = vpop.xlane.xlu1 %6545 }
0x212f   : > { %v6556_v26 = vmul.f32 0.03125, %v6546_v6 }
0x2130   : > { %v6549_v12 = vpop.xlane.xlu0 %6548 }
0x2131   : > { %v6560_v63 = vsub.f32 %v6540_v15, %v6556_v26  ;;  %v6557_v23 = vmul.f32 0.03125, %v6549_v12 }
0x2132   : > { %v6552_v41 = vpop.xlane.xlu1 %6551 }
0x2133   : > { %v6561_v61 = vsub.f32 %v6541_v30, %v6557_v23  ;;  %v6558_v37 = vmul.f32 0.03125, %v6552_v41  ;;  %v6564_v20 = vmul.f32 %v6560_v63, %v6560_v63 }
0x2134   : > { %v6555_v38 = vpop.xlane.xlu0 %6554 }
0x2135   : > { %v6562_v18 = vsub.f32 %v6542_v58, %v6558_v37  ;;  %v6559_v32 = vmul.f32 0.03125, %v6555_v38  ;;  %v6568_v48 = vsel %vm3646_vm11, %v6564_v20, 0.0  ;;  %v6565_v5 = vmul.f32 %v6561_v61, %v6561_v61 }
0x2136   : > { %6569 = vadd.xlane.f32.xlu1 %v6568_v48 }
0x2137   : > { %v6563_v34 = vsub.f32 %v6543_v4, %v6559_v32  ;;  %v6571_v0 = vsel %vm3646_vm11, %v6565_v5, 0.0  ;;  %v6566_v51 = vmul.f32 %v6562_v18, %v6562_v18 }
0x2138   : > { %6572 = vadd.xlane.f32.xlu0 %v6571_v0 }
0x2139   : > { %v6574_v52 = vsel %vm3646_vm11, %v6566_v51, 0.0  ;;  %v6567_v39 = vmul.f32 %v6563_v34, %v6563_v34  ;;  %v12993_v51 = vld [vmem:[%s13495_s24] sm:$0xff] }
0x213a   : > { %6575 = vadd.xlane.f32.xlu1 %v6574_v52 }
0x213b   : > { %v6577_v62 = vsel %vm3646_vm11, %v6567_v39, 0.0 }
0x213c   : > { %6578 = vadd.xlane.f32.xlu0 %v6577_v62 }
0x21c3   : > { %v6570_v43 = vpop.xlane.xlu1 %6569 }
0x21c4   : > { %v6580_v9 = vmul.f32 0.03125, %v6570_v43 }
0x21c5   : > { %v6573_v8 = vpop.xlane.xlu0 %6572 }
0x21c6   : > { %v6584_v40 = vadd.f32 1e-05, %v6580_v9  ;;  %v6581_v28 = vmul.f32 0.03125, %v6573_v8  ;;  %v13001_v9 = vld [vmem:[%s13495_s24 + $0x18] sm:$0xff] }
0x21c7   : > { %v6576_v53 = vpop.xlane.xlu1 %6575 }
0x21c8   : > { %10951 = vrsqrt.f32 %v6584_v40  ;;  %v6585_v36 = vadd.f32 1e-05, %v6581_v28  ;;  %v6582_v47 = vmul.f32 0.03125, %v6576_v53  ;;  %v13010_v53 = vld [vmem:[%s13495_s24 + $0x10] sm:$0xff] }
0x21c9   : > { %v6579_v10 = vpop.xlane.xlu0 %6578 }
0x21ca   : > { %10953 = vrsqrt.f32 %v6585_v36  ;;  %v6586_v54 = vadd.f32 1e-05, %v6582_v47  ;;  %v6583_v13 = vmul.f32 0.03125, %v6579_v10 }
0x21cc   : > { %10955 = vrsqrt.f32 %v6586_v54  ;;  %v6587_v25 = vadd.f32 1e-05, %v6583_v13 }
0x21ce   : > { %10957 = vrsqrt.f32 %v6587_v25 }
0x21d2   : > { %v10952_v56 = vpop.eup %10951 }
0x21d3   : > { %v6592_v60 = vmul.f32 %v10952_v56, %v6560_v63 }
0x21d4   : > { %v10954_v35 = vpop.eup %10953 }
0x21d5   : > { %v6593_v11 = vmul.f32 %v10954_v35, %v6561_v61  ;;  %v6602_v17 = vmul.f32 %v8868_v22, %v6592_v60 }
0x21d6   : > { %v10956_v2 = vpop.eup %10955 }
0x21d7   : > { %v6594_v59 = vmul.f32 %v10956_v2, %v6562_v18  ;;  %v6603_v29 = vmul.f32 %v8868_v22, %v6593_v11  ;;  %v12931_v27 = vadd.f32 %v8869_v21, %v6602_v17 }
0x21d8   : > { %v10958_v44 = vpop.eup %10957 }
0x21d9   : > { %v6604_v50 = vmul.f32 %v8868_v22, %v6594_v59  ;;  %v6595_v55 = vmul.f32 %v10958_v44, %v6563_v34  ;;  %v12933_v45 = vadd.f32 %v8869_v21, %v6603_v29  ;;  %v12987_v34 = vld [vmem:[%s13495_s24 + $0x8] sm:$0xff] }
0x21db   : > { %v6605_v33 = vmul.f32 %v8868_v22, %v6595_v55  ;;  %v6656_v14 = vpack.c.bf16 %v12933_v45, %v12931_v27  ;;  %v12938_v49 = vadd.f32 %v8869_v21, %v6604_v50 }
0x21dd   : > { %9570 = vmatprep.mubr.msk.bf16.mxu1 %vm3646_vm11, %v6656_v14  ;;  %v12940_v19 = vadd.f32 %v8869_v21, %v6605_v33 }
0x21df   : > { %v6657_v15 = vpack.c.bf16 %v12940_v19, %v12938_v49 }
0x21e1   : > { %9571 = vmatmul.mubr.msk.bf16.vlgmr.msra.gmra.mrb[44].mxu1 %vm3646_vm11, %v6657_v15 }
0x22b4   : > { %v9572_v57 = vpop.f32.mrb[44].mxu1 }
0x22b5   : > { %v6716_v58 = vpop.f32.mrb[45].mxu1  ;;  %v12950_v4 = vadd.f32 %v9572_v57, %v8898_v24 }
0x22b6   : > { %v12948_v30 = vadd.f32 %v8898_v24, %v6716_v58  ;;  %v9573_v16 = vpop.f32.mrb[46].mxu1 }
0x22b7   : > { %v12952_v46 = vadd.f32 %v9573_v16, %v8898_v24  ;;  %v6719_v3 = vpop.f32.mrb[47].mxu1 }
0x22b8   : > { %v12954_v42 = vadd.f32 %v8898_v24, %v6719_v3  ;;  %9582 = vmatprep.mubr.msk.f32.mxu1 %vm3714_vm12, %v12948_v30 }
0x22b9   : > { %v12960_v6 = vpack.i.bf16 %v12952_v46, %v12950_v4 }
0x22ba   : > { %v12964_v26 = vpack.i.bf16 %v12954_v42, %v12948_v30 }
0x22bb   : > { %10686 = vrot.lane.b32.xlu0 %v12960_v6, %s13508_s27 }
0x22bc   : > { %10681 = vrot.lane.b32.xlu1 %v12964_v26, %s13508_s27 }
0x232d   : > { %v10687_v12 = vpop.permute.xlu0 %10686 }
0x232e   : > { %v10682_v63 = vpop.permute.xlu1 %10681  ;;  %v10689_v23 = vunpack.i.h.bf16 %v10687_v12  ;;  %v10688_v41 = vunpack.i.l.bf16 %v10687_v12 }
0x232f   : > { %v10684_v61 = vunpack.i.h.bf16 %v10682_v63  ;;  %v10683_v37 = vunpack.i.l.bf16 %v10682_v63 }
0x2330   : > { %v9891_v38 = vpack.c.bf16 %v10689_v23, %v10688_v41 }
0x2331   : > { %v9885_v20 = vpack.c.bf16 %v10684_v61, %v10683_v37 }
0x2333   : > { %9887 = vmatprep.subr.msk.bf16.mxu1 %vm12326_vm13, %v9885_v20 }
0x2334   : > { %9890 = vmatpush3.bf16.xpose.msk.msra.mxu1 %vm12326_vm13, %v9885_v20 }
0x2335   : > { %9893 = vmatprep.subr.msk.bf16.mxu1 %vm12326_vm13, %v9891_v38 }
0x233c   : > { %9896 = vmatpush3.bf16.xpose.msk.msra.mxu1 %vm12326_vm13, %v9891_v38 }
0x2343   : > { %9583 = vmatmul.mubr.msk.f32.vlgmr.msra.gmra.mrb[48].mxu1 %vm3714_vm12, %v12954_v42 }
0x2344   : > { %9585 = vmatprep.mubr.msk.f32.mxu1 %vm3714_vm12, %v12950_v4 }
0x2347   : > { %9586 = vmatmul.mubr.msk.f32.gmra.mrb[50].mxu1 %vm3714_vm12, %v12952_v46 }
0x2416   : > { %v9584_v18 = vpop.f32.mrb[48].mxu1 }
0x2417   : > { %v6845_v32 = vmul.f32 0.35355338, %v9584_v18  ;;  %v6825_v48 = vpop.f32.mrb[49].mxu1 }
0x2418   : > { %v6844_v5 = vmul.f32 0.35355338, %v6825_v48 }
0x2419   : > { %v6849_v0 = vadd.f32 %v12987_v34, %v6845_v32 }
0x241a   : > { %v6848_v52 = vadd.f32 %v12993_v51, %v6844_v5  ;;  %v9587_v39 = vpop.f32.mrb[50].mxu1 }
0x241b   : > { %v6847_v62 = vmul.f32 0.35355338, %v9587_v39  ;;  %v6835_v31 = vpop.f32.mrb[51].mxu1  ;;  %v6855_v7 = vsel %vm3646_vm11, %v6849_v0, -inf }
0x241c   : > { %6856 = vmax.xlane.f32.xlu0 %v6855_v7  ;;  %v6852_v43 = vsel %vm3646_vm11, %v6848_v52, -inf  ;;  %v6846_v28 = vmul.f32 0.35355338, %v6835_v31 }
0x241d   : > { %v6851_v8 = vadd.f32 %v13001_v9, %v6847_v62  ;;  %6853 = vmax.xlane.f32.xlu1 %v6852_v43 }
0x241e   : > { %v6850_v36 = vadd.f32 %v13010_v53, %v6846_v28 }
0x241f   : > { %v6861_v40 = vsel %vm3646_vm11, %v6851_v8, -inf }
0x2420   : > { %6862 = vmax.xlane.f32.xlu0 %v6861_v40  ;;  %v6858_v47 = vsel %vm3646_vm11, %v6850_v36, -inf }
0x242e   : > { %10691 = vrot.lane.b32.xlu1 %v12964_v26, %s13509_s7 }
0x2452   : > { %6859 = vmax.xlane.f32.xlu1 %v6858_v47 }
0x2463   : > { %10701 = vrot.lane.b32.xlu1 %v12964_v26, %s13510_s15 }
0x24a9   : > { %v6857_v10 = vpop.xlane.xlu0 %6856 }
0x24aa   : > { %v6865_v54 = vsub.f32 %v6849_v0, %v6857_v10  ;;  %v6854_v13 = vpop.xlane.xlu1 %6853 }
0x24ab   : > { %v6864_v25 = vsub.f32 %v6848_v52, %v6854_v13 }
0x24ac   : > { %v6870_v56 = vmul.f32 1.442695, %v6865_v54 }
0x24ad   : > { %v6868_v22 = vmul.f32 1.442695, %v6864_v25  ;;  %v6863_v44 = vpop.xlane.xlu0 %6862 }
0x24ae   : > { %10959 = vpow2.f32 %v6870_v56  ;;  %v10692_v60 = vpop.permute.xlu1 %10691  ;;  %v6867_v50 = vsub.f32 %v6851_v8, %v6863_v44 }
0x24af   : > { %10961 = vpow2.f32 %v6868_v22  ;;  %v10694_v35 = vunpack.i.h.bf16 %v10692_v60  ;;  %v10693_v11 = vunpack.i.l.bf16 %v10692_v60 }
0x24b0   : > { %v6874_v55 = vmul.f32 1.442695, %v6867_v50 }
0x24b1   : > { %v9897_v17 = vpack.c.bf16 %v10694_v35, %v10693_v11 }
0x24b2   : > { %10963 = vpow2.f32 %v6874_v55 }
0x24b3   : > { %9898 = vmatprep.subr.bf16.mxu0 %v9897_v17 }
0x24b4   : > { %9900 = vmatpush3.bf16.msra.mxu0 %v9897_v17 }
0x24b8   : > { %v10960_v2 = vpop.eup %10959 }
0x24b9   : > { %v10962_v21 = vpop.eup %10961  ;;  %v6879_v59 = vsel %vm3646_vm11, %v10960_v2, 0.0 }
0x24ba   : > { %6880 = vadd.xlane.f32.xlu0 %v6879_v59  ;;  %v6876_v29 = vsel %vm3646_vm11, %v10962_v21, 0.0 }
0x24bb   : > { %6877 = vadd.xlane.f32.xlu1 %v6876_v29 }
0x24bc   : > { %v10964_v24 = vpop.eup %10963 }
0x24bd   : > { %v6885_v58 = vsel %vm3646_vm11, %v10964_v24, 0.0 }
0x24cc   : > { %10706 = vrot.lane.b32.xlu1 %v12960_v6, %s13510_s15 }
0x24d0   : > { %10696 = vrot.lane.b32.xlu0 %v12960_v6, %s13509_s7 }
0x24df   : > { %v6860_v33 = vpop.xlane.xlu1 %6859 }
0x24e0   : > { %v6866_v14 = vsub.f32 %v6850_v36, %v6860_v33 }
0x24e2   : > { %v6872_v15 = vmul.f32 1.442695, %v6866_v14 }
0x24e3   : > { %v10702_v3 = vpop.permute.xlu1 %10701 }
0x24e4   : > { %10965 = vpow2.f32 %v6872_v15  ;;  %v10704_v41 = vunpack.i.h.bf16 %v10702_v3  ;;  %v10703_v61 = vunpack.i.l.bf16 %v10702_v3 }
0x24e6   : > { %v9905_v18 = vpack.c.bf16 %v10704_v41, %v10703_v61 }
0x24ee   : > { %v10966_v57 = vpop.eup %10965 }
0x24ef   : > { %6886 = vadd.xlane.f32.xlu0 %v6885_v58  ;;  %v6882_v16 = vsel %vm3646_vm11, %v10966_v57, 0.0 }
0x24f0   : > { %6883 = vadd.xlane.f32.xlu1 %v6882_v16 }
0x2501   : > { %7007 = vrot.lane.b32.xlu1 %v12954_v42, %s13496_s10 }
0x2505   : > { %7005 = vrot.lane.b32.xlu0 %v12948_v30, %s13496_s10  ;;  %7011 = vrot.lane.b32.xlu1 %v12952_v46, %s13496_s10 }
0x2509   : > { %7009 = vrot.lane.b32.xlu0 %v12950_v4, %s13496_s10 }
0x2547   : > { %v6881_v12 = vpop.xlane.xlu0 %6880 }
0x2548   : > { %10967 = vrcp.f32 %v6881_v12  ;;  %v6878_v63 = vpop.xlane.xlu1 %6877 }
0x2549   : > { %10969 = vrcp.f32 %v6878_v63 }
0x254b   : > { %v10697_v23 = vpop.permute.xlu0 %10696 }
0x254c   : > { %v10699_v37 = vunpack.i.h.bf16 %v10697_v23  ;;  %v10698_v20 = vunpack.i.l.bf16 %v10697_v23  ;;  %v10707_v48 = vpop.permute.xlu1 %10706 }
0x254d   : > { %v10709_v39 = vunpack.i.h.bf16 %v10707_v48  ;;  %v10708_v62 = vunpack.i.l.bf16 %v10707_v48 }
0x254e   : > { %v9901_v38 = vpack.c.bf16 %v10699_v37, %v10698_v20 }
0x254f   : > { %v9911_v31 = vpack.c.bf16 %v10709_v39, %v10708_v62 }
0x2550   : > { %9902 = vmatprep.subr.bf16.mxu0 %v9901_v38 }
0x2551   : > { %9904 = vmatpush3.bf16.msra.mxu0 %v9901_v38 }
0x2552   : > { %v10968_v32 = vpop.eup %10967  ;;  %9907 = vmatprep.subr.msk.bf16.mxu0 %vm12326_vm13, %v9905_v18 }
0x2553   : > { %v10970_v5 = vpop.eup %10969  ;;  %v6891_v52 = vmul.f32 %v10968_v32, %v10960_v2 }
0x2554   : > { %v6889_v0 = vmul.f32 %v10970_v5, %v10962_v21 }
0x2556   : > { %9596 = vmatprep.mubr.msk.f32.mxu0 %vm3646_vm11, %v6889_v0 }
0x2557   : > { %9597 = vmatmul.mubr.msk.f32.vlgmr.msra.gmra.mrb[48].mxu0 %vm3646_vm11, %v6891_v52 }
0x255a   : > { %9910 = vmatpush3.bf16.xpose.msk.msra.mxu0 %vm12326_vm13, %v9905_v18 }
0x255b   : > { %9913 = vmatprep.subr.msk.bf16.mxu0 %vm12326_vm13, %v9911_v31 }
0x2562   : > { %9916 = vmatpush3.bf16.xpose.msk.msra.mxu0 %vm12326_vm13, %v9911_v31 }
0x257c   : > { %v6887_v7 = vpop.xlane.xlu0 %6886 }
0x257d   : > { %10971 = vrcp.f32 %v6887_v7  ;;  %v6884_v43 = vpop.xlane.xlu1 %6883 }
0x257e   : > { %10973 = vrcp.f32 %v6884_v43 }
0x2580   : > { %v7006_v36 = vpop.permute.xlu0 %7005 }
0x2581   : > { %v7008_v10 = vpop.permute.xlu1 %7007 }
0x2584   : > { %v7010_v54 = vpop.permute.xlu0 %7009 }
0x2585   : > { %v7012_v13 = vpop.permute.xlu1 %7011 }
0x2587   : > { %v10972_v8 = vpop.eup %10971 }
0x2588   : > { %v10974_v40 = vpop.eup %10973  ;;  %v6895_v47 = vmul.f32 %v10972_v8, %v10964_v24 }
0x2589   : > { %v6893_v28 = vmul.f32 %v10974_v40, %v10966_v57 }
0x258b   : > { %9599 = vmatprep.mubr.msk.f32.mxu0 %vm3646_vm11, %v6893_v28 }
0x258c   : > { %9600 = vmatmul.mubr.msk.f32.gmra.mrb[50].mxu0 %vm3646_vm11, %v6895_v47 }
0x258d   : > { %9610 = vmatprep.mubr.msk.f32.mxu0 %vm3714_vm12, %v7006_v36 }
0x2590   : > { %9611 = vmatmul.mubr.msk.f32.vlgmr.msra.gmra.mrb[52].mxu0 %vm3714_vm12, %v7008_v10 }
0x2591   : > { %9613 = vmatprep.mubr.msk.f32.mxu0 %vm3714_vm12, %v7010_v54 }
0x2594   : > { %9614 = vmatmul.mubr.msk.f32.gmra.mrb[54].mxu0 %vm3714_vm12, %v7012_v13 }
0x262a   : > { %v13048_v25 = vpop.f32.mrb[48].mxu0 }
0x262b   : > { %v13050_v56 = vpop.f32.mrb[49].mxu0 }
0x265f   : > { %v13052_v22 = vpop.f32.mrb[50].mxu0 }
0x2660   : > { %v13054_v60 = vpop.f32.mrb[51].mxu0 }
0x2663   : > { %v9612_v35 = vpop.f32.mrb[52].mxu0 }
0x2664   : > { %v7123_v11 = vmul.f32 0.35355338, %v9612_v35  ;;  %v7103_v17 = vpop.f32.mrb[53].mxu0 }
0x2665   : > { %v7122_v2 = vmul.f32 0.35355338, %v7103_v17 }
0x2666   : > { %v7127_v21 = vadd.f32 %v12987_v34, %v7123_v11 }
0x2667   : > { %v7126_v59 = vadd.f32 %v12993_v51, %v7122_v2  ;;  %v9615_v29 = vpop.f32.mrb[54].mxu0 }
0x2668   : > { %v7113_v44 = vpop.f32.mrb[55].mxu0  ;;  %v7133_v50 = vsel %vm3646_vm11, %v7127_v21, -inf  ;;  %v7125_v55 = vmul.f32 0.35355338, %v9615_v29 }
0x2669   : > { %v7124_v33 = vmul.f32 0.35355338, %v7113_v44  ;;  %7134 = vmax.xlane.f32.xlu1 %v7133_v50  ;;  %v7130_v14 = vsel %vm3646_vm11, %v7126_v59, -inf }
0x266a   : > { %7131 = vmax.xlane.f32.xlu0 %v7130_v14  ;;  %v7129_v24 = vadd.f32 %v13001_v9, %v7125_v55 }
0x266b   : > { %v7128_v15 = vadd.f32 %v13010_v53, %v7124_v33 }
0x266c   : > { %v7139_v58 = vsel %vm3646_vm11, %v7129_v24, -inf }
0x266d   : > { %v7136_v57 = vsel %vm3646_vm11, %v7128_v15, -inf }
0x266e   : > { %7137 = vmax.xlane.f32.xlu0 %v7136_v57 }
0x2672   : > { %7140 = vmax.xlane.f32.xlu0 %v7139_v58 }
0x267a   : > { %10711 = vrot.lane.b32.xlu1 %v12964_v26, %s13497_s6 }
0x267e   : > { %10721 = vrot.lane.b32.xlu1 %v12964_v26, %s13498_s0 }
0x26f6   : > { %v7135_v16 = vpop.xlane.xlu1 %7134 }
0x26f7   : > { %v7143_v3 = vsub.f32 %v7127_v21, %v7135_v16  ;;  %v7132_v12 = vpop.xlane.xlu0 %7131 }
0x26f8   : > { %v7142_v63 = vsub.f32 %v7126_v59, %v7132_v12 }
0x26f9   : > { %v7148_v23 = vmul.f32 1.442695, %v7143_v3 }
0x26fa   : > { %v7146_v41 = vmul.f32 1.442695, %v7142_v63  ;;  %v10712_v61 = vpop.permute.xlu1 %10711 }
0x26fb   : > { %10975 = vpow2.f32 %v7148_v23  ;;  %v10714_v37 = vunpack.i.h.bf16 %v10712_v61  ;;  %v10713_v20 = vunpack.i.l.bf16 %v10712_v61  ;;  %v7138_v0 = vpop.xlane.xlu0 %7137 }
0x26fc   : > { %10977 = vpow2.f32 %v7146_v41  ;;  %v7144_v62 = vsub.f32 %v7128_v15, %v7138_v0 }
0x26fd   : > { %v9917_v38 = vpack.c.bf16 %v10714_v37, %v10713_v20 }
0x26fe   : > { %v7150_v7 = vmul.f32 1.442695, %v7144_v62  ;;  %v10722_v36 = vpop.permute.xlu1 %10721 }
0x26ff   : > { %9918 = vmatprep.subr.bf16.mxu1 %v9917_v38  ;;  %v7141_v52 = vpop.xlane.xlu0 %7140  ;;  %v10724_v13 = vunpack.i.h.bf16 %v10722_v36  ;;  %v10723_v35 = vunpack.i.l.bf16 %v10722_v36 }
0x2700   : > { %9920 = vmatpush3.bf16.msra.mxu1 %v9917_v38  ;;  %v7145_v39 = vsub.f32 %v7129_v24, %v7141_v52 }
0x2701   : > { %v9925_v21 = vpack.c.bf16 %v10724_v13, %v10723_v35 }
0x2702   : > { %v7152_v31 = vmul.f32 1.442695, %v7145_v39 }
0x2704   : > { %10979 = vpow2.f32 %v7152_v31 }
0x2705   : > { %v10976_v18 = vpop.eup %10975  ;;  %10981 = vpow2.f32 %v7150_v7 }
0x2706   : > { %v10978_v32 = vpop.eup %10977  ;;  %v7157_v48 = vsel %vm3646_vm11, %v10976_v18, 0.0 }
0x2707   : > { %7158 = vadd.xlane.f32.xlu0 %v7157_v48  ;;  %v7154_v5 = vsel %vm3646_vm11, %v10978_v32, 0.0 }
0x2708   : > { %7155 = vadd.xlane.f32.xlu1 %v7154_v5 }
0x270e   : > { %v10980_v43 = vpop.eup %10979 }
0x270f   : > { %v10982_v8 = vpop.eup %10981  ;;  %v7163_v40 = vsel %vm3646_vm11, %v10980_v43, 0.0 }
0x2710   : > { %v7160_v28 = vsel %vm3646_vm11, %v10982_v8, 0.0 }
0x2719   : > { %10726 = vrot.lane.b32.xlu1 %v12960_v6, %s13498_s0  ;;  %s13511_s0 = sld [smem:[#allocation32_spill]] }
0x271d   : > { %10716 = vrot.lane.b32.xlu0 %v12960_v6, %s13497_s6  ;;  %s13514_s6 = sld [smem:[#allocation33_spill]] }
0x273c   : > { %7164 = vadd.xlane.f32.xlu0 %v7163_v40 }
0x273d   : > { %7161 = vadd.xlane.f32.xlu1 %v7160_v28 }
0x274e   : > { %7285 = vrot.lane.b32.xlu1 %v12954_v42, %s13499_s9 }
0x2752   : > { %7289 = vrot.lane.b32.xlu1 %v12952_v46, %s13499_s9  ;;  %7283 = vrot.lane.b32.xlu0 %v12948_v30, %s13499_s9 }
0x2756   : > { %7287 = vrot.lane.b32.xlu0 %v12950_v4, %s13499_s9 }
0x2794   : > { %v7159_v47 = vpop.xlane.xlu0 %7158 }
0x2795   : > { %10983 = vrcp.f32 %v7159_v47  ;;  %v7156_v10 = vpop.xlane.xlu1 %7155 }
0x2796   : > { %10985 = vrcp.f32 %v7156_v10 }
0x2798   : > { %v10717_v54 = vpop.permute.xlu0 %10716 }
0x2799   : > { %v10719_v11 = vunpack.i.h.bf16 %v10717_v54  ;;  %v10718_v17 = vunpack.i.l.bf16 %v10717_v54  ;;  %v10727_v29 = vpop.permute.xlu1 %10726 }
0x279a   : > { %v10729_v33 = vunpack.i.h.bf16 %v10727_v29  ;;  %v10728_v14 = vunpack.i.l.bf16 %v10727_v29 }
0x279b   : > { %v9921_v2 = vpack.c.bf16 %v10719_v11, %v10718_v17 }
0x279c   : > { %v9931_v15 = vpack.c.bf16 %v10729_v33, %v10728_v14 }
0x279d   : > { %9922 = vmatprep.subr.bf16.mxu1 %v9921_v2 }
0x279e   : > { %9924 = vmatpush3.bf16.msra.mxu1 %v9921_v2 }
0x279f   : > { %v10984_v59 = vpop.eup %10983  ;;  %9927 = vmatprep.subr.msk.bf16.mxu1 %vm12326_vm13, %v9925_v21 }
0x27a0   : > { %v10986_v44 = vpop.eup %10985  ;;  %v7169_v55 = vmul.f32 %v10984_v59, %v10976_v18 }
0x27a1   : > { %v7167_v50 = vmul.f32 %v10986_v44, %v10978_v32 }
0x27a3   : > { %9624 = vmatprep.mubr.msk.f32.mxu1 %vm3646_vm11, %v7167_v50 }
0x27a4   : > { %9625 = vmatmul.mubr.msk.f32.vlgmr.msra.gmra.mrb[52].mxu1 %vm3646_vm11, %v7169_v55 }
0x27a7   : > { %9930 = vmatpush3.bf16.xpose.msk.msra.mxu1 %vm12326_vm13, %v9925_v21 }
0x27a8   : > { %9933 = vmatprep.subr.msk.bf16.mxu1 %vm12326_vm13, %v9931_v15 }
0x27af   : > { %9936 = vmatpush3.bf16.xpose.msk.msra.mxu1 %vm12326_vm13, %v9931_v15 }
0x27c9   : > { %v7165_v24 = vpop.xlane.xlu0 %7164 }
0x27ca   : > { %10987 = vrcp.f32 %v7165_v24  ;;  %v7162_v57 = vpop.xlane.xlu1 %7161 }
0x27cb   : > { %10989 = vrcp.f32 %v7162_v57 }
0x27cd   : > { %v7284_v12 = vpop.permute.xlu0 %7283 }
0x27ce   : > { %v7286_v23 = vpop.permute.xlu1 %7285 }
0x27d1   : > { %v7288_v41 = vpop.permute.xlu0 %7287 }
0x27d2   : > { %v7290_v61 = vpop.permute.xlu1 %7289 }
0x27d4   : > { %v10988_v58 = vpop.eup %10987 }
0x27d5   : > { %v10990_v16 = vpop.eup %10989  ;;  %v7173_v63 = vmul.f32 %v10988_v58, %v10980_v43 }
0x27d6   : > { %v7171_v3 = vmul.f32 %v10990_v16, %v10982_v8 }
0x27d8   : > { %9627 = vmatprep.mubr.msk.f32.mxu1 %vm3646_vm11, %v7171_v3 }
0x27d9   : > { %9628 = vmatmul.mubr.msk.f32.gmra.mrb[54].mxu1 %vm3646_vm11, %v7173_v63 }
0x27da   : > { %9638 = vmatprep.mubr.msk.f32.mxu1 %vm3714_vm12, %v7284_v12 }
0x27dd   : > { %9639 = vmatmul.mubr.msk.f32.vlgmr.msra.gmra.mrb[56].mxu1 %vm3714_vm12, %v7286_v23 }
0x27de   : > { %9641 = vmatprep.mubr.msk.f32.mxu1 %vm3714_vm12, %v7288_v41 }
0x27e1   : > { %9642 = vmatmul.mubr.msk.f32.gmra.mrb[58].mxu1 %vm3714_vm12, %v7290_v61 }
0x2877   : > { %v13100_v37 = vpop.f32.mrb[52].mxu1 }
0x2878   : > { %v13102_v20 = vpop.f32.mrb[53].mxu1 }
0x2879   : > { %v10760_v38 = vpack.i.bf16 %v13100_v37, %v13102_v20 }
0x28ac   : > { %v13106_v18 = vpop.f32.mrb[54].mxu1 }
0x28ad   : > { %v13108_v32 = vpop.f32.mrb[55].mxu1 }
0x28ae   : > { %v10765_v48 = vpack.i.bf16 %v13106_v18, %v13108_v32 }
0x28b0   : > { %v9640_v5 = vpop.f32.mrb[56].mxu1 }
0x28b1   : > { %v7401_v0 = vmul.f32 0.35355338, %v9640_v5  ;;  %v7381_v52 = vpop.f32.mrb[57].mxu1 }
0x28b2   : > { %v7400_v39 = vmul.f32 0.35355338, %v7381_v52 }
0x28b3   : > { %v7405_v62 = vadd.f32 %v12987_v34, %v7401_v0 }
0x28b4   : > { %v7404_v31 = vadd.f32 %v12993_v51, %v7400_v39  ;;  %v9643_v7 = vpop.f32.mrb[58].mxu1 }
0x28b5   : > { %v7391_v43 = vpop.f32.mrb[59].mxu1  ;;  %v7411_v8 = vsel %vm3646_vm11, %v7405_v62, -inf  ;;  %v7403_v40 = vmul.f32 0.35355338, %v9643_v7 }
0x28b6   : > { %v7402_v28 = vmul.f32 0.35355338, %v7391_v43  ;;  %7412 = vmax.xlane.f32.xlu1 %v7411_v8  ;;  %v7408_v36 = vsel %vm3646_vm11, %v7404_v31, -inf }
0x28b7   : > { %7409 = vmax.xlane.f32.xlu0 %v7408_v36  ;;  %v7407_v10 = vadd.f32 %v13001_v9, %v7403_v40 }
0x28b8   : > { %v7406_v47 = vadd.f32 %v13010_v53, %v7402_v28 }
0x28b9   : > { %v7417_v13 = vsel %vm3646_vm11, %v7407_v10, -inf }
0x28ba   : > { %v7414_v54 = vsel %vm3646_vm11, %v7406_v47, -inf }
0x28bb   : > { %7415 = vmax.xlane.f32.xlu0 %v7414_v54 }
0x28bf   : > { %7418 = vmax.xlane.f32.xlu0 %v7417_v13 }
0x28c7   : > { %10731 = vrot.lane.b32.xlu1 %v12964_v26, %s13500_s11 }
0x28cb   : > { %10741 = vrot.lane.b32.xlu1 %v12964_v26, %s13501_s30 }
0x28cf   : > { %10746 = vrot.lane.b32.xlu1 %v12960_v6, %s13501_s30 }
0x2943   : > { %v7413_v35 = vpop.xlane.xlu1 %7412 }
0x2944   : > { %v7421_v11 = vsub.f32 %v7405_v62, %v7413_v35  ;;  %v7410_v17 = vpop.xlane.xlu0 %7409 }
0x2945   : > { %v7420_v2 = vsub.f32 %v7404_v31, %v7410_v17 }
0x2946   : > { %v7426_v21 = vmul.f32 1.442695, %v7421_v11 }
0x2947   : > { %v7424_v59 = vmul.f32 1.442695, %v7420_v2  ;;  %v10732_v29 = vpop.permute.xlu1 %10731 }
0x2948   : > { %10991 = vpow2.f32 %v7426_v21  ;;  %v10734_v44 = vunpack.i.h.bf16 %v10732_v29  ;;  %v10733_v50 = vunpack.i.l.bf16 %v10732_v29  ;;  %v7416_v57 = vpop.xlane.xlu0 %7415 }
0x2949   : > { %10993 = vpow2.f32 %v7424_v59  ;;  %v7422_v3 = vsub.f32 %v7406_v47, %v7416_v57 }
0x294a   : > { %v9937_v55 = vpack.c.bf16 %v10734_v44, %v10733_v50 }
0x294b   : > { %v7428_v63 = vmul.f32 1.442695, %v7422_v3 }
0x294c   : > { %9938 = vmatprep.subr.bf16.mxu0 %v9937_v55  ;;  %v7419_v58 = vpop.xlane.xlu0 %7418 }
0x294d   : > { %9940 = vmatpush3.bf16.msra.mxu0 %v9937_v55  ;;  %v7423_v16 = vsub.f32 %v7407_v10, %v7419_v58 }
0x294f   : > { %v7430_v12 = vmul.f32 1.442695, %v7423_v16 }
0x2951   : > { %10995 = vpow2.f32 %v7430_v12 }
0x2952   : > { %v10992_v33 = vpop.eup %10991  ;;  %10997 = vpow2.f32 %v7428_v63 }
0x2953   : > { %v10994_v14 = vpop.eup %10993  ;;  %v7435_v15 = vsel %vm3646_vm11, %v10992_v33, 0.0 }
0x2954   : > { %7436 = vadd.xlane.f32.xlu0 %v7435_v15  ;;  %v7432_v24 = vsel %vm3646_vm11, %v10994_v14, 0.0 }
0x2955   : > { %7433 = vadd.xlane.f32.xlu1 %v7432_v24 }
0x295b   : > { %v10996_v23 = vpop.eup %10995 }
0x295c   : > { %v10998_v41 = vpop.eup %10997  ;;  %v7441_v61 = vsel %vm3646_vm11, %v10996_v23, 0.0 }
0x295d   : > { %v7438_v5 = vsel %vm3646_vm11, %v10998_v41, 0.0 }
0x2966   : > { %7563 = vrot.lane.b32.xlu1 %v12954_v42, %s13502_s1  ;;  %v10742_v42 = vpop.permute.xlu1 %10741 }
0x2967   : > { %v10744_v31 = vunpack.i.h.bf16 %v10742_v42  ;;  %v10743_v7 = vunpack.i.l.bf16 %v10742_v42 }
0x2969   : > { %v9945_v28 = vpack.c.bf16 %v10744_v31, %v10743_v7 }
0x296a   : > { %10736 = vrot.lane.b32.xlu0 %v12960_v6, %s13500_s11  ;;  %v10747_v0 = vpop.permute.xlu1 %10746  ;;  %s13515_s11 = sld [smem:[#allocation34_spill]] }
0x296b   : > { %v10749_v36 = vunpack.i.h.bf16 %v10747_v0  ;;  %v10748_v47 = vunpack.i.l.bf16 %v10747_v0 }
0x296d   : > { %v9951_v54 = vpack.c.bf16 %v10749_v36, %v10748_v47 }
0x2989   : > { %7442 = vadd.xlane.f32.xlu0 %v7441_v61 }
0x298a   : > { %7439 = vadd.xlane.f32.xlu1 %v7438_v5 }
0x299b   : > { %7567 = vrot.lane.b32.xlu1 %v12952_v46, %s13502_s1 }
0x299f   : > { %7561 = vrot.lane.b32.xlu0 %v12948_v30, %s13502_s1 }
0x29a3   : > { %7565 = vrot.lane.b32.xlu0 %v12950_v4, %s13502_s1 }
0x29e1   : > { %v7437_v52 = vpop.xlane.xlu0 %7436 }
0x29e2   : > { %10999 = vrcp.f32 %v7437_v52  ;;  %v7434_v39 = vpop.xlane.xlu1 %7433 }
0x29e3   : > { %11001 = vrcp.f32 %v7434_v39 }
0x29e5   : > { %v10737_v62 = vpop.permute.xlu0 %10736 }
0x29e6   : > { %v10739_v43 = vunpack.i.h.bf16 %v10737_v62  ;;  %v10738_v8 = vunpack.i.l.bf16 %v10737_v62  ;;  %v7564_v13 = vpop.permute.xlu1 %7563 }
0x29e8   : > { %v9941_v40 = vpack.c.bf16 %v10739_v43, %v10738_v8 }
0x29ea   : > { %9942 = vmatprep.subr.bf16.mxu0 %v9941_v40 }
0x29eb   : > { %9944 = vmatpush3.bf16.msra.mxu0 %v9941_v40 }
0x29ec   : > { %v11000_v46 = vpop.eup %10999  ;;  %9947 = vmatprep.subr.msk.bf16.mxu0 %vm12326_vm13, %v9945_v28 }
0x29ed   : > { %v11002_v30 = vpop.eup %11001  ;;  %v7447_v10 = vmul.f32 %v11000_v46, %v10992_v33 }
0x29ee   : > { %v7445_v4 = vmul.f32 %v11002_v30, %v10994_v14 }
0x29f0   : > { %9652 = vmatprep.mubr.msk.f32.mxu0 %vm3646_vm11, %v7445_v4 }
0x29f1   : > { %9653 = vmatmul.mubr.msk.f32.vlgmr.msra.gmra.mrb[56].mxu0 %vm3646_vm11, %v7447_v10 }
0x29f4   : > { %9950 = vmatpush3.bf16.xpose.msk.msra.mxu0 %vm12326_vm13, %v9945_v28 }
0x29f5   : > { %9953 = vmatprep.subr.msk.bf16.mxu0 %vm12326_vm13, %v9951_v54 }
0x29fc   : > { %9956 = vmatpush3.bf16.xpose.msk.msra.mxu0 %vm12326_vm13, %v9951_v54 }
0x2a16   : > { %v7443_v35 = vpop.xlane.xlu0 %7442 }
0x2a17   : > { %11003 = vrcp.f32 %v7443_v35  ;;  %v7440_v11 = vpop.xlane.xlu1 %7439 }
0x2a18   : > { %11005 = vrcp.f32 %v7440_v11 }
0x2a1a   : > { %v7562_v59 = vpop.permute.xlu0 %7561 }
0x2a1b   : > { %v7568_v1 = vpop.permute.xlu1 %7567 }
0x2a1e   : > { %v7566_v44 = vpop.permute.xlu0 %7565 }
0x2a21   : > { %v11004_v17 = vpop.eup %11003 }
0x2a22   : > { %v11006_v2 = vpop.eup %11005  ;;  %v7451_v29 = vmul.f32 %v11004_v17, %v10996_v23 }
0x2a23   : > { %v7449_v21 = vmul.f32 %v11006_v2, %v10998_v41 }
0x2a25   : > { %9655 = vmatprep.mubr.msk.f32.mxu0 %vm3646_vm11, %v7449_v21 }
0x2a26   : > { %9656 = vmatmul.mubr.msk.f32.gmra.mrb[58].mxu0 %vm3646_vm11, %v7451_v29 }
0x2a27   : > { %9666 = vmatprep.mubr.msk.f32.mxu0 %vm3714_vm12, %v7562_v59 }
0x2a2a   : > { %9667 = vmatmul.mubr.msk.f32.vlgmr.msra.gmra.mrb[60].mxu0 %vm3714_vm12, %v7564_v13 }
0x2a2b   : > { %9669 = vmatprep.mubr.msk.f32.mxu0 %vm3714_vm12, %v7566_v44 }
0x2a2e   : > { %9670 = vmatmul.mubr.msk.f32.gmra.mrb[62].mxu0 %vm3714_vm12, %v7568_v1 }
0x2ac4   : > { %v9654_v50 = vpop.f32.mrb[56].mxu0 }
0x2ac5   : > { %v7542_v55 = vpop.f32.mrb[57].mxu0 }
0x2ac6   : > { %v10770_v33 = vpack.i.bf16 %v9654_v50, %v7542_v55 }
0x2af9   : > { %v9657_v14 = vpop.f32.mrb[58].mxu0 }
0x2afa   : > { %v7552_v15 = vpop.f32.mrb[59].mxu0 }
0x2afb   : > { %v10775_v24 = vpack.i.bf16 %v9657_v14, %v7552_v15 }
0x2afd   : > { %v9668_v57 = vpop.f32.mrb[60].mxu0 }
0x2afe   : > { %v7679_v58 = vmul.f32 0.35355338, %v9668_v57  ;;  %v7659_v16 = vpop.f32.mrb[61].mxu0  ;;  %v10807_v57 = vld [vmem:[%s13372_s14 + $0x10] sm:$0xff]  }
0x2aff   : > { %v7678_v3 = vmul.f32 0.35355338, %v7659_v16 }
0x2b00   : > { %v7683_v12 = vadd.f32 %v12987_v34, %v7679_v58  ;;  %v10808_v58 = vld [vmem:[%s13372_s14 + $0x18] sm:$0xff]  }
0x2b01   : > { %v7682_v63 = vadd.f32 %v12993_v51, %v7678_v3  ;;  %v9671_v23 = vpop.f32.mrb[62].mxu0 }
0x2b02   : > { %v7669_v41 = vpop.f32.mrb[63].mxu0  ;;  %v7689_v61 = vsel %vm3646_vm11, %v7683_v12, -inf  ;;  %v7681_v5 = vmul.f32 0.35355338, %v9671_v23 }
0x2b03   : > { %v7680_v42 = vmul.f32 0.35355338, %v7669_v41  ;;  %7690 = vmax.xlane.f32.xlu1 %v7689_v61  ;;  %v7686_v0 = vsel %vm3646_vm11, %v7682_v63, -inf }
0x2b04   : > { %7687 = vmax.xlane.f32.xlu0 %v7686_v0  ;;  %v7685_v39 = vadd.f32 %v13001_v9, %v7681_v5 }
0x2b05   : > { %v7684_v52 = vadd.f32 %v13010_v53, %v7680_v42 }
0x2b06   : > { %v7695_v34 = vsel %vm3646_vm11, %v7685_v39, -inf }
0x2b07   : > { %v7692_v62 = vsel %vm3646_vm11, %v7684_v52, -inf }
0x2b08   : > { %7693 = vmax.xlane.f32.xlu0 %v7692_v62 }
0x2b0c   : > { %7696 = vmax.xlane.f32.xlu0 %v7695_v34 }
0x2b90   : > { %v7691_v51 = vpop.xlane.xlu1 %7690 }
0x2b91   : > { %v7699_v31 = vsub.f32 %v7683_v12, %v7691_v51  ;;  %v7688_v7 = vpop.xlane.xlu0 %7687 }
0x2b92   : > { %v7698_v43 = vsub.f32 %v7682_v63, %v7688_v7 }
0x2b93   : > { %v7704_v8 = vmul.f32 1.442695, %v7699_v31 }
0x2b94   : > { %v7702_v40 = vmul.f32 1.442695, %v7698_v43 }
0x2b95   : > { %11007 = vpow2.f32 %v7704_v8  ;;  %v7694_v28 = vpop.xlane.xlu0 %7693 }
0x2b96   : > { %11009 = vpow2.f32 %v7702_v40  ;;  %v7700_v46 = vsub.f32 %v7684_v52, %v7694_v28 }
0x2b98   : > { %v7706_v30 = vmul.f32 1.442695, %v7700_v46 }
0x2b99   : > { %v7697_v53 = vpop.xlane.xlu0 %7696 }
0x2b9a   : > { %11011 = vpow2.f32 %v7706_v30  ;;  %v7701_v9 = vsub.f32 %v7685_v39, %v7697_v53 }
0x2b9c   : > { %v7708_v4 = vmul.f32 1.442695, %v7701_v9 }
0x2b9e   : > { %11013 = vpow2.f32 %v7708_v4 }
0x2b9f   : > { %v11008_v36 = vpop.eup %11007 }
0x2ba0   : > { %v11010_v47 = vpop.eup %11009  ;;  %v7713_v10 = vsel %vm3646_vm11, %v11008_v36, 0.0 }
0x2ba1   : > { %7714 = vadd.xlane.f32.xlu0 %v7713_v10  ;;  %v7710_v54 = vsel %vm3646_vm11, %v11010_v47, 0.0 }
0x2ba2   : > { %7711 = vadd.xlane.f32.xlu1 %v7710_v54 }
0x2ba4   : > { %v11012_v13 = vpop.eup %11011 }
0x2ba5   : > { %v7716_v35 = vsel %vm3646_vm11, %v11012_v13, 0.0 }
0x2ba6   : > { %7717 = vadd.xlane.f32.xlu1 %v7716_v35 }
0x2ba8   : > { %v11014_v11 = vpop.eup %11013 }
0x2ba9   : > { %v7719_v17 = vsel %vm3646_vm11, %v11014_v11, 0.0 }
0x2baa   : > { %7720 = vadd.xlane.f32.xlu0 %v7719_v17 }
0x2bb7   : > { %10751 = vrot.lane.b32.xlu1 %v12964_v26, %s13503_s8 }
0x2bbb   : > { %10761 = vrot.lane.b32.xlu1 %v10760_v38, %s13504_s3 }
0x2bbf   : > { %10766 = vrot.lane.b32.xlu1 %v10765_v48, %s13504_s3 }
0x2bc0   : > { %10756 = vrot.lane.b32.xlu0 %v12960_v6, %s13503_s8  ;;  %s13513_s8 = sld [smem:[#allocation18_spill]] }
0x2bc3   : > { %10776 = vrot.lane.b32.xlu1 %v10775_v24, %s13505_s25 }
0x2bc4   : > { %10771 = vrot.lane.b32.xlu0 %v10770_v33, %s13505_s25 }
0x2c2e   : > { %v7715_v26 = vpop.xlane.xlu0 %7714 }
0x2c2f   : > { %v7712_v2 = vpop.xlane.xlu1 %7711 }
0x2c30   : > { %11015 = vrcp.f32 %v7712_v2 }
0x2c31   : > { %11017 = vrcp.f32 %v7715_v26 }
0x2c33   : > { %v7718_v21 = vpop.xlane.xlu1 %7717 }
0x2c34   : > { %11019 = vrcp.f32 %v7718_v21 }
0x2c37   : > { %v10752_v37 = vpop.permute.xlu1 %10751  ;;  %v7721_v20 = vpop.xlane.xlu0 %7720 }
0x2c38   : > { %v10754_v38 = vunpack.i.h.bf16 %v10752_v37  ;;  %v10753_v59 = vunpack.i.l.bf16 %v10752_v37  ;;  %11021 = vrcp.f32 %v7721_v20 }
0x2c3a   : > { %v11016_v18 = vpop.eup %11015  ;;  %v9957_v32 = vpack.c.bf16 %v10754_v38, %v10753_v59 }
0x2c3b   : > { %v10757_v48 = vpop.permute.xlu0 %10756  ;;  %v7723_v29 = vmul.f32 %v11016_v18, %v11010_v47  ;;  %v11018_v50 = vpop.eup %11017 }
0x2c3c   : > { %v10759_v6 = vunpack.i.h.bf16 %v10757_v48  ;;  %v10758_v44 = vunpack.i.l.bf16 %v10757_v48  ;;  %9958 = vmatprep.subr.bf16.mxu1 %v9957_v32  ;;  %v7725_v33 = vmul.f32 %v11018_v50, %v11008_v36  ;;  %v10762_v61 = vpop.permute.xlu1 %10761 }
0x2c3d   : > { %9960 = vmatpush3.bf16.msra.mxu1 %v9957_v32  ;;  %9680 = vmatprep.mubr.msk.f32.mxu1 %vm3646_vm11, %v7723_v29  ;;  %v10764_v0 = vunpack.i.h.bf16 %v10762_v61  ;;  %v10763_v52 = vunpack.i.l.bf16 %v10762_v61 }
0x2c3e   : > { %v9961_v1 = vpack.c.bf16 %v10759_v6, %v10758_v44  ;;  %v11020_v55 = vpop.eup %11019 }
0x2c3f   : > { %v7727_v15 = vmul.f32 %v11020_v55, %v11012_v13  ;;  %v10772_v42 = vpop.permute.xlu0 %10771  ;;  %v7887_v51 = vsel %vm3714_vm12, %v13050_v56, %v10763_v52  ;;  %v7888_v31 = vsel %vm3714_vm12, %v13048_v25, %v10764_v0 }
0x2c40   : > { %9962 = vmatprep.subr.bf16.mxu1 %v9961_v1  ;;  %v10767_v5 = vpop.permute.xlu1 %10766  ;;  %v10774_v39 = vunpack.i.h.bf16 %v10772_v42  ;;  %v10773_v62 = vunpack.i.l.bf16 %v10772_v42 }
0x2c41   : > { %9964 = vmatpush3.bf16.msra.mxu1 %v9961_v1  ;;  %v10769_v43 = vunpack.i.h.bf16 %v10767_v5  ;;  %v10768_v8 = vunpack.i.l.bf16 %v10767_v5 }
0x2c42   : > { %v11022_v14 = vpop.eup %11021  ;;  %9686 = vmatprep.subr.bf16.mxu1 %v10807_v57  ;;  %v7892_v46 = vsel %vm3420_vm3, %v7888_v31, %v10774_v39  ;;  %v7891_v30 = vsel %vm3420_vm3, %v7887_v51, %v10773_v62  ;;  %v10809_v39 = vld [vmem:[%s13376_s18 + $0x10] sm:$0xff]   ;;  %v10810_v62 = vld [vmem:[%s13376_s18 + $0x18] sm:$0xff]   ;;  %v10812_v51 = vld [vmem:[%s13378_s20 + $0x28] sm:$0xff]  }
0x2c43   : > { %v7729_v24 = vmul.f32 %v11022_v14, %v11014_v11  ;;  %v7889_v25 = vsel %vm3714_vm12, %v13054_v60, %v10768_v8  ;;  %v7890_v10 = vsel %vm3714_vm12, %v13052_v22, %v10769_v43  ;;  %v8951_v60 = vld [vmem:[%s13511_s0 + $0x1] ss:$0 sm:$0xff]  ;;  %9694 = vmatprep.subr.bf16.mxu0 %v10809_v39 }
0x2c44   : > { %9681 = vmatmul.mubr.msk.f32.vlgmr.msra.gmra.mrb[60].mxu1 %vm3646_vm11, %v7725_v33  ;;  %v10777_v34 = vpop.permute.xlu1 %10776  ;;  %9695 = vmatpush3.bf16.msra.mxu0 %v10809_v39 }
0x2c45   : > { %9683 = vmatprep.mubr.msk.f32.mxu1 %vm3646_vm11, %v7727_v15  ;;  %9687 = vmatpush3.bf16.msra.mxu1 %v10807_v57  ;;  %v10779_v53 = vunpack.i.h.bf16 %v10777_v34  ;;  %v10778_v9 = vunpack.i.l.bf16 %v10777_v34  ;;  %v10811_v34 = vld [vmem:[%s13378_s20 + $0x20] sm:$0xff]  }
0x2c46   : > { %9688 = vmatprep.subr.bf16.mxu1 %v10808_v58  ;;  %9696 = vmatprep.subr.bf16.mxu0 %v10810_v62 }
0x2c47   : > { %v7893_v35 = vsel %vm3420_vm3, %v7889_v25, %v10778_v9  ;;  %v7894_v11 = vsel %vm3420_vm3, %v7890_v10, %v10779_v53 }
0x2c48   : > { %9684 = vmatmul.mubr.msk.f32.gmra.mrb[62].mxu1 %vm3646_vm11, %v7729_v24  ;;  %9697 = vmatpush3.bf16.msra.mxu0 %v10810_v62 }
0x2c49   : > { %9689 = vmatpush3.bf16.msra.mxu1 %v10808_v58 }
0x2c4a   : > { %9702 = vmatprep.subr.bf16.mxu1 %v10811_v34 }
0x2d17   : > { %v9682_v16 = vpop.f32.mrb[60].mxu1 }
0x2d18   : > { %v7820_v3 = vpop.f32.mrb[61].mxu1 }
0x2d19   : > { %v10780_v12 = vpack.i.bf16 %v9682_v16, %v7820_v3 }
0x2d1b   : > { %10781 = vrot.lane.b32.xlu0 %v10780_v12, %s13506_s28  ;;  %v9685_v63 = vpop.f32.mrb[62].mxu1 }
0x2d1c   : > { %v7830_v23 = vpop.f32.mrb[63].mxu1 }
0x2d1d   : > { %v10785_v41 = vpack.i.bf16 %v9685_v63, %v7830_v23 }
0x2d1f   : > { %10786 = vrot.lane.b32.xlu1 %v10785_v41, %s13506_s28 }
0x2d8d   : > { %v10782_v7 = vpop.permute.xlu0 %10781 }
0x2d8e   : > { %v10784_v40 = vunpack.i.h.bf16 %v10782_v7  ;;  %v10783_v28 = vunpack.i.l.bf16 %v10782_v7 }
0x2d90   : > { %v7896_v4 = vsel %vm4867_vm14, %v7892_v46, %v10784_v40  ;;  %v7895_v36 = vsel %vm4867_vm14, %v7891_v30, %v10783_v28 }
0x2d91   : > { %v7899_v47 = vpack.c.bf16 %v7896_v4, %v7895_v36  ;;  %v10787_v56 = vpop.permute.xlu1 %10786 }
0x2d92   : > { %v10789_v54 = vunpack.i.h.bf16 %v10787_v56  ;;  %v10788_v13 = vunpack.i.l.bf16 %v10787_v56  ;;  %v8956_v56 = vld [vmem:[%s13374_s16 + $0x1] ss:$0 sm:$0xff] }
0x2d93   : > { %9690 = vmatprep.mubr.msk.bf16.mxu1 %vm3646_vm11, %v7899_v47 }
0x2d94   : > { %v7898_v17 = vsel %vm4867_vm14, %v7894_v11, %v10789_v54  ;;  %v7897_v2 = vsel %vm4867_vm14, %v7893_v35, %v10788_v13  ;;  %v8957_v11 = vld [vmem:[%s13375_s17 + $0x1] ss:$0 sm:$0xff] }
0x2d95   : > { %v7900_v26 = vpack.c.bf16 %v7898_v17, %v7897_v2 }
0x2d97   : > { %9691 = vmatmul.mubr.msk.bf16.vlgmr.msra.gmra.mrb[64].mxu1 %vm3646_vm11, %v7900_v26 }
0x2d98   : > { %9703 = vmatpush3.bf16.msra.mxu1 %v10811_v34 }
0x2d99   : > { %9704 = vmatprep.subr.bf16.mxu1 %v10812_v51 }
0x2d9c   : > { %9705 = vmatpush3.bf16.msra.mxu1 %v10812_v51 }
0x2e6a   : > { %v9692_v22 = vpop.f32.mrb[64].mxu1 }
0x2e6b   : > { %v7959_v21 = vpop.f32.mrb[65].mxu1  ;;  %v7968_v37 = vadd.f32 %v9692_v22, %v8951_v60 }
0x2e6c   : > { %v7960_v20 = vadd.f32 %v8951_v60, %v7959_v21  ;;  %v9693_v38 = vpop.f32.mrb[66].mxu1 }
0x2e6d   : > { %v7962_v59 = vpop.f32.mrb[67].mxu1  ;;  %v7976_v48 = vadd.f32 %v7968_v37, %v12938_v49  ;;  %v7971_v29 = vadd.f32 %v9693_v38, %v8951_v60 }
0x2e6e   : > { %v7974_v18 = vadd.f32 %v7960_v20, %v12931_v27  ;;  %v7963_v32 = vadd.f32 %v8951_v60, %v7962_v59 }
0x2e6f   : > { %v7977_v50 = vadd.f32 %v7971_v29, %v12940_v19  ;;  %v7984_v55 = vsel %vm3646_vm11, %v7976_v48, 0.0  ;;  %v10814_v29 = vld [vmem:[%s13378_s20 + $0x38] sm:$0xff]  }
0x2e70   : > { %v7975_v6 = vadd.f32 %v7963_v32, %v12933_v45  ;;  %v7978_v44 = vsel %vm3646_vm11, %v7974_v18, 0.0 }
0x2e71   : > { %7979 = vadd.xlane.f32.xlu0 %v7978_v44  ;;  %v7987_v33 = vsel %vm3646_vm11, %v7977_v50, 0.0 }
0x2e72   : > { %v7981_v1 = vsel %vm3646_vm11, %v7975_v6, 0.0 }
0x2e73   : > { %7982 = vadd.xlane.f32.xlu1 %v7981_v1 }
0x2e75   : > { %7985 = vadd.xlane.f32.xlu0 %v7984_v55 }
0x2e79   : > { %7988 = vadd.xlane.f32.xlu0 %v7987_v33 }
0x2efe   : > { %v7980_v27 = vpop.xlane.xlu0 %7979 }
0x2eff   : > { %v7990_v14 = vmul.f32 0.03125, %v7980_v27 }
0x2f00   : > { %v7983_v49 = vpop.xlane.xlu1 %7982 }
0x2f01   : > { %v7994_v15 = vsub.f32 %v7974_v18, %v7990_v14  ;;  %v7991_v24 = vmul.f32 0.03125, %v7983_v49 }
0x2f02   : > { %v7986_v45 = vpop.xlane.xlu0 %7985 }
0x2f03   : > { %v7995_v57 = vsub.f32 %v7975_v6, %v7991_v24  ;;  %v7992_v58 = vmul.f32 0.03125, %v7986_v45  ;;  %v7998_v16 = vmul.f32 %v7994_v15, %v7994_v15  ;;  %v8958_v6 = vld [vmem:[%s13377_s19 + $0x1] ss:$0 sm:$0xff] }
0x2f05   : > { %v7996_v3 = vsub.f32 %v7976_v48, %v7992_v58  ;;  %v8002_v12 = vsel %vm3646_vm11, %v7998_v16, 0.0  ;;  %v7999_v63 = vmul.f32 %v7995_v57, %v7995_v57  ;;  %v10813_v48 = vld [vmem:[%s13378_s20 + $0x30] sm:$0xff]  }
0x2f06   : > { %8003 = vadd.xlane.f32.xlu1 %v8002_v12  ;;  %v7989_v19 = vpop.xlane.xlu0 %7988  ;;  %9706 = vmatprep.subr.bf16.mxu1 %v10813_v48 }
0x2f07   : > { %v7993_v23 = vmul.f32 0.03125, %v7989_v19  ;;  %v8005_v41 = vsel %vm3646_vm11, %v7999_v63, 0.0  ;;  %v8000_v61 = vmul.f32 %v7996_v3, %v7996_v3  ;;  %9707 = vmatpush3.bf16.msra.mxu1 %v10813_v48 }
0x2f08   : > { %8006 = vadd.xlane.f32.xlu0 %v8005_v41  ;;  %9708 = vmatprep.subr.bf16.mxu1 %v10814_v29 }
0x2f09   : > { %v7997_v5 = vsub.f32 %v7977_v50, %v7993_v23  ;;  %v8008_v42 = vsel %vm3646_vm11, %v8000_v61, 0.0 }
0x2f0a   : > { %8009 = vadd.xlane.f32.xlu1 %v8008_v42 }
0x2f0b   : > { %v8001_v0 = vmul.f32 %v7997_v5, %v7997_v5  ;;  %9709 = vmatpush3.bf16.msra.mxu1 %v10814_v29 }
0x2f0d   : > { %v8011_v52 = vsel %vm3646_vm11, %v8001_v0, 0.0 }
0x2f0e   : > { %8012 = vadd.xlane.f32.xlu0 %v8011_v52 }
0x2f93   : > { %v8004_v31 = vpop.xlane.xlu1 %8003 }
0x2f94   : > { %v8014_v7 = vmul.f32 0.03125, %v8004_v31 }
0x2f95   : > { %v8007_v43 = vpop.xlane.xlu0 %8006 }
0x2f96   : > { %v8018_v8 = vadd.f32 1e-05, %v8014_v7  ;;  %v8015_v40 = vmul.f32 0.03125, %v8007_v43 }
0x2f97   : > { %v8010_v28 = vpop.xlane.xlu1 %8009 }
0x2f98   : > { %11023 = vrsqrt.f32 %v8018_v8  ;;  %v8019_v46 = vadd.f32 1e-05, %v8015_v40  ;;  %v8016_v30 = vmul.f32 0.03125, %v8010_v28 }
0x2f9a   : > { %11025 = vrsqrt.f32 %v8019_v46  ;;  %v8020_v53 = vadd.f32 1e-05, %v8016_v30 }
0x2f9b   : > { %v8013_v9 = vpop.xlane.xlu0 %8012 }
0x2f9c   : > { %11027 = vrsqrt.f32 %v8020_v53  ;;  %v8017_v4 = vmul.f32 0.03125, %v8013_v9 }
0x2f9e   : > { %v8021_v36 = vadd.f32 1e-05, %v8017_v4 }
0x2fa0   : > { %11029 = vrsqrt.f32 %v8021_v36 }
0x2fa2   : > { %v11024_v47 = vpop.eup %11023 }
0x2fa3   : > { %v8026_v25 = vmul.f32 %v11024_v47, %v7994_v15 }
0x2fa4   : > { %v11026_v10 = vpop.eup %11025 }
0x2fa5   : > { %v8027_v54 = vmul.f32 %v11026_v10, %v7995_v57  ;;  %v8036_v13 = vmul.f32 %v8956_v56, %v8026_v25 }
0x2fa6   : > { %v11028_v35 = vpop.eup %11027 }
0x2fa7   : > { %v8028_v17 = vmul.f32 %v11028_v35, %v7996_v3  ;;  %v8037_v2 = vmul.f32 %v8956_v56, %v8027_v54  ;;  %v8046_v26 = vadd.f32 %v8957_v11, %v8036_v13  ;;  %v8963_v3 = vld [vmem:[%s13379_s21 + $0x1] ss:$0 sm:$0xff] }
0x2fa9   : > { %v8047_v60 = vadd.f32 %v8957_v11, %v8037_v2  ;;  %v8038_v21 = vmul.f32 %v8956_v56, %v8028_v17 }
0x2faa   : > { %v11030_v22 = vpop.eup %11029 }
0x2fab   : > { %v8029_v37 = vmul.f32 %v11030_v22, %v7997_v5  ;;  %v8050_v20 = vpack.c.bf16 %v8047_v60, %v8046_v26  ;;  %v8048_v59 = vadd.f32 %v8957_v11, %v8038_v21 }
0x2fad   : > { %v8039_v38 = vmul.f32 %v8956_v56, %v8029_v37  ;;  %9698 = vmatprep.mubr.msk.bf16.mxu0 %vm3646_vm11, %v8050_v20 }
0x2faf   : > { %v8049_v18 = vadd.f32 %v8957_v11, %v8039_v38 }
0x2fb1   : > { %v8051_v32 = vpack.c.bf16 %v8049_v18, %v8048_v59 }
0x2fb3   : > { %9699 = vmatmul.mubr.msk.bf16.vlgmr.msra.gmra.mrb[64].mxu0 %vm3646_vm11, %v8051_v32 }
0x3086   : > { %v9700_v44 = vpop.f32.mrb[64].mxu0 }
0x3087   : > { %v8119_v1 = vadd.f32 %v9700_v44, %v8958_v6  ;;  %v8110_v50 = vpop.f32.mrb[65].mxu0  ;;  %v8970_v44 = vld [vmem:[%s13380_s22 + $0x1] ss:$0 sm:$0xff] }
0x3088   : > { %v8111_v55 = vadd.f32 %v8958_v6, %v8110_v50  ;;  %v9701_v33 = vpop.f32.mrb[66].mxu0 }
0x3089   : > { %v8122_v27 = vadd.f32 %v9701_v33, %v8958_v6  ;;  %v8113_v14 = vpop.f32.mrb[67].mxu0  ;;  %v8127_v15 = vmax.f32 %v8119_v1, 0.0 }
0x308a   : > { %v8114_v49 = vadd.f32 %v8958_v6, %v8113_v14  ;;  %v8125_v45 = vmax.f32 %v8111_v55, 0.0  ;;  %v8971_v55 = vld [vmem:[%s13381_s23 + $0x1] ss:$0 sm:$0xff] }
0x308b   : > { %v8128_v24 = vmax.f32 %v8122_v27, 0.0 }
0x308c   : > { %v8126_v57 = vmax.f32 %v8114_v49, 0.0 }
0x308d   : > { %v8130_v58 = vpack.c.bf16 %v8128_v24, %v8127_v15 }
0x308e   : > { %v8129_v16 = vpack.c.bf16 %v8126_v57, %v8125_v45 }
0x3090   : > { %9710 = vmatprep.mubr.msk.bf16.mxu1 %vm1012_vm2, %v8129_v16 }
0x3091   : > { %9711 = vmatmul.mubr.msk.bf16.vlgmr.msra.gmra.mrb[68].mxu1 %vm1012_vm2, %v8130_v58 }
0x3164   : > { %v9712_v12 = vpop.f32.mrb[68].mxu1 }
0x3165   : > { %v8201_v63 = vpop.f32.mrb[69].mxu1  ;;  %v8210_v19 = vadd.f32 %v9712_v12, %v8963_v3 }
0x3166   : > { %v8202_v23 = vadd.f32 %v8963_v3, %v8201_v63  ;;  %v9713_v41 = vpop.f32.mrb[70].mxu1 }
0x3167   : > { %v8204_v61 = vpop.f32.mrb[71].mxu1  ;;  %v8213_v42 = vadd.f32 %v9713_v41, %v8963_v3  ;;  %v8218_v52 = vadd.f32 %v8210_v19, %v8048_v59 }
0x3168   : > { %v8216_v5 = vadd.f32 %v8202_v23, %v8046_v26  ;;  %v8205_v0 = vadd.f32 %v8963_v3, %v8204_v61 }
0x3169   : > { %v8219_v34 = vadd.f32 %v8213_v42, %v8049_v18  ;;  %v8226_v31 = vsel %vm3646_vm11, %v8218_v52, 0.0 }
0x316a   : > { %v8217_v39 = vadd.f32 %v8205_v0, %v8047_v60  ;;  %v8220_v62 = vsel %vm3646_vm11, %v8216_v5, 0.0 }
0x316b   : > { %8221 = vadd.xlane.f32.xlu1 %v8220_v62  ;;  %v8229_v7 = vsel %vm3646_vm11, %v8219_v34, 0.0 }
0x316c   : > { %v8223_v51 = vsel %vm3646_vm11, %v8217_v39, 0.0 }
0x316d   : > { %8224 = vadd.xlane.f32.xlu0 %v8223_v51 }
0x316f   : > { %8227 = vadd.xlane.f32.xlu1 %v8226_v31 }
0x3171   : > { %8230 = vadd.xlane.f32.xlu0 %v8229_v7 }
0x31f8   : > { %v8222_v43 = vpop.xlane.xlu1 %8221 }
0x31f9   : > { %v8232_v8 = vmul.f32 0.03125, %v8222_v43 }
0x31fa   : > { %v8225_v40 = vpop.xlane.xlu0 %8224 }
0x31fb   : > { %v8236_v28 = vsub.f32 %v8216_v5, %v8232_v8  ;;  %v8233_v46 = vmul.f32 0.03125, %v8225_v40 }
0x31fc   : > { %v8228_v30 = vpop.xlane.xlu1 %8227 }
0x31fd   : > { %v8237_v53 = vsub.f32 %v8217_v39, %v8233_v46  ;;  %v8234_v9 = vmul.f32 0.03125, %v8228_v30  ;;  %v8240_v4 = vmul.f32 %v8236_v28, %v8236_v28 }
0x31fe   : > { %v8231_v36 = vpop.xlane.xlu0 %8230 }
0x31ff   : > { %v8238_v47 = vsub.f32 %v8218_v52, %v8234_v9  ;;  %v8235_v56 = vmul.f32 0.03125, %v8231_v36  ;;  %v8244_v25 = vsel %vm3646_vm11, %v8240_v4, 0.0  ;;  %v8241_v10 = vmul.f32 %v8237_v53, %v8237_v53  ;;  %v8324_v9 = vld [vmem:[%s13512_s12 + $0x8] sm:$0xff] }
0x3200   : > { %8245 = vadd.xlane.f32.xlu1 %v8244_v25  ;;  %v11158_v36 = vmov 0.0|0.0  }
0x3201   : > { %v8239_v54 = vsub.f32 %v8219_v34, %v8235_v56  ;;  %v8247_v13 = vsel %vm3646_vm11, %v8241_v10, 0.0  ;;  %v8242_v35 = vmul.f32 %v8238_v47, %v8238_v47  ;;  %9965 = vmatprep.subr.bf16.mxu0 %v11158_v36  ;;  %v8326_v56 = vld [vmem:[%s13512_s12 + $0x18] sm:$0xff]  ;;  %v11160_v10 = vmov 0.0  }
0x3202   : > { %8248 = vadd.xlane.f32.xlu0 %v8247_v13  ;;  %9722 = vmatprep.mubr.msk.f32.mxu0 %vm11159_vm15, %v11160_v10 }
0x3203   : > { %v8250_v11 = vsel %vm3646_vm11, %v8242_v35, 0.0  ;;  %v8243_v17 = vmul.f32 %v8239_v54, %v8239_v54 }
0x3204   : > { %8251 = vadd.xlane.f32.xlu1 %v8250_v11 }
0x3205   : > { %v8253_v2 = vsel %vm3646_vm11, %v8243_v17, 0.0  ;;  %v8306_v17 = vld [vmem:[%s13514_s6] sm:$0x1] }
0x3206   : > { %8254 = vadd.xlane.f32.xlu0 %v8253_v2 }
0x328d   : > { %v8246_v26 = vpop.xlane.xlu1 %8245 }
0x328e   : > { %v8256_v60 = vmul.f32 0.03125, %v8246_v26  ;;  %v8307_v26 = vld [vmem:[%s13515_s11] sm:$0x1] }
0x328f   : > { %v8249_v22 = vpop.xlane.xlu0 %8248 }
0x3290   : > { %v8260_v21 = vadd.f32 1e-05, %v8256_v60  ;;  %v8257_v37 = vmul.f32 0.03125, %v8249_v22 }
0x3291   : > { %v8252_v20 = vpop.xlane.xlu1 %8251 }
0x3292   : > { %11031 = vrsqrt.f32 %v8260_v21  ;;  %v8261_v38 = vadd.f32 1e-05, %v8257_v37  ;;  %v8258_v59 = vmul.f32 0.03125, %v8252_v20  ;;  %v8327_v21 = vld [vmem:[%s13516_s26] sm:$0x1] }
0x3293   : > { %v8255_v18 = vpop.xlane.xlu0 %8254 }
0x3294   : > { %11033 = vrsqrt.f32 %v8261_v38  ;;  %v8262_v32 = vadd.f32 1e-05, %v8258_v59  ;;  %v8259_v48 = vmul.f32 0.03125, %v8255_v18 }
0x3296   : > { %11035 = vrsqrt.f32 %v8262_v32  ;;  %v8263_v29 = vadd.f32 1e-05, %v8259_v48 }
0x3298   : > { %11037 = vrsqrt.f32 %v8263_v29 }
0x329c   : > { %v11032_v6 = vpop.eup %11031 }
0x329d   : > { %v8268_v1 = vmul.f32 %v11032_v6, %v8236_v28 }
0x329e   : > { %v11034_v50 = vpop.eup %11033 }
0x329f   : > { %v8278_v33 = vmul.f32 %v8970_v44, %v8268_v1  ;;  %v8269_v27 = vmul.f32 %v11034_v50, %v8237_v53  ;;  %v8323_v53 = vld [vmem:[%s13512_s12] sm:$0xff] }
0x32a0   : > { %v11036_v14 = vpop.eup %11035  ;;  %v9966_v4 = vpack.c.bf16 %v8324_v9, %v8323_v53 }
0x32a1   : > { %v8288_v49 = vadd.f32 %v8971_v55, %v8278_v33  ;;  %v8279_v15 = vmul.f32 %v8970_v44, %v8269_v27  ;;  %v8270_v24 = vmul.f32 %v11036_v14, %v8238_v47  ;;  %v8325_v47 = vld [vmem:[%s13512_s12 + $0x10] sm:$0xff] }
0x32a2   : > { %v11038_v45 = vpop.eup %11037  ;;  %9967 = vmatpush3.bf16.msra.mxu0 %v9966_v4  ;;  %v9969_v25 = vpack.c.bf16 %v8326_v56, %v8325_v47 }
0x32a3   : > { %v8289_v57 = vadd.f32 %v8971_v55, %v8279_v15  ;;  %v8280_v58 = vmul.f32 %v8970_v44, %v8270_v24  ;;  %v8271_v16 = vmul.f32 %v11038_v45, %v8239_v54  ;;  %v8292_v63 = vsel %vm3646_vm11, %v8288_v49, 0.0  ;;  %9968 = vmatprep.subr.bf16.mxu0 %v11158_v36 }
0x32a5   : > { %v8281_v3 = vmul.f32 %v8970_v44, %v8271_v16  ;;  %v8290_v12 = vadd.f32 %v8971_v55, %v8280_v58  ;;  %v8293_v19 = vsel %vm3646_vm11, %v8289_v57, 0.0 }
0x32a6   : > { %v8294_v23 = vadd.f32 %v8293_v19, %v8292_v63  ;;  %9970 = vmatpush3.bf16.msra.mxu0 %v9969_v25 }
0x32a7   : > { %v8291_v41 = vadd.f32 %v8971_v55, %v8281_v3  ;;  %v8295_v61 = vsel %vm3646_vm11, %v8290_v12, 0.0 }
0x32a8   : > { %v8296_v5 = vadd.f32 %v8295_v61, %v8294_v23 }
0x32a9   : > { %v8297_v42 = vsel %vm3646_vm11, %v8291_v41, 0.0 }
0x32aa   : > { %v8298_v0 = vadd.f32 %v8297_v42, %v8296_v5 }
0x32ac   : > { %v8299_v52 = vrot.slane %v8298_v0, 4 }
0x32ae   : > { %v8300_v39 = vadd.f32 %v8299_v52, %v8298_v0 }
0x32b0   : > { %v8301_v62 = vrot.slane %v8300_v39, 2 }
0x32b2   : > { %v8302_v34 = vadd.f32 %v8301_v62, %v8300_v39 }
0x32b4   : > { %v8303_v51 = vrot.slane %v8302_v34, 1 }
0x32b6   : > { %v8304_v31 = vadd.f32 %v8303_v51, %v8302_v34 }
0x32b8   : > { %v8305_v7 = vmul.f32 0.03125, %v8304_v31 }
0x32ba   : > { %v8308_v43 = vsel %vm3646_vm11, %v8305_v7, 0.0 }
0x32bb   : > { %8309 = vadd.xlane.f32.xlu1 %v8308_v43 }
0x3348   : > { %v8310_v8 = vpop.xlane.xlu1 %8309 }
0x3349   : > { %v8311_v40 = vmul.f32 0.03125, %v8310_v8 }
0x334b   : > { %v8312_v28 = vsub.f32 %v8305_v7, %v8311_v40 }
0x334d   : > { %v8313_v46 = vmul.f32 %v8312_v28, %v8312_v28 }
0x334f   : > { %v8314_v30 = vsel %vm3646_vm11, %v8313_v46, 0.0 }
0x3350   : > { %8315 = vadd.xlane.f32.xlu0 %v8314_v30 }
0x33dd   : > { %v8316_v54 = vpop.xlane.xlu0 %8315 }
0x33de   : > { %v8317_v13 = vmul.f32 0.03125, %v8316_v54 }
0x33e0   : > { %v8318_v35 = vadd.f32 1e-05, %v8317_v13 }
0x33e2   : > { %11039 = vrsqrt.f32 %v8318_v35 }
0x33ec   : > { %v11040_v11 = vpop.eup %11039 }
0x33ed   : > { %v8320_v2 = vmul.f32 %v11040_v11, %v8312_v28 }
0x33ef   : > { %v8321_v60 = vmul.f32 %v8320_v2, %v8306_v17 }
0x33f1   : > { %v8322_v22 = vadd.f32 %v8321_v60, %v8307_v26 }
0x33f3   : > { %9723 = vmatmul.mubr.msk.f32.vlgmr.msra.gmra.mrb[68].mxu0 %vm3646_vm11, %v8322_v22 }
0x34c6   : > { %v8397_v37 = vpop.f32.mrb[68].mxu0 }
0x34c7   : > { %v8398_v20 = vadd.f32 %v8397_v37, %v8327_v21  ;;  %v9724_v38 = vpop.f32.mrb[69].mxu0 }
0x34c9   : > { %8402 = vst.msk [vmem:[%s13513_s8] sm:$0x1] %vm8401_vm0, %v8398_v20 }
0x34ca PF: > { %s13517_s5 = sld [smem:[#allocation9_spill]]  ;;  %s13518_s4 = sld [smem:[#allocation18_spill]] }
0x34cb   : > { %s13519_s7 = sld [smem:[#allocation7_spill]]  ;;  %s13521_s3 = sld [smem:[#allocation37_spill]] }
0x34cc   : > { %s11161_s8 = smov [#allocation3]  }
0x34cd   : > { %s11049_s30 = sshll.u32 %s11161_s8, 4  ;;  %s11050_s30 = int_to_ptr.vmem [resolvable:$false] %s11049_s30 }
0x34ce   : > { %s11051_s1 = scalar_lea.vmem %s11050_s30, 32 }
0x34d0   : > { %s8973_s2 = sshll.u32 %s13517_s5, 4  ;;  %s8416_s6 = sshll.u32 %s13518_s4, 4  ;;  %s8417_s6 = int_to_ptr.vmem [resolvable:$true] %s8416_s6 }
0x34d1   : > { %s13522_s28 = smov %s13521_s3  ;;  %s13308_s10 = scalar_lea.hbm %s13521_s3, %s8973_s2 }
0x34d2   : > { %s13523_s0 = sand.u32 1, %s13519_s7   ;;  %s11045_s11 = scalar_lea.vmem %s8417_s6, 16 }
0x34d3   : > { %s8404_s9 = scalar_lea.sflag [#allocation4], %s13523_s0  ;;  %p11046_p1 = scmp.ne.s32.totalorder %s8417_s6, %s11045_s11 }
0x34d4   : > { %p11052_p5 = scmp.lt.s32.totalorder %s8417_s6, %s11050_s30  ;;  %p11053_p6 = scmp.lt.s32.totalorder %s11051_s1, %s11045_s11 }
0x34d5   : > { %p11047_p2 = pnand %p11046_p1, %p11356_p3 }
0x34d6   : > { %p11054_p7 = por %p11053_p6, %p11052_p5 }
0x34d7   : > { %p11048_p4 = pneg %p11047_p2 }
0x34d9   : > { %p11055_p8 = pnand %p11054_p7, %p11048_p4 }
0x34db   : > { %11058 = shalt.err (!%p11055_p8)
}
0x34dc   : > { %s11059_s26 = scalar_lea.hbm %s13308_s10, 16  ;;  %s11063_s7 = scalar_lea.hbm %s13522_s28, 32 }
0x34dd   : > { %p11060_p10 = scmp.ne.s32.totalorder %s13308_s10, %s11059_s26  ;;  %p11064_p13 = scmp.lt.u32.totalorder %s13308_s10, %s13522_s28 }
0x34de   : > { %p11065_p0 = scmp.lt.u32.totalorder %s11063_s7, %s11059_s26  ;;  %p11067_p2 = scmp.lt.u32.totalorder %s11059_s26, %s13308_s10 }
0x34df   : > { %p11061_p11 = pnand %p11060_p10, %p11356_p3 }
0x34e0   : > { %p11066_p1 = por %p11065_p0, %p11064_p13 }
0x34e1   : > { %p11062_p12 = pneg %p11061_p11 }
0x34e2   : > { %p11068_p4 = por %p11067_p2, %p11066_p1 }
0x34e4   : > { %p11069_p5 = pnand %p11068_p4, %p11062_p12 }
0x34e6   : > { %11072 = shalt.err (!%p11069_p5)
}
0x34e7   : > { %10229 = dma.vmem_to_hbm [thread:$0]  (%p11356_p3), %s8417_s6, 16, %s13308_s10, %s8404_s9  }
0x34e8 PF: > { %s13524_s25 = sld [smem:[#allocation12_spill]]  ;;  %s13525_s3 = sld [smem:[#allocation6_spill]] }
0x34ee   : > { %p10235_p6 = scmp.ge.s32.totalorder %s13524_s25, 2  ;;  %s8428_s11 = sand.u32 1, %s13525_s3  }
0x34ef   : > { %s8429_s8 = scalar_lea.sflag [#allocation4], %s8428_s11 }
0x34f0   : > { %p10232_p7 = pnand %p10235_p6, %p11366_p9 }
0x34f2   : > { %11106 = dma.done.wait (!%p10232_p7), %s8429_s8, 16  }
0x34f3   : > { %11108 = vsyncadd (!%p10232_p7), %s8429_s8, 4294967280  ;;  %s41_s0 = sadd.s32 1, %s13524_s25   ;;  %s13527_s8 = sld [smem:[#allocation7_spill]] }
0x34f4   : > { %p38_p8 = scmp.ge.s32.totalorder %s41_s0, 10   ;;  %s13528_s5 = sld [smem:[#allocation8_spill]] }
0x34f5   : > { %s13529_s9 = sld [smem:[#allocation17_spill]]  ;;  %s13530_s30 = sld [smem:[#allocation10_spill]] }
0x34f6   : > { %s13531_s3 = sld [smem:[#allocation11_spill]]  ;;  %s13532_s6 = sld [smem:[#allocation13_spill]] }
0x34f7   : > { %s13533_s10 = sld [smem:[#allocation15_spill]]  ;;  %40 = sbr.rel (!%p38_p8) target bundleno = 25 (0x19), region = 192 }
0x34fe   :  { %8433 = vsyncpa [#allocation4], 1 }
0x34ff   :  { %8435 = vsyncpa [#allocation4 + $0x1], 1 }

</bundles_post_ra>
